<compile_context>
chip_gen: v6e
topology: v6e:2x2x1
jax: 0.10.0
libtpu: 0.0.40
codegen_flags: <defaults>
</compile_context>

<pallas_src>
import math
from functools import partial

import jax
import jax.numpy as jnp
from jax.experimental import pallas as pl
from jax.experimental.pallas import tpu as pltpu

BN_EPS = 1e-5
LANE = 128

_TAPS = tuple((ky, kx) for ky in range(3) for kx in range(3))  # tap t = 3*ky + kx

_CPARAMS = pltpu.CompilerParams(
    dimension_semantics=("parallel",),
    vmem_limit_bytes=32 * 1024 * 1024,
)


# ----------------------------------------------------------------------------
# small helpers
# ----------------------------------------------------------------------------
def _round_up(x, m):
    return ((x + m - 1) // m) * m


def _pick_batch_tile(n, m_per_image, target_m=512, max_bt=8):
    """Batch tile so the matmul M = bt * ho * wo reaches ~target_m rows (MXU fill)."""
    want = max(1, -(-target_m // max(1, m_per_image)))
    bt = max(1, min(n, max_bt, want))
    while n % bt:
        bt -= 1
    return bt


def _phase_pad(x, stride, pad=1):
    """(N,H,W,C) -> (N, stride*stride, Hph, Wph, C) phase-split, spatially padded view.

    xph[n, py*stride+px, i, j, c] == pad(x)[n, stride*i+py, stride*j+px, c]
    For stride == 1 this is just the padded image with a singleton phase axis.
    x must already be the *activation* (padding zeros are genuine activation zeros).
    """
    n, h, w, c = x.shape
    xp = jnp.pad(x, ((0, 0), (pad, pad), (pad, pad), (0, 0)))
    if stride == 1:
        return xp[:, None]
    s = stride
    hp, wp = h + 2 * pad, w + 2 * pad
    hpp, wpp = _round_up(hp, s), _round_up(wp, s)
    xp = jnp.pad(xp, ((0, 0), (0, hpp - hp), (0, wpp - wp), (0, 0)))
    xp = xp.reshape(n, hpp // s, s, wpp // s, s, c)
    xp = jnp.transpose(xp, (0, 2, 4, 1, 3, 5))
    return xp.reshape(n, s * s, hpp // s, wpp // s, c)


def _fold_bn(gamma, beta, mean, var, cpad):
    scale = gamma * jax.lax.rsqrt(var + BN_EPS)
    bias = beta - mean * scale
    extra = cpad - scale.shape[0]
    scale = jnp.pad(scale, (0, extra)).astype(jnp.float32)
    bias = jnp.pad(bias, (0, extra)).astype(jnp.float32)
    return scale, bias


def _prep_conv3(w_oihw, cinp, coutp):
    # (Cout, Cin, 3, 3) -> (9*Cin_p, Cout_p) bf16, K laid out as [tap t = 3*ky+kx][cin]
    cout, cin = w_oihw.shape[:2]
    w = jnp.transpose(w_oihw, (2, 3, 1, 0))                 # (3, 3, Cin, Cout)
    w = jnp.pad(w, ((0, 0), (0, 0), (0, cinp - cin), (0, coutp - cout)))
    return w.reshape(9 * cinp, coutp).astype(jnp.bfloat16)


def _prep_conv1(w_oihw, cinp, coutp):
    cout, cin = w_oihw.shape[:2]
    w = jnp.transpose(w_oihw.reshape(cout, cin), (1, 0))
    w = jnp.pad(w, ((0, cinp - cin), (0, coutp - cout)))
    return w.astype(jnp.bfloat16)


# ----------------------------------------------------------------------------
# Pallas kernels
# ----------------------------------------------------------------------------
def _fill_im2col(act_ref, slab_ref, *, h, w, cinp, m):
    """Gather the 9 shifted tap views of the padded activation into the im2col slab."""
    for t, (ky, kx) in enumerate(_TAPS):
        tap = act_ref[:, ky:ky + h, kx:kx + w, :]            # (bt, h, w, cinp) in VMEM
        slab_ref[:, t * cinp:(t + 1) * cinp] = tap.reshape(m, cinp)


def _conv1_s1_kernel(x_ref, w_ref, s1_ref, b1_ref, s2_ref, b2_ref, o_ref,
                     act_ref, slab_ref, *, bt, h, w, cinp, coutp):
    """BN1+ReLU prologue -> 3x3 conv (stride 1) via im2col big-K dot -> BN2+ReLU epilogue."""
    m = bt * h * w
    # BN1 + ReLU written into a zero spatial-padded VMEM scratch (halo stays 0).
    act_ref[...] = jnp.zeros(act_ref.shape, act_ref.dtype)
    s1 = s1_ref[...].reshape(1, 1, 1, cinp)
    b1 = b1_ref[...].reshape(1, 1, 1, cinp)
    a = jnp.maximum(x_ref[...].astype(jnp.float32) * s1 + b1, 0.0)
    act_ref[:, 1:h + 1, 1:w + 1, :] = a.astype(act_ref.dtype)
    # im2col slab + single MXU dot with K = 9 * Cin_p.
    _fill_im2col(act_ref, slab_ref, h=h, w=w, cinp=cinp, m=m)
    acc = jnp.dot(slab_ref[...], w_ref[...], preferred_element_type=jnp.float32)
    # BN2 + ReLU epilogue on the f32 accumulator.
    y = jnp.maximum(acc * s2_ref[...] + b2_ref[...], 0.0)
    o_ref[...] = y.reshape(bt, h, w, coutp).astype(o_ref.dtype)


def _conv1_sc_kernel(aph_ref, w_ref, wsc_ref, s2_ref, b2_ref, o_ref, sc_ref,
                     slab_ref, *, stride, bt, ho, wo, cinp, coutp):
    """3x3 strided conv from the phase-split activation + BN2+ReLU epilogue + fused
    1x1 strided shortcut conv (reuses the centre tap)."""
    m = bt * ho * wo
    centre = None
    for t, (ky, kx) in enumerate(_TAPS):
        p = (ky % stride) * stride + (kx % stride)
        oy, ox = ky // stride, kx // stride
        tap = aph_ref[:, p, oy:oy + ho, ox:ox + wo, :].reshape(m, cinp)
        slab_ref[:, t * cinp:(t + 1) * cinp] = tap
        if ky == 1 and kx == 1:
            centre = tap                                     # == act at (stride*i, stride*j)
    acc = jnp.dot(slab_ref[...], w_ref[...], preferred_element_type=jnp.float32)
    y = jnp.maximum(acc * s2_ref[...] + b2_ref[...], 0.0)
    o_ref[...] = y.reshape(bt, ho, wo, coutp).astype(o_ref.dtype)
    sc = jnp.dot(centre, wsc_ref[...], preferred_element_type=jnp.float32)
    sc_ref[...] = sc.reshape(bt, ho, wo, coutp).astype(sc_ref.dtype)


def _conv2_res_kernel(h_ref, res_ref, w_ref, o_ref, act_ref, slab_ref,
                      *, bt, ho, wo, coutp):
    """In-kernel zero-padding of the conv1 output -> 3x3 conv -> fused residual add."""
    m = bt * ho * wo
    act_ref[...] = jnp.zeros(act_ref.shape, act_ref.dtype)
    act_ref[:, 1:ho + 1, 1:wo + 1, :] = h_ref[...]
    _fill_im2col(act_ref, slab_ref, h=ho, w=wo, cinp=coutp, m=m)
    acc = jnp.dot(slab_ref[...], w_ref[...], preferred_element_type=jnp.float32)
    out = acc.reshape(bt, ho, wo, coutp) + res_ref[...].astype(jnp.float32)
    o_ref[...] = out.astype(o_ref.dtype)


# ----------------------------------------------------------------------------
# pallas_call wrappers
# ----------------------------------------------------------------------------
def conv1_bn_fused(x, w1, s1, b1, s2, b2, *, bt):
    n, h, w, cinp = x.shape
    coutp = w1.shape[-1]
    m = bt * h * w
    kern = partial(_conv1_s1_kernel, bt=bt, h=h, w=w, cinp=cinp, coutp=coutp)
    return pl.pallas_call(
        kern,
        out_shape=jax.ShapeDtypeStruct((n, h, w, coutp), jnp.bfloat16),
        grid=(n // bt,),
        in_specs=[
            pl.BlockSpec((bt, h, w, cinp), lambda i: (i, 0, 0, 0)),
            pl.BlockSpec(w1.shape, lambda i: (0, 0)),        # resident im2col weights
            pl.BlockSpec((1, cinp), lambda i: (0, 0)),
            pl.BlockSpec((1, cinp), lambda i: (0, 0)),
            pl.BlockSpec((1, coutp), lambda i: (0, 0)),
            pl.BlockSpec((1, coutp), lambda i: (0, 0)),
        ],
        out_specs=pl.BlockSpec((bt, h, w, coutp), lambda i: (i, 0, 0, 0)),
        scratch_shapes=[pltpu.VMEM((bt, h + 2, w + 2, cinp), jnp.bfloat16),
                        pltpu.VMEM((m, 9 * cinp), jnp.bfloat16)],
        compiler_params=_CPARAMS,
    )(x, w1, s1.reshape(1, cinp), b1.reshape(1, cinp),
      s2.reshape(1, coutp), b2.reshape(1, coutp))


def conv1_shortcut_fused(aph, w1, wsc, s2, b2, *, stride, bt, ho, wo):
    n, _, hph, wph, cinp = aph.shape
    coutp = w1.shape[-1]
    m = bt * ho * wo
    kern = partial(_conv1_sc_kernel, stride=stride, bt=bt, ho=ho, wo=wo,
                   cinp=cinp, coutp=coutp)
    out_sd = jax.ShapeDtypeStruct((n, ho, wo, coutp), jnp.bfloat16)
    return pl.pallas_call(
        kern,
        out_shape=(out_sd, out_sd),
        grid=(n // bt,),
        in_specs=[
            pl.BlockSpec((bt,) + aph.shape[1:], lambda i: (i, 0, 0, 0, 0)),
            pl.BlockSpec(w1.shape, lambda i: (0, 0)),
            pl.BlockSpec(wsc.shape, lambda i: (0, 0)),
            pl.BlockSpec((1, coutp), lambda i: (0, 0)),
            pl.BlockSpec((1, coutp), lambda i: (0, 0)),
        ],
        out_specs=(pl.BlockSpec((bt, ho, wo, coutp), lambda i: (i, 0, 0, 0)),
                   pl.BlockSpec((bt, ho, wo, coutp), lambda i: (i, 0, 0, 0))),
        scratch_shapes=[pltpu.VMEM((m, 9 * cinp), jnp.bfloat16)],
        compiler_params=_CPARAMS,
    )(aph, w1, wsc, s2.reshape(1, coutp), b2.reshape(1, coutp))


def conv2_residual_fused(h1, residual, w2, *, bt):
    n, ho, wo, coutp = h1.shape
    m = bt * ho * wo
    kern = partial(_conv2_res_kernel, bt=bt, ho=ho, wo=wo, coutp=coutp)
    return pl.pallas_call(
        kern,
        out_shape=jax.ShapeDtypeStruct((n, ho, wo, coutp), jnp.bfloat16),
        grid=(n // bt,),
        in_specs=[
            pl.BlockSpec((bt, ho, wo, coutp), lambda i: (i, 0, 0, 0)),
            pl.BlockSpec((bt, ho, wo, coutp), lambda i: (i, 0, 0, 0)),
            pl.BlockSpec(w2.shape, lambda i: (0, 0)),
        ],
        out_specs=pl.BlockSpec((bt, ho, wo, coutp), lambda i: (i, 0, 0, 0)),
        scratch_shapes=[pltpu.VMEM((bt, ho + 2, wo + 2, coutp), jnp.bfloat16),
                        pltpu.VMEM((m, 9 * coutp), jnp.bfloat16)],
        compiler_params=_CPARAMS,
    )(h1, residual, w2)


# ----------------------------------------------------------------------------
# BasicBlock / NetworkBlock forward (Pallas)
# ----------------------------------------------------------------------------
def basic_block_fwd(x, p, stride):
    # x: (N, H, W, Cin_p) bf16, Cin_p multiple of 128
    n, h, w, cinp = x.shape
    cout, cin = p["conv1_w"].shape[0], p["conv1_w"].shape[1]
    coutp = _round_up(cout, LANE)
    equal_in_out = cin == cout
    ho = (h - 1) // stride + 1
    wo = (w - 1) // stride + 1

    s1, b1 = _fold_bn(p["bn1_gamma"], p["bn1_beta"], p["bn1_mean"], p["bn1_var"], cinp)
    s2, b2 = _fold_bn(p["bn2_gamma"], p["bn2_beta"], p["bn2_mean"], p["bn2_var"], coutp)
    w1 = _prep_conv3(p["conv1_w"], cinp, coutp)
    w2 = _prep_conv3(p["conv2_w"], coutp, coutp)
    bt = _pick_batch_tile(n, ho * wo)

    if equal_in_out:
        # Identity shortcut requires matching spatial dims (as in the PyTorch BasicBlock).
        assert stride == 1, "equal-channel BasicBlock with stride > 1 is unsupported"
        # BN1+ReLU fused as the conv1 kernel prologue -> no extra HBM pass.
        h1 = conv1_bn_fused(x, w1, s1, b1, s2, b2, bt=bt)
        residual = x
    else:
        # BN1+ReLU is folded into the single XLA pad / phase-split pass over x
        # (same HBM traffic as padding the raw input); the 1x1 strided shortcut
        # conv is fused into the conv1 kernel (centre-tap reuse).
        act = jnp.maximum(x.astype(jnp.float32) * s1 + b1, 0.0).astype(jnp.bfloat16)
        aph = _phase_pad(act, stride)
        wsc = _prep_conv1(p["shortcut_w"], cinp, coutp)
        h1, residual = conv1_shortcut_fused(aph, w1, wsc, s2, b2,
                                            stride=stride, bt=bt, ho=ho, wo=wo)

    # dropRate == 0.0 -> dropout is the identity.
    # conv2 zero-pads h1 inside the kernel (no XLA pad pass) and fuses the residual add.
    out = conv2_residual_fused(h1, residual, w2, bt=bt)
    return out


def network_block_fwd(x_nchw, params_list, strides):
    x = jnp.transpose(x_nchw, (0, 2, 3, 1))        # NCHW -> NHWC
    cin0 = x.shape[-1]
    cinp0 = _round_up(cin0, LANE)
    # lane-dense, bf16 activations for the whole block (exactness preserved by
    # zero-padded channels / weights / BN params).
    x = jnp.pad(x, ((0, 0), (0, 0), (0, 0), (0, cinp0 - cin0))).astype(jnp.bfloat16)
    for p, s in zip(params_list, strides):
        x = basic_block_fwd(x, p, s)
    cout = params_list[-1]["conv2_w"].shape[0]
    x = x[..., :cout].astype(jnp.float32)
    return jnp.transpose(x, (0, 3, 1, 2))          # back to NCHW


# ----------------------------------------------------------------------------
# Pure-JAX reference (f32, for correctness check)
# ----------------------------------------------------------------------------
def _conv_ref(x, w_oihw, stride, padding):
    return jax.lax.conv_general_dilated(
        x, jnp.transpose(w_oihw, (2, 3, 1, 0)),
        window_strides=(stride, stride),
        padding=[(padding, padding), (padding, padding)],
        dimension_numbers=("NHWC", "HWIO", "NHWC"))


def _bn_relu_ref(x, g, b, m, v):
    return jnp.maximum((x - m) * jax.lax.rsqrt(v + BN_EPS) * g + b, 0.0)


def ref_basic_block(x, p, stride):
    equal_in_out = x.shape[-1] == p["conv1_w"].shape[0]
    act = _bn_relu_ref(x, p["bn1_gamma"], p["bn1_beta"], p["bn1_mean"], p["bn1_var"])
    shortcut = x if equal_in_out else _conv_ref(act, p["shortcut_w"], stride, 0)
    out = _conv_ref(act, p["conv1_w"], stride, 1)
    out = _bn_relu_ref(out, p["bn2_gamma"], p["bn2_beta"], p["bn2_mean"], p["bn2_var"])
    out = _conv_ref(out, p["conv2_w"], 1, 1)
    return shortcut + out


def ref_network_block(x_nchw, params_list, strides):
    x = jnp.transpose(x_nchw, (0, 2, 3, 1))
    for p, s in zip(params_list, strides):
        x = ref_basic_block(x, p, s)
    return jnp.transpose(x, (0, 3, 1, 2))


# ----------------------------------------------------------------------------
# deterministic parameter init (shapes match the PyTorch module)
# ----------------------------------------------------------------------------
def init_basic_block(key, in_planes, out_planes):
    ks = jax.random.split(key, 11)

    def conv_init(k, cout, cin, ksz):
        fan = ksz * ksz * cout
        return jax.random.normal(k, (cout, cin, ksz, ksz), jnp.float32) * math.sqrt(2.0 / fan)

    p = {
        "bn1_gamma": 1.0 + 0.1 * jax.random.normal(ks[0], (in_planes,), jnp.float32),
        "bn1_beta": 0.1 * jax.random.normal(ks[1], (in_planes,), jnp.float32),
        "bn1_mean": 0.1 * jax.random.normal(ks[2], (in_planes,), jnp.float32),
        "bn1_var": 1.0 + 0.1 * jax.random.uniform(ks[3], (in_planes,), jnp.float32),
        "conv1_w": conv_init(ks[4], out_planes, in_planes, 3),
        "bn2_gamma": 1.0 + 0.1 * jax.random.normal(ks[5], (out_planes,), jnp.float32),
        "bn2_beta": 0.1 * jax.random.normal(ks[6], (out_planes,), jnp.float32),
        "bn2_mean": 0.1 * jax.random.normal(ks[7], (out_planes,), jnp.float32),
        "bn2_var": 1.0 + 0.1 * jax.random.uniform(ks[8], (out_planes,), jnp.float32),
        "conv2_w": conv_init(ks[9], out_planes, out_planes, 3),
    }
    if in_planes != out_planes:
        p["shortcut_w"] = conv_init(ks[10], out_planes, in_planes, 1)
    return p


def init_network_block(key, nb_layers, in_planes, out_planes, stride):
    keys = jax.random.split(key, nb_layers)
    params_list, strides = [], []
    for i in range(nb_layers):
        ip = in_planes if i == 0 else out_planes
        st = stride if i == 0 else 1
        params_list.append(init_basic_block(keys[i], ip, out_planes))
        strides.append(st)
    return params_list, strides


# ----------------------------------------------------------------------------
if __name__ == "__main__":
    key = jax.random.PRNGKey(0)
    k_x, k_p = jax.random.split(key)

    # NetworkBlock(nb_layers=2, in_planes=4, out_planes=8, block=BasicBlock, stride=2)
    nb_layers, in_planes, out_planes, stride = 2, 4, 8, 2
    N, H, W = 2, 16, 16

    x = jax.random.normal(k_x, (N, in_planes, H, W), jnp.float32)  # NCHW like PyTorch
    params_list, strides = init_network_block(k_p, nb_layers, in_planes, out_planes, stride)

    fwd = jax.jit(partial(network_block_fwd, strides=strides))
    out = jax.block_until_ready(fwd(x, params_list))

    ref = ref_network_block(x, params_list, strides)
    assert out.shape == (N, out_planes, H // stride, W // stride), out.shape
    max_err = float(jnp.max(jnp.abs(out - ref)))
    # bf16 activations / MXU inputs (f32 accumulation) -> tolerance ~ bf16 precision
    assert jnp.allclose(out, ref, atol=5e-2, rtol=5e-2), f"mismatch vs reference, max err={max_err}"

    print("KERNEL_OK")
</pallas_src>

<mosaic_0001>
module attributes {stable_mosaic.version = 11 : i64} {
  func.func @_conv1_sc_kernel(%arg0: i32, %arg1: memref<2x4x9x9x128xbf16, #tpu.memory_space<vmem>>, %arg2: memref<1152x128xbf16, #tpu.memory_space<vmem>>, %arg3: memref<128x128xbf16, #tpu.memory_space<vmem>>, %arg4: memref<1x128xf32, #tpu.memory_space<vmem>>, %arg5: memref<1x128xf32, #tpu.memory_space<vmem>>, %arg6: memref<2x8x8x128xbf16, #tpu.memory_space<vmem>>, %arg7: memref<2x8x8x128xbf16, #tpu.memory_space<vmem>>, %arg8: memref<128x1152xbf16, #tpu.memory_space<vmem>>) attributes {dimension_semantics = [#tpu.dimension_semantics<parallel>], iteration_bounds = array<i64: 1>, scalar_prefetch = 0 : i64, scratch_operands = 1 : i64, tpu.core_type = #tpu.core_type<tc>, window_params = [{transform_indices = @transform_0, window_bounds = array<i64: 2, 4, 9, 9, 128>}, {pipeline_mode = #tpu.pipeline_mode<synchronous>, transform_indices = @transform_1, window_bounds = array<i64: 1152, 128>}, {pipeline_mode = #tpu.pipeline_mode<synchronous>, transform_indices = @transform_2, window_bounds = array<i64: 128, 128>}, {pipeline_mode = #tpu.pipeline_mode<synchronous>, transform_indices = @transform_3, window_bounds = array<i64: 1, 128>}, {pipeline_mode = #tpu.pipeline_mode<synchronous>, transform_indices = @transform_4, window_bounds = array<i64: 1, 128>}, {transform_indices = @transform_5, window_bounds = array<i64: 2, 8, 8, 128>}, {transform_indices = @transform_6, window_bounds = array<i64: 2, 8, 8, 128>}]} {
    %c0 = arith.constant 0 : index
    %c0_0 = arith.constant 0 : index
    %c0_1 = arith.constant 0 : index
    %c0_2 = arith.constant 0 : index
    %c0_3 = arith.constant 0 : index
    %0 = vector.load %arg1[%c0, %c0_0, %c0_1, %c0_2, %c0_3] : memref<2x4x9x9x128xbf16, #tpu.memory_space<vmem>>, vector<2x1x8x8x128xbf16>
    %1 = vector.shape_cast %0 : vector<2x1x8x8x128xbf16> to vector<2x8x8x128xbf16>
    %2 = vector.shape_cast %1 : vector<2x8x8x128xbf16> to vector<128x128xbf16>
    %c0_4 = arith.constant 0 : index
    %c0_5 = arith.constant 0 : index
    %3 = vector.load %arg8[%c0_4, %c0_5] : memref<128x1152xbf16, #tpu.memory_space<vmem>>, vector<128x128xbf16>
    tpu.vector_store %arg8[%c0_4, %c0_5], %2 {strides = array<i32>} : memref<128x1152xbf16, #tpu.memory_space<vmem>>, vector<128x128xbf16>,
    %c0_6 = arith.constant 0 : index
    %c1 = arith.constant 1 : index
    %c0_7 = arith.constant 0 : index
    %c0_8 = arith.constant 0 : index
    %c0_9 = arith.constant 0 : index
    %4 = vector.load %arg1[%c0_6, %c1, %c0_7, %c0_8, %c0_9] : memref<2x4x9x9x128xbf16, #tpu.memory_space<vmem>>, vector<2x1x8x8x128xbf16>
    %5 = vector.shape_cast %4 : vector<2x1x8x8x128xbf16> to vector<2x8x8x128xbf16>
    %6 = vector.shape_cast %5 : vector<2x8x8x128xbf16> to vector<128x128xbf16>
    %c0_10 = arith.constant 0 : index
    %c128 = arith.constant 128 : index
    %7 = vector.load %arg8[%c0_10, %c128] : memref<128x1152xbf16, #tpu.memory_space<vmem>>, vector<128x128xbf16>
    tpu.vector_store %arg8[%c0_10, %c128], %6 {strides = array<i32>} : memref<128x1152xbf16, #tpu.memory_space<vmem>>, vector<128x128xbf16>,
    %c0_11 = arith.constant 0 : index
    %c0_12 = arith.constant 0 : index
    %c0_13 = arith.constant 0 : index
    %c1_14 = arith.constant 1 : index
    %c0_15 = arith.constant 0 : index
    %8 = vector.load %arg1[%c0_11, %c0_12, %c0_13, %c1_14, %c0_15] : memref<2x4x9x9x128xbf16, #tpu.memory_space<vmem>>, vector<2x1x8x8x128xbf16>
    %9 = vector.shape_cast %8 : vector<2x1x8x8x128xbf16> to vector<2x8x8x128xbf16>
    %10 = vector.shape_cast %9 : vector<2x8x8x128xbf16> to vector<128x128xbf16>
    %c0_16 = arith.constant 0 : index
    %c256 = arith.constant 256 : index
    %11 = vector.load %arg8[%c0_16, %c256] : memref<128x1152xbf16, #tpu.memory_space<vmem>>, vector<128x128xbf16>
    tpu.vector_store %arg8[%c0_16, %c256], %10 {strides = array<i32>} : memref<128x1152xbf16, #tpu.memory_space<vmem>>, vector<128x128xbf16>,
    %c0_17 = arith.constant 0 : index
    %c2 = arith.constant 2 : index
    %c0_18 = arith.constant 0 : index
    %c0_19 = arith.constant 0 : index
    %c0_20 = arith.constant 0 : index
    %12 = vector.load %arg1[%c0_17, %c2, %c0_18, %c0_19, %c0_20] : memref<2x4x9x9x128xbf16, #tpu.memory_space<vmem>>, vector<2x1x8x8x128xbf16>
    %13 = vector.shape_cast %12 : vector<2x1x8x8x128xbf16> to vector<2x8x8x128xbf16>
    %14 = vector.shape_cast %13 : vector<2x8x8x128xbf16> to vector<128x128xbf16>
    %c0_21 = arith.constant 0 : index
    %c384 = arith.constant 384 : index
    %15 = vector.load %arg8[%c0_21, %c384] : memref<128x1152xbf16, #tpu.memory_space<vmem>>, vector<128x128xbf16>
    tpu.vector_store %arg8[%c0_21, %c384], %14 {strides = array<i32>} : memref<128x1152xbf16, #tpu.memory_space<vmem>>, vector<128x128xbf16>,
    %c0_22 = arith.constant 0 : index
    %c3 = arith.constant 3 : index
    %c0_23 = arith.constant 0 : index
    %c0_24 = arith.constant 0 : index
    %c0_25 = arith.constant 0 : index
    %16 = vector.load %arg1[%c0_22, %c3, %c0_23, %c0_24, %c0_25] : memref<2x4x9x9x128xbf16, #tpu.memory_space<vmem>>, vector<2x1x8x8x128xbf16>
    %17 = vector.shape_cast %16 : vector<2x1x8x8x128xbf16> to vector<2x8x8x128xbf16>
    %18 = vector.shape_cast %17 : vector<2x8x8x128xbf16> to vector<128x128xbf16>
    %c0_26 = arith.constant 0 : index
    %c512 = arith.constant 512 : index
    %19 = vector.load %arg8[%c0_26, %c512] : memref<128x1152xbf16, #tpu.memory_space<vmem>>, vector<128x128xbf16>
    tpu.vector_store %arg8[%c0_26, %c512], %18 {strides = array<i32>} : memref<128x1152xbf16, #tpu.memory_space<vmem>>, vector<128x128xbf16>,
    %c0_27 = arith.constant 0 : index
    %c2_28 = arith.constant 2 : index
    %c0_29 = arith.constant 0 : index
    %c1_30 = arith.constant 1 : index
    %c0_31 = arith.constant 0 : index
    %20 = vector.load %arg1[%c0_27, %c2_28, %c0_29, %c1_30, %c0_31] : memref<2x4x9x9x128xbf16, #tpu.memory_space<vmem>>, vector<2x1x8x8x128xbf16>
    %21 = vector.shape_cast %20 : vector<2x1x8x8x128xbf16> to vector<2x8x8x128xbf16>
    %22 = vector.shape_cast %21 : vector<2x8x8x128xbf16> to vector<128x128xbf16>
    %c0_32 = arith.constant 0 : index
    %c640 = arith.constant 640 : index
    %23 = vector.load %arg8[%c0_32, %c640] : memref<128x1152xbf16, #tpu.memory_space<vmem>>, vector<128x128xbf16>
    tpu.vector_store %arg8[%c0_32, %c640], %22 {strides = array<i32>} : memref<128x1152xbf16, #tpu.memory_space<vmem>>, vector<128x128xbf16>,
    %c0_33 = arith.constant 0 : index
    %c0_34 = arith.constant 0 : index
    %c1_35 = arith.constant 1 : index
    %c0_36 = arith.constant 0 : index
    %c0_37 = arith.constant 0 : index
    %24 = vector.load %arg1[%c0_33, %c0_34, %c1_35, %c0_36, %c0_37] : memref<2x4x9x9x128xbf16, #tpu.memory_space<vmem>>, vector<2x1x8x8x128xbf16>
    %25 = vector.shape_cast %24 : vector<2x1x8x8x128xbf16> to vector<2x8x8x128xbf16>
    %26 = vector.shape_cast %25 : vector<2x8x8x128xbf16> to vector<128x128xbf16>
    %c0_38 = arith.constant 0 : index
    %c768 = arith.constant 768 : index
    %27 = vector.load %arg8[%c0_38, %c768] : memref<128x1152xbf16, #tpu.memory_space<vmem>>, vector<128x128xbf16>
    tpu.vector_store %arg8[%c0_38, %c768], %26 {strides = array<i32>} : memref<128x1152xbf16, #tpu.memory_space<vmem>>, vector<128x128xbf16>,
    %c0_39 = arith.constant 0 : index
    %c1_40 = arith.constant 1 : index
    %c1_41 = arith.constant 1 : index
    %c0_42 = arith.constant 0 : index
    %c0_43 = arith.constant 0 : index
    %28 = vector.load %arg1[%c0_39, %c1_40, %c1_41, %c0_42, %c0_43] : memref<2x4x9x9x128xbf16, #tpu.memory_space<vmem>>, vector<2x1x8x8x128xbf16>
    %29 = vector.shape_cast %28 : vector<2x1x8x8x128xbf16> to vector<2x8x8x128xbf16>
    %30 = vector.shape_cast %29 : vector<2x8x8x128xbf16> to vector<128x128xbf16>
    %c0_44 = arith.constant 0 : index
    %c896 = arith.constant 896 : index
    %31 = vector.load %arg8[%c0_44, %c896] : memref<128x1152xbf16, #tpu.memory_space<vmem>>, vector<128x128xbf16>
    tpu.vector_store %arg8[%c0_44, %c896], %30 {strides = array<i32>} : memref<128x1152xbf16, #tpu.memory_space<vmem>>, vector<128x128xbf16>,
    %c0_45 = arith.constant 0 : index
    %c0_46 = arith.constant 0 : index
    %c1_47 = arith.constant 1 : index
    %c1_48 = arith.constant 1 : index
    %c0_49 = arith.constant 0 : index
    %32 = vector.load %arg1[%c0_45, %c0_46, %c1_47, %c1_48, %c0_49] : memref<2x4x9x9x128xbf16, #tpu.memory_space<vmem>>, vector<2x1x8x8x128xbf16>
    %33 = vector.shape_cast %32 : vector<2x1x8x8x128xbf16> to vector<2x8x8x128xbf16>
    %34 = vector.shape_cast %33 : vector<2x8x8x128xbf16> to vector<128x128xbf16>
    %c0_50 = arith.constant 0 : index
    %c1024 = arith.constant 1024 : index
    %35 = vector.load %arg8[%c0_50, %c1024] : memref<128x1152xbf16, #tpu.memory_space<vmem>>, vector<128x128xbf16>
    tpu.vector_store %arg8[%c0_50, %c1024], %34 {strides = array<i32>} : memref<128x1152xbf16, #tpu.memory_space<vmem>>, vector<128x128xbf16>,
    %c0_51 = arith.constant 0 : index
    %c0_52 = arith.constant 0 : index
    %36 = vector.load %arg8[%c0_51, %c0_52] : memref<128x1152xbf16, #tpu.memory_space<vmem>>, vector<128x1152xbf16>
    %c0_53 = arith.constant 0 : index
    %c0_54 = arith.constant 0 : index
    %37 = vector.load %arg2[%c0_53, %c0_54] : memref<1152x128xbf16, #tpu.memory_space<vmem>>, vector<1152x128xbf16>
    %cst = arith.constant dense<0.000000e+00> : vector<128x128xf32>
    %38 = tpu.matmul %36, %37, %cst {dimension_numbers = #tpu.dot_dimension_numbers<[1], [0], [0], [1], [0, 0, 1, 1], [], []>} : vector<128x1152xbf16>, vector<1152x128xbf16>, vector<128x128xf32> -> vector<128x128xf32>
    %c0_55 = arith.constant 0 : index
    %c0_56 = arith.constant 0 : index
    %39 = vector.load %arg4[%c0_55, %c0_56] : memref<1x128xf32, #tpu.memory_space<vmem>>, vector<1x128xf32>
    %40 = vector.broadcast %39 : vector<1x128xf32> to vector<128x128xf32>
    %41 = arith.mulf %38, %40 : vector<128x128xf32>
    %c0_57 = arith.constant 0 : index
    %c0_58 = arith.constant 0 : index
    %42 = vector.load %arg5[%c0_57, %c0_58] : memref<1x128xf32, #tpu.memory_space<vmem>>, vector<1x128xf32>
    %43 = vector.broadcast %42 : vector<1x128xf32> to vector<128x128xf32>
    %44 = arith.addf %41, %43 : vector<128x128xf32>
    %cst_59 = arith.constant 0.000000e+00 : f32
    %45 = vector.broadcast %cst_59 : f32 to vector<128x128xf32>
    %46 = arith.maximumf %44, %45 : vector<128x128xf32>
    %47 = vector.shape_cast %46 : vector<128x128xf32> to vector<2x8x8x128xf32>
    %48 = arith.truncf %47 : vector<2x8x8x128xf32> to vector<2x8x8x128xbf16>
    %c0_60 = arith.constant 0 : index
    %c0_61 = arith.constant 0 : index
    %c0_62 = arith.constant 0 : index
    %c0_63 = arith.constant 0 : index
    %49 = vector.load %arg6[%c0_60, %c0_61, %c0_62, %c0_63] : memref<2x8x8x128xbf16, #tpu.memory_space<vmem>>, vector<2x8x8x128xbf16>
    tpu.vector_store %arg6[%c0_60, %c0_61, %c0_62, %c0_63], %48 {strides = array<i32>} : memref<2x8x8x128xbf16, #tpu.memory_space<vmem>>, vector<2x8x8x128xbf16>,
    %c0_64 = arith.constant 0 : index
    %c0_65 = arith.constant 0 : index
    %50 = vector.load %arg3[%c0_64, %c0_65] : memref<128x128xbf16, #tpu.memory_space<vmem>>, vector<128x128xbf16>
    %cst_66 = arith.constant dense<0.000000e+00> : vector<128x128xf32>
    %51 = tpu.matmul %18, %50, %cst_66 {dimension_numbers = #tpu.dot_dimension_numbers<[1], [0], [0], [1], [0, 0, 1, 1], [], []>} : vector<128x128xbf16>, vector<128x128xbf16>, vector<128x128xf32> -> vector<128x128xf32>
    %52 = vector.shape_cast %51 : vector<128x128xf32> to vector<2x8x8x128xf32>
    %53 = arith.truncf %52 : vector<2x8x8x128xf32> to vector<2x8x8x128xbf16>
    %c0_67 = arith.constant 0 : index
    %c0_68 = arith.constant 0 : index
    %c0_69 = arith.constant 0 : index
    %c0_70 = arith.constant 0 : index
    %54 = vector.load %arg7[%c0_67, %c0_68, %c0_69, %c0_70] : memref<2x8x8x128xbf16, #tpu.memory_space<vmem>>, vector<2x8x8x128xbf16>
    tpu.vector_store %arg7[%c0_67, %c0_68, %c0_69, %c0_70], %53 {strides = array<i32>} : memref<2x8x8x128xbf16, #tpu.memory_space<vmem>>, vector<2x8x8x128xbf16>,
    return
  }
  func.func @transform_0(%arg0: i32) -> (i32, i32, i32, i32, i32) {
    %c0_i32 = arith.constant 0 : i32
    %c0_i32_0 = arith.constant 0 : i32
    %c0_i32_1 = arith.constant 0 : i32
    %c0_i32_2 = arith.constant 0 : i32
    %c0_i32_3 = arith.constant 0 : i32
    return %arg0, %c0_i32, %c0_i32_0, %c0_i32_1, %c0_i32_2 : i32, i32, i32, i32, i32
  }
  func.func @transform_1(%arg0: i32) -> (i32, i32) {
    %c0_i32 = arith.constant 0 : i32
    %c0_i32_0 = arith.constant 0 : i32
    %c0_i32_1 = arith.constant 0 : i32
    return %c0_i32, %c0_i32_0 : i32, i32
  }
  func.func @transform_2(%arg0: i32) -> (i32, i32) {
    %c0_i32 = arith.constant 0 : i32
    %c0_i32_0 = arith.constant 0 : i32
    %c0_i32_1 = arith.constant 0 : i32
    return %c0_i32, %c0_i32_0 : i32, i32
  }
  func.func @transform_3(%arg0: i32) -> (i32, i32) {
    %c0_i32 = arith.constant 0 : i32
    %c0_i32_0 = arith.constant 0 : i32
    %c0_i32_1 = arith.constant 0 : i32
    return %c0_i32, %c0_i32_0 : i32, i32
  }
  func.func @transform_4(%arg0: i32) -> (i32, i32) {
    %c0_i32 = arith.constant 0 : i32
    %c0_i32_0 = arith.constant 0 : i32
    %c0_i32_1 = arith.constant 0 : i32
    return %c0_i32, %c0_i32_0 : i32, i32
  }
  func.func @transform_5(%arg0: i32) -> (i32, i32, i32, i32) {
    %c0_i32 = arith.constant 0 : i32
    %c0_i32_0 = arith.constant 0 : i32
    %c0_i32_1 = arith.constant 0 : i32
    %c0_i32_2 = arith.constant 0 : i32
    return %arg0, %c0_i32, %c0_i32_0, %c0_i32_1 : i32, i32, i32, i32
  }
  func.func @transform_6(%arg0: i32) -> (i32, i32, i32, i32) {
    %c0_i32 = arith.constant 0 : i32
    %c0_i32_0 = arith.constant 0 : i32
    %c0_i32_1 = arith.constant 0 : i32
    %c0_i32_2 = arith.constant 0 : i32
    return %arg0, %c0_i32, %c0_i32_0, %c0_i32_1 : i32, i32, i32, i32
  }
}

module attributes {stable_mosaic.version = 11 : i64} {
  func.func @_conv2_res_kernel(%arg0: i32, %arg1: memref<2x8x8x128xbf16, #tpu.memory_space<vmem>>, %arg2: memref<2x8x8x128xbf16, #tpu.memory_space<vmem>>, %arg3: memref<1152x128xbf16, #tpu.memory_space<vmem>>, %arg4: memref<2x8x8x128xbf16, #tpu.memory_space<vmem>>, %arg5: memref<2x10x10x128xbf16, #tpu.memory_space<vmem>>, %arg6: memref<128x1152xbf16, #tpu.memory_space<vmem>>) attributes {dimension_semantics = [#tpu.dimension_semantics<parallel>], iteration_bounds = array<i64: 1>, scalar_prefetch = 0 : i64, scratch_operands = 2 : i64, tpu.core_type = #tpu.core_type<tc>, window_params = [{transform_indices = @transform_0, window_bounds = array<i64: 2, 8, 8, 128>}, {transform_indices = @transform_1, window_bounds = array<i64: 2, 8, 8, 128>}, {pipeline_mode = #tpu.pipeline_mode<synchronous>, transform_indices = @transform_2, window_bounds = array<i64: 1152, 128>}, {transform_indices = @transform_3, window_bounds = array<i64: 2, 8, 8, 128>}]} {
    %cst = arith.constant 0.000000e+00 : bf16
    %0 = vector.broadcast %cst : bf16 to vector<2x10x10x128xbf16>
    %c0 = arith.constant 0 : index
    %c0_0 = arith.constant 0 : index
    %c0_1 = arith.constant 0 : index
    %c0_2 = arith.constant 0 : index
    %1 = vector.load %arg5[%c0, %c0_0, %c0_1, %c0_2] : memref<2x10x10x128xbf16, #tpu.memory_space<vmem>>, vector<2x10x10x128xbf16>
    tpu.vector_store %arg5[%c0, %c0_0, %c0_1, %c0_2], %0 {strides = array<i32>} : memref<2x10x10x128xbf16, #tpu.memory_space<vmem>>, vector<2x10x10x128xbf16>,
    %c0_3 = arith.constant 0 : index
    %c0_4 = arith.constant 0 : index
    %c0_5 = arith.constant 0 : index
    %c0_6 = arith.constant 0 : index
    %2 = vector.load %arg1[%c0_3, %c0_4, %c0_5, %c0_6] : memref<2x8x8x128xbf16, #tpu.memory_space<vmem>>, vector<2x8x8x128xbf16>
    %c0_7 = arith.constant 0 : index
    %c1 = arith.constant 1 : index
    %c1_8 = arith.constant 1 : index
    %c0_9 = arith.constant 0 : index
    %3 = vector.load %arg5[%c0_7, %c1, %c1_8, %c0_9] : memref<2x10x10x128xbf16, #tpu.memory_space<vmem>>, vector<2x8x8x128xbf16>
    tpu.vector_store %arg5[%c0_7, %c1, %c1_8, %c0_9], %2 {strides = array<i32>} : memref<2x10x10x128xbf16, #tpu.memory_space<vmem>>, vector<2x8x8x128xbf16>,
    %c0_10 = arith.constant 0 : index
    %c0_11 = arith.constant 0 : index
    %c0_12 = arith.constant 0 : index
    %c0_13 = arith.constant 0 : index
    %4 = vector.load %arg5[%c0_10, %c0_11, %c0_12, %c0_13] : memref<2x10x10x128xbf16, #tpu.memory_space<vmem>>, vector<2x8x8x128xbf16>
    %5 = vector.shape_cast %4 : vector<2x8x8x128xbf16> to vector<128x128xbf16>
    %c0_14 = arith.constant 0 : index
    %c0_15 = arith.constant 0 : index
    %6 = vector.load %arg6[%c0_14, %c0_15] : memref<128x1152xbf16, #tpu.memory_space<vmem>>, vector<128x128xbf16>
    tpu.vector_store %arg6[%c0_14, %c0_15], %5 {strides = array<i32>} : memref<128x1152xbf16, #tpu.memory_space<vmem>>, vector<128x128xbf16>,
    %c0_16 = arith.constant 0 : index
    %c0_17 = arith.constant 0 : index
    %c1_18 = arith.constant 1 : index
    %c0_19 = arith.constant 0 : index
    %7 = vector.load %arg5[%c0_16, %c0_17, %c1_18, %c0_19] : memref<2x10x10x128xbf16, #tpu.memory_space<vmem>>, vector<2x8x8x128xbf16>
    %8 = vector.shape_cast %7 : vector<2x8x8x128xbf16> to vector<128x128xbf16>
    %c0_20 = arith.constant 0 : index
    %c128 = arith.constant 128 : index
    %9 = vector.load %arg6[%c0_20, %c128] : memref<128x1152xbf16, #tpu.memory_space<vmem>>, vector<128x128xbf16>
    tpu.vector_store %arg6[%c0_20, %c128], %8 {strides = array<i32>} : memref<128x1152xbf16, #tpu.memory_space<vmem>>, vector<128x128xbf16>,
    %c0_21 = arith.constant 0 : index
    %c0_22 = arith.constant 0 : index
    %c2 = arith.constant 2 : index
    %c0_23 = arith.constant 0 : index
    %10 = vector.load %arg5[%c0_21, %c0_22, %c2, %c0_23] : memref<2x10x10x128xbf16, #tpu.memory_space<vmem>>, vector<2x8x8x128xbf16>
    %11 = vector.shape_cast %10 : vector<2x8x8x128xbf16> to vector<128x128xbf16>
    %c0_24 = arith.constant 0 : index
    %c256 = arith.constant 256 : index
    %12 = vector.load %arg6[%c0_24, %c256] : memref<128x1152xbf16, #tpu.memory_space<vmem>>, vector<128x128xbf16>
    tpu.vector_store %arg6[%c0_24, %c256], %11 {strides = array<i32>} : memref<128x1152xbf16, #tpu.memory_space<vmem>>, vector<128x128xbf16>,
    %c0_25 = arith.constant 0 : index
    %c1_26 = arith.constant 1 : index
    %c0_27 = arith.constant 0 : index
    %c0_28 = arith.constant 0 : index
    %13 = vector.load %arg5[%c0_25, %c1_26, %c0_27, %c0_28] : memref<2x10x10x128xbf16, #tpu.memory_space<vmem>>, vector<2x8x8x128xbf16>
    %14 = vector.shape_cast %13 : vector<2x8x8x128xbf16> to vector<128x128xbf16>
    %c0_29 = arith.constant 0 : index
    %c384 = arith.constant 384 : index
    %15 = vector.load %arg6[%c0_29, %c384] : memref<128x1152xbf16, #tpu.memory_space<vmem>>, vector<128x128xbf16>
    tpu.vector_store %arg6[%c0_29, %c384], %14 {strides = array<i32>} : memref<128x1152xbf16, #tpu.memory_space<vmem>>, vector<128x128xbf16>,
    %c0_30 = arith.constant 0 : index
    %c1_31 = arith.constant 1 : index
    %c1_32 = arith.constant 1 : index
    %c0_33 = arith.constant 0 : index
    %16 = vector.load %arg5[%c0_30, %c1_31, %c1_32, %c0_33] : memref<2x10x10x128xbf16, #tpu.memory_space<vmem>>, vector<2x8x8x128xbf16>
    %17 = vector.shape_cast %16 : vector<2x8x8x128xbf16> to vector<128x128xbf16>
    %c0_34 = arith.constant 0 : index
    %c512 = arith.constant 512 : index
    %18 = vector.load %arg6[%c0_34, %c512] : memref<128x1152xbf16, #tpu.memory_space<vmem>>, vector<128x128xbf16>
    tpu.vector_store %arg6[%c0_34, %c512], %17 {strides = array<i32>} : memref<128x1152xbf16, #tpu.memory_space<vmem>>, vector<128x128xbf16>,
    %c0_35 = arith.constant 0 : index
    %c1_36 = arith.constant 1 : index
    %c2_37 = arith.constant 2 : index
    %c0_38 = arith.constant 0 : index
    %19 = vector.load %arg5[%c0_35, %c1_36, %c2_37, %c0_38] : memref<2x10x10x128xbf16, #tpu.memory_space<vmem>>, vector<2x8x8x128xbf16>
    %20 = vector.shape_cast %19 : vector<2x8x8x128xbf16> to vector<128x128xbf16>
    %c0_39 = arith.constant 0 : index
    %c640 = arith.constant 640 : index
    %21 = vector.load %arg6[%c0_39, %c640] : memref<128x1152xbf16, #tpu.memory_space<vmem>>, vector<128x128xbf16>
    tpu.vector_store %arg6[%c0_39, %c640], %20 {strides = array<i32>} : memref<128x1152xbf16, #tpu.memory_space<vmem>>, vector<128x128xbf16>,
    %c0_40 = arith.constant 0 : index
    %c2_41 = arith.constant 2 : index
    %c0_42 = arith.constant 0 : index
    %c0_43 = arith.constant 0 : index
    %22 = vector.load %arg5[%c0_40, %c2_41, %c0_42, %c0_43] : memref<2x10x10x128xbf16, #tpu.memory_space<vmem>>, vector<2x8x8x128xbf16>
    %23 = vector.shape_cast %22 : vector<2x8x8x128xbf16> to vector<128x128xbf16>
    %c0_44 = arith.constant 0 : index
    %c768 = arith.constant 768 : index
    %24 = vector.load %arg6[%c0_44, %c768] : memref<128x1152xbf16, #tpu.memory_space<vmem>>, vector<128x128xbf16>
    tpu.vector_store %arg6[%c0_44, %c768], %23 {strides = array<i32>} : memref<128x1152xbf16, #tpu.memory_space<vmem>>, vector<128x128xbf16>,
    %c0_45 = arith.constant 0 : index
    %c2_46 = arith.constant 2 : index
    %c1_47 = arith.constant 1 : index
    %c0_48 = arith.constant 0 : index
    %25 = vector.load %arg5[%c0_45, %c2_46, %c1_47, %c0_48] : memref<2x10x10x128xbf16, #tpu.memory_space<vmem>>, vector<2x8x8x128xbf16>
    %26 = vector.shape_cast %25 : vector<2x8x8x128xbf16> to vector<128x128xbf16>
    %c0_49 = arith.constant 0 : index
    %c896 = arith.constant 896 : index
    %27 = vector.load %arg6[%c0_49, %c896] : memref<128x1152xbf16, #tpu.memory_space<vmem>>, vector<128x128xbf16>
    tpu.vector_store %arg6[%c0_49, %c896], %26 {strides = array<i32>} : memref<128x1152xbf16, #tpu.memory_space<vmem>>, vector<128x128xbf16>,
    %c0_50 = arith.constant 0 : index
    %c2_51 = arith.constant 2 : index
    %c2_52 = arith.constant 2 : index
    %c0_53 = arith.constant 0 : index
    %28 = vector.load %arg5[%c0_50, %c2_51, %c2_52, %c0_53] : memref<2x10x10x128xbf16, #tpu.memory_space<vmem>>, vector<2x8x8x128xbf16>
    %29 = vector.shape_cast %28 : vector<2x8x8x128xbf16> to vector<128x128xbf16>
    %c0_54 = arith.constant 0 : index
    %c1024 = arith.constant 1024 : index
    %30 = vector.load %arg6[%c0_54, %c1024] : memref<128x1152xbf16, #tpu.memory_space<vmem>>, vector<128x128xbf16>
    tpu.vector_store %arg6[%c0_54, %c1024], %29 {strides = array<i32>} : memref<128x1152xbf16, #tpu.memory_space<vmem>>, vector<128x128xbf16>,
    %c0_55 = arith.constant 0 : index
    %c0_56 = arith.constant 0 : index
    %31 = vector.load %arg6[%c0_55, %c0_56] : memref<128x1152xbf16, #tpu.memory_space<vmem>>, vector<128x1152xbf16>
    %c0_57 = arith.constant 0 : index
    %c0_58 = arith.constant 0 : index
    %32 = vector.load %arg3[%c0_57, %c0_58] : memref<1152x128xbf16, #tpu.memory_space<vmem>>, vector<1152x128xbf16>
    %cst_59 = arith.constant dense<0.000000e+00> : vector<128x128xf32>
    %33 = tpu.matmul %31, %32, %cst_59 {dimension_numbers = #tpu.dot_dimension_numbers<[1], [0], [0], [1], [0, 0, 1, 1], [], []>} : vector<128x1152xbf16>, vector<1152x128xbf16>, vector<128x128xf32> -> vector<128x128xf32>
    %34 = vector.shape_cast %33 : vector<128x128xf32> to vector<2x8x8x128xf32>
    %c0_60 = arith.constant 0 : index
    %c0_61 = arith.constant 0 : index
    %c0_62 = arith.constant 0 : index
    %c0_63 = arith.constant 0 : index
    %35 = vector.load %arg2[%c0_60, %c0_61, %c0_62, %c0_63] : memref<2x8x8x128xbf16, #tpu.memory_space<vmem>>, vector<2x8x8x128xbf16>
    %36 = arith.extf %35 : vector<2x8x8x128xbf16> to vector<2x8x8x128xf32>
    %37 = arith.addf %34, %36 : vector<2x8x8x128xf32>
    %38 = arith.truncf %37 : vector<2x8x8x128xf32> to vector<2x8x8x128xbf16>
    %c0_64 = arith.constant 0 : index
    %c0_65 = arith.constant 0 : index
    %c0_66 = arith.constant 0 : index
    %c0_67 = arith.constant 0 : index
    %39 = vector.load %arg4[%c0_64, %c0_65, %c0_66, %c0_67] : memref<2x8x8x128xbf16, #tpu.memory_space<vmem>>, vector<2x8x8x128xbf16>
    tpu.vector_store %arg4[%c0_64, %c0_65, %c0_66, %c0_67], %38 {strides = array<i32>} : memref<2x8x8x128xbf16, #tpu.memory_space<vmem>>, vector<2x8x8x128xbf16>,
    return
  }
  func.func @transform_0(%arg0: i32) -> (i32, i32, i32, i32) {
    %c0_i32 = arith.constant 0 : i32
    %c0_i32_0 = arith.constant 0 : i32
    %c0_i32_1 = arith.constant 0 : i32
    %c0_i32_2 = arith.constant 0 : i32
    return %arg0, %c0_i32, %c0_i32_0, %c0_i32_1 : i32, i32, i32, i32
  }
  func.func @transform_1(%arg0: i32) -> (i32, i32, i32, i32) {
    %c0_i32 = arith.constant 0 : i32
    %c0_i32_0 = arith.constant 0 : i32
    %c0_i32_1 = arith.constant 0 : i32
    %c0_i32_2 = arith.constant 0 : i32
    return %arg0, %c0_i32, %c0_i32_0, %c0_i32_1 : i32, i32, i32, i32
  }
  func.func @transform_2(%arg0: i32) -> (i32, i32) {
    %c0_i32 = arith.constant 0 : i32
    %c0_i32_0 = arith.constant 0 : i32
    %c0_i32_1 = arith.constant 0 : i32
    return %c0_i32, %c0_i32_0 : i32, i32
  }
  func.func @transform_3(%arg0: i32) -> (i32, i32, i32, i32) {
    %c0_i32 = arith.constant 0 : i32
    %c0_i32_0 = arith.constant 0 : i32
    %c0_i32_1 = arith.constant 0 : i32
    %c0_i32_2 = arith.constant 0 : i32
    return %arg0, %c0_i32, %c0_i32_0, %c0_i32_1 : i32, i32, i32, i32
  }
}

module attributes {stable_mosaic.version = 11 : i64} {
  func.func @_conv1_s1_kernel(%arg0: i32, %arg1: memref<2x8x8x128xbf16, #tpu.memory_space<vmem>>, %arg2: memref<1152x128xbf16, #tpu.memory_space<vmem>>, %arg3: memref<1x128xf32, #tpu.memory_space<vmem>>, %arg4: memref<1x128xf32, #tpu.memory_space<vmem>>, %arg5: memref<1x128xf32, #tpu.memory_space<vmem>>, %arg6: memref<1x128xf32, #tpu.memory_space<vmem>>, %arg7: memref<2x8x8x128xbf16, #tpu.memory_space<vmem>>, %arg8: memref<2x10x10x128xbf16, #tpu.memory_space<vmem>>, %arg9: memref<128x1152xbf16, #tpu.memory_space<vmem>>) attributes {dimension_semantics = [#tpu.dimension_semantics<parallel>], iteration_bounds = array<i64: 1>, scalar_prefetch = 0 : i64, scratch_operands = 2 : i64, tpu.core_type = #tpu.core_type<tc>, window_params = [{transform_indices = @transform_0, window_bounds = array<i64: 2, 8, 8, 128>}, {pipeline_mode = #tpu.pipeline_mode<synchronous>, transform_indices = @transform_1, window_bounds = array<i64: 1152, 128>}, {pipeline_mode = #tpu.pipeline_mode<synchronous>, transform_indices = @transform_2, window_bounds = array<i64: 1, 128>}, {pipeline_mode = #tpu.pipeline_mode<synchronous>, transform_indices = @transform_3, window_bounds = array<i64: 1, 128>}, {pipeline_mode = #tpu.pipeline_mode<synchronous>, transform_indices = @transform_4, window_bounds = array<i64: 1, 128>}, {pipeline_mode = #tpu.pipeline_mode<synchronous>, transform_indices = @transform_5, window_bounds = array<i64: 1, 128>}, {transform_indices = @transform_6, window_bounds = array<i64: 2, 8, 8, 128>}]} {
    %cst = arith.constant 0.000000e+00 : bf16
    %0 = vector.broadcast %cst : bf16 to vector<2x10x10x128xbf16>
    %c0 = arith.constant 0 : index
    %c0_0 = arith.constant 0 : index
    %c0_1 = arith.constant 0 : index
    %c0_2 = arith.constant 0 : index
    %1 = vector.load %arg8[%c0, %c0_0, %c0_1, %c0_2] : memref<2x10x10x128xbf16, #tpu.memory_space<vmem>>, vector<2x10x10x128xbf16>
    tpu.vector_store %arg8[%c0, %c0_0, %c0_1, %c0_2], %0 {strides = array<i32>} : memref<2x10x10x128xbf16, #tpu.memory_space<vmem>>, vector<2x10x10x128xbf16>,
    %c0_3 = arith.constant 0 : index
    %c0_4 = arith.constant 0 : index
    %2 = vector.load %arg3[%c0_3, %c0_4] : memref<1x128xf32, #tpu.memory_space<vmem>>, vector<1x128xf32>
    %3 = vector.shape_cast %2 : vector<1x128xf32> to vector<1x1x1x128xf32>
    %c0_5 = arith.constant 0 : index
    %c0_6 = arith.constant 0 : index
    %4 = vector.load %arg4[%c0_5, %c0_6] : memref<1x128xf32, #tpu.memory_space<vmem>>, vector<1x128xf32>
    %5 = vector.shape_cast %4 : vector<1x128xf32> to vector<1x1x1x128xf32>
    %c0_7 = arith.constant 0 : index
    %c0_8 = arith.constant 0 : index
    %c0_9 = arith.constant 0 : index
    %c0_10 = arith.constant 0 : index
    %6 = vector.load %arg1[%c0_7, %c0_8, %c0_9, %c0_10] : memref<2x8x8x128xbf16, #tpu.memory_space<vmem>>, vector<2x8x8x128xbf16>
    %7 = arith.extf %6 : vector<2x8x8x128xbf16> to vector<2x8x8x128xf32>
    %8 = vector.broadcast %3 : vector<1x1x1x128xf32> to vector<2x8x8x128xf32>
    %9 = arith.mulf %7, %8 : vector<2x8x8x128xf32>
    %10 = vector.broadcast %5 : vector<1x1x1x128xf32> to vector<2x8x8x128xf32>
    %11 = arith.addf %9, %10 : vector<2x8x8x128xf32>
    %cst_11 = arith.constant 0.000000e+00 : f32
    %12 = vector.broadcast %cst_11 : f32 to vector<2x8x8x128xf32>
    %13 = arith.maximumf %11, %12 : vector<2x8x8x128xf32>
    %14 = arith.truncf %13 : vector<2x8x8x128xf32> to vector<2x8x8x128xbf16>
    %c0_12 = arith.constant 0 : index
    %c1 = arith.constant 1 : index
    %c1_13 = arith.constant 1 : index
    %c0_14 = arith.constant 0 : index
    %15 = vector.load %arg8[%c0_12, %c1, %c1_13, %c0_14] : memref<2x10x10x128xbf16, #tpu.memory_space<vmem>>, vector<2x8x8x128xbf16>
    tpu.vector_store %arg8[%c0_12, %c1, %c1_13, %c0_14], %14 {strides = array<i32>} : memref<2x10x10x128xbf16, #tpu.memory_space<vmem>>, vector<2x8x8x128xbf16>,
    %c0_15 = arith.constant 0 : index
    %c0_16 = arith.constant 0 : index
    %c0_17 = arith.constant 0 : index
    %c0_18 = arith.constant 0 : index
    %16 = vector.load %arg8[%c0_15, %c0_16, %c0_17, %c0_18] : memref<2x10x10x128xbf16, #tpu.memory_space<vmem>>, vector<2x8x8x128xbf16>
    %17 = vector.shape_cast %16 : vector<2x8x8x128xbf16> to vector<128x128xbf16>
    %c0_19 = arith.constant 0 : index
    %c0_20 = arith.constant 0 : index
    %18 = vector.load %arg9[%c0_19, %c0_20] : memref<128x1152xbf16, #tpu.memory_space<vmem>>, vector<128x128xbf16>
    tpu.vector_store %arg9[%c0_19, %c0_20], %17 {strides = array<i32>} : memref<128x1152xbf16, #tpu.memory_space<vmem>>, vector<128x128xbf16>,
    %c0_21 = arith.constant 0 : index
    %c0_22 = arith.constant 0 : index
    %c1_23 = arith.constant 1 : index
    %c0_24 = arith.constant 0 : index
    %19 = vector.load %arg8[%c0_21, %c0_22, %c1_23, %c0_24] : memref<2x10x10x128xbf16, #tpu.memory_space<vmem>>, vector<2x8x8x128xbf16>
    %20 = vector.shape_cast %19 : vector<2x8x8x128xbf16> to vector<128x128xbf16>
    %c0_25 = arith.constant 0 : index
    %c128 = arith.constant 128 : index
    %21 = vector.load %arg9[%c0_25, %c128] : memref<128x1152xbf16, #tpu.memory_space<vmem>>, vector<128x128xbf16>
    tpu.vector_store %arg9[%c0_25, %c128], %20 {strides = array<i32>} : memref<128x1152xbf16, #tpu.memory_space<vmem>>, vector<128x128xbf16>,
    %c0_26 = arith.constant 0 : index
    %c0_27 = arith.constant 0 : index
    %c2 = arith.constant 2 : index
    %c0_28 = arith.constant 0 : index
    %22 = vector.load %arg8[%c0_26, %c0_27, %c2, %c0_28] : memref<2x10x10x128xbf16, #tpu.memory_space<vmem>>, vector<2x8x8x128xbf16>
    %23 = vector.shape_cast %22 : vector<2x8x8x128xbf16> to vector<128x128xbf16>
    %c0_29 = arith.constant 0 : index
    %c256 = arith.constant 256 : index
    %24 = vector.load %arg9[%c0_29, %c256] : memref<128x1152xbf16, #tpu.memory_space<vmem>>, vector<128x128xbf16>
    tpu.vector_store %arg9[%c0_29, %c256], %23 {strides = array<i32>} : memref<128x1152xbf16, #tpu.memory_space<vmem>>, vector<128x128xbf16>,
    %c0_30 = arith.constant 0 : index
    %c1_31 = arith.constant 1 : index
    %c0_32 = arith.constant 0 : index
    %c0_33 = arith.constant 0 : index
    %25 = vector.load %arg8[%c0_30, %c1_31, %c0_32, %c0_33] : memref<2x10x10x128xbf16, #tpu.memory_space<vmem>>, vector<2x8x8x128xbf16>
    %26 = vector.shape_cast %25 : vector<2x8x8x128xbf16> to vector<128x128xbf16>
    %c0_34 = arith.constant 0 : index
    %c384 = arith.constant 384 : index
    %27 = vector.load %arg9[%c0_34, %c384] : memref<128x1152xbf16, #tpu.memory_space<vmem>>, vector<128x128xbf16>
    tpu.vector_store %arg9[%c0_34, %c384], %26 {strides = array<i32>} : memref<128x1152xbf16, #tpu.memory_space<vmem>>, vector<128x128xbf16>,
    %c0_35 = arith.constant 0 : index
    %c1_36 = arith.constant 1 : index
    %c1_37 = arith.constant 1 : index
    %c0_38 = arith.constant 0 : index
    %28 = vector.load %arg8[%c0_35, %c1_36, %c1_37, %c0_38] : memref<2x10x10x128xbf16, #tpu.memory_space<vmem>>, vector<2x8x8x128xbf16>
    %29 = vector.shape_cast %28 : vector<2x8x8x128xbf16> to vector<128x128xbf16>
    %c0_39 = arith.constant 0 : index
    %c512 = arith.constant 512 : index
    %30 = vector.load %arg9[%c0_39, %c512] : memref<128x1152xbf16, #tpu.memory_space<vmem>>, vector<128x128xbf16>
    tpu.vector_store %arg9[%c0_39, %c512], %29 {strides = array<i32>} : memref<128x1152xbf16, #tpu.memory_space<vmem>>, vector<128x128xbf16>,
    %c0_40 = arith.constant 0 : index
    %c1_41 = arith.constant 1 : index
    %c2_42 = arith.constant 2 : index
    %c0_43 = arith.constant 0 : index
    %31 = vector.load %arg8[%c0_40, %c1_41, %c2_42, %c0_43] : memref<2x10x10x128xbf16, #tpu.memory_space<vmem>>, vector<2x8x8x128xbf16>
    %32 = vector.shape_cast %31 : vector<2x8x8x128xbf16> to vector<128x128xbf16>
    %c0_44 = arith.constant 0 : index
    %c640 = arith.constant 640 : index
    %33 = vector.load %arg9[%c0_44, %c640] : memref<128x1152xbf16, #tpu.memory_space<vmem>>, vector<128x128xbf16>
    tpu.vector_store %arg9[%c0_44, %c640], %32 {strides = array<i32>} : memref<128x1152xbf16, #tpu.memory_space<vmem>>, vector<128x128xbf16>,
    %c0_45 = arith.constant 0 : index
    %c2_46 = arith.constant 2 : index
    %c0_47 = arith.constant 0 : index
    %c0_48 = arith.constant 0 : index
    %34 = vector.load %arg8[%c0_45, %c2_46, %c0_47, %c0_48] : memref<2x10x10x128xbf16, #tpu.memory_space<vmem>>, vector<2x8x8x128xbf16>
    %35 = vector.shape_cast %34 : vector<2x8x8x128xbf16> to vector<128x128xbf16>
    %c0_49 = arith.constant 0 : index
    %c768 = arith.constant 768 : index
    %36 = vector.load %arg9[%c0_49, %c768] : memref<128x1152xbf16, #tpu.memory_space<vmem>>, vector<128x128xbf16>
    tpu.vector_store %arg9[%c0_49, %c768], %35 {strides = array<i32>} : memref<128x1152xbf16, #tpu.memory_space<vmem>>, vector<128x128xbf16>,
    %c0_50 = arith.constant 0 : index
    %c2_51 = arith.constant 2 : index
    %c1_52 = arith.constant 1 : index
    %c0_53 = arith.constant 0 : index
    %37 = vector.load %arg8[%c0_50, %c2_51, %c1_52, %c0_53] : memref<2x10x10x128xbf16, #tpu.memory_space<vmem>>, vector<2x8x8x128xbf16>
    %38 = vector.shape_cast %37 : vector<2x8x8x128xbf16> to vector<128x128xbf16>
    %c0_54 = arith.constant 0 : index
    %c896 = arith.constant 896 : index
    %39 = vector.load %arg9[%c0_54, %c896] : memref<128x1152xbf16, #tpu.memory_space<vmem>>, vector<128x128xbf16>
    tpu.vector_store %arg9[%c0_54, %c896], %38 {strides = array<i32>} : memref<128x1152xbf16, #tpu.memory_space<vmem>>, vector<128x128xbf16>,
    %c0_55 = arith.constant 0 : index
    %c2_56 = arith.constant 2 : index
    %c2_57 = arith.constant 2 : index
    %c0_58 = arith.constant 0 : index
    %40 = vector.load %arg8[%c0_55, %c2_56, %c2_57, %c0_58] : memref<2x10x10x128xbf16, #tpu.memory_space<vmem>>, vector<2x8x8x128xbf16>
    %41 = vector.shape_cast %40 : vector<2x8x8x128xbf16> to vector<128x128xbf16>
    %c0_59 = arith.constant 0 : index
    %c1024 = arith.constant 1024 : index
    %42 = vector.load %arg9[%c0_59, %c1024] : memref<128x1152xbf16, #tpu.memory_space<vmem>>, vector<128x128xbf16>
    tpu.vector_store %arg9[%c0_59, %c1024], %41 {strides = array<i32>} : memref<128x1152xbf16, #tpu.memory_space<vmem>>, vector<128x128xbf16>,
    %c0_60 = arith.constant 0 : index
    %c0_61 = arith.constant 0 : index
    %43 = vector.load %arg9[%c0_60, %c0_61] : memref<128x1152xbf16, #tpu.memory_space<vmem>>, vector<128x1152xbf16>
    %c0_62 = arith.constant 0 : index
    %c0_63 = arith.constant 0 : index
    %44 = vector.load %arg2[%c0_62, %c0_63] : memref<1152x128xbf16, #tpu.memory_space<vmem>>, vector<1152x128xbf16>
    %cst_64 = arith.constant dense<0.000000e+00> : vector<128x128xf32>
    %45 = tpu.matmul %43, %44, %cst_64 {dimension_numbers = #tpu.dot_dimension_numbers<[1], [0], [0], [1], [0, 0, 1, 1], [], []>} : vector<128x1152xbf16>, vector<1152x128xbf16>, vector<128x128xf32> -> vector<128x128xf32>
    %c0_65 = arith.constant 0 : index
    %c0_66 = arith.constant 0 : index
    %46 = vector.load %arg5[%c0_65, %c0_66] : memref<1x128xf32, #tpu.memory_space<vmem>>, vector<1x128xf32>
    %47 = vector.broadcast %46 : vector<1x128xf32> to vector<128x128xf32>
    %48 = arith.mulf %45, %47 : vector<128x128xf32>
    %c0_67 = arith.constant 0 : index
    %c0_68 = arith.constant 0 : index
    %49 = vector.load %arg6[%c0_67, %c0_68] : memref<1x128xf32, #tpu.memory_space<vmem>>, vector<1x128xf32>
    %50 = vector.broadcast %49 : vector<1x128xf32> to vector<128x128xf32>
    %51 = arith.addf %48, %50 : vector<128x128xf32>
    %cst_69 = arith.constant 0.000000e+00 : f32
    %52 = vector.broadcast %cst_69 : f32 to vector<128x128xf32>
    %53 = arith.maximumf %51, %52 : vector<128x128xf32>
    %54 = vector.shape_cast %53 : vector<128x128xf32> to vector<2x8x8x128xf32>
    %55 = arith.truncf %54 : vector<2x8x8x128xf32> to vector<2x8x8x128xbf16>
    %c0_70 = arith.constant 0 : index
    %c0_71 = arith.constant 0 : index
    %c0_72 = arith.constant 0 : index
    %c0_73 = arith.constant 0 : index
    %56 = vector.load %arg7[%c0_70, %c0_71, %c0_72, %c0_73] : memref<2x8x8x128xbf16, #tpu.memory_space<vmem>>, vector<2x8x8x128xbf16>
    tpu.vector_store %arg7[%c0_70, %c0_71, %c0_72, %c0_73], %55 {strides = array<i32>} : memref<2x8x8x128xbf16, #tpu.memory_space<vmem>>, vector<2x8x8x128xbf16>,
    return
  }
  func.func @transform_0(%arg0: i32) -> (i32, i32, i32, i32) {
    %c0_i32 = arith.constant 0 : i32
    %c0_i32_0 = arith.constant 0 : i32
    %c0_i32_1 = arith.constant 0 : i32
    %c0_i32_2 = arith.constant 0 : i32
    return %arg0, %c0_i32, %c0_i32_0, %c0_i32_1 : i32, i32, i32, i32
  }
  func.func @transform_1(%arg0: i32) -> (i32, i32) {
    %c0_i32 = arith.constant 0 : i32
    %c0_i32_0 = arith.constant 0 : i32
    %c0_i32_1 = arith.constant 0 : i32
    return %c0_i32, %c0_i32_0 : i32, i32
  }
  func.func @transform_2(%arg0: i32) -> (i32, i32) {
    %c0_i32 = arith.constant 0 : i32
    %c0_i32_0 = arith.constant 0 : i32
    %c0_i32_1 = arith.constant 0 : i32
    return %c0_i32, %c0_i32_0 : i32, i32
  }
  func.func @transform_3(%arg0: i32) -> (i32, i32) {
    %c0_i32 = arith.constant 0 : i32
    %c0_i32_0 = arith.constant 0 : i32
    %c0_i32_1 = arith.constant 0 : i32
    return %c0_i32, %c0_i32_0 : i32, i32
  }
  func.func @transform_4(%arg0: i32) -> (i32, i32) {
    %c0_i32 = arith.constant 0 : i32
    %c0_i32_0 = arith.constant 0 : i32
    %c0_i32_1 = arith.constant 0 : i32
    return %c0_i32, %c0_i32_0 : i32, i32
  }
  func.func @transform_5(%arg0: i32) -> (i32, i32) {
    %c0_i32 = arith.constant 0 : i32
    %c0_i32_0 = arith.constant 0 : i32
    %c0_i32_1 = arith.constant 0 : i32
    return %c0_i32, %c0_i32_0 : i32, i32
  }
  func.func @transform_6(%arg0: i32) -> (i32, i32, i32, i32) {
    %c0_i32 = arith.constant 0 : i32
    %c0_i32_0 = arith.constant 0 : i32
    %c0_i32_1 = arith.constant 0 : i32
    %c0_i32_2 = arith.constant 0 : i32
    return %arg0, %c0_i32, %c0_i32_0, %c0_i32_1 : i32, i32, i32, i32
  }
}

</mosaic_0001>

<bundles_post_ra>
// kernel: network_block_fwd.4
= control target key start
LH: loop header
LB: loop body
LE: loop exit
PB: predicated region body
PF: predicated region fallthrough
CT: control target
= control target key end

     0   :  { %vm120_vm0 = vsmask.f32 3328  ;;  %vm121_vm1 = vsmask.f32 7440  ;;  %s5176_s1 = inlined_call_operand.vmem [shape: bf16[1152,128], index: 1, kind: input, shape index: {}]   ;;  %s5177_s0 = inlined_call_operand.vmem [shape: bf16[2,4,9,9,128], index: 0, kind: input, shape index: {}]   ;;  %s5178_s2 = inlined_call_operand.vmem [shape: bf16[128,128], index: 2, kind: input, shape index: {}]   ;;  %s5179_s6 = inlined_call_operand.vmem [shape: bf16[2,8,8,128], index: 6, kind: output, shape index: {1}]   ;;  %s5180_s3 = inlined_call_operand.vmem [shape: f32[1,128], index: 3, kind: input, shape index: {}]   ;;  %s5181_s4 = inlined_call_operand.vmem [shape: f32[1,128], index: 4, kind: input, shape index: {}]   ;;  %s5182_s5 = inlined_call_operand.vmem [shape: bf16[2,8,8,128], index: 5, kind: output, shape index: {0}]  }
   0x1   :  { %v3691_v0 = vld [vmem:[%s5176_s1 + $0x78] sm:$0xff]   ;;  %v3695_v4 = vld [vmem:[%s5176_s1 + $0x70] sm:$0xff]   ;;  %v3699_v8 = vld [vmem:[%s5176_s1 + $0x68] sm:$0xff]  }
   0x2   :  { %v3692_v1 = vld [vmem:[%s5176_s1 + $0xf8] sm:$0xff]   ;;  %3339 = vmatprep.subr.bf16.mxu0 %v3691_v0  ;;  %v3696_v5 = vld [vmem:[%s5176_s1 + $0xf0] sm:$0xff]   ;;  %v3700_v9 = vld [vmem:[%s5176_s1 + $0xe8] sm:$0xff]  }
   0x3   :  { %v3693_v2 = vld [vmem:[%s5176_s1 + $0x38] sm:$0xff]   ;;  %3403 = vmatprep.subr.bf16.mxu1 %v3692_v1  ;;  %v3697_v6 = vld [vmem:[%s5176_s1 + $0x30] sm:$0xff]   ;;  %v3701_v10 = vld [vmem:[%s5176_s1 + $0x28] sm:$0xff]  }
   0x4   :  { %v3694_v3 = vld [vmem:[%s5176_s1 + $0xb8] sm:$0xff]   ;;  %3340 = vmatpush3.bf16.msra.mxu0 %v3693_v2  ;;  %v3698_v7 = vld [vmem:[%s5176_s1 + $0xb0] sm:$0xff]   ;;  %v3702_v11 = vld [vmem:[%s5176_s1 + $0xa8] sm:$0xff]  }
   0x5   :  { %3404 = vmatpush3.bf16.msra.mxu1 %v3694_v3  ;;  %3341 = vmatprep.subr.bf16.mxu0 %v3695_v4  ;;  %v3703_v12 = vld [vmem:[%s5176_s1 + $0x60] sm:$0xff]   ;;  %v3707_v16 = vld [vmem:[%s5176_s1 + $0x58] sm:$0xff]   ;;  %v3711_v20 = vld [vmem:[%s5176_s1 + $0x50] sm:$0xff]  }
   0x6   :  { %3405 = vmatprep.subr.bf16.mxu1 %v3696_v5  ;;  %v3704_v13 = vld [vmem:[%s5176_s1 + $0xe0] sm:$0xff]   ;;  %v3708_v17 = vld [vmem:[%s5176_s1 + $0xd8] sm:$0xff]   ;;  %v3712_v21 = vld [vmem:[%s5176_s1 + $0xd0] sm:$0xff]  }
   0x7   :  { %v3705_v14 = vld [vmem:[%s5176_s1 + $0x20] sm:$0xff]   ;;  %v3709_v18 = vld [vmem:[%s5176_s1 + $0x18] sm:$0xff]   ;;  %v3713_v22 = vld [vmem:[%s5176_s1 + $0x10] sm:$0xff]  }
   0x8   :  { %3342 = vmatpush3.bf16.msra.mxu0 %v3697_v6  ;;  %v3706_v15 = vld [vmem:[%s5176_s1 + $0xa0] sm:$0xff]   ;;  %v3710_v19 = vld [vmem:[%s5176_s1 + $0x98] sm:$0xff]   ;;  %v3714_v23 = vld [vmem:[%s5176_s1 + $0x90] sm:$0xff]  }
   0x9   :  { %3406 = vmatpush3.bf16.msra.mxu1 %v3698_v7  ;;  %3343 = vmatprep.subr.bf16.mxu0 %v3699_v8  ;;  %v3715_v24 = vld [vmem:[%s5176_s1 + $0x48] sm:$0xff]   ;;  %v3719_v28 = vld [vmem:[%s5176_s1 + $0x40] sm:$0xff]   ;;  %v2940_v35 = vld [vmem:[%s5177_s0 + $0x50] sm:$0xf] }
   0xa   :  { %3407 = vmatprep.subr.bf16.mxu1 %v3700_v9  ;;  %v3716_v25 = vld [vmem:[%s5176_s1 + $0xc8] sm:$0xff]   ;;  %v3720_v29 = vld [vmem:[%s5176_s1 + $0xc0] sm:$0xff]   ;;  %73 = vst [vmem:[#allocation2 + $0x28] sm:$0xf] %v2940_v35  ;;  %v2955_v46 = vld [vmem:[%s5177_s0 + $0x90] sm:$0xf] }
   0xb   :  { %v3717_v26 = vld [vmem:[%s5176_s1 + $0x8] sm:$0xff]   ;;  %v3721_v30 = vld [vmem:[%s5176_s1] sm:$0xff]   ;;  %v2956_v49 = vld [vmem:[%s5177_s0 + $0x98] sm:$0xf]  ;;  %396 = vst [vmem:[#allocation2 + $0xc] sm:$0xf] %v2955_v46 }
   0xc   :  { %3344 = vmatpush3.bf16.msra.mxu0 %v3701_v10  ;;  %v3718_v27 = vld [vmem:[%s5176_s1 + $0x88] sm:$0xff]   ;;  %v3722_v31 = vld [vmem:[%s5176_s1 + $0x80] sm:$0xff]   ;;  %vm4039_vm2 = vmor %vm120_vm0, %vm121_vm1  ;;  %397 = vst [vmem:[#allocation2 + $0x30] sm:$0xf] %v2956_v49 }
   0xd   :  { %3408 = vmatpush3.bf16.msra.mxu1 %v3702_v11  ;;  %3345 = vmatprep.subr.bf16.mxu0 %v3703_v12  ;;  %v23_v32 = vld [vmem:[%s5177_s0] sm:$0xf]  ;;  %v24_v33 = vld [vmem:[%s5177_s0 + $0x8] sm:$0xf]  ;;  %v89_v37 = vld [vmem:[%s5177_s0 + $0x4] sm:$0x1] }
   0xe   :  { %3409 = vmatprep.subr.bf16.mxu1 %v3704_v13  ;;  %v2939_v34 = vld [vmem:[%s5177_s0 + $0x48] sm:$0xf]  ;;  %39 = vst [vmem:[#allocation2] sm:$0xf] %v23_v32  ;;  %40 = vst [vmem:[#allocation2 + $0x24] sm:$0xf] %v24_v33 }
   0xf   :  { %72 = vst [vmem:[#allocation2 + $0x4] sm:$0xf] %v2939_v34  ;;  %v88_v36 = vld [vmem:[%s5177_s0] sm:$0xf]  ;;  %v90_v38 = vld [vmem:[%s5177_s0 + $0x8] sm:$0xf] }
  0x10   :  { %3346 = vmatpush3.bf16.msra.mxu0 %v3705_v14  ;;  %v91_v39 = vld [vmem:[%s5177_s0 + $0xc] sm:$0x1]  ;;  %v124_v40 = vshrl.u32 %v88_v36, 16  ;;  %v127_v41 = vshll.u32 %v88_v36, 16  ;;  %v133_v42 = vshll.u32 %v89_v37, 16  ;;  %v138_v43 = vshrl.u32 %v90_v38, 16 }
  0x11   :  { %3410 = vmatpush3.bf16.msra.mxu1 %v3706_v15  ;;  %3347 = vmatprep.subr.bf16.mxu0 %v3707_v16  ;;  %v141_v44 = vshll.u32 %v90_v38, 16  ;;  %v147_v45 = vshll.u32 %v91_v39, 16  ;;  %v3729_v55 = vld [vmem:[%s5176_s1 + $0x178] sm:$0xff]   ;;  %v25_v59 = vld [vmem:[%s5177_s0 + $0x10] sm:$0xf]  ;;  %v3745_v34 = vld [vmem:[%s5176_s1 + $0x168] sm:$0xff]  }
  0x12   :  { %3411 = vmatprep.subr.bf16.mxu1 %v3708_v17  ;;  %v126_v47 = vrot.slane %v124_v40, 4  ;;  %v129_v48 = vrot.slane %v127_v41, 5  ;;  %v140_v51 = vrot.slane %v138_v43, 4  ;;  %v135_v54 = vrot.slane %v133_v42, 5  ;;  %v3730_v58 = vld [vmem:[%s5176_s1 + $0x138] sm:$0xff]   ;;  %v3736_v12 = vld [vmem:[%s5176_s1 + $0x170] sm:$0xff]  }
  0x13   :  { %v143_v52 = vrot.slane %v141_v44, 5  ;;  %v149_v57 = vrot.slane %v147_v45, 5  ;;  %v26_v60 = vld [vmem:[%s5177_s0 + $0x18] sm:$0xf]  ;;  %41 = vst [vmem:[#allocation2 + $0x48] sm:$0xf] %v25_v59 }
  0x14   :  { %3348 = vmatpush3.bf16.msra.mxu0 %v3709_v18  ;;  %v130_v53 = vor.u32 %v129_v48, %v126_v47  ;;  %42 = vst [vmem:[#allocation2 + $0x6c] sm:$0xf] %v26_v60  ;;  %v2941_v62 = vld [vmem:[%s5177_s0 + $0x58] sm:$0xf]  ;;  %v2942_v63 = vld [vmem:[%s5177_s0 + $0x60] sm:$0xf] }
  0x15   :  { %3412 = vmatpush3.bf16.msra.mxu1 %v3710_v19  ;;  %3349 = vmatprep.subr.bf16.mxu0 %v3711_v20  ;;  %v144_v56 = vor.u32 %v143_v52, %v140_v51  ;;  %v3723_v0 = vld [vmem:[#allocation2] ss:$36 sps:$4 sm:$0xff]   ;;  %74 = vst [vmem:[#allocation2 + $0x4c] sm:$0xf] %v2941_v62  ;;  %75 = vst [vmem:[#allocation2 + $0x70] sm:$0xf] %v2942_v63 }
  0x16   :  { %3413 = vmatprep.subr.bf16.mxu1 %v3712_v21  ;;  %v131_v61 = vrot.slane %v130_v53, 4  ;;  %v3725_v1 = vld [vmem:[#allocation2 + $0x4] ss:$36 sps:$4 sm:$0xff]   ;;  %v92_v4 = vld [vmem:[%s5177_s0 + $0x10] sm:$0xf]  ;;  %v3737_v17 = vld [vmem:[%s5176_s1 + $0x1f8] sm:$0xff]  }
  0x17   :  { %v145_v2 = vrot.slane %v144_v56, 4  ;;  %v93_v5 = vld [vmem:[%s5177_s0 + $0x14] sm:$0x1]  ;;  %v94_v6 = vld [vmem:[%s5177_s0 + $0x18] sm:$0xf]  ;;  %2143 = vmatprep.mubr.bf16.mxu0 %v3725_v1  ;;  %v152_v9 = vshrl.u32 %v92_v4, 16 }
  0x18   :  { %3350 = vmatpush3.bf16.msra.mxu0 %v3713_v22  ;;  %v136_v3 = vsel %vm4039_vm2, %v131_v61, %v135_v54  ;;  %v95_v8 = vld [vmem:[%s5177_s0 + $0x1c] sm:$0x1]  ;;  %v155_v10 = vshll.u32 %v92_v4, 16  ;;  %v161_v11 = vshll.u32 %v93_v5, 16  ;;  %v166_v13 = vshrl.u32 %v94_v6, 16  ;;  %v3738_v21 = vld [vmem:[%s5176_s1 + $0x130] sm:$0xff]  }
  0x19   :  { %3414 = vmatpush3.bf16.msra.mxu1 %v3714_v23  ;;  %3351 = vmatprep.subr.bf16.mxu0 %v3715_v24  ;;  %v150_v7 = vsel %vm4039_vm2, %v145_v2, %v149_v57  ;;  %363 = vst [vmem:[#allocation2 + $0x8] sm:$0xf] %v136_v3  ;;  %v169_v14 = vshll.u32 %v94_v6, 16  ;;  %v175_v15 = vshll.u32 %v95_v8, 16  ;;  %v2957_v16 = vld [vmem:[%s5177_s0 + $0xa0] sm:$0xf] }
  0x1a   :  { %3415 = vmatprep.subr.bf16.mxu1 %v3716_v25  ;;  %364 = vst [vmem:[#allocation2 + $0x2c] sm:$0xf] %v150_v7  ;;  %v154_v18 = vrot.slane %v152_v9, 4  ;;  %v157_v19 = vrot.slane %v155_v10, 5  ;;  %v2958_v20 = vld [vmem:[%s5177_s0 + $0xa8] sm:$0xf] }
  0x1b   :  { %398 = vst [vmem:[#allocation2 + $0x54] sm:$0xf] %v2957_v16  ;;  %v163_v22 = vrot.slane %v161_v11, 5  ;;  %v168_v23 = vrot.slane %v166_v13, 4  ;;  %v171_v24 = vrot.slane %v169_v14, 5  ;;  %v3739_v33 = vld [vmem:[%s5176_s1 + $0x1b8] sm:$0xff]  }
  0x1c   :  { %3352 = vmatpush3.bf16.msra.mxu0 %v3717_v26  ;;  %399 = vst [vmem:[#allocation2 + $0x78] sm:$0xf] %v2958_v20  ;;  %v158_v25 = vor.u32 %v157_v19, %v154_v18  ;;  %v1097_v26 = vld [vmem:[#allocation2 + $0x48] sm:$0xff]  ;;  %v27_v40 = vld [vmem:[%s5177_s0 + $0x20] sm:$0xf]  ;;  %v3746_v63 = vld [vmem:[%s5176_s1 + $0x1f0] sm:$0xff]  }
  0x1d   :  { %3416 = vmatpush3.bf16.msra.mxu1 %v3718_v27  ;;  %3353 = vmatprep.subr.bf16.mxu0 %v3719_v28  ;;  %v1102_v27 = vld [vmem:[#allocation2 + $0x6c] sm:$0xff]  ;;  %v28_v41 = vld [vmem:[%s5177_s0 + $0x28] sm:$0xf]  ;;  %43 = vst [vmem:[#allocation2 + $0x90] sm:$0xf] %v27_v40 }
  0x1e   :  { %3417 = vmatprep.subr.bf16.mxu1 %v3720_v29  ;;  %v3731_v28 = vld [vmem:[#allocation2 + $0x4c] ss:$36 sps:$4 sm:$0xff]   ;;  %v172_v29 = vor.u32 %v171_v24, %v168_v23  ;;  %v3092_v32 = vcombine.low %v1097_v26, %v1102_v27  ;;  %v2943_v42 = vld [vmem:[%s5177_s0 + $0x68] sm:$0xf]  ;;  %44 = vst [vmem:[#allocation2 + $0xb4] sm:$0xf] %v28_v41 }
  0x1f   :  { %v3728_v37 = vld [vmem:[#allocation2 + $0xc] ss:$36 sps:$4 sm:$0xff]   ;;  %76 = vst [vmem:[#allocation2 + $0x94] sm:$0xf] %v2943_v42  ;;  %v96_v44 = vld [vmem:[%s5177_s0 + $0x20] sm:$0xf] }
  0x20   :  { %3354 = vmatpush3.bf16.msra.mxu0 %v3721_v30  ;;  %v177_v30 = vrot.slane %v175_v15, 5  ;;  %v173_v35 = vrot.slane %v172_v29, 4  ;;  %2240 = vmatprep.mubr.bf16.mxu1 %v3728_v37  ;;  %v2944_v43 = vld [vmem:[%s5177_s0 + $0x70] sm:$0xf]  ;;  %v97_v45 = vld [vmem:[%s5177_s0 + $0x24] sm:$0x1] }
  0x21   :  { %3418 = vmatpush3.bf16.msra.mxu1 %v3722_v31  ;;  %3467 = vmatprep.subr.bf16.mxu0 %v3729_v55  ;;  %v159_v31 = vrot.slane %v158_v25, 4  ;;  %v3726_v36 = vld [vmem:[#allocation2 + $0x8] ss:$36 sps:$4 sm:$0xff]   ;;  %77 = vst [vmem:[#allocation2 + $0xb8] sm:$0xf] %v2944_v43  ;;  %v180_v48 = vshrl.u32 %v96_v44, 16 }
  0x22   :  { %3531 = vmatprep.subr.bf16.mxu1 %v3737_v17  ;;  %v178_v39 = vsel %vm4039_vm2, %v173_v35, %v177_v30  ;;  %v98_v46 = vld [vmem:[%s5177_s0 + $0x28] sm:$0xf]  ;;  %v99_v47 = vld [vmem:[%s5177_s0 + $0x2c] sm:$0x1]  ;;  %v183_v49 = vshll.u32 %v96_v44, 16  ;;  %v189_v51 = vshll.u32 %v97_v45, 16 }
  0x23   :  { %2144 = vmatmul.mubr.bf16.vlgmr.msra.gmra.mxu0 %v3723_v0  ;;  %v164_v38 = vsel %vm4039_vm2, %v159_v31, %v163_v22  ;;  %366 = vst [vmem:[#allocation2 + $0x74] sm:$0xf] %v178_v39  ;;  %v194_v52 = vshrl.u32 %v98_v46, 16  ;;  %v197_v53 = vshll.u32 %v98_v46, 16  ;;  %v203_v54 = vshll.u32 %v99_v47, 16  ;;  %v3747_v11 = vld [vmem:[%s5176_s1 + $0x128] sm:$0xff]  }
  0x24   :  { %3468 = vmatpush3.bf16.msra.mxu0 %v3730_v58  ;;  %2151 = vmatprep.mubr.bf16.mxu0 %v3731_v28  ;;  %365 = vst [vmem:[#allocation2 + $0x50] sm:$0xf] %v164_v38  ;;  %v2959_v55 = vld [vmem:[%s5177_s0 + $0xb0] sm:$0xf]  ;;  %v182_v56 = vrot.slane %v180_v48, 4  ;;  %v185_v57 = vrot.slane %v183_v49, 5 }
  0x25   :  { %3469 = vmatprep.subr.bf16.mxu0 %v3736_v12  ;;  %2241 = vmatmul.mubr.bf16.vlgmr.msra.gmra.mxu1 %v3726_v36  ;;  %v2960_v58 = vld [vmem:[%s5177_s0 + $0xb8] sm:$0xf]  ;;  %400 = vst [vmem:[#allocation2 + $0x9c] sm:$0xf] %v2959_v55  ;;  %v196_v59 = vrot.slane %v194_v52, 4  ;;  %v199_v60 = vrot.slane %v197_v53, 5 }
  0x26   :  { %3532 = vmatpush3.bf16.msra.mxu1 %v3739_v33  ;;  %401 = vst [vmem:[#allocation2 + $0xc0] sm:$0xf] %v2960_v58  ;;  %v186_v61 = vor.u32 %v185_v57, %v182_v56  ;;  %v191_v62 = vrot.slane %v189_v51, 5  ;;  %v205_v1 = vrot.slane %v203_v54, 5  ;;  %v3733_v2 = vld [vmem:[#allocation2 + $0x54] ss:$36 sps:$4 sm:$0xff]  }
  0x27   :  { %v200_v0 = vor.u32 %v199_v60, %v196_v59  ;;  %3533 = vmatprep.subr.bf16.mxu1 %v3746_v63  ;;  %v1107_v5 = vld [vmem:[#allocation2 + $0x90] sm:$0xff]  ;;  %2248 = vmatprep.mubr.bf16.mxu1 %v3733_v2  ;;  %v30_v15 = vld [vmem:[%s5177_s0 + $0x38] sm:$0xf]  ;;  %v2946_v17 = vld [vmem:[%s5177_s0 + $0x80] sm:$0xf] }
  0x28   :  { %3470 = vmatpush3.bf16.msra.mxu0 %v3738_v21  ;;  %v187_v4 = vrot.slane %v186_v61, 4  ;;  %v1112_v6 = vld [vmem:[#allocation2 + $0xb4] sm:$0xff]  ;;  %v29_v14 = vld [vmem:[%s5177_s0 + $0x30] sm:$0xf]  ;;  %46 = vst [vmem:[#allocation2 + $0xfc] sm:$0xf] %v30_v15 }
  0x29   :  { %3471 = vmatprep.subr.bf16.mxu0 %v3745_v34  ;;  %v3740_v7 = vld [vmem:[#allocation2 + $0x94] ss:$36 sps:$4 sm:$0xff]   ;;  %v201_v8 = vrot.slane %v200_v0, 4  ;;  %v3101_v10 = vcombine.low %v1107_v5, %v1112_v6  ;;  %45 = vst [vmem:[#allocation2 + $0xd8] sm:$0xf] %v29_v14  ;;  %v3754_v34 = vld [vmem:[%s5176_s1 + $0x160] sm:$0xff]  }
  0x2a   :  { %v192_v9 = vsel %vm4039_vm2, %v187_v4, %v191_v62  ;;  %v3748_v13 = vld [vmem:[%s5176_s1 + $0x1b0] sm:$0xff]   ;;  %v2945_v16 = vld [vmem:[%s5177_s0 + $0x78] sm:$0xf]  ;;  %79 = vst [vmem:[#allocation2 + $0x100] sm:$0xf] %v2946_v17  ;;  %v3755_v35 = vld [vmem:[%s5176_s1 + $0x1e8] sm:$0xff]  }
  0x2b   :  { %2152 = vmatmul.mubr.bf16.gmra.mxu0 %v3092_v32  ;;  %v3735_v3 = vld [vmem:[#allocation2 + $0x50] ss:$36 sps:$4 sm:$0xff]   ;;  %v206_v12 = vsel %vm4039_vm2, %v201_v8, %v205_v1  ;;  %367 = vst [vmem:[#allocation2 + $0x98] sm:$0xf] %v192_v9  ;;  %3534 = vmatpush3.bf16.msra.mxu1 %v3748_v13  ;;  %78 = vst [vmem:[#allocation2 + $0xdc] sm:$0xf] %v2945_v16 }
  0x2c   :  { %2159 = vmatprep.mubr.bf16.mxu0 %v3740_v7  ;;  %368 = vst [vmem:[#allocation2 + $0xbc] sm:$0xf] %v206_v12  ;;  %v100_v18 = vld [vmem:[%s5177_s0 + $0x30] sm:$0xf]  ;;  %3472 = vmatpush3.bf16.msra.mxu0 %v3747_v11  ;;  %v101_v19 = vld [vmem:[%s5177_s0 + $0x34] sm:$0x1] }
  0x2d   :  { %2249 = vmatmul.mubr.bf16.gmra.mxu1 %v3735_v3  ;;  %v102_v20 = vld [vmem:[%s5177_s0 + $0x38] sm:$0xf]  ;;  %v103_v21 = vld [vmem:[%s5177_s0 + $0x3c] sm:$0x1]  ;;  %v208_v22 = vshrl.u32 %v100_v18, 16  ;;  %v211_v23 = vshll.u32 %v100_v18, 16  ;;  %3473 = vmatprep.subr.bf16.mxu0 %v3754_v34 }
  0x2e   :  { %v217_v24 = vshll.u32 %v101_v19, 16  ;;  %v222_v25 = vshrl.u32 %v102_v20, 16  ;;  %v2961_v26 = vld [vmem:[%s5177_s0 + $0xc0] sm:$0xf]  ;;  %v225_v27 = vshll.u32 %v102_v20, 16  ;;  %v231_v28 = vshll.u32 %v103_v21, 16  ;;  %3535 = vmatprep.subr.bf16.mxu1 %v3755_v35 }
  0x2f   :  { %v2962_v29 = vld [vmem:[%s5177_s0 + $0xc8] sm:$0xf]  ;;  %402 = vst [vmem:[#allocation2 + $0xe4] sm:$0xf] %v2961_v26  ;;  %v210_v30 = vrot.slane %v208_v22, 4  ;;  %v213_v31 = vrot.slane %v211_v23, 5 }
  0x30   :  { %v224_v32 = vrot.slane %v222_v25, 4  ;;  %403 = vst [vmem:[#allocation2 + $0x108] sm:$0xf] %v2962_v29  ;;  %v227_v33 = vrot.slane %v225_v27, 5  ;;  %v219_v37 = vrot.slane %v217_v24, 5  ;;  %v233_v41 = vrot.slane %v231_v28, 5 }
  0x31   :  { %v214_v36 = vor.u32 %v213_v31, %v210_v30  ;;  %v3742_v38 = vld [vmem:[#allocation2 + $0x9c] ss:$36 sps:$4 sm:$0xff]   ;;  %v3757_v51 = vld [vmem:[%s5176_s1 + $0x1a8] sm:$0xff]   ;;  %v2948_v56 = vld [vmem:[%s5177_s0 + $0x170] sm:$0xf] }
  0x32   :  { %v228_v40 = vor.u32 %v227_v33, %v224_v32  ;;  %v1117_v42 = vld [vmem:[#allocation2 + $0xd8] sm:$0xff]  ;;  %2256 = vmatprep.mubr.bf16.mxu1 %v3742_v38  ;;  %v3756_v48 = vld [vmem:[%s5176_s1 + $0x120] sm:$0xff]   ;;  %v32_v54 = vld [vmem:[%s5177_s0 + $0x128] sm:$0xf]  ;;  %3536 = vmatpush3.bf16.msra.mxu1 %v3757_v51  ;;  %81 = vst [vmem:[#allocation2 + $0x148] sm:$0xf] %v2948_v56 }
  0x33   :  { %2160 = vmatmul.mubr.bf16.gmra.mxu0 %v3101_v10  ;;  %v3744_v39 = vld [vmem:[#allocation2 + $0x98] ss:$36 sps:$4 sm:$0xff]   ;;  %v215_v45 = vrot.slane %v214_v36, 4  ;;  %v31_v52 = vld [vmem:[%s5177_s0 + $0x120] sm:$0xf] }
  0x34   :  { %v1122_v43 = vld [vmem:[#allocation2 + $0xfc] sm:$0xff]  ;;  %v229_v46 = vrot.slane %v228_v40, 4  ;;  %47 = vst [vmem:[#allocation2 + $0x120] sm:$0xf] %v31_v52  ;;  %v2947_v55 = vld [vmem:[%s5177_s0 + $0x168] sm:$0xf]  ;;  %3474 = vmatpush3.bf16.msra.mxu0 %v3756_v48 }
  0x35   :  { %v3749_v44 = vld [vmem:[#allocation2 + $0xdc] ss:$36 sps:$4 sm:$0xff]   ;;  %v3110_v47 = vcombine.low %v1117_v42, %v1122_v43  ;;  %2257 = vmatmul.mubr.bf16.gmra.mxu1 %v3744_v39  ;;  %v220_v49 = vsel %vm4039_vm2, %v215_v45, %v219_v37  ;;  %48 = vst [vmem:[#allocation2 + $0x144] sm:$0xf] %v32_v54  ;;  %80 = vst [vmem:[#allocation2 + $0x124] sm:$0xf] %v2947_v55 }
  0x36   :  { %2167 = vmatprep.mubr.bf16.mxu0 %v3749_v44  ;;  %v234_v53 = vsel %vm4039_vm2, %v229_v46, %v233_v41  ;;  %369 = vst [vmem:[#allocation2 + $0xe0] sm:$0xf] %v220_v49  ;;  %v104_v57 = vld [vmem:[%s5177_s0 + $0x120] sm:$0xf]  ;;  %v105_v58 = vld [vmem:[%s5177_s0 + $0x124] sm:$0x1] }
  0x37   :  { %370 = vst [vmem:[#allocation2 + $0x104] sm:$0xf] %v234_v53  ;;  %v106_v59 = vld [vmem:[%s5177_s0 + $0x128] sm:$0xf]  ;;  %v107_v60 = vld [vmem:[%s5177_s0 + $0x12c] sm:$0x1] }
  0x38   :  { %v236_v61 = vshrl.u32 %v104_v57, 16  ;;  %v239_v62 = vshll.u32 %v104_v57, 16  ;;  %v245_v63 = vshll.u32 %v105_v58, 16  ;;  %v250_v0 = vshrl.u32 %v106_v59, 16  ;;  %v2963_v3 = vld [vmem:[%s5177_s0 + $0x1b0] sm:$0xf] }
  0x39   :  { %v253_v1 = vshll.u32 %v106_v59, 16  ;;  %v259_v2 = vshll.u32 %v107_v60, 16  ;;  %v2964_v4 = vld [vmem:[%s5177_s0 + $0x1b8] sm:$0xf]  ;;  %404 = vst [vmem:[#allocation2 + $0x12c] sm:$0xf] %v2963_v3 }
  0x3a   :  { %v238_v5 = vrot.slane %v236_v61, 4  ;;  %v241_v6 = vrot.slane %v239_v62, 5  ;;  %v252_v7 = vrot.slane %v250_v0, 4  ;;  %405 = vst [vmem:[#allocation2 + $0x150] sm:$0xf] %v2964_v4  ;;  %v247_v8 = vrot.slane %v245_v63, 5 }
  0x3b   :  { %2168 = vmatmul.mubr.bf16.gmra.mxu0 %v3110_v47  ;;  %v255_v9 = vrot.slane %v253_v1, 5  ;;  %v3763_v10 = vld [vmem:[%s5176_s1 + $0x158] sm:$0xff]   ;;  %v3764_v11 = vld [vmem:[%s5176_s1 + $0x1e0] sm:$0xff]   ;;  %v261_v14 = vrot.slane %v259_v2, 5  ;;  %v33_v27 = vld [vmem:[%s5177_s0 + $0x130] sm:$0xf] }
  0x3c   :  { %v242_v12 = vor.u32 %v241_v6, %v238_v5  ;;  %3475 = vmatprep.subr.bf16.mxu0 %v3763_v10  ;;  %3537 = vmatprep.subr.bf16.mxu1 %v3764_v11  ;;  %v3765_v15 = vld [vmem:[%s5176_s1 + $0x118] sm:$0xff]   ;;  %v3751_v16 = vld [vmem:[#allocation2 + $0xe4] ss:$36 sps:$4 sm:$0xff]   ;;  %49 = vst [vmem:[#allocation2 + $0x168] sm:$0xf] %v33_v27  ;;  %v3772_v49 = vld [vmem:[%s5176_s1 + $0x150] sm:$0xff]  }
  0x3d   :  { %v256_v13 = vor.u32 %v255_v9, %v252_v7  ;;  %v1127_v19 = vld [vmem:[#allocation2 + $0x120] sm:$0xff]  ;;  %3476 = vmatpush3.bf16.msra.mxu0 %v3765_v15  ;;  %2264 = vmatprep.mubr.bf16.mxu1 %v3751_v16  ;;  %v34_v28 = vld [vmem:[%s5177_s0 + $0x138] sm:$0xf]  ;;  %v108_v31 = vld [vmem:[%s5177_s0 + $0x130] sm:$0xf] }
  0x3e   :  { %v3753_v17 = vld [vmem:[#allocation2 + $0xe0] ss:$36 sps:$4 sm:$0xff]   ;;  %v243_v18 = vrot.slane %v242_v12, 4  ;;  %v2949_v29 = vld [vmem:[%s5177_s0 + $0x178] sm:$0xf]  ;;  %v264_v35 = vshrl.u32 %v108_v31, 16  ;;  %3477 = vmatprep.subr.bf16.mxu0 %v3772_v49 }
  0x3f   :  { %v1132_v20 = vld [vmem:[#allocation2 + $0x144] sm:$0xff]  ;;  %v257_v22 = vrot.slane %v256_v13, 4  ;;  %2265 = vmatmul.mubr.bf16.gmra.mxu1 %v3753_v17  ;;  %50 = vst [vmem:[#allocation2 + $0x18c] sm:$0xf] %v34_v28  ;;  %v2950_v30 = vld [vmem:[%s5177_s0 + $0x180] sm:$0xf] }
  0x40   :  { %v3758_v21 = vld [vmem:[#allocation2 + $0x124] ss:$36 sps:$4 sm:$0xff]   ;;  %v248_v23 = vsel %vm4039_vm2, %v243_v18, %v247_v8  ;;  %v3119_v24 = vcombine.low %v1127_v19, %v1132_v20  ;;  %82 = vst [vmem:[#allocation2 + $0x16c] sm:$0xf] %v2949_v29  ;;  %v109_v32 = vld [vmem:[%s5177_s0 + $0x134] sm:$0x1] }
  0x41   :  { %v3766_v25 = vld [vmem:[%s5176_s1 + $0x1a0] sm:$0xff]   ;;  %2175 = vmatprep.mubr.bf16.mxu0 %v3758_v21  ;;  %v262_v26 = vsel %vm4039_vm2, %v257_v22, %v261_v14  ;;  %371 = vst [vmem:[#allocation2 + $0x128] sm:$0xf] %v248_v23  ;;  %83 = vst [vmem:[#allocation2 + $0x190] sm:$0xf] %v2950_v30  ;;  %v267_v36 = vshll.u32 %v108_v31, 16 }
  0x42   :  { %372 = vst [vmem:[#allocation2 + $0x14c] sm:$0xf] %v262_v26  ;;  %3538 = vmatpush3.bf16.msra.mxu1 %v3766_v25  ;;  %v110_v33 = vld [vmem:[%s5177_s0 + $0x138] sm:$0xf]  ;;  %v111_v34 = vld [vmem:[%s5177_s0 + $0x13c] sm:$0x1] }
  0x43   :  { %2176 = vmatmul.mubr.bf16.gmra.mxu0 %v3119_v24  ;;  %v273_v37 = vshll.u32 %v109_v32, 16  ;;  %v278_v38 = vshrl.u32 %v110_v33, 16  ;;  %v281_v39 = vshll.u32 %v110_v33, 16  ;;  %v287_v40 = vshll.u32 %v111_v34, 16  ;;  %v2965_v41 = vld [vmem:[%s5177_s0 + $0x1c0] sm:$0xf] }
  0x44   :  { %v266_v42 = vrot.slane %v264_v35, 4  ;;  %v269_v43 = vrot.slane %v267_v36, 5  ;;  %v2966_v44 = vld [vmem:[%s5177_s0 + $0x1c8] sm:$0xf]  ;;  %406 = vst [vmem:[#allocation2 + $0x174] sm:$0xf] %v2965_v41 }
  0x45   :  { %v280_v45 = vrot.slane %v278_v38, 4  ;;  %v283_v46 = vrot.slane %v281_v39, 5  ;;  %407 = vst [vmem:[#allocation2 + $0x198] sm:$0xf] %v2966_v44  ;;  %v275_v48 = vrot.slane %v273_v37, 5  ;;  %v289_v52 = vrot.slane %v287_v40, 5 }
  0x46   :  { %v270_v47 = vor.u32 %v269_v43, %v266_v42  ;;  %v3773_v53 = vld [vmem:[%s5176_s1 + $0x1d8] sm:$0xff]   ;;  %v3760_v54 = vld [vmem:[#allocation2 + $0x12c] ss:$36 sps:$4 sm:$0xff]   ;;  %v35_v2 = vld [vmem:[%s5177_s0 + $0x140] sm:$0xf] }
  0x47   :  { %v284_v51 = vor.u32 %v283_v46, %v280_v45  ;;  %v1137_v57 = vld [vmem:[#allocation2 + $0x168] sm:$0xff]  ;;  %3539 = vmatprep.subr.bf16.mxu1 %v3773_v53  ;;  %2272 = vmatprep.mubr.bf16.mxu1 %v3760_v54  ;;  %v3774_v63 = vld [vmem:[%s5176_s1 + $0x110] sm:$0xff]   ;;  %v3775_v1 = vld [vmem:[%s5176_s1 + $0x198] sm:$0xff]   ;;  %51 = vst [vmem:[#allocation2 + $0x1b0] sm:$0xf] %v35_v2 }
  0x48   :  { %v271_v56 = vrot.slane %v270_v47, 4  ;;  %v1142_v58 = vld [vmem:[#allocation2 + $0x18c] sm:$0xff]  ;;  %v36_v3 = vld [vmem:[%s5177_s0 + $0x148] sm:$0xf]  ;;  %3478 = vmatpush3.bf16.msra.mxu0 %v3774_v63  ;;  %3540 = vmatpush3.bf16.msra.mxu1 %v3775_v1  ;;  %v112_v6 = vld [vmem:[%s5177_s0 + $0x140] sm:$0xf] }
  0x49   :  { %v3762_v55 = vld [vmem:[#allocation2 + $0x128] ss:$36 sps:$4 sm:$0xff]   ;;  %v285_v60 = vrot.slane %v284_v51, 4  ;;  %v3128_v62 = vcombine.low %v1137_v57, %v1142_v58  ;;  %v2952_v5 = vld [vmem:[%s5177_s0 + $0x190] sm:$0xf]  ;;  %v292_v10 = vshrl.u32 %v112_v6, 16 }
  0x4a   :  { %v3767_v59 = vld [vmem:[#allocation2 + $0x16c] ss:$36 sps:$4 sm:$0xff]   ;;  %v276_v61 = vsel %vm4039_vm2, %v271_v56, %v275_v48  ;;  %2273 = vmatmul.mubr.bf16.gmra.mxu1 %v3762_v55  ;;  %v2951_v4 = vld [vmem:[%s5177_s0 + $0x188] sm:$0xf]  ;;  %52 = vst [vmem:[#allocation2 + $0x1d4] sm:$0xf] %v36_v3 }
  0x4b   :  { %2183 = vmatprep.mubr.bf16.mxu0 %v3767_v59  ;;  %v290_v0 = vsel %vm4039_vm2, %v285_v60, %v289_v52  ;;  %373 = vst [vmem:[#allocation2 + $0x170] sm:$0xf] %v276_v61  ;;  %84 = vst [vmem:[#allocation2 + $0x1b4] sm:$0xf] %v2951_v4  ;;  %v113_v7 = vld [vmem:[%s5177_s0 + $0x144] sm:$0x1] }
  0x4c   :  { %374 = vst [vmem:[#allocation2 + $0x194] sm:$0xf] %v290_v0  ;;  %2184 = vmatmul.mubr.bf16.gmra.mxu0 %v3128_v62  ;;  %85 = vst [vmem:[#allocation2 + $0x1d8] sm:$0xf] %v2952_v5  ;;  %v114_v8 = vld [vmem:[%s5177_s0 + $0x148] sm:$0xf] }
  0x4d   :  { %v115_v9 = vld [vmem:[%s5177_s0 + $0x14c] sm:$0x1]  ;;  %v295_v11 = vshll.u32 %v112_v6, 16  ;;  %v301_v12 = vshll.u32 %v113_v7, 16  ;;  %v306_v13 = vshrl.u32 %v114_v8, 16  ;;  %v309_v14 = vshll.u32 %v114_v8, 16 }
  0x4e   :  { %v315_v15 = vshll.u32 %v115_v9, 16  ;;  %v2967_v16 = vld [vmem:[%s5177_s0 + $0x1d0] sm:$0xf]  ;;  %v2968_v17 = vld [vmem:[%s5177_s0 + $0x1d8] sm:$0xf]  ;;  %v294_v18 = vrot.slane %v292_v10, 4 }
  0x4f   :  { %v297_v19 = vrot.slane %v295_v11, 5  ;;  %v308_v20 = vrot.slane %v306_v13, 4  ;;  %408 = vst [vmem:[#allocation2 + $0x1bc] sm:$0xf] %v2967_v16  ;;  %409 = vst [vmem:[#allocation2 + $0x1e0] sm:$0xf] %v2968_v17 }
  0x50   :  { %v311_v21 = vrot.slane %v309_v14, 5  ;;  %v3781_v22 = vld [vmem:[%s5176_s1 + $0x148] sm:$0xff]   ;;  %v3782_v23 = vld [vmem:[%s5176_s1 + $0x1d0] sm:$0xff]   ;;  %v303_v25 = vrot.slane %v301_v12, 5  ;;  %v317_v29 = vrot.slane %v315_v15, 5  ;;  %v3790_v63 = vld [vmem:[%s5176_s1 + $0x140] sm:$0xff]  }
  0x51   :  { %v298_v24 = vor.u32 %v297_v19, %v294_v18  ;;  %v3769_v26 = vld [vmem:[#allocation2 + $0x174] ss:$36 sps:$4 sm:$0xff]   ;;  %3479 = vmatprep.subr.bf16.mxu0 %v3781_v22  ;;  %3541 = vmatprep.subr.bf16.mxu1 %v3782_v23  ;;  %v3783_v36 = vld [vmem:[%s5176_s1 + $0x108] sm:$0xff]   ;;  %v37_v40 = vld [vmem:[%s5177_s0 + $0x150] sm:$0xf] }
  0x52   :  { %v312_v28 = vor.u32 %v311_v21, %v308_v20  ;;  %v1147_v30 = vld [vmem:[#allocation2 + $0x1b0] sm:$0xff]  ;;  %2280 = vmatprep.mubr.bf16.mxu1 %v3769_v26  ;;  %v38_v41 = vld [vmem:[%s5177_s0 + $0x158] sm:$0xf]  ;;  %3480 = vmatpush3.bf16.msra.mxu0 %v3783_v36  ;;  %53 = vst [vmem:[#allocation2 + $0x1f8] sm:$0xf] %v37_v40  ;;  %v3791_v2 = vld [vmem:[%s5176_s1 + $0x1c8] sm:$0xff]  }
  0x53   :  { %v3771_v27 = vld [vmem:[#allocation2 + $0x170] ss:$36 sps:$4 sm:$0xff]   ;;  %v299_v33 = vrot.slane %v298_v24, 4  ;;  %v2953_v42 = vld [vmem:[%s5177_s0 + $0x198] sm:$0xf]  ;;  %3481 = vmatprep.subr.bf16.mxu0 %v3790_v63  ;;  %v3792_v12 = vld [vmem:[%s5176_s1 + $0x100] sm:$0xff]  }
  0x54   :  { %v1152_v31 = vld [vmem:[#allocation2 + $0x1d4] sm:$0xff]  ;;  %v313_v34 = vrot.slane %v312_v28, 4  ;;  %2281 = vmatmul.mubr.bf16.gmra.mxu1 %v3771_v27  ;;  %54 = vst [vmem:[#allocation2 + $0x21c] sm:$0xf] %v38_v41  ;;  %v2954_v43 = vld [vmem:[%s5177_s0 + $0x1a0] sm:$0xf] }
  0x55   :  { %v3776_v32 = vld [vmem:[#allocation2 + $0x1b4] ss:$36 sps:$4 sm:$0xff]   ;;  %v3137_v35 = vcombine.low %v1147_v30, %v1152_v31  ;;  %v304_v37 = vsel %vm4039_vm2, %v299_v33, %v303_v25  ;;  %86 = vst [vmem:[#allocation2 + $0x1fc] sm:$0xf] %v2953_v42  ;;  %v116_v44 = vld [vmem:[%s5177_s0 + $0x150] sm:$0xf] }
  0x56   :  { %2191 = vmatprep.mubr.bf16.mxu0 %v3776_v32  ;;  %v3784_v38 = vld [vmem:[%s5176_s1 + $0x190] sm:$0xff]   ;;  %v318_v39 = vsel %vm4039_vm2, %v313_v34, %v317_v29  ;;  %375 = vst [vmem:[#allocation2 + $0x1b8] sm:$0xf] %v304_v37  ;;  %87 = vst [vmem:[#allocation2 + $0x220] sm:$0xf] %v2954_v43  ;;  %v320_v48 = vshrl.u32 %v116_v44, 16  ;;  %3482 = vmatpush3.bf16.msra.mxu0 %v3792_v12 }
  0x57   :  { %2192 = vmatmul.mubr.bf16.gmra.mxu0 %v3137_v35  ;;  %376 = vst [vmem:[#allocation2 + $0x1dc] sm:$0xf] %v318_v39  ;;  %3542 = vmatpush3.bf16.msra.mxu1 %v3784_v38  ;;  %v117_v45 = vld [vmem:[%s5177_s0 + $0x154] sm:$0x1]  ;;  %v118_v46 = vld [vmem:[%s5177_s0 + $0x158] sm:$0xf] }
  0x58   :  { %v119_v47 = vld [vmem:[%s5177_s0 + $0x15c] sm:$0x1]  ;;  %v323_v49 = vshll.u32 %v116_v44, 16  ;;  %v329_v51 = vshll.u32 %v117_v45, 16  ;;  %v334_v52 = vshrl.u32 %v118_v46, 16  ;;  %v337_v53 = vshll.u32 %v118_v46, 16  ;;  %3543 = vmatprep.subr.bf16.mxu1 %v3791_v2 }
  0x59   :  { %v343_v54 = vshll.u32 %v119_v47, 16  ;;  %v2969_v55 = vld [vmem:[%s5177_s0 + $0x1e0] sm:$0xf]  ;;  %v322_v56 = vrot.slane %v320_v48, 4  ;;  %v2970_v58 = vld [vmem:[%s5177_s0 + $0x1e8] sm:$0xf] }
  0x5a   :  { %v325_v57 = vrot.slane %v323_v49, 5  ;;  %410 = vst [vmem:[#allocation2 + $0x204] sm:$0xf] %v2969_v55  ;;  %v336_v59 = vrot.slane %v334_v52, 4  ;;  %v339_v60 = vrot.slane %v337_v53, 5  ;;  %v331_v62 = vrot.slane %v329_v51, 5 }
  0x5b   :  { %411 = vst [vmem:[#allocation2 + $0x228] sm:$0xf] %v2970_v58  ;;  %v345_v1 = vrot.slane %v343_v54, 5  ;;  %v3778_v3 = vld [vmem:[#allocation2 + $0x1bc] ss:$36 sps:$4 sm:$0xff]   ;;  %v3793_v14 = vld [vmem:[%s5176_s1 + $0x188] sm:$0xff]  }
  0x5c   :  { %v326_v61 = vor.u32 %v325_v57, %v322_v56  ;;  %v340_v0 = vor.u32 %v339_v60, %v336_v59  ;;  %v1157_v6 = vld [vmem:[#allocation2 + $0x1f8] sm:$0xff]  ;;  %2288 = vmatprep.mubr.bf16.mxu1 %v3778_v3  ;;  %v3794_v15 = vld [vmem:[%s5176_s1 + $0x1c0] sm:$0xff]   ;;  %3544 = vmatpush3.bf16.msra.mxu1 %v3793_v14  ;;  %v2987_v18 = vld [vmem:[%s5177_s0 + $0x90] sm:$0xf] }
  0x5d   :  { %v1162_v7 = vld [vmem:[#allocation2 + $0x21c] sm:$0xff]  ;;  %v4381_v16 = vld [vmem:[%s5177_s0 + $0xd8] sm:$0xf]  ;;  %v2988_v19 = vld [vmem:[%s5177_s0 + $0x94] sm:$0x1]  ;;  %3545 = vmatprep.subr.bf16.mxu1 %v3794_v15  ;;  %v478_v22 = vshrl.u32 %v2987_v18, 16 }
  0x5e   :  { %v3780_v4 = vld [vmem:[#allocation2 + $0x1b8] ss:$36 sps:$4 sm:$0xff]   ;;  %v327_v5 = vrot.slane %v326_v61, 4  ;;  %v341_v9 = vrot.slane %v340_v0, 4  ;;  %v3146_v11 = vcombine.low %v1157_v6, %v1162_v7  ;;  %v4386_v17 = vld [vmem:[%s5177_s0 + $0xe0] sm:$0xf] }
  0x5f   :  { %v3785_v8 = vld [vmem:[#allocation2 + $0x1fc] ss:$36 sps:$4 sm:$0xff]   ;;  %2289 = vmatmul.mubr.bf16.gmra.mxu1 %v3780_v4  ;;  %429 = vst [vmem:[#allocation2 + $0x10] sm:$0xf] %v4381_v16  ;;  %430 = vst [vmem:[#allocation2 + $0x34] sm:$0xf] %v4386_v17  ;;  %v3229_v24 = vcombine.low %v4381_v16, %v4386_v17 }
  0x60   :  { %v332_v10 = vsel %vm4039_vm2, %v327_v5, %v331_v62  ;;  %2199 = vmatprep.mubr.bf16.mxu0 %v3785_v8  ;;  %v346_v13 = vsel %vm4039_vm2, %v341_v9, %v345_v1  ;;  %v2989_v20 = vld [vmem:[%s5177_s0 + $0x98] sm:$0xf]  ;;  %v2990_v21 = vld [vmem:[%s5177_s0 + $0x9c] sm:$0x1]  ;;  %v481_v23 = vshll.u32 %v2987_v18, 16  ;;  %v487_v25 = vshll.u32 %v2988_v19, 16 }
  0x61   :  { %377 = vst [vmem:[#allocation2 + $0x200] sm:$0xf] %v332_v10  ;;  %378 = vst [vmem:[#allocation2 + $0x224] sm:$0xf] %v346_v13  ;;  %2200 = vmatmul.mubr.bf16.gmra.mxu0 %v3146_v11  ;;  %v492_v26 = vshrl.u32 %v2989_v20, 16  ;;  %v495_v27 = vshll.u32 %v2989_v20, 16 }
  0x62   :  { %v501_v28 = vshll.u32 %v2990_v21, 16  ;;  %v480_v29 = vrot.slane %v478_v22, 4  ;;  %v483_v30 = vrot.slane %v481_v23, 5  ;;  %v3798_v31 = vld [vmem:[%s5176_s1 + $0x180] sm:$0xff]   ;;  %v4410_v32 = vld [vmem:[%s5176_s1 + $0x238] sm:$0xff]   ;;  %v489_v36 = vrot.slane %v487_v25, 5 }
  0x63   :  { %v494_v33 = vrot.slane %v492_v26, 4  ;;  %v497_v34 = vrot.slane %v495_v27, 5  ;;  %3546 = vmatpush3.bf16.msra.mxu1 %v3798_v31  ;;  %3627 = vmatprep.subr.bf16.mxu0 %v4410_v32  ;;  %v3019_v37 = vld [vmem:[%s5177_s0 + $0x8] sm:$0xf]  ;;  %v3020_v43 = vld [vmem:[%s5177_s0 + $0x10] sm:$0xf] }
  0x64   :  { %v484_v35 = vor.u32 %v483_v30, %v480_v29  ;;  %v3787_v38 = vld [vmem:[#allocation2 + $0x204] ss:$36 sps:$4 sm:$0xff]   ;;  %v503_v41 = vrot.slane %v501_v28, 5  ;;  %750 = vst [vmem:[#allocation2 + $0x18] sm:$0xf] %v3019_v37  ;;  %v3807_v48 = vld [vmem:[%s5178_s2 + $0x38] sm:$0xff]  }
  0x65   :  { %v498_v40 = vor.u32 %v497_v34, %v494_v33  ;;  %v3035_v44 = vld [vmem:[%s5177_s0 + $0x50] sm:$0xf]  ;;  %2296 = vmatprep.mubr.bf16.mxu1 %v3787_v38  ;;  %751 = vst [vmem:[#allocation2 + $0x3c] sm:$0xf] %v3020_v43  ;;  %v3036_v46 = vld [vmem:[%s5177_s0 + $0x58] sm:$0xf]  ;;  %3659 = vmatprep.subr.bf16.mxu1 %v3807_v48 }
  0x66   :  { %v485_v42 = vrot.slane %v484_v35, 4  ;;  %783 = vst [vmem:[#allocation2 + $0x1c] sm:$0xf] %v3035_v44  ;;  %v4428_v47 = vld [vmem:[%s5177_s0 + $0xe8] sm:$0xf]  ;;  %v3806_v19 = vld [vmem:[%s5176_s1 + $0x230] sm:$0xff]  }
  0x67   :  { %v499_v45 = vrot.slane %v498_v40, 4  ;;  %784 = vst [vmem:[#allocation2 + $0x40] sm:$0xf] %v3036_v46  ;;  %v4438_v51 = vld [vmem:[%s5177_s0 + $0xf0] sm:$0xf] }
  0x68   :  { %v3789_v39 = vld [vmem:[#allocation2 + $0x200] ss:$36 sps:$4 sm:$0xff]   ;;  %v490_v49 = vsel %vm4039_vm2, %v485_v42, %v489_v36  ;;  %431 = vst [vmem:[#allocation2 + $0x58] sm:$0xf] %v4428_v47  ;;  %432 = vst [vmem:[#allocation2 + $0x7c] sm:$0xf] %v4438_v51  ;;  %v3230_v59 = vcombine.low %v4428_v47, %v4438_v51 }
  0x69   :  { %2297 = vmatmul.mubr.bf16.gmra.mxu1 %v3789_v39  ;;  %v2991_v52 = vld [vmem:[%s5177_s0 + $0xa0] sm:$0xf]  ;;  %v2992_v53 = vld [vmem:[%s5177_s0 + $0xa4] sm:$0x1]  ;;  %v504_v54 = vsel %vm4039_vm2, %v499_v45, %v503_v41  ;;  %717 = vst [vmem:[#allocation2 + $0x14] sm:$0xf] %v490_v49 }
  0x6a   :  { %v2993_v55 = vld [vmem:[%s5177_s0 + $0xa8] sm:$0xf]  ;;  %v2994_v56 = vld [vmem:[%s5177_s0 + $0xac] sm:$0x1]  ;;  %v506_v57 = vshrl.u32 %v2991_v52, 16  ;;  %v509_v58 = vshll.u32 %v2991_v52, 16 }
  0x6b   :  { %718 = vst [vmem:[#allocation2 + $0x38] sm:$0xf] %v504_v54  ;;  %v515_v60 = vshll.u32 %v2992_v53, 16  ;;  %v520_v61 = vshrl.u32 %v2993_v55, 16  ;;  %v523_v62 = vshll.u32 %v2993_v55, 16  ;;  %v529_v63 = vshll.u32 %v2994_v56, 16 }
  0x6c   :  { %v508_v0 = vrot.slane %v506_v57, 4  ;;  %v511_v1 = vrot.slane %v509_v58, 5  ;;  %v3021_v6 = vld [vmem:[%s5177_s0 + $0x18] sm:$0xf]  ;;  %v3022_v7 = vld [vmem:[%s5177_s0 + $0x20] sm:$0xf] }
  0x6d   :  { %v517_v2 = vrot.slane %v515_v60, 5  ;;  %v522_v3 = vrot.slane %v520_v61, 4  ;;  %v525_v4 = vrot.slane %v523_v62, 5  ;;  %v3037_v8 = vld [vmem:[%s5177_s0 + $0x60] sm:$0xf]  ;;  %v531_v10 = vrot.slane %v529_v63, 5 }
  0x6e   :  { %v512_v5 = vor.u32 %v511_v1, %v508_v0  ;;  %752 = vst [vmem:[#allocation2 + $0x60] sm:$0xf] %v3021_v6  ;;  %753 = vst [vmem:[#allocation2 + $0x84] sm:$0xf] %v3022_v7  ;;  %v3038_v11 = vld [vmem:[%s5177_s0 + $0x68] sm:$0xf] }
  0x6f   :  { %v526_v9 = vor.u32 %v525_v4, %v522_v3  ;;  %785 = vst [vmem:[#allocation2 + $0x64] sm:$0xf] %v3037_v8  ;;  %v4473_v12 = vld [vmem:[%s5177_s0 + $0xf8] sm:$0xf]  ;;  %v3802_v14 = vld [vmem:[#allocation2 + $0x1c] ss:$36 sps:$4 sm:$0xff]  }
  0x70   :  { %v3800_v13 = vld [vmem:[#allocation2 + $0x18] ss:$36 sps:$4 sm:$0xff]   ;;  %v513_v15 = vrot.slane %v512_v5, 4  ;;  %786 = vst [vmem:[#allocation2 + $0x88] sm:$0xf] %v3038_v11  ;;  %2434 = vmatprep.mubr.bf16.mxu1 %v3802_v14  ;;  %v3815_v39 = vld [vmem:[%s5178_s2 + $0x30] sm:$0xff]  }
  0x71   :  { %433 = vst [vmem:[#allocation2 + $0xa0] sm:$0xf] %v4473_v12  ;;  %v527_v18 = vrot.slane %v526_v9, 4  ;;  %v4482_v20 = vld [vmem:[%s5177_s0 + $0x100] sm:$0xf]  ;;  %2435 = vmatmul.mubr.bf16.vlgmr.msra.gmra.mxu1 %v3800_v13  ;;  %v3814_v42 = vld [vmem:[%s5176_s1 + $0x228] sm:$0xff]  }
  0x72   :  { %v2995_v21 = vld [vmem:[%s5177_s0 + $0xb0] sm:$0xf]  ;;  %v3797_v23 = vld [vmem:[#allocation2 + $0x14] ss:$36 sps:$4 sm:$0xff]   ;;  %v518_v25 = vsel %vm4039_vm2, %v513_v15, %v517_v2  ;;  %434 = vst [vmem:[#allocation2 + $0xc4] sm:$0xf] %v4482_v20  ;;  %v3231_v27 = vcombine.low %v4473_v12, %v4482_v20  ;;  %3660 = vmatpush3.bf16.msra.mxu1 %v3807_v48 }
  0x73   :  { %v3795_v22 = vld [vmem:[#allocation2 + $0x10] ss:$36 sps:$4 sm:$0xff]   ;;  %v534_v26 = vshrl.u32 %v2995_v21, 16  ;;  %v532_v28 = vsel %vm4039_vm2, %v527_v18, %v531_v10  ;;  %719 = vst [vmem:[#allocation2 + $0x5c] sm:$0xf] %v518_v25  ;;  %2337 = vmatprep.mubr.bf16.mxu0 %v3797_v23  ;;  %v537_v34 = vshll.u32 %v2995_v21, 16  ;;  %3661 = vmatprep.subr.bf16.mxu1 %v3815_v39 }
  0x74   :  { %v2996_v29 = vld [vmem:[%s5177_s0 + $0xb4] sm:$0x1]  ;;  %v2997_v30 = vld [vmem:[%s5177_s0 + $0xb8] sm:$0xf]  ;;  %v2998_v31 = vld [vmem:[%s5177_s0 + $0xbc] sm:$0x1]  ;;  %2338 = vmatmul.mubr.bf16.vlgmr.msra.gmra.mxu0 %v3795_v22 }
  0x75   :  { %720 = vst [vmem:[#allocation2 + $0x80] sm:$0xf] %v532_v28  ;;  %v536_v33 = vrot.slane %v534_v26, 4  ;;  %v543_v35 = vshll.u32 %v2996_v29, 16  ;;  %v548_v36 = vshrl.u32 %v2997_v30, 16  ;;  %v551_v37 = vshll.u32 %v2997_v30, 16  ;;  %3628 = vmatpush3.bf16.msra.mxu0 %v4410_v32 }
  0x76   :  { %v557_v38 = vshll.u32 %v2998_v31, 16  ;;  %v539_v40 = vrot.slane %v537_v34, 5  ;;  %3629 = vmatprep.subr.bf16.mxu0 %v3806_v19  ;;  %v3810_v44 = vld [vmem:[#allocation2 + $0x60] ss:$36 sps:$4 sm:$0xff]   ;;  %v3023_v52 = vld [vmem:[%s5177_s0 + $0x28] sm:$0xf]  ;;  %3662 = vmatpush3.bf16.msra.mxu1 %v3815_v39 }
  0x77   :  { %v550_v41 = vrot.slane %v548_v36, 4  ;;  %v3808_v43 = vld [vmem:[#allocation2 + $0x64] ss:$36 sps:$4 sm:$0xff]   ;;  %v553_v45 = vrot.slane %v551_v37, 5  ;;  %v545_v48 = vrot.slane %v543_v35, 5  ;;  %v3830_v23 = vld [vmem:[%s5176_s1 + $0x218] sm:$0xff]  }
  0x78   :  { %v540_v46 = vor.u32 %v539_v40, %v536_v33  ;;  %v559_v49 = vrot.slane %v557_v38, 5  ;;  %2442 = vmatprep.mubr.bf16.mxu1 %v3808_v43  ;;  %v3024_v53 = vld [vmem:[%s5177_s0 + $0x30] sm:$0xf]  ;;  %754 = vst [vmem:[#allocation2 + $0xa8] sm:$0xf] %v3023_v52  ;;  %v3822_v60 = vld [vmem:[%s5176_s1 + $0x220] sm:$0xff]  }
  0x79   :  { %v554_v32 = vor.u32 %v553_v45, %v550_v41  ;;  %v3039_v54 = vld [vmem:[%s5177_s0 + $0x70] sm:$0xf]  ;;  %v3040_v55 = vld [vmem:[%s5177_s0 + $0x78] sm:$0xf]  ;;  %3630 = vmatpush3.bf16.msra.mxu0 %v3806_v19  ;;  %755 = vst [vmem:[#allocation2 + $0xcc] sm:$0xf] %v3024_v53  ;;  %2443 = vmatmul.mubr.bf16.gmra.mxu1 %v3810_v44 }
  0x7a   :  { %v541_v56 = vrot.slane %v540_v46, 4  ;;  %787 = vst [vmem:[#allocation2 + $0xac] sm:$0xf] %v3039_v54  ;;  %788 = vst [vmem:[#allocation2 + $0xd0] sm:$0xf] %v3040_v55  ;;  %3631 = vmatprep.subr.bf16.mxu0 %v3814_v42  ;;  %v3823_v10 = vld [vmem:[%s5178_s2 + $0x28] sm:$0xff]  }
  0x7b   :  { %v4525_v57 = vld [vmem:[%s5177_s0 + $0x108] sm:$0xf]  ;;  %v4530_v58 = vld [vmem:[%s5177_s0 + $0x110] sm:$0xf]  ;;  %v3805_v62 = vld [vmem:[#allocation2 + $0x58] ss:$36 sps:$4 sm:$0xff]   ;;  %3663 = vmatprep.subr.bf16.mxu1 %v3823_v10 }
  0x7c   :  { %v3803_v61 = vld [vmem:[#allocation2 + $0x5c] ss:$36 sps:$4 sm:$0xff]   ;;  %v555_v63 = vrot.slane %v554_v32, 4  ;;  %435 = vst [vmem:[#allocation2 + $0xe8] sm:$0xf] %v4525_v57  ;;  %v3232_v0 = vcombine.low %v4525_v57, %v4530_v58  ;;  %v546_v1 = vsel %vm4039_vm2, %v541_v56, %v545_v48  ;;  %3664 = vmatpush3.bf16.msra.mxu1 %v3823_v10  ;;  %v3838_v34 = vld [vmem:[%s5176_s1 + $0x210] sm:$0xff]  }
  0x7d   :  { %436 = vst [vmem:[#allocation2 + $0x10c] sm:$0xf] %v4530_v58  ;;  %v2999_v2 = vld [vmem:[%s5177_s0 + $0xc0] sm:$0xf]  ;;  %v3000_v3 = vld [vmem:[%s5177_s0 + $0xc4] sm:$0x1]  ;;  %2345 = vmatprep.mubr.bf16.mxu0 %v3803_v61  ;;  %3632 = vmatpush3.bf16.msra.mxu0 %v3814_v42 }
  0x7e   :  { %v3001_v4 = vld [vmem:[%s5177_s0 + $0xc8] sm:$0xf]  ;;  %v560_v5 = vsel %vm4039_vm2, %v555_v63, %v559_v49  ;;  %721 = vst [vmem:[#allocation2 + $0xa4] sm:$0xf] %v546_v1  ;;  %v3002_v6 = vld [vmem:[%s5177_s0 + $0xcc] sm:$0x1]  ;;  %2346 = vmatmul.mubr.bf16.gmra.mxu0 %v3805_v62  ;;  %3633 = vmatprep.subr.bf16.mxu0 %v3822_v60 }
  0x7f   :  { %v562_v7 = vshrl.u32 %v2999_v2, 16  ;;  %v565_v8 = vshll.u32 %v2999_v2, 16  ;;  %v571_v9 = vshll.u32 %v3000_v3, 16  ;;  %722 = vst [vmem:[#allocation2 + $0xc8] sm:$0xf] %v560_v5  ;;  %v576_v11 = vshrl.u32 %v3001_v4, 16 }
  0x80   :  { %v579_v13 = vshll.u32 %v3001_v4, 16  ;;  %v585_v14 = vshll.u32 %v3002_v6, 16  ;;  %v3831_v19 = vld [vmem:[%s5178_s2 + $0x20] sm:$0xff]   ;;  %v3818_v30 = vld [vmem:[#allocation2 + $0xa8] ss:$36 sps:$4 sm:$0xff]   ;;  %v3839_v38 = vld [vmem:[%s5178_s2 + $0x18] sm:$0xff]  }
  0x81   :  { %v564_v15 = vrot.slane %v562_v7, 4  ;;  %v567_v18 = vrot.slane %v565_v8, 5  ;;  %v578_v21 = vrot.slane %v576_v11, 4  ;;  %v3816_v25 = vld [vmem:[#allocation2 + $0xac] ss:$36 sps:$4 sm:$0xff]   ;;  %v573_v28 = vrot.slane %v571_v9, 5  ;;  %3665 = vmatprep.subr.bf16.mxu1 %v3831_v19  ;;  %3634 = vmatpush3.bf16.msra.mxu0 %v3822_v60 }
  0x82   :  { %v581_v22 = vrot.slane %v579_v13, 5  ;;  %v587_v29 = vrot.slane %v585_v14, 5  ;;  %v3025_v33 = vld [vmem:[%s5177_s0 + $0x38] sm:$0xf]  ;;  %2450 = vmatprep.mubr.bf16.mxu1 %v3816_v25  ;;  %v3026_v36 = vld [vmem:[%s5177_s0 + $0x40] sm:$0xf]  ;;  %3635 = vmatprep.subr.bf16.mxu0 %v3830_v23 }
  0x83   :  { %v568_v26 = vor.u32 %v567_v18, %v564_v15  ;;  %756 = vst [vmem:[#allocation2 + $0xf0] sm:$0xf] %v3025_v33  ;;  %v3041_v37 = vld [vmem:[%s5177_s0 + $0x80] sm:$0xf]  ;;  %2451 = vmatmul.mubr.bf16.gmra.mxu1 %v3818_v30  ;;  %757 = vst [vmem:[#allocation2 + $0x114] sm:$0xf] %v3026_v36 }
  0x84   :  { %v582_v31 = vor.u32 %v581_v22, %v578_v21  ;;  %v3042_v40 = vld [vmem:[%s5177_s0 + $0x88] sm:$0xf]  ;;  %789 = vst [vmem:[#allocation2 + $0xf4] sm:$0xf] %v3041_v37  ;;  %v4585_v41 = vld [vmem:[%s5177_s0 + $0x1f8] sm:$0xf]  ;;  %3666 = vmatpush3.bf16.msra.mxu1 %v3831_v19 }
  0x85   :  { %v569_v35 = vrot.slane %v568_v26, 4  ;;  %v3813_v43 = vld [vmem:[#allocation2 + $0xa0] ss:$36 sps:$4 sm:$0xff]   ;;  %790 = vst [vmem:[#allocation2 + $0x118] sm:$0xf] %v3042_v40  ;;  %3667 = vmatprep.subr.bf16.mxu1 %v3839_v38  ;;  %3636 = vmatpush3.bf16.msra.mxu0 %v3830_v23 }
  0x86   :  { %v583_v39 = vrot.slane %v582_v31, 4  ;;  %v3811_v42 = vld [vmem:[#allocation2 + $0xa4] ss:$36 sps:$4 sm:$0xff]   ;;  %437 = vst [vmem:[#allocation2 + $0x130] sm:$0xf] %v4585_v41  ;;  %3637 = vmatprep.subr.bf16.mxu0 %v3838_v34 }
  0x87   :  { %v574_v44 = vsel %vm4039_vm2, %v569_v35, %v573_v28  ;;  %v4595_v46 = vld [vmem:[%s5177_s0 + $0x200] sm:$0xf]  ;;  %v3003_v48 = vld [vmem:[%s5177_s0 + $0x1b0] sm:$0xf]  ;;  %v3004_v49 = vld [vmem:[%s5177_s0 + $0x1b4] sm:$0x1]  ;;  %2353 = vmatprep.mubr.bf16.mxu0 %v3811_v42 }
  0x88   :  { %v588_v45 = vsel %vm4039_vm2, %v583_v39, %v587_v29  ;;  %723 = vst [vmem:[#allocation2 + $0xec] sm:$0xf] %v574_v44  ;;  %438 = vst [vmem:[#allocation2 + $0x154] sm:$0xf] %v4595_v46  ;;  %v3005_v52 = vld [vmem:[%s5177_s0 + $0x1b8] sm:$0xf]  ;;  %2354 = vmatmul.mubr.bf16.gmra.mxu0 %v3813_v43  ;;  %3668 = vmatpush3.bf16.msra.mxu1 %v3839_v38 }
  0x89   :  { %724 = vst [vmem:[#allocation2 + $0x110] sm:$0xf] %v588_v45  ;;  %v3006_v32 = vld [vmem:[%s5177_s0 + $0x1bc] sm:$0x1]  ;;  %v590_v53 = vshrl.u32 %v3003_v48, 16  ;;  %v593_v54 = vshll.u32 %v3003_v48, 16  ;;  %3638 = vmatpush3.bf16.msra.mxu0 %v3838_v34 }
  0x8a   :  { %v599_v55 = vshll.u32 %v3004_v49, 16  ;;  %v604_v56 = vshrl.u32 %v3005_v52, 16  ;;  %v607_v60 = vshll.u32 %v3005_v52, 16  ;;  %v613_v61 = vshll.u32 %v3006_v32, 16  ;;  %v3027_v5 = vld [vmem:[%s5177_s0 + $0x128] sm:$0xf] }
  0x8b   :  { %v592_v62 = vrot.slane %v590_v53, 4  ;;  %v595_v63 = vrot.slane %v593_v54, 5  ;;  %v3028_v6 = vld [vmem:[%s5177_s0 + $0x130] sm:$0xf]  ;;  %758 = vst [vmem:[#allocation2 + $0x138] sm:$0xf] %v3027_v5 }
  0x8c   :  { %v606_v1 = vrot.slane %v604_v56, 4  ;;  %v609_v2 = vrot.slane %v607_v60, 5  ;;  %v601_v4 = vrot.slane %v599_v55, 5  ;;  %v3824_v7 = vld [vmem:[#allocation2 + $0xf4] ss:$36 sps:$4 sm:$0xff]   ;;  %v615_v10 = vrot.slane %v613_v61, 5 }
  0x8d   :  { %v596_v3 = vor.u32 %v595_v63, %v592_v62  ;;  %v3826_v8 = vld [vmem:[#allocation2 + $0xf0] ss:$36 sps:$4 sm:$0xff]   ;;  %759 = vst [vmem:[#allocation2 + $0x15c] sm:$0xf] %v3028_v6  ;;  %v3044_v14 = vld [vmem:[%s5177_s0 + $0x178] sm:$0xf]  ;;  %2458 = vmatprep.mubr.bf16.mxu1 %v3824_v7 }
  0x8e   :  { %v610_v9 = vor.u32 %v609_v2, %v606_v1  ;;  %v3043_v13 = vld [vmem:[%s5177_s0 + $0x170] sm:$0xf]  ;;  %v3821_v18 = vld [vmem:[#allocation2 + $0xe8] ss:$36 sps:$4 sm:$0xff]   ;;  %792 = vst [vmem:[#allocation2 + $0x160] sm:$0xf] %v3044_v14  ;;  %2459 = vmatmul.mubr.bf16.gmra.mxu1 %v3826_v8 }
  0x8f   :  { %v597_v11 = vrot.slane %v596_v3, 4  ;;  %791 = vst [vmem:[#allocation2 + $0x13c] sm:$0xf] %v3043_v13  ;;  %v4627_v22 = vld [vmem:[%s5177_s0 + $0x208] sm:$0xf] }
  0x90   :  { %v3819_v15 = vld [vmem:[#allocation2 + $0xec] ss:$36 sps:$4 sm:$0xff]   ;;  %v611_v19 = vrot.slane %v610_v9, 4  ;;  %v3007_v25 = vld [vmem:[%s5177_s0 + $0x1c0] sm:$0xf] }
  0x91   :  { %v602_v21 = vsel %vm4039_vm2, %v597_v11, %v601_v4  ;;  %v4632_v23 = vld [vmem:[%s5177_s0 + $0x210] sm:$0xf]  ;;  %2361 = vmatprep.mubr.bf16.mxu0 %v3819_v15  ;;  %439 = vst [vmem:[#allocation2 + $0x178] sm:$0xf] %v4627_v22  ;;  %v3008_v28 = vld [vmem:[%s5177_s0 + $0x1c4] sm:$0x1] }
  0x92   :  { %v616_v26 = vsel %vm4039_vm2, %v611_v19, %v615_v10  ;;  %725 = vst [vmem:[#allocation2 + $0x134] sm:$0xf] %v602_v21  ;;  %440 = vst [vmem:[#allocation2 + $0x19c] sm:$0xf] %v4632_v23  ;;  %v3009_v29 = vld [vmem:[%s5177_s0 + $0x1c8] sm:$0xf]  ;;  %2362 = vmatmul.mubr.bf16.gmra.mxu0 %v3821_v18 }
  0x93   :  { %v3010_v30 = vld [vmem:[%s5177_s0 + $0x1cc] sm:$0x1]  ;;  %726 = vst [vmem:[#allocation2 + $0x158] sm:$0xf] %v616_v26  ;;  %v618_v31 = vshrl.u32 %v3007_v25, 16  ;;  %v621_v33 = vshll.u32 %v3007_v25, 16 }
  0x94   :  { %v627_v34 = vshll.u32 %v3008_v28, 16  ;;  %v632_v35 = vshrl.u32 %v3009_v29, 16  ;;  %v635_v36 = vshll.u32 %v3009_v29, 16  ;;  %v641_v37 = vshll.u32 %v3010_v30, 16  ;;  %v3029_v43 = vld [vmem:[%s5177_s0 + $0x138] sm:$0xf] }
  0x95   :  { %v620_v38 = vrot.slane %v618_v31, 4  ;;  %v623_v39 = vrot.slane %v621_v33, 5  ;;  %v3030_v44 = vld [vmem:[%s5177_s0 + $0x140] sm:$0xf]  ;;  %760 = vst [vmem:[#allocation2 + $0x180] sm:$0xf] %v3029_v43 }
  0x96   :  { %v634_v40 = vrot.slane %v632_v35, 4  ;;  %v637_v42 = vrot.slane %v635_v36, 5  ;;  %v3832_v45 = vld [vmem:[#allocation2 + $0x13c] ss:$36 sps:$4 sm:$0xff]   ;;  %v629_v49 = vrot.slane %v627_v34, 5  ;;  %v643_v52 = vrot.slane %v641_v37, 5 }
  0x97   :  { %v624_v48 = vor.u32 %v623_v39, %v620_v38  ;;  %761 = vst [vmem:[#allocation2 + $0x1a4] sm:$0xf] %v3030_v44  ;;  %v3834_v32 = vld [vmem:[#allocation2 + $0x138] ss:$36 sps:$4 sm:$0xff]   ;;  %v3045_v54 = vld [vmem:[%s5177_s0 + $0x180] sm:$0xf]  ;;  %2466 = vmatprep.mubr.bf16.mxu1 %v3832_v45 }
  0x98   :  { %v638_v53 = vor.u32 %v637_v42, %v634_v40  ;;  %v3046_v55 = vld [vmem:[%s5177_s0 + $0x188] sm:$0xf]  ;;  %793 = vst [vmem:[#allocation2 + $0x184] sm:$0xf] %v3045_v54  ;;  %v4665_v60 = vld [vmem:[%s5177_s0 + $0x218] sm:$0xf]  ;;  %2467 = vmatmul.mubr.bf16.gmra.mxu1 %v3834_v32 }
  0x99   :  { %v625_v56 = vrot.slane %v624_v48, 4  ;;  %794 = vst [vmem:[#allocation2 + $0x1a8] sm:$0xf] %v3046_v55  ;;  %v4670_v61 = vld [vmem:[%s5177_s0 + $0x220] sm:$0xf]  ;;  %v3846_v11 = vld [vmem:[%s5176_s1 + $0x208] sm:$0xff]  }
  0x9a   :  { %v3827_v62 = vld [vmem:[#allocation2 + $0x134] ss:$36 sps:$4 sm:$0xff]   ;;  %v639_v1 = vrot.slane %v638_v53, 4  ;;  %441 = vst [vmem:[#allocation2 + $0x1c0] sm:$0xf] %v4665_v60  ;;  %3639 = vmatprep.subr.bf16.mxu0 %v3846_v11  ;;  %v3854_v25 = vld [vmem:[%s5176_s1 + $0x200] sm:$0xff]  }
  0x9b   :  { %v3829_v63 = vld [vmem:[#allocation2 + $0x130] ss:$36 sps:$4 sm:$0xff]   ;;  %442 = vst [vmem:[#allocation2 + $0x1e4] sm:$0xf] %v4670_v61  ;;  %v630_v2 = vsel %vm4039_vm2, %v625_v56, %v629_v49  ;;  %v3013_v5 = vld [vmem:[%s5177_s0 + $0x1d8] sm:$0xf]  ;;  %2369 = vmatprep.mubr.bf16.mxu0 %v3827_v62  ;;  %3640 = vmatpush3.bf16.msra.mxu0 %v3846_v11 }
  0x9c   :  { %v3011_v3 = vld [vmem:[%s5177_s0 + $0x1d0] sm:$0xf]  ;;  %v3012_v4 = vld [vmem:[%s5177_s0 + $0x1d4] sm:$0x1]  ;;  %v644_v6 = vsel %vm4039_vm2, %v639_v1, %v643_v52  ;;  %727 = vst [vmem:[#allocation2 + $0x17c] sm:$0xf] %v630_v2  ;;  %2370 = vmatmul.mubr.bf16.gmra.mxu0 %v3829_v63  ;;  %3641 = vmatprep.subr.bf16.mxu0 %v3854_v25 }
  0x9d   :  { %v3014_v7 = vld [vmem:[%s5177_s0 + $0x1dc] sm:$0x1]  ;;  %v646_v8 = vshrl.u32 %v3011_v3, 16  ;;  %v649_v9 = vshll.u32 %v3011_v3, 16  ;;  %v655_v10 = vshll.u32 %v3012_v4, 16  ;;  %v660_v13 = vshrl.u32 %v3013_v5, 16 }
  0x9e   :  { %728 = vst [vmem:[#allocation2 + $0x1a0] sm:$0xf] %v644_v6  ;;  %v663_v14 = vshll.u32 %v3013_v5, 16  ;;  %v669_v15 = vshll.u32 %v3014_v7, 16  ;;  %v3847_v18 = vld [vmem:[%s5178_s2 + $0x10] sm:$0xff]   ;;  %v3855_v29 = vld [vmem:[%s5178_s2 + $0x8] sm:$0xff]  }
  0x9f   :  { %v648_v19 = vrot.slane %v646_v8, 4  ;;  %v651_v21 = vrot.slane %v649_v9, 5  ;;  %v662_v26 = vrot.slane %v660_v13, 4  ;;  %3669 = vmatprep.subr.bf16.mxu1 %v3847_v18  ;;  %v657_v33 = vrot.slane %v655_v10, 5  ;;  %v3842_v35 = vld [vmem:[#allocation2 + $0x180] ss:$36 sps:$4 sm:$0xff]   ;;  %3642 = vmatpush3.bf16.msra.mxu0 %v3854_v25 }
  0xa0   :  { %v665_v28 = vrot.slane %v663_v14, 5  ;;  %v3840_v30 = vld [vmem:[#allocation2 + $0x184] ss:$36 sps:$4 sm:$0xff]   ;;  %v671_v34 = vrot.slane %v669_v15, 5  ;;  %3670 = vmatpush3.bf16.msra.mxu1 %v3847_v18  ;;  %v3032_v39 = vld [vmem:[%s5177_s0 + $0x150] sm:$0xf] }
  0xa1   :  { %v652_v31 = vor.u32 %v651_v21, %v648_v19  ;;  %v3031_v37 = vld [vmem:[%s5177_s0 + $0x148] sm:$0xf]  ;;  %3671 = vmatprep.subr.bf16.mxu1 %v3855_v29  ;;  %2474 = vmatprep.mubr.bf16.mxu1 %v3840_v30  ;;  %v3047_v40 = vld [vmem:[%s5177_s0 + $0x190] sm:$0xf]  ;;  %v3860_v42 = vld [vmem:[%s5178_s2] sm:$0xff]  }
  0xa2   :  { %v666_v36 = vor.u32 %v665_v28, %v662_v26  ;;  %762 = vst [vmem:[#allocation2 + $0x1c8] sm:$0xf] %v3031_v37  ;;  %2475 = vmatmul.mubr.bf16.gmra.mxu1 %v3842_v35  ;;  %763 = vst [vmem:[#allocation2 + $0x1ec] sm:$0xf] %v3032_v39  ;;  %v3048_v44 = vld [vmem:[%s5177_s0 + $0x198] sm:$0xf] }
  0xa3   :  { %v653_v38 = vrot.slane %v652_v31, 4  ;;  %795 = vst [vmem:[#allocation2 + $0x1cc] sm:$0xf] %v3047_v40  ;;  %v4720_v45 = vld [vmem:[%s5177_s0 + $0x228] sm:$0xf] }
  0xa4   :  { %v667_v43 = vrot.slane %v666_v36, 4  ;;  %v3837_v49 = vld [vmem:[#allocation2 + $0x178] ss:$36 sps:$4 sm:$0xff]   ;;  %796 = vst [vmem:[#allocation2 + $0x1f0] sm:$0xf] %v3048_v44  ;;  %3672 = vmatpush3.bf16.msra.mxu1 %v3855_v29 }
  0xa5   :  { %v3835_v48 = vld [vmem:[#allocation2 + $0x17c] ss:$36 sps:$4 sm:$0xff]   ;;  %v658_v52 = vsel %vm4039_vm2, %v653_v38, %v657_v33  ;;  %443 = vst [vmem:[#allocation2 + $0x208] sm:$0xf] %v4720_v45  ;;  %v4730_v53 = vld [vmem:[%s5177_s0 + $0x230] sm:$0xf]  ;;  %3673 = vmatprep.subr.bf16.mxu1 %v3860_v42 }
  0xa6   :  { %v672_v32 = vsel %vm4039_vm2, %v667_v43, %v671_v34  ;;  %729 = vst [vmem:[#allocation2 + $0x1c4] sm:$0xf] %v658_v52  ;;  %v3015_v54 = vld [vmem:[%s5177_s0 + $0x1e0] sm:$0xf]  ;;  %v3016_v55 = vld [vmem:[%s5177_s0 + $0x1e4] sm:$0x1]  ;;  %2377 = vmatprep.mubr.bf16.mxu0 %v3835_v48 }
  0xa7   :  { %730 = vst [vmem:[#allocation2 + $0x1e8] sm:$0xf] %v672_v32  ;;  %444 = vst [vmem:[#allocation2 + $0x22c] sm:$0xf] %v4730_v53  ;;  %v3017_v56 = vld [vmem:[%s5177_s0 + $0x1e8] sm:$0xf]  ;;  %2378 = vmatmul.mubr.bf16.gmra.mxu0 %v3837_v49 }
  0xa8   :  { %v3018_v62 = vld [vmem:[%s5177_s0 + $0x1ec] sm:$0x1]  ;;  %v674_v63 = vshrl.u32 %v3015_v54, 16  ;;  %v677_v1 = vshll.u32 %v3015_v54, 16  ;;  %v683_v2 = vshll.u32 %v3016_v55, 16  ;;  %v688_v3 = vshrl.u32 %v3017_v56, 16  ;;  %3674 = vmatpush3.bf16.msra.mxu1 %v3860_v42 }
  0xa9   :  { %v691_v4 = vshll.u32 %v3017_v56, 16  ;;  %v697_v5 = vshll.u32 %v3018_v62, 16  ;;  %v3033_v13 = vld [vmem:[%s5177_s0 + $0x158] sm:$0xf]  ;;  %v3034_v14 = vld [vmem:[%s5177_s0 + $0x160] sm:$0xf] }
  0xaa   :  { %v676_v6 = vrot.slane %v674_v63, 4  ;;  %v679_v7 = vrot.slane %v677_v1, 5  ;;  %v690_v8 = vrot.slane %v688_v3, 4  ;;  %v685_v11 = vrot.slane %v683_v2, 5  ;;  %v3850_v18 = vld [vmem:[#allocation2 + $0x1c8] ss:$36 sps:$4 sm:$0xff]  }
  0xab   :  { %v693_v9 = vrot.slane %v691_v4, 5  ;;  %v3848_v15 = vld [vmem:[#allocation2 + $0x1cc] ss:$36 sps:$4 sm:$0xff]   ;;  %v699_v21 = vrot.slane %v697_v5, 5  ;;  %764 = vst [vmem:[#allocation2 + $0x210] sm:$0xf] %v3033_v13 }
  0xac   :  { %v680_v10 = vor.u32 %v679_v7, %v676_v6  ;;  %765 = vst [vmem:[#allocation2 + $0x234] sm:$0xf] %v3034_v14  ;;  %v3049_v26 = vld [vmem:[%s5177_s0 + $0x1a0] sm:$0xf]  ;;  %v3050_v28 = vld [vmem:[%s5177_s0 + $0x1a8] sm:$0xf]  ;;  %2482 = vmatprep.mubr.bf16.mxu1 %v3848_v15 }
  0xad   :  { %v694_v19 = vor.u32 %v693_v9, %v690_v8  ;;  %v3845_v30 = vld [vmem:[#allocation2 + $0x1c0] ss:$36 sps:$4 sm:$0xff]   ;;  %797 = vst [vmem:[#allocation2 + $0x214] sm:$0xf] %v3049_v26  ;;  %798 = vst [vmem:[#allocation2 + $0x238] sm:$0xf] %v3050_v28  ;;  %2483 = vmatmul.mubr.bf16.gmra.mxu1 %v3850_v18 }
  0xae   :  { %v681_v25 = vrot.slane %v680_v10, 4  ;;  %v3843_v29 = vld [vmem:[#allocation2 + $0x1c4] ss:$36 sps:$4 sm:$0xff]   ;;  %v3052_v35 = vld [vmem:[%s5177_s0 + $0xc] sm:$0x1] }
  0xaf   :  { %v695_v31 = vrot.slane %v694_v19, 4  ;;  %v3051_v34 = vld [vmem:[%s5177_s0 + $0x8] sm:$0xf]  ;;  %v3053_v36 = vld [vmem:[%s5177_s0 + $0x10] sm:$0xf]  ;;  %2385 = vmatprep.mubr.bf16.mxu0 %v3843_v29  ;;  %v841_v42 = vshll.u32 %v3052_v35, 16 }
  0xb0   :  { %v686_v33 = vsel %vm4039_vm2, %v681_v25, %v685_v11  ;;  %v3054_v38 = vld [vmem:[%s5177_s0 + $0x14] sm:$0x1]  ;;  %v832_v39 = vshrl.u32 %v3051_v34, 16  ;;  %v835_v40 = vshll.u32 %v3051_v34, 16  ;;  %2386 = vmatmul.mubr.bf16.gmra.mxu0 %v3845_v30  ;;  %v846_v43 = vshrl.u32 %v3053_v36, 16 }
  0xb1   :  { %v700_v37 = vsel %vm4039_vm2, %v695_v31, %v699_v21  ;;  %731 = vst [vmem:[#allocation2 + $0x20c] sm:$0xf] %v686_v33  ;;  %v849_v44 = vshll.u32 %v3053_v36, 16  ;;  %v855_v48 = vshll.u32 %v3054_v38, 16  ;;  %v843_v32 = vrot.slane %v841_v42, 5 }
  0xb2   :  { %732 = vst [vmem:[#allocation2 + $0x230] sm:$0xf] %v700_v37  ;;  %v834_v49 = vrot.slane %v832_v39, 4  ;;  %v837_v52 = vrot.slane %v835_v40, 5  ;;  %v848_v54 = vrot.slane %v846_v43, 4 }
  0xb3   :  { %v851_v55 = vrot.slane %v849_v44, 5  ;;  %v857_v56 = vrot.slane %v855_v48, 5  ;;  %v3055_v62 = vld [vmem:[%s5177_s0 + $0x18] sm:$0xf]  ;;  %v3056_v1 = vld [vmem:[%s5177_s0 + $0x1c] sm:$0x1] }
  0xb4   :  { %v838_v63 = vor.u32 %v837_v52, %v834_v49  ;;  %v3057_v2 = vld [vmem:[%s5177_s0 + $0x20] sm:$0xf]  ;;  %v3058_v3 = vld [vmem:[%s5177_s0 + $0x24] sm:$0x1]  ;;  %v3856_v4 = vld [vmem:[#allocation2 + $0x214] ss:$36 sps:$4 sm:$0xff]  }
  0xb5   :  { %v852_v5 = vor.u32 %v851_v55, %v848_v54  ;;  %v860_v6 = vshrl.u32 %v3055_v62, 16  ;;  %v863_v7 = vshll.u32 %v3055_v62, 16  ;;  %v3858_v8 = vld [vmem:[#allocation2 + $0x210] ss:$36 sps:$4 sm:$0xff]   ;;  %v869_v10 = vshll.u32 %v3056_v1, 16  ;;  %2490 = vmatprep.mubr.bf16.mxu1 %v3856_v4 }
  0xb6   :  { %v839_v9 = vrot.slane %v838_v63, 4  ;;  %v874_v11 = vshrl.u32 %v3057_v2, 16  ;;  %v877_v13 = vshll.u32 %v3057_v2, 16  ;;  %v883_v19 = vshll.u32 %v3058_v3, 16  ;;  %v3853_v25 = vld [vmem:[#allocation2 + $0x208] ss:$36 sps:$4 sm:$0xff]   ;;  %2491 = vmatmul.mubr.bf16.gmra.mxu1 %v3858_v8 }
  0xb7   :  { %v853_v14 = vrot.slane %v852_v5, 4  ;;  %v862_v15 = vrot.slane %v860_v6, 4  ;;  %v865_v18 = vrot.slane %v863_v7, 5  ;;  %v871_v28 = vrot.slane %v869_v10, 5  ;;  %3675 = vmatprep.mubr.bf16.mxu1 %v3229_v24  ;;  %v3059_v34 = vld [vmem:[%s5177_s0 + $0x28] sm:$0xf] }
  0xb8   :  { %v844_v26 = vsel %vm4039_vm2, %v839_v9, %v843_v32  ;;  %v876_v31 = vrot.slane %v874_v11, 4  ;;  %v879_v33 = vrot.slane %v877_v13, 5  ;;  %v3060_v35 = vld [vmem:[%s5177_s0 + $0x2c] sm:$0x1]  ;;  %v885_v36 = vrot.slane %v883_v19, 5 }
  0xb9   :  { %v3851_v21 = vld [vmem:[#allocation2 + $0x20c] ss:$36 sps:$4 sm:$0xff]   ;;  %v858_v29 = vsel %vm4039_vm2, %v853_v14, %v857_v56  ;;  %1071 = vst [vmem:[#allocation2 + $0x20] sm:$0xf] %v844_v26  ;;  %v866_v30 = vor.u32 %v865_v18, %v862_v15  ;;  %v3062_v16 = vld [vmem:[%s5177_s0 + $0x34] sm:$0x1] }
  0xba   :  { %2393 = vmatprep.mubr.bf16.mxu0 %v3851_v21  ;;  %1072 = vst [vmem:[#allocation2 + $0x44] sm:$0xf] %v858_v29  ;;  %v3061_v37 = vld [vmem:[%s5177_s0 + $0x30] sm:$0xf]  ;;  %v888_v17 = vshrl.u32 %v3059_v34, 16  ;;  %v880_v38 = vor.u32 %v879_v33, %v876_v31  ;;  %v891_v39 = vshll.u32 %v3059_v34, 16 }
  0xbb   :  { %2394 = vmatmul.mubr.bf16.gmra.mxu0 %v3853_v25  ;;  %v867_v24 = vrot.slane %v866_v30, 4  ;;  %v897_v40 = vshll.u32 %v3060_v35, 16  ;;  %v3063_v42 = vld [vmem:[%s5177_s0 + $0x38] sm:$0xf]  ;;  %v902_v44 = vshrl.u32 %v3061_v37, 16  ;;  %v905_v48 = vshll.u32 %v3061_v37, 16 }
  0xbc   :  { %v890_v43 = vrot.slane %v888_v17, 4  ;;  %v911_v49 = vshll.u32 %v3062_v16, 16  ;;  %v3064_v52 = vld [vmem:[%s5177_s0 + $0x3c] sm:$0x1]  ;;  %v881_v54 = vrot.slane %v880_v38, 4  ;;  %v893_v55 = vrot.slane %v891_v39, 5 }
  0xbd   :  { %v872_v32 = vsel %vm4039_vm2, %v867_v24, %v871_v28  ;;  %v899_v56 = vrot.slane %v897_v40, 5  ;;  %v3065_v62 = vld [vmem:[%s5177_s0 + $0x40] sm:$0xf]  ;;  %v904_v63 = vrot.slane %v902_v44, 4  ;;  %v907_v1 = vrot.slane %v905_v48, 5 }
  0xbe   :  { %1073 = vst [vmem:[#allocation2 + $0x68] sm:$0xf] %v872_v32  ;;  %v913_v2 = vrot.slane %v911_v49, 5  ;;  %v3066_v3 = vld [vmem:[%s5177_s0 + $0x44] sm:$0x1]  ;;  %v916_v4 = vshrl.u32 %v3063_v42, 16  ;;  %v886_v5 = vsel %vm4039_vm2, %v881_v54, %v885_v36  ;;  %v894_v6 = vor.u32 %v893_v55, %v890_v43  ;;  %3676 = vmatmul.mubr.bf16.vlgmr.msra.gmra.mxu1 %v3230_v59 }
  0xbf   :  { %v919_v7 = vshll.u32 %v3063_v42, 16  ;;  %v925_v8 = vshll.u32 %v3064_v52, 16  ;;  %v3067_v9 = vld [vmem:[%s5177_s0 + $0x128] sm:$0xf]  ;;  %v3068_v10 = vld [vmem:[%s5177_s0 + $0x12c] sm:$0x1]  ;;  %v908_v11 = vor.u32 %v907_v1, %v904_v63  ;;  %3679 = vmatprep.mubr.bf16.mxu1 %v3231_v27  ;;  %v3233_v25 = vcombine.low %v4585_v41, %v4595_v46 }
  0xc0   :  { %1074 = vst [vmem:[#allocation2 + $0x8c] sm:$0xf] %v886_v5  ;;  %v918_v13 = vrot.slane %v916_v4, 4  ;;  %v930_v14 = vshrl.u32 %v3065_v62, 16  ;;  %v933_v15 = vshll.u32 %v3065_v62, 16  ;;  %v895_v19 = vrot.slane %v894_v6, 4 }
  0xc1   :  { %v3859_v18 = vld [vmem:[#allocation2 + $0x20] ss:$36 sps:$4 sm:$0xff]   ;;  %v921_v21 = vrot.slane %v919_v7, 5  ;;  %v909_v26 = vrot.slane %v908_v11, 4  ;;  %v927_v28 = vrot.slane %v925_v8, 5  ;;  %v939_v31 = vshll.u32 %v3066_v3, 16 }
  0xc2   :  { %v932_v29 = vrot.slane %v930_v14, 4  ;;  %v935_v30 = vrot.slane %v933_v15, 5  ;;  %v3069_v47 = vld [vmem:[%s5177_s0 + $0x130] sm:$0xf]  ;;  %3643 = vmatprep.mubr.bf16.mxu0 %v3859_v18  ;;  %v900_v51 = vsel %vm4039_vm2, %v895_v19, %v899_v56  ;;  %v3070_v12 = vld [vmem:[%s5177_s0 + $0x134] sm:$0x1]  ;;  %v3234_v52 = vcombine.low %v4627_v22, %v4632_v23 }
  0xc3   :  { %v922_v59 = vor.u32 %v921_v21, %v918_v13  ;;  %v944_v20 = vshrl.u32 %v3067_v9, 16  ;;  %v914_v27 = vsel %vm4039_vm2, %v909_v26, %v913_v2  ;;  %1075 = vst [vmem:[#allocation2 + $0xb0] sm:$0xf] %v900_v51  ;;  %v947_v46 = vshll.u32 %v3067_v9, 16  ;;  %v3071_v34 = vld [vmem:[%s5177_s0 + $0x138] sm:$0xf] }
  0xc4   :  { %v936_v41 = vor.u32 %v935_v30, %v932_v29  ;;  %v953_v33 = vshll.u32 %v3068_v10, 16  ;;  %v3072_v35 = vld [vmem:[%s5177_s0 + $0x13c] sm:$0x1]  ;;  %1076 = vst [vmem:[#allocation2 + $0xd4] sm:$0xf] %v914_v27  ;;  %v941_v37 = vrot.slane %v939_v31, 5  ;;  %v3235_v15 = vcombine.low %v4665_v60, %v4670_v61 }
  0xc5   :  { %v923_v36 = vrot.slane %v922_v59, 4  ;;  %v946_v16 = vrot.slane %v944_v20, 4  ;;  %v958_v17 = vshrl.u32 %v3069_v47, 16  ;;  %v949_v38 = vrot.slane %v947_v46, 5  ;;  %v3073_v42 = vld [vmem:[%s5177_s0 + $0x140] sm:$0xf] }
  0xc6   :  { %v937_v24 = vrot.slane %v936_v41, 4  ;;  %v955_v39 = vrot.slane %v953_v33, 5  ;;  %v961_v40 = vshll.u32 %v3069_v47, 16  ;;  %v967_v49 = vshll.u32 %v3070_v12, 16  ;;  %3680 = vmatmul.mubr.bf16.gmra.mxu1 %v3232_v0  ;;  %v3074_v56 = vld [vmem:[%s5177_s0 + $0x144] sm:$0x1] }
  0xc7   :  { %v3861_v43 = vld [vmem:[#allocation2 + $0x68] ss:$36 sps:$4 sm:$0xff]   ;;  %v928_v44 = vsel %vm4039_vm2, %v923_v36, %v927_v28  ;;  %v960_v48 = vrot.slane %v958_v17, 4  ;;  %v950_v54 = vor.u32 %v949_v38, %v946_v16  ;;  %v972_v62 = vshrl.u32 %v3071_v34, 16  ;;  %3683 = vmatprep.mubr.bf16.mxu1 %v3233_v25  ;;  %v3077_v5 = vld [vmem:[%s5177_s0 + $0x150] sm:$0xf] }
  0xc8   :  { %v942_v32 = vsel %vm4039_vm2, %v937_v24, %v941_v37  ;;  %1077 = vst [vmem:[#allocation2 + $0xf8] sm:$0xf] %v928_v44  ;;  %v963_v55 = vrot.slane %v961_v40, 5  ;;  %v3075_v63 = vld [vmem:[%s5177_s0 + $0x148] sm:$0xf]  ;;  %3644 = vmatmul.mubr.bf16.vlgmr.msra.gmra.mxu0 %v3861_v43  ;;  %v969_v22 = vrot.slane %v967_v49, 5  ;;  %v3236_v33 = vcombine.low %v4720_v45, %v4730_v53 }
  0xc9   :  { %1078 = vst [vmem:[#allocation2 + $0x11c] sm:$0xf] %v942_v32  ;;  %v975_v23 = vshll.u32 %v3071_v34, 16  ;;  %v981_v1 = vshll.u32 %v3072_v35, 16  ;;  %v986_v2 = vshrl.u32 %v3073_v42, 16  ;;  %v951_v58 = vrot.slane %v950_v54, 4 }
  0xca   :  { %v3076_v57 = vld [vmem:[%s5177_s0 + $0x14c] sm:$0x1]  ;;  %v964_v0 = vor.u32 %v963_v55, %v960_v48  ;;  %v974_v3 = vrot.slane %v972_v62, 4  ;;  %v989_v4 = vshll.u32 %v3073_v42, 16  ;;  %v995_v9 = vshll.u32 %v3074_v56, 16 }
  0xcb   :  { %v977_v6 = vrot.slane %v975_v23, 5  ;;  %v983_v7 = vrot.slane %v981_v1, 5  ;;  %v988_v8 = vrot.slane %v986_v2, 4  ;;  %v3864_v10 = vld [vmem:[#allocation2 + $0xb0] ss:$36 sps:$4 sm:$0xff]   ;;  %v956_v11 = vsel %vm4039_vm2, %v951_v58, %v955_v39 }
  0xcc   :  { %v965_v13 = vrot.slane %v964_v0, 4  ;;  %v991_v14 = vrot.slane %v989_v4, 5  ;;  %1079 = vst [vmem:[#allocation2 + $0x140] sm:$0xf] %v956_v11  ;;  %v997_v19 = vrot.slane %v995_v9, 5  ;;  %v1000_v25 = vshrl.u32 %v3075_v63, 16  ;;  %3647 = vmatprep.mubr.bf16.mxu0 %v3864_v10 }
  0xcd   :  { %v978_v18 = vor.u32 %v977_v6, %v974_v3  ;;  %v3078_v21 = vld [vmem:[%s5177_s0 + $0x154] sm:$0x1]  ;;  %v1003_v26 = vshll.u32 %v3075_v63, 16  ;;  %v3079_v28 = vld [vmem:[%s5177_s0 + $0x158] sm:$0xf]  ;;  %v1009_v47 = vshll.u32 %v3076_v57, 16 }
  0xce   :  { %v970_v29 = vsel %vm4039_vm2, %v965_v13, %v969_v22  ;;  %v992_v30 = vor.u32 %v991_v14, %v988_v8  ;;  %v1014_v60 = vshrl.u32 %v3077_v5, 16  ;;  %v3080_v61 = vld [vmem:[%s5177_s0 + $0x15c] sm:$0x1]  ;;  %v3081_v51 = vld [vmem:[%s5177_s0 + $0x160] sm:$0xf]  ;;  %v1002_v31 = vrot.slane %v1000_v25, 4  ;;  %3684 = vmatmul.mubr.bf16.gmra.mxu1 %v3234_v52 }
  0xcf   :  { %1080 = vst [vmem:[#allocation2 + $0x164] sm:$0xf] %v970_v29  ;;  %v979_v59 = vrot.slane %v978_v18, 4  ;;  %v1005_v12 = vrot.slane %v1003_v26, 5  ;;  %v1017_v20 = vshll.u32 %v3077_v5, 16  ;;  %v1011_v46 = vrot.slane %v1009_v47, 5  ;;  %3687 = vmatprep.mubr.bf16.mxu1 %v3235_v15 }
  0xd0   :  { %v3865_v27 = vld [vmem:[#allocation2 + $0xf8] ss:$36 sps:$4 sm:$0xff]   ;;  %v993_v41 = vrot.slane %v992_v30, 4  ;;  %v1016_v36 = vrot.slane %v1014_v60, 4  ;;  %v1023_v17 = vshll.u32 %v3078_v21, 16  ;;  %v1028_v24 = vshrl.u32 %v3079_v28, 16 }
  0xd1   :  { %v984_v34 = vsel %vm4039_vm2, %v979_v59, %v983_v7  ;;  %v1006_v35 = vor.u32 %v1005_v12, %v1002_v31  ;;  %v1019_v37 = vrot.slane %v1017_v20, 5  ;;  %3648 = vmatmul.mubr.bf16.gmra.mxu0 %v3865_v27  ;;  %v1031_v38 = vshll.u32 %v3079_v28, 16  ;;  %v3082_v45 = vld [vmem:[%s5177_s0 + $0x164] sm:$0x1] }
  0xd2   :  { %v998_v16 = vsel %vm4039_vm2, %v993_v41, %v997_v19  ;;  %1081 = vst [vmem:[#allocation2 + $0x188] sm:$0xf] %v984_v34  ;;  %v1037_v53 = vshll.u32 %v3080_v61, 16  ;;  %v1042_v42 = vshrl.u32 %v3081_v51, 16  ;;  %v1025_v43 = vrot.slane %v1023_v17, 5 }
  0xd3   :  { %1082 = vst [vmem:[#allocation2 + $0x1ac] sm:$0xf] %v998_v16  ;;  %v1007_v39 = vrot.slane %v1006_v35, 4  ;;  %v1020_v40 = vor.u32 %v1019_v37, %v1016_v36  ;;  %v1030_v44 = vrot.slane %v1028_v24, 4  ;;  %v1033_v48 = vrot.slane %v1031_v38, 5 }
  0xd4   :  { %v1045_v49 = vshll.u32 %v3081_v51, 16  ;;  %v1039_v54 = vrot.slane %v1037_v53, 5  ;;  %v1044_v55 = vrot.slane %v1042_v42, 4  ;;  %v1051_v23 = vshll.u32 %v3082_v45, 16 }
  0xd5   :  { %v1012_v52 = vsel %vm4039_vm2, %v1007_v39, %v1011_v46  ;;  %v1021_v32 = vrot.slane %v1020_v40, 4  ;;  %v1034_v63 = vor.u32 %v1033_v48, %v1030_v44 }
  0xd6   :  { %v3868_v62 = vld [vmem:[#allocation2 + $0x140] ss:$36 sps:$4 sm:$0xff]   ;;  %1083 = vst [vmem:[#allocation2 + $0x1d0] sm:$0xf] %v1012_v52  ;;  %v1047_v22 = vrot.slane %v1045_v49, 5  ;;  %v1053_v0 = vrot.slane %v1051_v23, 5  ;;  %3688 = vmatmul.mubr.bf16.gmra.mxu1 %v3236_v33 }
  0xd7   :  { %v1026_v1 = vsel %vm4039_vm2, %v1021_v32, %v1025_v43  ;;  %3651 = vmatprep.mubr.bf16.mxu0 %v3868_v62  ;;  %v1035_v57 = vrot.slane %v1034_v63, 4 }
  0xd8   :  { %1084 = vst [vmem:[#allocation2 + $0x1f4] sm:$0xf] %v1026_v1  ;;  %v1048_v58 = vor.u32 %v1047_v22, %v1044_v55 }
  0xd9   :  { %v1040_v6 = vsel %vm4039_vm2, %v1035_v57, %v1039_v54 }
  0xda   :  { %v3869_v5 = vld [vmem:[#allocation2 + $0x188] ss:$36 sps:$4 sm:$0xff]   ;;  %v1049_v7 = vrot.slane %v1048_v58, 4  ;;  %1085 = vst [vmem:[#allocation2 + $0x218] sm:$0xf] %v1040_v6 }
  0xdb   :  { %3652 = vmatmul.mubr.bf16.gmra.mxu0 %v3869_v5 }
  0xdc   :  { %v1054_v9 = vsel %vm4039_vm2, %v1049_v7, %v1053_v0 }
  0xdd   :  { %1086 = vst [vmem:[#allocation2 + $0x23c] sm:$0xf] %v1054_v9 }
  0xdf   :  { %v3872_v13 = vld [vmem:[#allocation2 + $0x1d0] ss:$36 sps:$4 sm:$0xff]  }
  0xe0   :  { %3655 = vmatprep.mubr.bf16.mxu0 %v3872_v13 }
  0xe3   :  { %v3355_v56 = vpop.f32.mrf.mxu0 }
  0xe4   :  { %v3873_v29 = vld [vmem:[#allocation2 + $0x218] ss:$36 sps:$4 sm:$0xff]  }
  0xe5   :  { %v3356_v2 = vpop.f32.mrf.mxu0  ;;  %v3419_v14 = vpop.f32.mrf.mxu1  ;;  %3656 = vmatmul.mubr.bf16.gmra.mxu0 %v3873_v29 }
  0xe6   :  { %v3357_v3 = vadd.f32 %v3356_v2, %v3355_v56 }
  0xe7   :  { %v3358_v4 = vpop.f32.mrf.mxu0  ;;  %v3420_v19 = vpop.f32.mrf.mxu1 }
  0xe8   :  { %v3421_v25 = vadd.f32 %v3420_v19, %v3419_v14 }
  0xe9   :  { %v3359_v8 = vpop.f32.mrf.mxu0  ;;  %v3422_v26 = vpop.f32.mrf.mxu1 }
  0xea   :  { %v3360_v10 = vadd.f32 %v3359_v8, %v3358_v4  ;;  %v4909_v30 = vadd.f32 %v3421_v25, %v3357_v3 }
  0xeb   :  { %v3361_v11 = vpop.f32.mrf.mxu0  ;;  %v3423_v60 = vpop.f32.mrf.mxu1 }
  0xec   :  { %v3424_v50 = vadd.f32 %v3423_v60, %v3422_v26 }
  0xed   :  { %v3362_v15 = vpop.f32.mrf.mxu0  ;;  %v3425_v51 = vpop.f32.mrf.mxu1 }
  0xee   :  { %v3363_v18 = vadd.f32 %v3362_v15, %v3361_v11  ;;  %v4911_v61 = vadd.f32 %v3424_v50, %v3360_v10 }
  0xef   :  { %v3364_v21 = vpop.f32.mrf.mxu0  ;;  %v3426_v31 = vpop.f32.mrf.mxu1 }
  0xf0   :  { %v3427_v12 = vadd.f32 %v3426_v31, %v3425_v51 }
  0xf1   :  { %v3365_v28 = vpop.f32.mrf.mxu0  ;;  %v3428_v27 = vpop.f32.mrf.mxu1 }
  0xf2   :  { %v3366_v47 = vadd.f32 %v3365_v28, %v3364_v21  ;;  %v4913_v46 = vadd.f32 %v3427_v12, %v3363_v18 }
  0xf3   :  { %v3367_v59 = vpop.f32.mrf.mxu0  ;;  %v3429_v34 = vpop.f32.mrf.mxu1 }
  0xf4   :  { %v3430_v35 = vadd.f32 %v3429_v34, %v3428_v27 }
  0xf5   :  { %v3368_v20 = vpop.f32.mrf.mxu0  ;;  %v3431_v17 = vpop.f32.mrf.mxu1 }
  0xf6   :  { %v3369_v41 = vadd.f32 %v3368_v20, %v3367_v59  ;;  %v4915_v16 = vadd.f32 %v3430_v35, %v3366_v47 }
  0xf7   :  { %v3370_v33 = vpop.f32.mrf.mxu0  ;;  %v3432_v38 = vpop.f32.mrf.mxu1 }
  0xf8   :  { %v3433_v39 = vadd.f32 %v3432_v38, %v3431_v17 }
  0xf9   :  { %v3371_v36 = vpop.f32.mrf.mxu0  ;;  %v3434_v45 = vpop.f32.mrf.mxu1 }
  0xfa   :  { %v3372_v37 = vadd.f32 %v3371_v36, %v3370_v33  ;;  %v4917_v42 = vadd.f32 %v3433_v39, %v3369_v41 }
  0xfb   :  { %v3373_v24 = vpop.f32.mrf.mxu0  ;;  %v3435_v44 = vpop.f32.mrf.mxu1 }
  0xfc   :  { %v3436_v48 = vadd.f32 %v3435_v44, %v3434_v45 }
  0xfd   :  { %v3374_v40 = vpop.f32.mrf.mxu0 }
  0xfe   :  { %v3375_v53 = vadd.f32 %v3374_v40, %v3373_v24  ;;  %v4919_v32 = vadd.f32 %v3436_v48, %v3372_v37 }
  0xff   :  { %v3376_v43 = vpop.f32.mrf.mxu0  ;;  %v3437_v54 = vpop.f32.mrf.mxu1 }
 0x101   :  { %v3377_v49 = vpop.f32.mrf.mxu0  ;;  %v3438_v56 = vpop.f32.mrf.mxu1 }
 0x102   :  { %v3378_v52 = vadd.f32 %v3377_v49, %v3376_v43  ;;  %v3439_v62 = vadd.f32 %v3438_v56, %v3437_v54 }
 0x103   :  { %v3379_v55 = vpop.f32.mrf.mxu0  ;;  %v3440_v22 = vpop.f32.mrf.mxu1 }
 0x104   :  { %v4921_v1 = vadd.f32 %v3439_v62, %v3375_v53 }
 0x105   :  { %v3380_v63 = vpop.f32.mrf.mxu0  ;;  %v3441_v57 = vpop.f32.mrf.mxu1 }
 0x106   :  { %v3381_v23 = vadd.f32 %v3380_v63, %v3379_v55  ;;  %v3442_v58 = vadd.f32 %v3441_v57, %v3440_v22 }
 0x107   :  { %v3382_v2 = vpop.f32.mrf.mxu0 }
 0x108   :  { %v4923_v4 = vadd.f32 %v3442_v58, %v3378_v52 }
 0x109   :  { %v3383_v0 = vpop.f32.mrf.mxu0 }
 0x10a   :  { %v3384_v3 = vadd.f32 %v3383_v0, %v3382_v2  ;;  %v3443_v5 = vpop.f32.mrf.mxu1 }
 0x10c   :  { %v3385_v6 = vpop.f32.mrf.mxu0  ;;  %v3444_v7 = vpop.f32.mrf.mxu1 }
 0x10d   :  { %v3445_v8 = vadd.f32 %v3444_v7, %v3443_v5 }
 0x10e   :  { %v3386_v9 = vpop.f32.mrf.mxu0  ;;  %v3446_v10 = vpop.f32.mrf.mxu1 }
 0x10f   :  { %v3387_v11 = vadd.f32 %v3386_v9, %v3385_v6  ;;  %v4925_v13 = vadd.f32 %v3445_v8, %v3381_v23 }
 0x110   :  { %v3388_v14 = vpop.f32.mrf.mxu0  ;;  %v3447_v15 = vpop.f32.mrf.mxu1 }
 0x111   :  { %v3448_v18 = vadd.f32 %v3447_v15, %v3446_v10 }
 0x112   :  { %v3389_v19 = vpop.f32.mrf.mxu0 }
 0x113   :  { %v3390_v21 = vadd.f32 %v3389_v19, %v3388_v14  ;;  %v4927_v25 = vadd.f32 %v3448_v18, %v3384_v3 }
 0x114   :  { %v3449_v26 = vpop.f32.mrf.mxu1 }
 0x116   :  { %v3450_v29 = vpop.f32.mrf.mxu1 }
 0x117   :  { %v3391_v28 = vpop.f32.mrf.mxu0  ;;  %v3451_v47 = vadd.f32 %v3450_v29, %v3449_v26 }
 0x118   :  { %v3452_v50 = vpop.f32.mrf.mxu1 }
 0x119   :  { %v3392_v60 = vpop.f32.mrf.mxu0  ;;  %v4929_v59 = vadd.f32 %v3451_v47, %v3387_v11 }
 0x11a   :  { %v3393_v51 = vadd.f32 %v3392_v60, %v3391_v28  ;;  %v3453_v12 = vpop.f32.mrf.mxu1 }
 0x11b   :  { %v3394_v31 = vpop.f32.mrf.mxu0  ;;  %v3454_v20 = vadd.f32 %v3453_v12, %v3452_v50 }
 0x11d   :  { %v3395_v27 = vpop.f32.mrf.mxu0  ;;  %v4931_v33 = vadd.f32 %v3454_v20, %v3390_v21 }
 0x11e   :  { %v3396_v41 = vadd.f32 %v3395_v27, %v3394_v31 }
 0x11f   :  { %v3455_v34 = vpop.f32.mrf.mxu1 }
 0x121   :  { %v3397_v35 = vpop.f32.mrf.mxu0  ;;  %v3456_v36 = vpop.f32.mrf.mxu1 }
 0x122   :  { %v3457_v37 = vadd.f32 %v3456_v36, %v3455_v34 }
 0x123   :  { %v3398_v17 = vpop.f32.mrf.mxu0  ;;  %v3458_v24 = vpop.f32.mrf.mxu1 }
 0x124   :  { %v3399_v38 = vadd.f32 %v3398_v17, %v3397_v35  ;;  %v4933_v39 = vadd.f32 %v3457_v37, %v3393_v51 }
 0x125   :  { %v3400_v40 = vpop.f32.mrf.mxu0  ;;  %v3459_v45 = vpop.f32.mrf.mxu1 }
 0x126   :  { %v3460_v53 = vadd.f32 %v3459_v45, %v3458_v24 }
 0x127   :  { %v3401_v43 = vpop.f32.mrf.mxu0 }
 0x128   :  { %v3402_v44 = vadd.f32 %v3401_v43, %v3400_v40  ;;  %v4935_v48 = vadd.f32 %v3460_v53, %v3396_v41 }
 0x129   :  { %v3461_v49 = vpop.f32.mrf.mxu1 }
 0x12a   :  { %5185 = vst [vmem:[#allocation3_spill] sm:$0xff] %v4935_v48 }
 0x12b   :  { %v3462_v52 = vpop.f32.mrf.mxu1 }
 0x12c   :  { %v3463_v54 = vadd.f32 %v3462_v52, %v3461_v49 }
 0x12d   :  { %v3464_v55 = vpop.f32.mrf.mxu1 }
 0x12e   :  { %v4937_v56 = vadd.f32 %v3463_v54, %v3399_v38 }
 0x12f   :  { %v3465_v62 = vpop.f32.mrf.mxu1 }
 0x130   :  { %v3466_v63 = vadd.f32 %v3465_v62, %v3464_v55 }
 0x131   :  { %v3547_v23 = vpop.f32.mrf.mxu1 }
 0x132   :  { %v4939_v22 = vadd.f32 %v3466_v63, %v3402_v44 }
 0x133   :  { %v3548_v57 = vpop.f32.mrf.mxu1 }
 0x134   :  { %5186 = vst [vmem:[#allocation4_spill] sm:$0xff] %v4939_v22  ;;  %v3483_v2 = vpop.f32.mrf.mxu0  ;;  %v3549_v58 = vadd.f32 %v3548_v57, %v3547_v23 }
 0x135   :  { %v3550_v3 = vpop.f32.mrf.mxu1 }
 0x136   :  { %v3484_v0 = vpop.f32.mrf.mxu0 }
 0x137   :  { %v3485_v5 = vadd.f32 %v3484_v0, %v3483_v2  ;;  %v3551_v7 = vpop.f32.mrf.mxu1 }
 0x138   :  { %v3486_v6 = vpop.f32.mrf.mxu0  ;;  %v3552_v9 = vadd.f32 %v3551_v7, %v3550_v3 }
 0x139   :  { %v2340_v8 = vadd.f32 %v3485_v5, %v4909_v30  ;;  %v3553_v11 = vpop.f32.mrf.mxu1 }
 0x13a   :  { %v3487_v10 = vpop.f32.mrf.mxu0 }
 0x13b   :  { %v3488_v14 = vadd.f32 %v3487_v10, %v3486_v6  ;;  %v4942_v15 = vadd.f32 %v3549_v58, %v2340_v8  ;;  %v3554_v18 = vpop.f32.mrf.mxu1 }
 0x13c   :  { %v3555_v60 = vadd.f32 %v3554_v18, %v3553_v11 }
 0x13d   :  { %v2343_v19 = vadd.f32 %v3488_v14, %v4911_v61  ;;  %v4945_v26 = vpop.f32.mrf.mxu1 }
 0x13e   :  { %v3489_v21 = vpop.f32.mrf.mxu0 }
 0x13f   :  { %v4947_v29 = vadd.f32 %v3552_v9, %v2343_v19  ;;  %v4949_v50 = vpop.f32.mrf.mxu1 }
 0x140   :  { %v3490_v28 = vpop.f32.mrf.mxu0 }
 0x141   :  { %v3491_v47 = vadd.f32 %v3490_v28, %v3489_v21 }
 0x142   :  { %v3492_v30 = vpop.f32.mrf.mxu0 }
 0x143   :  { %v2348_v51 = vadd.f32 %v3491_v47, %v4913_v46  ;;  %v3559_v12 = vpop.f32.mrf.mxu1 }
 0x144   :  { %v3493_v31 = vpop.f32.mrf.mxu0 }
 0x145   :  { %v4952_v20 = vadd.f32 %v3555_v60, %v2348_v51  ;;  %v3560_v27 = vpop.f32.mrf.mxu1 }
 0x146   :  { %v3561_v41 = vadd.f32 %v3560_v27, %v3559_v12 }
 0x147   :  { %v3562_v34 = vpop.f32.mrf.mxu1 }
 0x148   :  { %v3495_v61 = vpop.f32.mrf.mxu0 }
 0x149   :  { %v3563_v37 = vpop.f32.mrf.mxu1 }
 0x14a   :  { %v3496_v35 = vpop.f32.mrf.mxu0  ;;  %v3564_v45 = vadd.f32 %v3563_v37, %v3562_v34 }
 0x14b   :  { %v3497_v36 = vadd.f32 %v3496_v35, %v3495_v61 }
 0x14c   :  { %v3498_v17 = vpop.f32.mrf.mxu0 }
 0x14d   :  { %v2356_v24 = vadd.f32 %v3497_v36, %v4917_v42 }
 0x14e   :  { %v3499_v38 = vpop.f32.mrf.mxu0  ;;  %v4955_v53 = vpop.f32.mrf.mxu1 }
 0x14f   :  { %v3500_v40 = vadd.f32 %v3499_v38, %v3498_v17  ;;  %v4957_v46 = vadd.f32 %v3561_v41, %v2356_v24 }
 0x150   :  { %v4960_v49 = vpop.f32.mrf.mxu1 }
 0x151   :  { %v2359_v43 = vadd.f32 %v3500_v40, %v4919_v32  ;;  %v3494_v40 = vadd.f32 %v3493_v31, %v3492_v30  ;;  %v5041_v30 = vld [vmem:[%s5180_s3] ss:$0 sm:$0xff] }
 0x152   :  { %v3501_v44 = vpop.f32.mrf.mxu0  ;;  %v4962_v54 = vpop.f32.mrf.mxu1 }
 0x153   :  { %v4964_v55 = vadd.f32 %v3564_v45, %v2359_v43 }
 0x154   :  { %v3502_v52 = vpop.f32.mrf.mxu0  ;;  %v4966_v63 = vpop.f32.mrf.mxu1 }
 0x156   :  { %v3504_v62 = vpop.f32.mrf.mxu0 }
 0x158   :  { %v3505_v42 = vpop.f32.mrf.mxu0  ;;  %v4968_v23 = vpop.f32.mrf.mxu1 }
 0x15a   :  { %v4970_v2 = vpop.f32.mrf.mxu1 }
 0x15c   :  { %v4972_v57 = vpop.f32.mrf.mxu0  ;;  %v4974_v58 = vpop.f32.mrf.mxu1 }
 0x15e   :  { %v4976_v32 = vpop.f32.mrf.mxu0  ;;  %v4978_v0 = vpop.f32.mrf.mxu1 }
 0x160   :  { %v4980_v3 = vpop.f32.mrf.mxu0 }
 0x162   :  { %v4982_v5 = vpop.f32.mrf.mxu0  ;;  %v4984_v6 = vpop.f32.mrf.mxu1 }
 0x164   :  { %v4986_v7 = vpop.f32.mrf.mxu1 }
 0x166   :  { %v4990_v9 = vpop.f32.mrf.mxu1 }
 0x167   :  { %v4988_v8 = vpop.f32.mrf.mxu0 }
 0x168   :  { %v4994_v11 = vpop.f32.mrf.mxu1 }
 0x169   :  { %v4992_v10 = vpop.f32.mrf.mxu0 }
 0x16b   :  { %v4996_v14 = vpop.f32.mrf.mxu0 }
 0x16d   :  { %v4998_v18 = vpop.f32.mrf.mxu0  ;;  %v5000_v19 = vpop.f32.mrf.mxu1 }
 0x16f   :  { %v5004_v28 = vpop.f32.mrf.mxu1 }
 0x170   :  { %v5002_v21 = vpop.f32.mrf.mxu0 }
 0x171   :  { %v5008_v60 = vpop.f32.mrf.mxu1 }
 0x172   :  { %v5006_v47 = vpop.f32.mrf.mxu0  ;;  %5187 = vst [vmem:[#allocation5_spill] sm:$0xff] %v5008_v60 }
 0x173   :  { %v5012_v12 = vpop.f32.mrf.mxu1 }
 0x174   :  { %v5010_v51 = vpop.f32.mrf.mxu0  ;;  %5189 = vst [vmem:[#allocation7_spill] sm:$0xff] %v5012_v12 }
 0x175   :  { %5188 = vst [vmem:[#allocation6_spill] sm:$0xff] %v5010_v51 }
 0x176   :  { %v5014_v27 = vpop.f32.mrf.mxu0  ;;  %v5016_v41 = vpop.f32.mrf.mxu1 }
 0x177   :  { %5190 = vst [vmem:[#allocation8_spill] sm:$0xff] %v5014_v27  ;;  %v3503_v27 = vadd.f32 %v3502_v52, %v3501_v44 }
 0x178   :  { %v5018_v61 = vpop.f32.mrf.mxu1 }
 0x179   :  { %v2364_v52 = vadd.f32 %v3503_v27, %v4921_v1 }
 0x17a   :  { %v5022_v35 = vpop.f32.mrf.mxu1 }
 0x17b   :  { %v5020_v34 = vpop.f32.mrf.mxu0  ;;  %5191 = vst [vmem:[#allocation9_spill] sm:$0xff] %v5022_v35  ;;  %v2351_v35 = vadd.f32 %v3494_v40, %v4915_v16 }
 0x17c   :  { %v5026_v37 = vpop.f32.mrf.mxu1 }
 0x17d   :  { %v5024_v36 = vpop.f32.mrf.mxu0  ;;  %5192 = vst [vmem:[#allocation10_spill] sm:$0xff] %v5026_v37  ;;  %v3558_v37 = vadd.f32 %v4949_v50, %v4945_v26 }
 0x17e   :  { %v3677_v17 = vpop.f32.mrf.mxu1 }
 0x17f   :  { %v5028_v24 = vpop.f32.mrf.mxu0  ;;  %v2448_v50 = vadd.f32 %v3558_v37, %v2351_v35  ;;  %v3570_v35 = vadd.f32 %v4966_v63, %v4962_v54 }
 0x180   :  { %v2836_v38 = vpop.f32.mrf.mxu1 }
 0x181   :  { %v5030_v43 = vpop.f32.mrf.mxu0 }
 0x182   :  { %v3678_v45 = vpop.f32.mrf.mxu1 }
 0x183   :  { %v3293_v12 = vpack.c.bf16 %v3678_v45, %v3677_v17 }
 0x184   :  { %v2839_v60 = vpop.f32.mrf.mxu1 }
 0x185   :  { %3332 = vst [vmem:[%s5179_s6 + $0x8] sm:$0xff] %v3293_v12   ;;  %v3288_v48 = vpack.c.bf16 %v2839_v60, %v2836_v38  ;;  %v3506_v12 = vadd.f32 %v3505_v42, %v3504_v62  ;;  %v3567_v38 = vadd.f32 %v4960_v49, %v4955_v53 }
 0x186   :  { %v3681_v22 = vpop.f32.mrf.mxu1 }
 0x187   :  { %3289 = vst [vmem:[%s5179_s6] sm:$0xff] %v3288_v48   ;;  %v5055_v48 = vld [vmem:[%s5181_s4] ss:$0 sm:$0xff]  ;;  %v2461_v45 = vadd.f32 %v3567_v38, %v2364_v52 }
 0x188   :  { %v3645_v51 = vpop.f32.mrf.mxu0  ;;  %v2852_v60 = vpop.f32.mrf.mxu1 }
 0x189   :  { %v2542_v31 = vadd.f32 %v3645_v51, %v4952_v20 }
 0x18a   :  { %v2533_v16 = vpop.f32.mrf.mxu0  ;;  %v3682_v44 = vpop.f32.mrf.mxu1 }
 0x18b   :  { %v2605_v17 = vmul.f32 %v5041_v30, %v2542_v31  ;;  %v2534_v26 = vadd.f32 %v2533_v16, %v4942_v15  ;;  %v3303_v51 = vpack.c.bf16 %v3682_v44, %v3681_v22  ;;  %v2367_v15 = vadd.f32 %v3506_v12, %v4923_v4 }
 0x18c   :  { %v3646_v20 = vpop.f32.mrf.mxu0  ;;  %v2855_v40 = vpop.f32.mrf.mxu1  ;;  %v3573_v12 = vadd.f32 %v4970_v2, %v4968_v23 }
 0x18d   :  { %v2603_v62 = vmul.f32 %v5041_v30, %v2534_v26  ;;  %v2545_v42 = vadd.f32 %v3646_v20, %v2448_v50  ;;  %3334 = vst [vmem:[%s5179_s6 + $0x18] sm:$0xff] %v3303_v51   ;;  %v3298_v53 = vpack.c.bf16 %v2855_v40, %v2852_v60  ;;  %v2628_v49 = vadd.f32 %v5055_v48, %v2605_v17 }
 0x18e   :  { %v2536_v1 = vpop.f32.mrf.mxu0  ;;  %v3685_v37 = vpop.f32.mrf.mxu1  ;;  %v2464_v17 = vadd.f32 %v3570_v35, %v2367_v15  ;;  %v3509_v26 = vadd.f32 %v4976_v32, %v4972_v57  ;;  %v3579_v51 = vadd.f32 %v4986_v7, %v4984_v6  ;;  %v3512_v7 = vadd.f32 %v4982_v5, %v4980_v3 }
 0x18f   :  { %v2606_v27 = vmul.f32 %v5041_v30, %v2545_v42  ;;  %v2537_v22 = vadd.f32 %v2536_v1, %v4947_v29  ;;  %3333 = vst [vmem:[%s5179_s6 + $0x10] sm:$0xff] %v3298_v53   ;;  %v2626_v4 = vadd.f32 %v5055_v48, %v2603_v62  ;;  %v3515_v29 = vadd.f32 %v4992_v10, %v4988_v8 }
 0x190   :  { %v2868_v60 = vpop.f32.mrf.mxu1  ;;  %v2644_v50 = vmax.f32 %v2628_v49, 0.0  ;;  %v3518_v8 = vadd.f32 %v4998_v18, %v4996_v14  ;;  %v3582_v3 = vadd.f32 %v4994_v11, %v4990_v9  ;;  %v3527_v9 = vadd.f32 %v5024_v36, %v5020_v34 }
 0x191   :  { %v2629_v54 = vadd.f32 %v5055_v48, %v2606_v27  ;;  %v2604_v63 = vmul.f32 %v5041_v30, %v2537_v22  ;;  %v3649_v31 = vpop.f32.mrf.mxu0  ;;  %v2642_v10 = vmax.f32 %v2626_v4, 0.0  ;;  %v2380_v15 = vadd.f32 %v3515_v29, %v4929_v59 }
 0x192   :  { %v2558_v16 = vadd.f32 %v3649_v31, %v2461_v45  ;;  %v3686_v20 = vpop.f32.mrf.mxu1 }
 0x193   :  { %v2645_v44 = vmax.f32 %v2629_v54, 0.0  ;;  %v2627_v52 = vadd.f32 %v5055_v48, %v2604_v63  ;;  %v2549_v38 = vpop.f32.mrf.mxu0  ;;  %v3313_v2 = vpack.c.bf16 %v3686_v20, %v3685_v37  ;;  %v3576_v37 = vadd.f32 %v4978_v0, %v4974_v58 }
 0x194   :  { %v2609_v62 = vmul.f32 %v5041_v30, %v2558_v16  ;;  %v2550_v23 = vadd.f32 %v2549_v38, %v4957_v46  ;;  %v2871_v40 = vpop.f32.mrf.mxu1  ;;  %v2372_v46 = vadd.f32 %v3509_v26, %v4925_v13  ;;  %v2383_v13 = vadd.f32 %v3518_v8, %v4931_v33 }
 0x195   :  { %v3253_v42 = vpack.c.bf16 %v2645_v44, %v2644_v50  ;;  %v2643_v57 = vmax.f32 %v2627_v52, 0.0  ;;  %v3650_v32 = vpop.f32.mrf.mxu0  ;;  %3336 = vst [vmem:[%s5179_s6 + $0x28] sm:$0xff] %v3313_v2   ;;  %v3308_v6 = vpack.c.bf16 %v2871_v40, %v2868_v60  ;;  %v2477_v4 = vadd.f32 %v3579_v51, %v2380_v15 }
 0x196   :  { %v2607_v35 = vmul.f32 %v5041_v30, %v2550_v23  ;;  %v2561_v1 = vadd.f32 %v3650_v32, %v2464_v17  ;;  %v2632_v59 = vadd.f32 %v5055_v48, %v2609_v62  ;;  %v3689_v53 = vpop.f32.mrf.mxu1  ;;  %v2375_v33 = vadd.f32 %v3512_v7, %v4927_v25 }
 0x197   :  { %3325 = vst [vmem:[%s5182_s5 + $0x8] sm:$0xff] %v3253_v42   ;;  %v3248_v14 = vpack.c.bf16 %v2643_v57, %v2642_v10  ;;  %v2552_v18 = vpop.f32.mrf.mxu0  ;;  %3335 = vst [vmem:[%s5179_s6 + $0x20] sm:$0xff] %v3308_v6   ;;  %v2469_v63 = vadd.f32 %v3573_v12, %v2372_v46  ;;  %v3521_v58 = vadd.f32 %v5006_v47, %v5002_v21  ;;  %v5195_v57 = vld [vmem:[#allocation4_spill] sm:$0xff]  ;;  %v5198_v46 = vld [vmem:[#allocation3_spill] sm:$0xff] }
 0x198   :  { %v2610_v49 = vmul.f32 %v5041_v30, %v2561_v1  ;;  %v2553_v27 = vadd.f32 %v2552_v18, %v4964_v55  ;;  %v2630_v5 = vadd.f32 %v5055_v48, %v2607_v35  ;;  %v2884_v22 = vpop.f32.mrf.mxu1  ;;  %v2648_v11 = vmax.f32 %v2632_v59, 0.0  ;;  %v5200_v59 = vld [vmem:[#allocation7_spill] sm:$0xff] }
 0x199   :  { %3249 = vst [vmem:[%s5182_s5] sm:$0xff] %v3248_v14   ;;  %v2480_v50 = vadd.f32 %v3582_v3, %v2383_v13  ;;  %v3591_v12 = vadd.f32 %v5018_v61, %v5016_v41  ;;  %v3530_v38 = vadd.f32 %v5030_v43, %v5028_v24  ;;  %v2472_v47 = vadd.f32 %v3576_v37, %v2375_v33  ;;  %v5193_v61 = vld [vmem:[#allocation6_spill] sm:$0xff]  ;;  %v5194_v24 = vld [vmem:[#allocation8_spill] sm:$0xff]  ;;  %v5199_v14 = vld [vmem:[#allocation5_spill] sm:$0xff] }
 0x19a   :  { %v2633_v55 = vadd.f32 %v5055_v48, %v2610_v49  ;;  %v2608_v45 = vmul.f32 %v5041_v30, %v2553_v27  ;;  %v3690_v31 = vpop.f32.mrf.mxu1  ;;  %v2646_v0 = vmax.f32 %v2630_v5, 0.0  ;;  %v2396_v51 = vadd.f32 %v3527_v9, %v4937_v56 }
 0x19b   :  { %v3653_v54 = vpop.f32.mrf.mxu0  ;;  %v3323_v17 = vpack.c.bf16 %v3690_v31, %v3689_v53  ;;  %v2388_v8 = vadd.f32 %v3521_v58, %v4933_v39  ;;  %v3585_v41 = vadd.f32 %v5004_v28, %v5000_v19  ;;  %v3524_v43 = vadd.f32 %v5194_v24, %v5193_v61  ;;  %v5196_v19 = vld [vmem:[#allocation9_spill] sm:$0xff]  ;;  %v5197_v28 = vld [vmem:[#allocation10_spill] sm:$0xff] }
 0x19c   :  { %v2649_v60 = vmax.f32 %v2633_v55, 0.0  ;;  %v2631_v29 = vadd.f32 %v5055_v48, %v2608_v45  ;;  %v2574_v16 = vadd.f32 %v3653_v54, %v2477_v4  ;;  %v2887_v44 = vpop.f32.mrf.mxu1  ;;  %v2399_v32 = vadd.f32 %v3530_v38, %v5195_v57 }
 0x19d   :  { %v2565_v26 = vpop.f32.mrf.mxu0  ;;  %3338 = vst [vmem:[%s5179_s6 + $0x38] sm:$0xff] %v3323_v17   ;;  %v3318_v20 = vpack.c.bf16 %v2887_v44, %v2884_v22  ;;  %v3594_v40 = vadd.f32 %v5197_v28, %v5196_v19  ;;  %v2493_v6 = vadd.f32 %v3591_v12, %v2396_v51  ;;  %v2391_v7 = vadd.f32 %v3524_v43, %v5198_v46 }
 0x19e   :  { %v3263_v25 = vpack.c.bf16 %v2649_v60, %v2648_v11  ;;  %v2647_v52 = vmax.f32 %v2631_v29, 0.0  ;;  %v2613_v34 = vmul.f32 %v5041_v30, %v2574_v16  ;;  %v2566_v36 = vadd.f32 %v2565_v26, %v2469_v63 }
 0x19f   :  { %v3654_v21 = vpop.f32.mrf.mxu0  ;;  %3337 = vst [vmem:[%s5179_s6 + $0x30] sm:$0xff] %v3318_v20   ;;  %v3588_v18 = vadd.f32 %v5200_v59, %v5199_v14  ;;  %v2485_v49 = vadd.f32 %v3585_v41, %v2388_v8  ;;  %v2496_v55 = vadd.f32 %v3594_v40, %v2399_v32 }
 0x1a0   :  { %3327 = vst [vmem:[%s5182_s5 + $0x18] sm:$0xff] %v3263_v25   ;;  %v3258_v62 = vpack.c.bf16 %v2647_v52, %v2646_v0  ;;  %v2611_v23 = vmul.f32 %v5041_v30, %v2566_v36  ;;  %v2577_v2 = vadd.f32 %v3654_v21, %v2480_v50  ;;  %v2636_v56 = vadd.f32 %v5055_v48, %v2613_v34 }
 0x1a1   :  { %v2568_v10 = vpop.f32.mrf.mxu0  ;;  %v2488_v60 = vadd.f32 %v3588_v18, %v2391_v7 }
 0x1a2   :  { %3326 = vst [vmem:[%s5182_s5 + $0x10] sm:$0xff] %v3258_v62   ;;  %v2614_v42 = vmul.f32 %v5041_v30, %v2577_v2  ;;  %v2569_v39 = vadd.f32 %v2568_v10, %v2472_v47  ;;  %v2634_v15 = vadd.f32 %v5055_v48, %v2611_v23  ;;  %v2652_v27 = vmax.f32 %v2636_v56, 0.0 }
 0x1a4   :  { %v2637_v35 = vadd.f32 %v5055_v48, %v2614_v42  ;;  %v2612_v1 = vmul.f32 %v5041_v30, %v2569_v39  ;;  %v2650_v22 = vmax.f32 %v2634_v15, 0.0 }
 0x1a5   :  { %v3657_v53 = vpop.f32.mrf.mxu0 }
 0x1a6   :  { %v2653_v13 = vmax.f32 %v2637_v35, 0.0  ;;  %v2635_v3 = vadd.f32 %v5055_v48, %v2612_v1  ;;  %v2590_v5 = vadd.f32 %v3657_v53, %v2493_v6 }
 0x1a7   :  { %v2581_v37 = vpop.f32.mrf.mxu0 }
 0x1a8   :  { %v3273_v45 = vpack.c.bf16 %v2653_v13, %v2652_v27  ;;  %v2651_v4 = vmax.f32 %v2635_v3, 0.0  ;;  %v2617_v33 = vmul.f32 %v5041_v30, %v2590_v5  ;;  %v2582_v9 = vadd.f32 %v2581_v37, %v2485_v49 }
 0x1a9   :  { %v3658_v11 = vpop.f32.mrf.mxu0 }
 0x1aa   :  { %3329 = vst [vmem:[%s5182_s5 + $0x28] sm:$0xff] %v3273_v45   ;;  %v3268_v54 = vpack.c.bf16 %v2651_v4, %v2650_v22  ;;  %v2615_v63 = vmul.f32 %v5041_v30, %v2582_v9  ;;  %v2593_v31 = vadd.f32 %v3658_v11, %v2496_v55  ;;  %v2640_v16 = vadd.f32 %v5055_v48, %v2617_v33 }
 0x1ab   :  { %v2584_v29 = vpop.f32.mrf.mxu0 }
 0x1ac   :  { %3328 = vst [vmem:[%s5182_s5 + $0x20] sm:$0xff] %v3268_v54   ;;  %v2618_v17 = vmul.f32 %v5041_v30, %v2593_v31  ;;  %v2585_v58 = vadd.f32 %v2584_v29, %v2488_v60  ;;  %v2638_v0 = vadd.f32 %v5055_v48, %v2615_v63  ;;  %v2656_v44 = vmax.f32 %v2640_v16, 0.0 }
 0x1ae   :  { %v2641_v26 = vadd.f32 %v5055_v48, %v2618_v17  ;;  %v2616_v50 = vmul.f32 %v5041_v30, %v2585_v58  ;;  %v2654_v34 = vmax.f32 %v2638_v0, 0.0 }
 0x1b0   :  { %v2657_v25 = vmax.f32 %v2641_v26, 0.0  ;;  %v2639_v52 = vadd.f32 %v5055_v48, %v2616_v50 }
 0x1b2   :  { %v3283_v36 = vpack.c.bf16 %v2657_v25, %v2656_v44  ;;  %v2655_v12 = vmax.f32 %v2639_v52, 0.0 }
 0x1b4   :  { %3331 = vst [vmem:[%s5182_s5 + $0x38] sm:$0xff] %v3283_v36   ;;  %v3278_v38 = vpack.c.bf16 %v2655_v12, %v2654_v34 }
 0x1b6   :  { %3330 = vst [vmem:[%s5182_s5 + $0x30] sm:$0xff] %v3278_v38  }

// kernel: network_block_fwd.6
= control target key start
LH: loop header
LB: loop body
LE: loop exit
PB: predicated region body
PF: predicated region fallthrough
CT: control target
= control target key end

     0   :  { %v4352_v1 = vmov 0   ;;  %vm872_vm0 = vcmask 1042432   ;;  %vm873_vm1 = vcmask 1046532   ;;  %vm384_vm2 = vsmask.f32 7938  ;;  %s5244_s1 = inlined_call_operand.vmem [shape: bf16[1152,128], index: 1, kind: input, shape index: {}]   ;;  %s5245_s0 = inlined_call_operand.vmem [shape: bf16[2,8,8,128], index: 0, kind: input, shape index: {}]   ;;  %s5246_s2 = inlined_call_operand.vmem [shape: f32[1,128], index: 2, kind: input, shape index: {}]   ;;  %s5247_s3 = inlined_call_operand.vmem [shape: f32[1,128], index: 3, kind: input, shape index: {}]   ;;  %s5248_s4 = inlined_call_operand.vmem [shape: f32[1,128], index: 4, kind: input, shape index: {}]   ;;  %s5249_s5 = inlined_call_operand.vmem [shape: f32[1,128], index: 5, kind: input, shape index: {}]   ;;  %s5250_s6 = inlined_call_operand.vmem [shape: bf16[2,8,8,128], index: 6, kind: output, shape index: {}]  }
   0x1   :  { %v4174_v0 = vld [vmem:[%s5244_s1 + $0xf8] sm:$0xff]   ;;  %24 = vst [vmem:[#allocation2] sm:$0xf] %v4352_v1  ;;  %25 = vst [vmem:[#allocation2 + $0x4] sm:$0x1] %v4352_v1  ;;  %v4176_v3 = vld [vmem:[%s5244_s1 + $0xf0] sm:$0xff]  }
   0x2   :  { %26 = vst [vmem:[#allocation2 + $0x8] sm:$0xf] %v4352_v1  ;;  %27 = vst [vmem:[#allocation2 + $0xc] sm:$0x1] %v4352_v1  ;;  %v4175_v2 = vld [vmem:[%s5244_s1 + $0xb8] sm:$0xff]   ;;  %3917 = vmatprep.subr.bf16.mxu1 %v4174_v0  ;;  %v4178_v5 = vld [vmem:[%s5244_s1 + $0xb0] sm:$0xff]  }
   0x3   :  { %28 = vst [vmem:[#allocation2 + $0x10] sm:$0xf] %v4352_v1  ;;  %29 = vst [vmem:[#allocation2 + $0x14] sm:$0x1] %v4352_v1  ;;  %3918 = vmatpush3.bf16.msra.mxu1 %v4175_v2  ;;  %v4177_v4 = vld [vmem:[%s5244_s1 + $0x78] sm:$0xff]   ;;  %v4180_v7 = vld [vmem:[%s5244_s1 + $0xe8] sm:$0xff]  }
   0x4   :  { %30 = vst [vmem:[#allocation2 + $0x18] sm:$0xf] %v4352_v1  ;;  %31 = vst [vmem:[#allocation2 + $0x1c] sm:$0x1] %v4352_v1  ;;  %3919 = vmatprep.subr.bf16.mxu1 %v4176_v3  ;;  %3853 = vmatprep.subr.bf16.mxu0 %v4177_v4  ;;  %v4179_v6 = vld [vmem:[%s5244_s1 + $0x38] sm:$0xff]   ;;  %v4181_v8 = vld [vmem:[%s5244_s1 + $0x70] sm:$0xff]  }
   0x5   :  { %32 = vst [vmem:[#allocation2 + $0x20] sm:$0xf] %v4352_v1  ;;  %33 = vst [vmem:[#allocation2 + $0x24] sm:$0x1] %v4352_v1  ;;  %3854 = vmatpush3.bf16.msra.mxu0 %v4179_v6  ;;  %v4182_v9 = vld [vmem:[%s5244_s1 + $0xa8] sm:$0xff]   ;;  %v4183_v10 = vld [vmem:[%s5244_s1 + $0x30] sm:$0xff]  }
   0x6   :  { %34 = vst [vmem:[#allocation2 + $0x28] sm:$0xf] %v4352_v1  ;;  %35 = vst [vmem:[#allocation2 + $0x2c] sm:$0x1] %v4352_v1  ;;  %3855 = vmatprep.subr.bf16.mxu0 %v4181_v8  ;;  %v4184_v11 = vld [vmem:[%s5244_s1 + $0xe0] sm:$0xff]   ;;  %v4185_v12 = vld [vmem:[%s5244_s1 + $0x68] sm:$0xff]  }
   0x7   :  { %36 = vst [vmem:[#allocation2 + $0x30] sm:$0xf] %v4352_v1  ;;  %37 = vst [vmem:[#allocation2 + $0x34] sm:$0x1] %v4352_v1  ;;  %3920 = vmatpush3.bf16.msra.mxu1 %v4178_v5  ;;  %v4186_v13 = vld [vmem:[%s5244_s1 + $0xa0] sm:$0xff]   ;;  %v4187_v14 = vld [vmem:[%s5244_s1 + $0x28] sm:$0xff]  }
   0x8   :  { %38 = vst [vmem:[#allocation2 + $0x38] sm:$0xf] %v4352_v1  ;;  %39 = vst [vmem:[#allocation2 + $0x3c] sm:$0x1] %v4352_v1  ;;  %3921 = vmatprep.subr.bf16.mxu1 %v4180_v7  ;;  %v4188_v15 = vld [vmem:[%s5244_s1 + $0xd8] sm:$0xff]   ;;  %v4189_v16 = vld [vmem:[%s5244_s1 + $0x60] sm:$0xff]  }
   0x9   :  { %40 = vst [vmem:[#allocation2 + $0x40] sm:$0xf] %v4352_v1  ;;  %41 = vst [vmem:[#allocation2 + $0x44] sm:$0x1] %v4352_v1  ;;  %3856 = vmatpush3.bf16.msra.mxu0 %v4183_v10  ;;  %v4190_v17 = vld [vmem:[%s5244_s1 + $0x98] sm:$0xff]   ;;  %v4191_v18 = vld [vmem:[%s5244_s1 + $0x20] sm:$0xff]  }
   0xa   :  { %42 = vst [vmem:[#allocation2 + $0x48] sm:$0xf] %v4352_v1  ;;  %43 = vst [vmem:[#allocation2 + $0x4c] sm:$0x1] %v4352_v1  ;;  %3857 = vmatprep.subr.bf16.mxu0 %v4185_v12  ;;  %v4192_v19 = vld [vmem:[%s5244_s1 + $0xd0] sm:$0xff]   ;;  %v4193_v20 = vld [vmem:[%s5244_s1 + $0x58] sm:$0xff]  }
   0xb   :  { %44 = vst [vmem:[#allocation2 + $0x50] sm:$0xf] %v4352_v1  ;;  %45 = vst [vmem:[#allocation2 + $0x54] sm:$0x1] %v4352_v1  ;;  %3922 = vmatpush3.bf16.msra.mxu1 %v4182_v9  ;;  %v4194_v21 = vld [vmem:[%s5244_s1 + $0x90] sm:$0xff]   ;;  %v4195_v22 = vld [vmem:[%s5244_s1 + $0x18] sm:$0xff]  }
   0xc   :  { %46 = vst [vmem:[#allocation2 + $0x58] sm:$0xf] %v4352_v1  ;;  %47 = vst [vmem:[#allocation2 + $0x5c] sm:$0x1] %v4352_v1  ;;  %3923 = vmatprep.subr.bf16.mxu1 %v4184_v11  ;;  %v4196_v23 = vld [vmem:[%s5244_s1 + $0xc8] sm:$0xff]   ;;  %v4197_v24 = vld [vmem:[%s5244_s1 + $0x50] sm:$0xff]  }
   0xd   :  { %48 = vst [vmem:[#allocation2 + $0x60] sm:$0xf] %v4352_v1  ;;  %49 = vst [vmem:[#allocation2 + $0x64] sm:$0x1] %v4352_v1  ;;  %3858 = vmatpush3.bf16.msra.mxu0 %v4187_v14  ;;  %v4198_v25 = vld [vmem:[%s5244_s1 + $0x88] sm:$0xff]   ;;  %v4199_v26 = vld [vmem:[%s5244_s1 + $0x10] sm:$0xff]  }
   0xe   :  { %50 = vst [vmem:[#allocation2 + $0x68] sm:$0xf] %v4352_v1  ;;  %51 = vst [vmem:[#allocation2 + $0x6c] sm:$0x1] %v4352_v1  ;;  %3859 = vmatprep.subr.bf16.mxu0 %v4189_v16  ;;  %v4200_v27 = vld [vmem:[%s5244_s1 + $0xc0] sm:$0xff]   ;;  %v4201_v28 = vld [vmem:[%s5244_s1 + $0x48] sm:$0xff]  }
   0xf   :  { %52 = vst [vmem:[#allocation2 + $0x70] sm:$0xf] %v4352_v1  ;;  %53 = vst [vmem:[#allocation2 + $0x74] sm:$0x1] %v4352_v1  ;;  %3924 = vmatpush3.bf16.msra.mxu1 %v4186_v13  ;;  %v4202_v29 = vld [vmem:[%s5244_s1 + $0x80] sm:$0xff]   ;;  %v4203_v30 = vld [vmem:[%s5244_s1 + $0x8] sm:$0xff]  }
  0x10   :  { %54 = vst [vmem:[#allocation2 + $0x78] sm:$0xf] %v4352_v1  ;;  %55 = vst [vmem:[#allocation2 + $0x7c] sm:$0x1] %v4352_v1  ;;  %3925 = vmatprep.subr.bf16.mxu1 %v4188_v15  ;;  %v4481_v31 = vld [vmem:[%s5246_s2] ss:$0 sm:$0xff] }
  0x11   :  { %56 = vst [vmem:[#allocation2 + $0x80] sm:$0xf] %v4352_v1  ;;  %57 = vst [vmem:[#allocation2 + $0x84] sm:$0x1] %v4352_v1  ;;  %3860 = vmatpush3.bf16.msra.mxu0 %v4191_v18  ;;  %v3768_v32 = vld [vmem:[%s5245_s0] sm:$0xff]   ;;  %vm383_vm3 = vcmask 1043456  }
  0x12   :  { %58 = vst [vmem:[#allocation2 + $0x88] sm:$0xf] %v4352_v1  ;;  %59 = vst [vmem:[#allocation2 + $0x8c] sm:$0x1] %v4352_v1  ;;  %3861 = vmatprep.subr.bf16.mxu0 %v4193_v20  ;;  %v3769_v33 = vunpack.c.l.bf16 %v3768_v32  ;;  %v3770_v34 = vunpack.c.h.bf16 %v3768_v32  ;;  %v4489_v35 = vld [vmem:[%s5247_s3] ss:$0 sm:$0xff] }
  0x13   :  { %60 = vst [vmem:[#allocation2 + $0x90] sm:$0xf] %v4352_v1  ;;  %61 = vst [vmem:[#allocation2 + $0x94] sm:$0x1] %v4352_v1  ;;  %3926 = vmatpush3.bf16.msra.mxu1 %v4190_v17  ;;  %v808_v36 = vld [vmem:[#allocation2] sm:$0xe] }
  0x14   :  { %62 = vst [vmem:[#allocation2 + $0x98] sm:$0xf] %v4352_v1  ;;  %63 = vst [vmem:[#allocation2 + $0x9c] sm:$0x1] %v4352_v1  ;;  %3927 = vmatprep.subr.bf16.mxu1 %v4192_v19  ;;  %v104_v37 = vmul.f32 %v3769_v33, %v4481_v31  ;;  %v105_v38 = vmul.f32 %v3770_v34, %v4481_v31  ;;  %vm390_vm4 = vsmask.f32 256 }
  0x15   :  { %3862 = vmatpush3.bf16.msra.mxu0 %v4195_v22  ;;  %v809_v39 = vld [vmem:[#allocation2 + $0x4] sm:$0x1]  ;;  %vm4493_vm5 = vmor %vm872_vm0, %vm873_vm1  ;;  %v3557_v41 = vrot.slane %v808_v36, 9  ;;  %vm389_vm6 = vcmask 1040384   ;;  %v485_v47 = vld [vmem:[#allocation2] sm:$0xf] }
  0x16   :  { %3863 = vmatprep.subr.bf16.mxu0 %v4197_v24  ;;  %v877_v42 = vrot.slane %v809_v39, 5  ;;  %v4207_v43 = vld [vmem:[%s5244_s1 + $0x40] sm:$0xff]   ;;  %v126_v44 = vadd.f32 %v4489_v35, %v104_v37  ;;  %v127_v45 = vadd.f32 %v4489_v35, %v105_v38  ;;  %501 = vst [vmem:[#allocation3] sm:$0xf] %v485_v47  ;;  %vm549_vm7 = vsmask.f32 3328  ;;  %vm4515_vm9 = vmand %vm383_vm3, %vm384_vm2 }
  0x17   :  { %3928 = vmatpush3.bf16.msra.mxu1 %v4194_v21  ;;  %v4208_v46 = vld [vmem:[%s5244_s1] sm:$0xff]   ;;  %v4212_v56 = vld [vmem:[%s5244_s1 + $0x178] sm:$0xff]   ;;  %vm550_vm8 = vsmask.f32 7440  ;;  %v386_v3 = vld [vmem:[#allocation2 + $0x8] sm:$0xf] }
  0x18   :  { %3929 = vmatprep.subr.bf16.mxu1 %v4196_v23  ;;  %v878_v48 = vsel %vm4493_vm5, %v3557_v41, %v877_v42  ;;  %v517_v49 = vld [vmem:[#allocation2] sm:$0xf]  ;;  %v518_v50 = vld [vmem:[#allocation2 + $0x4] sm:$0x1]  ;;  %v142_v51 = vmax.f32 %v126_v44, 0.0  ;;  %v143_v52 = vmax.f32 %v127_v45, 0.0  ;;  %vm4524_vm10 = vmor %vm549_vm7, %vm550_vm8 }
  0x19   :  { %3864 = vmatpush3.bf16.msra.mxu0 %v4199_v26  ;;  %955 = vst [vmem:[#allocation3 + $0x8] sm:$0xf] %v878_v48  ;;  %v553_v53 = vshrl.u32 %v517_v49, 16  ;;  %v556_v54 = vshll.u32 %v517_v49, 16  ;;  %v562_v55 = vshll.u32 %v518_v50, 16  ;;  %v4213_v61 = vld [vmem:[%s5244_s1 + $0x1f8] sm:$0xff]   ;;  %vm4530_vm11 = vmand %vm389_vm6, %vm390_vm4 }
  0x1a   :  { %3865 = vmatprep.subr.bf16.mxu0 %v4201_v28  ;;  %v3751_v57 = vpack.c.bf16 %v142_v51, %v142_v51  ;;  %v3752_v58 = vpack.c.bf16 %v143_v52, %v143_v52  ;;  %v3839_v6 = vld [vmem:[%s5245_s0 + $0x8] sm:$0xff]   ;;  %v395_v10 = vld [vmem:[#allocation2 + $0x10] sm:$0xf]  ;;  %v398_v16 = vld [vmem:[#allocation2 + $0x14] sm:$0x1] }
  0x1b   :  { %3930 = vmatpush3.bf16.msra.mxu1 %v4198_v25  ;;  %v555_v59 = vrot.slane %v553_v53, 4  ;;  %v558_v60 = vrot.slane %v556_v54, 5  ;;  %v564_v5 = vrot.slane %v562_v55, 5  ;;  %v392_v9 = vld [vmem:[#allocation2 + $0xc] sm:$0x1]  ;;  %v3773_v12 = vunpack.c.l.bf16 %v3839_v6 }
  0x1c   :  { %3931 = vmatprep.subr.bf16.mxu1 %v4200_v27  ;;  %v223_v62 = vshrl.u32 %v3751_v57, 16  ;;  %v226_v63 = vshll.u32 %v3751_v57, 16  ;;  %v231_v0 = vshrl.u32 %v3752_v58, 16  ;;  %v234_v1 = vshll.u32 %v3752_v58, 16  ;;  %v401_v53 = vld [vmem:[#allocation2 + $0x18] sm:$0xf] }
  0x1d   :  { %3866 = vmatpush3.bf16.msra.mxu0 %v4203_v30  ;;  %v559_v4 = vor.u32 %v558_v60, %v555_v59  ;;  %v3774_v13 = vunpack.c.h.bf16 %v3839_v6  ;;  %v106_v22 = vmul.f32 %v3773_v12, %v4481_v31  ;;  %v3840_v30 = vld [vmem:[%s5245_s0 + $0x10] sm:$0xff]   ;;  %v404_v54 = vld [vmem:[#allocation2 + $0x1c] sm:$0x1]  ;;  %v407_v55 = vld [vmem:[#allocation2 + $0x20] sm:$0xf] }
  0x1e   :  { %3867 = vmatprep.subr.bf16.mxu0 %v4207_v43  ;;  %v225_v7 = vrot.slane %v223_v62, 7  ;;  %v233_v8 = vrot.slane %v231_v0, 7  ;;  %v3777_v32 = vunpack.c.l.bf16 %v3840_v30  ;;  %v3778_v33 = vunpack.c.h.bf16 %v3840_v30 }
  0x1f   :  { %3932 = vmatpush3.bf16.msra.mxu1 %v4202_v29  ;;  %v560_v15 = vrot.slane %v559_v4, 4  ;;  %v107_v23 = vmul.f32 %v3774_v13, %v4481_v31  ;;  %v128_v28 = vadd.f32 %v4489_v35, %v106_v22  ;;  %v410_v4 = vld [vmem:[#allocation2 + $0x24] sm:$0x1] }
  0x20   :  { %4045 = vmatprep.subr.bf16.mxu1 %v4213_v61  ;;  %v228_v17 = vor.u32 %v226_v63, %v225_v7  ;;  %v229_v18 = vrot.slane %v225_v7, 4  ;;  %v236_v19 = vor.u32 %v234_v1, %v233_v8  ;;  %v237_v20 = vrot.slane %v233_v8, 4 }
  0x21   :  { %3868 = vmatpush3.bf16.msra.mxu0 %v4208_v46  ;;  %v565_v21 = vsel %vm4524_vm10, %v560_v15, %v564_v5  ;;  %v129_v29 = vadd.f32 %v4489_v35, %v107_v23  ;;  %v144_v34 = vmax.f32 %v128_v28, 0.0  ;;  %v108_v39 = vmul.f32 %v3777_v32, %v4481_v31 }
  0x22   :  { %3981 = vmatprep.subr.bf16.mxu0 %v4212_v56  ;;  %v387_v24 = vsel %vm4515_vm9, %v228_v17, %v386_v3  ;;  %v393_v25 = vsel %vm4530_vm11, %v229_v18, %v392_v9  ;;  %v396_v26 = vsel %vm4515_vm9, %v236_v19, %v395_v10  ;;  %792 = vst [vmem:[#allocation3 + $0x4] sm:$0xf] %v565_v21 }
  0x23   :  { %v399_v27 = vsel %vm4530_vm11, %v237_v20, %v398_v16  ;;  %388 = vst [vmem:[#allocation2 + $0x8] sm:$0xf] %v387_v24  ;;  %394 = vst [vmem:[#allocation2 + $0xc] sm:$0x1] %v393_v25  ;;  %v145_v36 = vmax.f32 %v129_v29, 0.0  ;;  %v3753_v37 = vpack.c.bf16 %v144_v34, %v144_v34  ;;  %v109_v41 = vmul.f32 %v3778_v33, %v4481_v31 }
  0x24   :  { %397 = vst [vmem:[#allocation2 + $0x10] sm:$0xf] %v396_v26  ;;  %400 = vst [vmem:[#allocation2 + $0x14] sm:$0x1] %v399_v27  ;;  %v130_v60 = vadd.f32 %v4489_v35, %v108_v39  ;;  %v3841_v27 = vld [vmem:[%s5245_s0 + $0x18] sm:$0xff]  }
  0x25   :  { %v3754_v38 = vpack.c.bf16 %v145_v36, %v145_v36  ;;  %v239_v42 = vshrl.u32 %v3753_v37, 16  ;;  %v242_v43 = vshll.u32 %v3753_v37, 16  ;;  %v131_v61 = vadd.f32 %v4489_v35, %v109_v41  ;;  %v4215_v37 = vld [vmem:[%s5244_s1 + $0x1b8] sm:$0xff]  }
  0x26   :  { %v146_v29 = vmax.f32 %v130_v60, 0.0  ;;  %v3781_v41 = vunpack.c.l.bf16 %v3841_v27 }
  0x27   :  { %v247_v44 = vshrl.u32 %v3754_v38, 16  ;;  %v250_v45 = vshll.u32 %v3754_v38, 16  ;;  %v241_v58 = vrot.slane %v239_v42, 7  ;;  %v147_v30 = vmax.f32 %v131_v61, 0.0 }
  0x28   :  { %v3755_v38 = vpack.c.bf16 %v146_v29, %v146_v29  ;;  %v4242_v29 = vld [vmem:[%s5244_s1 + $0x1e0] sm:$0xff]  }
  0x29   :  { %v249_v59 = vrot.slane %v247_v44, 7  ;;  %v244_v5 = vor.u32 %v242_v43, %v241_v58  ;;  %v245_v6 = vrot.slane %v241_v58, 4  ;;  %v3756_v39 = vpack.c.bf16 %v147_v30, %v147_v30 }
  0x2a   :  { %v810_v46 = vld [vmem:[#allocation2 + $0x8] sm:$0xe]  ;;  %v811_v47 = vld [vmem:[#allocation2 + $0xc] sm:$0x1] }
  0x2b   :  { %v971_v48 = vld [vmem:[#allocation2 + $0x8] sm:$0xf]  ;;  %v3558_v49 = vrot.slane %v810_v46, 9  ;;  %v881_v50 = vrot.slane %v811_v47, 5  ;;  %v972_v51 = vld [vmem:[#allocation2 + $0x10] sm:$0xf]  ;;  %v252_v7 = vor.u32 %v250_v45, %v249_v59  ;;  %v402_v18 = vsel %vm4515_vm9, %v244_v5, %v401_v53 }
  0x2c   :  { %987 = vst [vmem:[#allocation3 + $0xc] sm:$0xf] %v971_v48  ;;  %v486_v52 = vld [vmem:[#allocation2 + $0x8] sm:$0xf]  ;;  %988 = vst [vmem:[#allocation3 + $0x30] sm:$0xf] %v972_v51  ;;  %v405_v19 = vsel %vm4530_vm11, %v245_v6, %v404_v54  ;;  %v3782_v47 = vunpack.c.h.bf16 %v3841_v27 }
  0x2d   :  { %502 = vst [vmem:[#allocation3 + $0x24] sm:$0xf] %v486_v52  ;;  %v519_v56 = vld [vmem:[#allocation2 + $0x8] sm:$0xf]  ;;  %v520_v57 = vld [vmem:[#allocation2 + $0xc] sm:$0x1]  ;;  %v882_v62 = vsel %vm4493_vm5, %v3558_v49, %v881_v50  ;;  %v408_v20 = vsel %vm4515_vm9, %v252_v7, %v407_v55  ;;  %v110_v55 = vmul.f32 %v3781_v41, %v4481_v31 }
  0x2e   :  { %v567_v63 = vshrl.u32 %v519_v56, 16  ;;  %v570_v0 = vshll.u32 %v519_v56, 16  ;;  %v576_v1 = vshll.u32 %v520_v57, 16  ;;  %v812_v3 = vld [vmem:[#allocation2 + $0x10] sm:$0xe]  ;;  %v253_v8 = vrot.slane %v249_v59, 4 }
  0x2f   :  { %956 = vst [vmem:[#allocation3 + $0x2c] sm:$0xf] %v882_v62  ;;  %v813_v9 = vld [vmem:[#allocation2 + $0x14] sm:$0x1]  ;;  %v487_v10 = vld [vmem:[#allocation2 + $0x10] sm:$0xf] }
  0x30   :  { %v569_v12 = vrot.slane %v567_v63, 4  ;;  %v572_v13 = vrot.slane %v570_v0, 5  ;;  %v578_v15 = vrot.slane %v576_v1, 5  ;;  %v3559_v16 = vrot.slane %v812_v3, 9  ;;  %503 = vst [vmem:[#allocation3 + $0x48] sm:$0xf] %v487_v10 }
  0x31   :  { %v521_v17 = vld [vmem:[#allocation2 + $0x10] sm:$0xf]  ;;  %v885_v21 = vrot.slane %v813_v9, 5  ;;  %v522_v22 = vld [vmem:[#allocation2 + $0x14] sm:$0x1]  ;;  %v411_v32 = vsel %vm4530_vm11, %v253_v8, %v410_v4  ;;  %v255_v49 = vshrl.u32 %v3755_v38, 16  ;;  %v111_v4 = vmul.f32 %v3782_v47, %v4481_v31 }
  0x32   :  { %v573_v23 = vor.u32 %v572_v13, %v569_v12  ;;  %403 = vst [vmem:[#allocation2 + $0x18] sm:$0xf] %v402_v18  ;;  %406 = vst [vmem:[#allocation2 + $0x1c] sm:$0x1] %v405_v19  ;;  %v581_v24 = vshrl.u32 %v521_v17, 16  ;;  %v584_v25 = vshll.u32 %v521_v17, 16  ;;  %v132_v10 = vadd.f32 %v4489_v35, %v110_v55 }
  0x33   :  { %409 = vst [vmem:[#allocation2 + $0x20] sm:$0xf] %v408_v20  ;;  %v590_v26 = vshll.u32 %v522_v22, 16  ;;  %v886_v28 = vsel %vm4493_vm5, %v3559_v16, %v885_v21  ;;  %412 = vst [vmem:[#allocation2 + $0x24] sm:$0x1] %v411_v32  ;;  %v4222_v48 = vld [vmem:[%s5244_s1 + $0x1f0] sm:$0xff]  }
  0x34   :  { %v574_v33 = vrot.slane %v573_v23, 4  ;;  %957 = vst [vmem:[#allocation3 + $0x50] sm:$0xf] %v886_v28  ;;  %v583_v34 = vrot.slane %v581_v24, 4  ;;  %v586_v36 = vrot.slane %v584_v25, 5  ;;  %v258_v50 = vshll.u32 %v3755_v38, 16 }
  0x35   :  { %v4206_v43 = vld [vmem:[#allocation3 + $0xc] ss:$36 sps:$4 sm:$0xff]   ;;  %v592_v46 = vrot.slane %v590_v26, 5  ;;  %v263_v51 = vshrl.u32 %v3756_v39, 16  ;;  %v266_v54 = vshll.u32 %v3756_v39, 16  ;;  %v257_v7 = vrot.slane %v255_v49, 7 }
  0x36   :  { %v4204_v42 = vld [vmem:[#allocation3 + $0x8] ss:$36 sps:$4 sm:$0xff]   ;;  %v579_v44 = vsel %vm4524_vm10, %v574_v33, %v578_v15  ;;  %v587_v45 = vor.u32 %v586_v36, %v583_v34  ;;  %3085 = vmatprep.mubr.bf16.mxu1 %v4206_v43  ;;  %v4225_v53 = vld [vmem:[%s5244_s1 + $0x1b0] sm:$0xff]   ;;  %v4214_v12 = vld [vmem:[%s5244_s1 + $0x138] sm:$0xff]   ;;  %v133_v34 = vadd.f32 %v4489_v35, %v111_v4 }
  0x37   :  { %793 = vst [vmem:[#allocation3 + $0x28] sm:$0xf] %v579_v44  ;;  %3086 = vmatmul.mubr.bf16.vlgmr.msra.gmra.mxu1 %v4204_v42  ;;  %v4232_v59 = vld [vmem:[%s5244_s1 + $0x1e8] sm:$0xff]   ;;  %v265_v8 = vrot.slane %v263_v51, 7  ;;  %v419_v9 = vld [vmem:[#allocation2 + $0x30] sm:$0xf]  ;;  %v260_v22 = vor.u32 %v258_v50, %v257_v7 }
  0x38   :  { %v588_v52 = vrot.slane %v587_v45, 4  ;;  %4046 = vmatpush3.bf16.msra.mxu1 %v4215_v37  ;;  %v413_v1 = vld [vmem:[#allocation2 + $0x28] sm:$0xf]  ;;  %v416_v3 = vld [vmem:[#allocation2 + $0x2c] sm:$0x1]  ;;  %v4600_v20 = vld [vmem:[%s5245_s0 + $0x20] sm:$0xff]  }
  0x39   :  { %v814_v56 = vld [vmem:[#allocation2 + $0x18] sm:$0xe]  ;;  %v815_v57 = vld [vmem:[#allocation2 + $0x1c] sm:$0x1]  ;;  %4047 = vmatprep.subr.bf16.mxu1 %v4222_v48  ;;  %v4235_v19 = vld [vmem:[%s5244_s1 + $0x1a8] sm:$0xff]   ;;  %v261_v23 = vrot.slane %v257_v7, 4  ;;  %v268_v24 = vor.u32 %v266_v54, %v265_v8  ;;  %v3785_v36 = vunpack.c.l.bf16 %v4600_v20  ;;  %v3786_v37 = vunpack.c.h.bf16 %v4600_v20 }
  0x3a   :  { %v973_v58 = vld [vmem:[#allocation2 + $0x18] sm:$0xf]  ;;  %v3560_v60 = vrot.slane %v814_v56, 9  ;;  %v889_v61 = vrot.slane %v815_v57, 5  ;;  %v974_v62 = vld [vmem:[#allocation2 + $0x20] sm:$0xf]  ;;  %v593_v0 = vsel %vm4524_vm10, %v588_v52, %v592_v46  ;;  %v414_v41 = vsel %vm4515_vm9, %v260_v22, %v413_v1 }
  0x3b   :  { %989 = vst [vmem:[#allocation3 + $0x54] sm:$0xf] %v973_v58  ;;  %v488_v63 = vld [vmem:[#allocation2 + $0x18] sm:$0xf]  ;;  %990 = vst [vmem:[#allocation3 + $0x78] sm:$0xf] %v974_v62  ;;  %v417_v42 = vsel %vm4530_vm11, %v261_v23, %v416_v3  ;;  %v420_v45 = vsel %vm4515_vm9, %v268_v24, %v419_v9  ;;  %v112_v3 = vmul.f32 %v3785_v36, %v4481_v31 }
  0x3c   :  { %504 = vst [vmem:[#allocation3 + $0x6c] sm:$0xf] %v488_v63  ;;  %v523_v5 = vld [vmem:[#allocation2 + $0x18] sm:$0xf]  ;;  %v524_v6 = vld [vmem:[#allocation2 + $0x1c] sm:$0x1]  ;;  %v890_v13 = vsel %vm4493_vm5, %v3560_v60, %v889_v61  ;;  %4048 = vmatpush3.bf16.msra.mxu1 %v4225_v53  ;;  %v113_v7 = vmul.f32 %v3786_v37, %v4481_v31 }
  0x3d   :  { %794 = vst [vmem:[#allocation3 + $0x4c] sm:$0xf] %v593_v0  ;;  %v595_v15 = vshrl.u32 %v523_v5, 16  ;;  %v598_v16 = vshll.u32 %v523_v5, 16  ;;  %v604_v17 = vshll.u32 %v524_v6, 16  ;;  %v4221_v21 = vld [vmem:[%s5244_s1 + $0x170] sm:$0xff]   ;;  %4049 = vmatprep.subr.bf16.mxu1 %v4232_v59 }
  0x3e   :  { %v816_v18 = vld [vmem:[#allocation2 + $0x20] sm:$0xe]  ;;  %958 = vst [vmem:[#allocation3 + $0x74] sm:$0xf] %v890_v13  ;;  %v269_v25 = vrot.slane %v265_v8, 4  ;;  %v148_v52 = vmax.f32 %v132_v10, 0.0 }
  0x3f   :  { %v817_v26 = vld [vmem:[#allocation2 + $0x24] sm:$0x1]  ;;  %v489_v27 = vld [vmem:[#allocation2 + $0x20] sm:$0xf]  ;;  %v422_v28 = vld [vmem:[#allocation2 + $0x34] sm:$0x1] }
  0x40   :  { %v4209_v30 = vld [vmem:[#allocation3] ss:$36 sps:$4 sm:$0xff]   ;;  %v597_v33 = vrot.slane %v595_v15, 4  ;;  %505 = vst [vmem:[#allocation3 + $0x90] sm:$0xf] %v489_v27  ;;  %v600_v38 = vrot.slane %v598_v16, 5  ;;  %4050 = vmatpush3.bf16.msra.mxu1 %v4235_v19  ;;  %v423_v57 = vsel %vm4530_vm11, %v269_v25, %v422_v28  ;;  %v3757_v61 = vpack.c.bf16 %v148_v52, %v148_v52 }
  0x41   :  { %v4211_v32 = vld [vmem:[#allocation3 + $0x4] ss:$36 sps:$4 sm:$0xff]   ;;  %v606_v39 = vrot.slane %v604_v17, 5  ;;  %v525_v43 = vld [vmem:[#allocation2 + $0x20] sm:$0xf]  ;;  %v3561_v46 = vrot.slane %v816_v18, 9  ;;  %4051 = vmatprep.subr.bf16.mxu1 %v4242_v29 }
  0x42   :  { %v526_v44 = vld [vmem:[#allocation2 + $0x24] sm:$0x1]  ;;  %2988 = vmatprep.mubr.bf16.mxu0 %v4211_v32  ;;  %415 = vst [vmem:[#allocation2 + $0x28] sm:$0xf] %v414_v41  ;;  %418 = vst [vmem:[#allocation2 + $0x2c] sm:$0x1] %v417_v42  ;;  %v601_v49 = vor.u32 %v600_v38, %v597_v33  ;;  %v4651_v32 = vadd.f32 %v4489_v35, %v112_v3  ;;  %v4654_v33 = vadd.f32 %v4489_v35, %v113_v7 }
  0x43   :  { %v893_v47 = vrot.slane %v817_v26, 5  ;;  %v609_v48 = vshrl.u32 %v525_v43, 16  ;;  %2989 = vmatmul.mubr.bf16.vlgmr.msra.gmra.mxu0 %v4209_v30  ;;  %421 = vst [vmem:[#allocation2 + $0x30] sm:$0xf] %v420_v45  ;;  %v612_v50 = vshll.u32 %v525_v43, 16  ;;  %v618_v51 = vshll.u32 %v526_v44, 16 }
  0x44   :  { %3982 = vmatpush3.bf16.msra.mxu0 %v4214_v12  ;;  %v4224_v53 = vld [vmem:[%s5244_s1 + $0x130] sm:$0xff]   ;;  %v149_v56 = vmax.f32 %v133_v34, 0.0  ;;  %v602_v58 = vrot.slane %v601_v49, 4  ;;  %v4231_v60 = vld [vmem:[%s5244_s1 + $0x168] sm:$0xff]   ;;  %424 = vst [vmem:[#allocation2 + $0x34] sm:$0x1] %v423_v57 }
  0x45   :  { %v894_v54 = vsel %vm4493_vm5, %v3561_v46, %v893_v47  ;;  %v611_v55 = vrot.slane %v609_v48, 4  ;;  %3983 = vmatprep.subr.bf16.mxu0 %v4221_v21  ;;  %v614_v59 = vrot.slane %v612_v50, 5  ;;  %v4245_v62 = vld [vmem:[%s5244_s1 + $0x1a0] sm:$0xff]   ;;  %v4216_v63 = vld [vmem:[#allocation3 + $0x54] ss:$36 sps:$4 sm:$0xff]   ;;  %v271_v6 = vshrl.u32 %v3757_v61, 16 }
  0x46   :  { %959 = vst [vmem:[#allocation3 + $0x98] sm:$0xf] %v894_v54  ;;  %v4218_v0 = vld [vmem:[#allocation3 + $0x50] ss:$36 sps:$4 sm:$0xff]   ;;  %v4630_v1 = vpack.c.bf16 %v149_v56, %v149_v56  ;;  %v607_v4 = vsel %vm4524_vm10, %v602_v58, %v606_v39  ;;  %v4252_v8 = vld [vmem:[%s5244_s1 + $0x1d8] sm:$0xff]   ;;  %3093 = vmatprep.mubr.bf16.mxu1 %v4216_v63  ;;  %v620_v9 = vrot.slane %v618_v51, 5  ;;  %4052 = vmatpush3.bf16.msra.mxu1 %v4245_v62 }
  0x47   :  { %v615_v5 = vor.u32 %v614_v59, %v611_v55  ;;  %795 = vst [vmem:[#allocation3 + $0x70] sm:$0xf] %v607_v4  ;;  %v4234_v10 = vld [vmem:[%s5244_s1 + $0x128] sm:$0xff]   ;;  %v274_v12 = vshll.u32 %v3757_v61, 16  ;;  %v4241_v16 = vld [vmem:[%s5244_s1 + $0x160] sm:$0xff]   ;;  %3094 = vmatmul.mubr.bf16.gmra.mxu1 %v4218_v0  ;;  %v273_v30 = vrot.slane %v271_v6, 7  ;;  %4053 = vmatprep.subr.bf16.mxu1 %v4252_v8 }
  0x48   :  { %3984 = vmatpush3.bf16.msra.mxu0 %v4224_v53  ;;  %v279_v13 = vshrl.u32 %v4630_v1, 16  ;;  %v282_v15 = vshll.u32 %v4630_v1, 16  ;;  %v425_v24 = vld [vmem:[#allocation2 + $0x38] sm:$0xf]  ;;  %v428_v25 = vld [vmem:[#allocation2 + $0x3c] sm:$0x1] }
  0x49   :  { %v818_v17 = vld [vmem:[#allocation2 + $0x28] sm:$0xe]  ;;  %v819_v18 = vld [vmem:[#allocation2 + $0x2c] sm:$0x1]  ;;  %3985 = vmatprep.subr.bf16.mxu0 %v4231_v60  ;;  %v4244_v26 = vld [vmem:[%s5244_s1 + $0x120] sm:$0xff]   ;;  %v616_v29 = vrot.slane %v615_v5, 4  ;;  %v276_v45 = vor.u32 %v274_v12, %v273_v30 }
  0x4a   :  { %v975_v19 = vld [vmem:[#allocation2 + $0x28] sm:$0xf]  ;;  %v3562_v20 = vrot.slane %v818_v17, 9  ;;  %v897_v21 = vrot.slane %v819_v18, 5  ;;  %v976_v22 = vld [vmem:[#allocation2 + $0x30] sm:$0xf] }
  0x4b   :  { %991 = vst [vmem:[#allocation3 + $0x9c] sm:$0xf] %v975_v19  ;;  %v490_v23 = vld [vmem:[#allocation2 + $0x28] sm:$0xf]  ;;  %992 = vst [vmem:[#allocation3 + $0xc0] sm:$0xf] %v976_v22  ;;  %v621_v44 = vsel %vm4524_vm10, %v616_v29, %v620_v9  ;;  %v426_v60 = vsel %vm4515_vm9, %v276_v45, %v425_v24 }
  0x4c   :  { %506 = vst [vmem:[#allocation3 + $0xb4] sm:$0xf] %v490_v23  ;;  %v527_v27 = vld [vmem:[#allocation2 + $0x28] sm:$0xf]  ;;  %v528_v28 = vld [vmem:[#allocation2 + $0x2c] sm:$0x1]  ;;  %v898_v36 = vsel %vm4493_vm5, %v3562_v20, %v897_v21  ;;  %3986 = vmatpush3.bf16.msra.mxu0 %v4234_v10 }
  0x4d   :  { %v4251_v34 = vld [vmem:[%s5244_s1 + $0x158] sm:$0xff]   ;;  %v623_v37 = vshrl.u32 %v527_v27, 16  ;;  %v626_v38 = vshll.u32 %v527_v27, 16  ;;  %v632_v39 = vshll.u32 %v528_v28, 16  ;;  %v431_v41 = vld [vmem:[#allocation2 + $0x40] sm:$0xf]  ;;  %3987 = vmatprep.subr.bf16.mxu0 %v4241_v16 }
  0x4e   :  { %v820_v42 = vld [vmem:[#allocation2 + $0x30] sm:$0xe]  ;;  %v4255_v43 = vld [vmem:[%s5244_s1 + $0x198] sm:$0xff]   ;;  %960 = vst [vmem:[#allocation3 + $0xbc] sm:$0xf] %v898_v36  ;;  %v277_v46 = vrot.slane %v273_v30, 4 }
  0x4f   :  { %v4666_v47 = vrot.slane %v279_v13, 7  ;;  %v821_v48 = vld [vmem:[#allocation2 + $0x34] sm:$0x1]  ;;  %v491_v49 = vld [vmem:[#allocation2 + $0x30] sm:$0xf]  ;;  %v625_v50 = vrot.slane %v623_v37, 4  ;;  %4054 = vmatpush3.bf16.msra.mxu1 %v4255_v43 }
  0x50   :  { %v628_v51 = vrot.slane %v626_v38, 5  ;;  %796 = vst [vmem:[#allocation3 + $0x94] sm:$0xf] %v621_v44  ;;  %v3563_v52 = vrot.slane %v820_v42, 9  ;;  %507 = vst [vmem:[#allocation3 + $0xd8] sm:$0xf] %v491_v49  ;;  %v429_v61 = vsel %vm4530_vm11, %v277_v46, %v428_v25  ;;  %3988 = vmatpush3.bf16.msra.mxu0 %v4244_v26 }
  0x51   :  { %v529_v53 = vld [vmem:[#allocation2 + $0x30] sm:$0xf]  ;;  %v4254_v55 = vld [vmem:[%s5244_s1 + $0x118] sm:$0xff]   ;;  %v4223_v57 = vld [vmem:[#allocation3 + $0x48] ss:$36 sps:$4 sm:$0xff]   ;;  %v634_v58 = vrot.slane %v632_v39, 5  ;;  %v284_v59 = vor.u32 %v282_v15, %v4666_v47  ;;  %3989 = vmatprep.subr.bf16.mxu0 %v4251_v34 }
  0x52   :  { %v824_v54 = vld [vmem:[#allocation2 + $0x50] sm:$0xe]  ;;  %v825_v62 = vld [vmem:[#allocation2 + $0x54] sm:$0x1]  ;;  %v629_v63 = vor.u32 %v628_v51, %v625_v50  ;;  %427 = vst [vmem:[#allocation2 + $0x38] sm:$0xf] %v426_v60 }
  0x53   :  { %v4219_v56 = vld [vmem:[#allocation3 + $0x4c] ss:$36 sps:$4 sm:$0xff]   ;;  %430 = vst [vmem:[#allocation2 + $0x3c] sm:$0x1] %v429_v61  ;;  %v901_v0 = vrot.slane %v821_v48, 5  ;;  %v637_v3 = vshrl.u32 %v529_v53, 16  ;;  %v432_v6 = vsel %vm4515_vm9, %v284_v59, %v431_v41 }
  0x54   :  { %v530_v1 = vld [vmem:[#allocation2 + $0x34] sm:$0x1]  ;;  %v640_v4 = vshll.u32 %v529_v53, 16  ;;  %v4679_v5 = vld [vmem:[%s5245_s0 + $0x28] sm:$0xff]   ;;  %2996 = vmatprep.mubr.bf16.mxu0 %v4219_v56  ;;  %v150_v8 = vmax.f32 %v4651_v32, 0.0  ;;  %v151_v9 = vmax.f32 %v4654_v33, 0.0  ;;  %3990 = vmatpush3.bf16.msra.mxu0 %v4254_v55 }
  0x55   :  { %v646_v7 = vshll.u32 %v530_v1, 16  ;;  %v493_v10 = vld [vmem:[#allocation2 + $0x50] sm:$0xf]  ;;  %2997 = vmatmul.mubr.bf16.gmra.mxu0 %v4223_v57  ;;  %v630_v12 = vrot.slane %v629_v63, 4  ;;  %433 = vst [vmem:[#allocation2 + $0x40] sm:$0xf] %v432_v6  ;;  %v902_v13 = vsel %vm4493_vm5, %v3563_v52, %v901_v0  ;;  %v3789_v28 = vunpack.c.l.bf16 %v4679_v5 }
  0x56   :  { %v639_v15 = vrot.slane %v637_v3, 4  ;;  %v642_v16 = vrot.slane %v640_v4, 5  ;;  %509 = vst [vmem:[#allocation3 + $0x120] sm:$0xf] %v493_v10  ;;  %v4261_v17 = vld [vmem:[%s5244_s1 + $0x150] sm:$0xff]   ;;  %v4690_v19 = vpack.c.bf16 %v150_v8, %v150_v8  ;;  %v4692_v20 = vpack.c.bf16 %v151_v9, %v151_v9 }
  0x57   :  { %961 = vst [vmem:[#allocation3 + $0xe0] sm:$0xf] %v902_v13  ;;  %v648_v18 = vrot.slane %v646_v7, 5  ;;  %v3565_v21 = vrot.slane %v824_v54, 9  ;;  %v533_v22 = vld [vmem:[#allocation2 + $0x50] sm:$0xf]  ;;  %v635_v25 = vsel %vm4524_vm10, %v630_v12, %v634_v58  ;;  %3991 = vmatprep.subr.bf16.mxu0 %v4261_v17  ;;  %v3790_v45 = vunpack.c.h.bf16 %v4679_v5 }
  0x58   :  { %v4226_v23 = vld [vmem:[#allocation3 + $0x9c] ss:$36 sps:$4 sm:$0xff]   ;;  %v643_v26 = vor.u32 %v642_v16, %v639_v15  ;;  %v909_v27 = vrot.slane %v825_v62, 5  ;;  %797 = vst [vmem:[#allocation3 + $0xb8] sm:$0xf] %v635_v25  ;;  %v287_v29 = vshrl.u32 %v4690_v19, 16  ;;  %v114_v46 = vmul.f32 %v3789_v28, %v4481_v31 }
  0x59   :  { %v4228_v24 = vld [vmem:[#allocation3 + $0x98] ss:$36 sps:$4 sm:$0xff]   ;;  %v290_v30 = vshll.u32 %v4690_v19, 16  ;;  %v295_v32 = vshrl.u32 %v4692_v20, 16  ;;  %v298_v33 = vshll.u32 %v4692_v20, 16  ;;  %v4262_v34 = vld [vmem:[%s5244_s1 + $0x1d0] sm:$0xff]   ;;  %3101 = vmatprep.mubr.bf16.mxu1 %v4226_v23  ;;  %v115_v60 = vmul.f32 %v3790_v45, %v4481_v31 }
  0x5a   :  { %v644_v36 = vrot.slane %v643_v26, 4  ;;  %v910_v37 = vsel %vm4493_vm5, %v3565_v21, %v909_v27  ;;  %v665_v38 = vshrl.u32 %v533_v22, 16  ;;  %v668_v39 = vshll.u32 %v533_v22, 16  ;;  %v4264_v41 = vld [vmem:[%s5244_s1 + $0x110] sm:$0xff]   ;;  %3102 = vmatmul.mubr.bf16.gmra.mxu1 %v4228_v24  ;;  %v822_v42 = vld [vmem:[#allocation2 + $0x38] sm:$0xe]  ;;  %4055 = vmatprep.subr.bf16.mxu1 %v4262_v34 }
  0x5b   :  { %v823_v43 = vld [vmem:[#allocation2 + $0x3c] sm:$0x1]  ;;  %v977_v44 = vld [vmem:[#allocation2 + $0x38] sm:$0xf]  ;;  %963 = vst [vmem:[#allocation3 + $0x128] sm:$0xf] %v910_v37  ;;  %3992 = vmatpush3.bf16.msra.mxu0 %v4264_v41  ;;  %v136_v61 = vadd.f32 %v4489_v35, %v114_v46  ;;  %v137_v15 = vadd.f32 %v4489_v35, %v115_v60 }
  0x5c   :  { %v3564_v48 = vrot.slane %v822_v42, 9  ;;  %v905_v49 = vrot.slane %v823_v43, 5  ;;  %993 = vst [vmem:[#allocation3 + $0xe4] sm:$0xf] %v977_v44  ;;  %v492_v50 = vld [vmem:[#allocation2 + $0x38] sm:$0xf]  ;;  %v649_v52 = vsel %vm4524_vm10, %v644_v36, %v648_v18 }
  0x5d   :  { %v531_v51 = vld [vmem:[#allocation2 + $0x38] sm:$0xf]  ;;  %v978_v53 = vld [vmem:[#allocation2 + $0x40] sm:$0xf]  ;;  %508 = vst [vmem:[#allocation3 + $0xfc] sm:$0xf] %v492_v50 }
  0x5e   :  { %v532_v54 = vld [vmem:[#allocation2 + $0x3c] sm:$0x1]  ;;  %v651_v55 = vshrl.u32 %v531_v51, 16  ;;  %v654_v56 = vshll.u32 %v531_v51, 16  ;;  %798 = vst [vmem:[#allocation3 + $0xdc] sm:$0xf] %v649_v52  ;;  %v906_v62 = vsel %vm4493_vm5, %v3564_v48, %v905_v49 }
  0x5f   :  { %v437_v57 = vld [vmem:[#allocation2 + $0x58] sm:$0xf]  ;;  %v443_v58 = vld [vmem:[#allocation2 + $0x60] sm:$0xf]  ;;  %v534_v59 = vld [vmem:[#allocation2 + $0x54] sm:$0x1] }
  0x60   :  { %994 = vst [vmem:[#allocation3 + $0x108] sm:$0xf] %v978_v53  ;;  %v660_v63 = vshll.u32 %v532_v54, 16  ;;  %v289_v0 = vrot.slane %v287_v29, 7  ;;  %v297_v1 = vrot.slane %v295_v32, 7  ;;  %v4265_v4 = vld [vmem:[%s5244_s1 + $0x190] sm:$0xff]  }
  0x61   :  { %v440_v3 = vld [vmem:[#allocation2 + $0x5c] sm:$0x1]  ;;  %962 = vst [vmem:[#allocation3 + $0x104] sm:$0xf] %v906_v62  ;;  %v653_v5 = vrot.slane %v651_v55, 4  ;;  %v656_v6 = vrot.slane %v654_v56, 5  ;;  %4056 = vmatpush3.bf16.msra.mxu1 %v4265_v4 }
  0x62   :  { %v667_v7 = vrot.slane %v665_v38, 4  ;;  %v670_v8 = vrot.slane %v668_v39, 5  ;;  %v4229_v31 = vld [vmem:[#allocation3 + $0x94] ss:$36 sps:$4 sm:$0xff]   ;;  %v662_v10 = vrot.slane %v660_v63, 5  ;;  %v292_v12 = vor.u32 %v290_v30, %v289_v0  ;;  %v4271_v51 = vld [vmem:[%s5244_s1 + $0x148] sm:$0xff]  }
  0x63   :  { %v4233_v9 = vld [vmem:[#allocation3 + $0x90] ss:$36 sps:$4 sm:$0xff]   ;;  %v300_v13 = vor.u32 %v298_v33, %v297_v1  ;;  %v657_v16 = vor.u32 %v656_v6, %v653_v5  ;;  %v293_v17 = vrot.slane %v289_v0, 4  ;;  %v301_v18 = vrot.slane %v297_v1, 4  ;;  %3004 = vmatprep.mubr.bf16.mxu0 %v4229_v31  ;;  %v446_v27 = vld [vmem:[#allocation2 + $0x64] sm:$0x1]  ;;  %3993 = vmatprep.subr.bf16.mxu0 %v4271_v51 }
  0x64   :  { %v671_v19 = vor.u32 %v670_v8, %v667_v7  ;;  %v438_v20 = vsel %vm4515_vm9, %v292_v12, %v437_v57  ;;  %v674_v22 = vshll.u32 %v534_v59, 16  ;;  %v152_v23 = vmax.f32 %v136_v61, 0.0  ;;  %3005 = vmatmul.mubr.bf16.gmra.mxu0 %v4233_v9  ;;  %v449_v43 = vld [vmem:[#allocation2 + $0x68] sm:$0xf]  ;;  %v3844_v44 = vld [vmem:[%s5245_s0 + $0x30] sm:$0xff]  }
  0x65   :  { %v444_v21 = vsel %vm4515_vm9, %v300_v13, %v443_v58  ;;  %v658_v24 = vrot.slane %v657_v16, 4  ;;  %439 = vst [vmem:[#allocation2 + $0x58] sm:$0xf] %v438_v20  ;;  %v441_v35 = vsel %vm4530_vm11, %v293_v17, %v440_v3  ;;  %v153_v26 = vmax.f32 %v137_v15, 0.0  ;;  %v452_v46 = vld [vmem:[#allocation2 + $0x6c] sm:$0x1] }
  0x66   :  { %445 = vst [vmem:[#allocation2 + $0x60] sm:$0xf] %v444_v21  ;;  %v672_v25 = vrot.slane %v671_v19, 4  ;;  %442 = vst [vmem:[#allocation2 + $0x5c] sm:$0x1] %v441_v35  ;;  %v676_v28 = vrot.slane %v674_v22, 5  ;;  %v3761_v29 = vpack.c.bf16 %v152_v23, %v152_v23  ;;  %v447_v30 = vsel %vm4530_vm11, %v301_v18, %v446_v27 }
  0x67   :  { %v663_v32 = vsel %vm4524_vm10, %v658_v24, %v662_v10  ;;  %v3762_v33 = vpack.c.bf16 %v153_v26, %v153_v26  ;;  %448 = vst [vmem:[#allocation2 + $0x64] sm:$0x1] %v447_v30  ;;  %v4236_v34 = vld [vmem:[#allocation3 + $0xe4] ss:$36 sps:$4 sm:$0xff]   ;;  %v455_v48 = vld [vmem:[#allocation2 + $0x70] sm:$0xf]  ;;  %v3793_v49 = vunpack.c.l.bf16 %v3844_v44  ;;  %v3794_v50 = vunpack.c.h.bf16 %v3844_v44 }
  0x68   :  { %v4238_v36 = vld [vmem:[#allocation3 + $0xe0] ss:$36 sps:$4 sm:$0xff]   ;;  %799 = vst [vmem:[#allocation3 + $0x100] sm:$0xf] %v663_v32  ;;  %v677_v37 = vsel %vm4524_vm10, %v672_v25, %v676_v28  ;;  %v303_v38 = vshrl.u32 %v3761_v29, 16  ;;  %v306_v39 = vshll.u32 %v3761_v29, 16  ;;  %3109 = vmatprep.mubr.bf16.mxu1 %v4236_v34 }
  0x69   :  { %800 = vst [vmem:[#allocation3 + $0x124] sm:$0xf] %v677_v37  ;;  %v311_v41 = vshrl.u32 %v3762_v33, 16  ;;  %v314_v42 = vshll.u32 %v3762_v33, 16  ;;  %3110 = vmatmul.mubr.bf16.gmra.mxu1 %v4238_v36  ;;  %v4272_v53 = vld [vmem:[%s5244_s1 + $0x1c8] sm:$0xff]  }
  0x6a   :  { %v305_v45 = vrot.slane %v303_v38, 7  ;;  %v4747_v58 = vld [vmem:[%s5246_s2] ss:$0 sm:$0xff]  ;;  %4057 = vmatprep.subr.bf16.mxu1 %v4272_v53  ;;  %v4243_v9 = vld [vmem:[#allocation3 + $0xd8] ss:$36 sps:$4 sm:$0xff]  }
  0x6b   :  { %v4739_v52 = vrot.slane %v311_v41, 7  ;;  %v116_v59 = vmul.f32 %v4747_v58, %v3793_v49  ;;  %v117_v60 = vmul.f32 %v4747_v58, %v3794_v50  ;;  %v4757_v7 = vld [vmem:[%s5247_s3] ss:$0 sm:$0xff] }
  0x6c   :  { %v826_v54 = vld [vmem:[#allocation2 + $0x58] sm:$0xe]  ;;  %v308_v57 = vor.u32 %v306_v39, %v305_v45  ;;  %v309_v0 = vrot.slane %v305_v45, 4  ;;  %v458_v39 = vld [vmem:[#allocation2 + $0x74] sm:$0x1] }
  0x6d   :  { %v979_v55 = vld [vmem:[#allocation2 + $0x58] sm:$0xf]  ;;  %v980_v56 = vld [vmem:[#allocation2 + $0x60] sm:$0xf]  ;;  %v827_v61 = vld [vmem:[#allocation2 + $0x5c] sm:$0x1]  ;;  %v316_v1 = vor.u32 %v314_v42, %v4739_v52  ;;  %v138_v8 = vadd.f32 %v4757_v7, %v116_v59  ;;  %v139_v15 = vadd.f32 %v4757_v7, %v117_v60 }
  0x6e   :  { %v3566_v62 = vrot.slane %v826_v54, 9  ;;  %995 = vst [vmem:[#allocation3 + $0x12c] sm:$0xf] %v979_v55  ;;  %996 = vst [vmem:[#allocation3 + $0x150] sm:$0xf] %v980_v56  ;;  %v913_v3 = vrot.slane %v827_v61, 5  ;;  %v450_v6 = vsel %vm4515_vm9, %v308_v57, %v449_v43  ;;  %v453_v12 = vsel %vm4530_vm11, %v309_v0, %v452_v46 }
  0x6f   :  { %v494_v63 = vld [vmem:[#allocation2 + $0x58] sm:$0xf]  ;;  %v536_v5 = vld [vmem:[#allocation2 + $0x5c] sm:$0x1]  ;;  %451 = vst [vmem:[#allocation2 + $0x68] sm:$0xf] %v450_v6  ;;  %v456_v13 = vsel %vm4515_vm9, %v316_v1, %v455_v48 }
  0x70   :  { %510 = vst [vmem:[#allocation3 + $0x144] sm:$0xf] %v494_v63  ;;  %v535_v4 = vld [vmem:[#allocation2 + $0x58] sm:$0xf]  ;;  %v4239_v31 = vld [vmem:[#allocation3 + $0xdc] ss:$36 sps:$4 sm:$0xff]   ;;  %v914_v16 = vsel %vm4493_vm5, %v3566_v62, %v913_v3 }
  0x71   :  { %v679_v10 = vshrl.u32 %v535_v4, 16  ;;  %v682_v17 = vshll.u32 %v535_v4, 16  ;;  %v688_v18 = vshll.u32 %v536_v5, 16  ;;  %454 = vst [vmem:[#allocation2 + $0x6c] sm:$0x1] %v453_v12  ;;  %v154_v20 = vmax.f32 %v138_v8, 0.0  ;;  %3012 = vmatprep.mubr.bf16.mxu0 %v4239_v31 }
  0x72   :  { %457 = vst [vmem:[#allocation2 + $0x70] sm:$0xf] %v456_v13  ;;  %v828_v19 = vld [vmem:[#allocation2 + $0x60] sm:$0xe]  ;;  %964 = vst [vmem:[#allocation3 + $0x14c] sm:$0xf] %v914_v16  ;;  %3013 = vmatmul.mubr.bf16.gmra.mxu0 %v4243_v9 }
  0x73   :  { %v681_v21 = vrot.slane %v679_v10, 4  ;;  %v829_v22 = vld [vmem:[#allocation2 + $0x64] sm:$0x1]  ;;  %v3567_v23 = vrot.slane %v828_v19, 9  ;;  %v495_v24 = vld [vmem:[#allocation2 + $0x60] sm:$0xf]  ;;  %v3763_v33 = vpack.c.bf16 %v154_v20, %v154_v20 }
  0x74   :  { %v684_v35 = vrot.slane %v682_v17, 5  ;;  %v317_v25 = vrot.slane %v4739_v52, 4  ;;  %v917_v26 = vrot.slane %v829_v22, 5  ;;  %511 = vst [vmem:[#allocation3 + $0x168] sm:$0xf] %v495_v24  ;;  %v155_v28 = vmax.f32 %v139_v15, 0.0 }
  0x75   :  { %v537_v27 = vld [vmem:[#allocation2 + $0x60] sm:$0xf]  ;;  %v538_v29 = vld [vmem:[#allocation2 + $0x64] sm:$0x1]  ;;  %v690_v36 = vrot.slane %v688_v18, 5  ;;  %v319_v43 = vshrl.u32 %v3763_v33, 16 }
  0x76   :  { %v693_v30 = vshrl.u32 %v537_v27, 16  ;;  %v696_v32 = vshll.u32 %v537_v27, 16  ;;  %v685_v34 = vor.u32 %v684_v35, %v681_v21  ;;  %v918_v37 = vsel %vm4493_vm5, %v3567_v23, %v917_v26  ;;  %v830_v46 = vld [vmem:[#allocation2 + $0x68] sm:$0xe]  ;;  %v461_v57 = vld [vmem:[#allocation2 + $0x78] sm:$0xf] }
  0x77   :  { %v702_v38 = vshll.u32 %v538_v29, 16  ;;  %965 = vst [vmem:[#allocation3 + $0x170] sm:$0xf] %v918_v37  ;;  %v322_v44 = vshll.u32 %v3763_v33, 16  ;;  %v981_v48 = vld [vmem:[#allocation2 + $0x68] sm:$0xf]  ;;  %v459_v50 = vsel %vm4530_vm11, %v317_v25, %v458_v39  ;;  %v3764_v55 = vpack.c.bf16 %v155_v28, %v155_v28 }
  0x78   :  { %v695_v41 = vrot.slane %v693_v30, 4  ;;  %v698_v42 = vrot.slane %v696_v32, 5  ;;  %v686_v45 = vrot.slane %v685_v34, 4  ;;  %v831_v51 = vld [vmem:[#allocation2 + $0x6c] sm:$0x1]  ;;  %v3568_v52 = vrot.slane %v830_v46, 9 }
  0x79   :  { %v704_v49 = vrot.slane %v702_v38, 5  ;;  %v982_v53 = vld [vmem:[#allocation2 + $0x70] sm:$0xf]  ;;  %997 = vst [vmem:[#allocation3 + $0x174] sm:$0xf] %v981_v48  ;;  %v321_v56 = vrot.slane %v319_v43, 7 }
  0x7a   :  { %v699_v54 = vor.u32 %v698_v42, %v695_v41  ;;  %460 = vst [vmem:[#allocation2 + $0x74] sm:$0x1] %v459_v50  ;;  %v4246_v59 = vld [vmem:[#allocation3 + $0x12c] ss:$36 sps:$4 sm:$0xff]   ;;  %v691_v61 = vsel %vm4524_vm10, %v686_v45, %v690_v36  ;;  %v921_v62 = vrot.slane %v831_v51, 5  ;;  %v327_v13 = vshrl.u32 %v3764_v55, 16 }
  0x7b   :  { %v4248_v60 = vld [vmem:[#allocation3 + $0x128] ss:$36 sps:$4 sm:$0xff]   ;;  %998 = vst [vmem:[#allocation3 + $0x198] sm:$0xf] %v982_v53  ;;  %801 = vst [vmem:[#allocation3 + $0x148] sm:$0xf] %v691_v61  ;;  %v324_v3 = vor.u32 %v322_v44, %v321_v56  ;;  %3117 = vmatprep.mubr.bf16.mxu1 %v4246_v59 }
  0x7c   :  { %v496_v63 = vld [vmem:[#allocation2 + $0x68] sm:$0xf]  ;;  %v540_v1 = vld [vmem:[#allocation2 + $0x6c] sm:$0x1]  ;;  %v922_v4 = vsel %vm4493_vm5, %v3568_v52, %v921_v62  ;;  %v700_v5 = vrot.slane %v699_v54, 4  ;;  %3118 = vmatmul.mubr.bf16.gmra.mxu1 %v4248_v60  ;;  %v325_v12 = vrot.slane %v321_v56, 4 }
  0x7d   :  { %v539_v0 = vld [vmem:[#allocation2 + $0x68] sm:$0xf]  ;;  %512 = vst [vmem:[#allocation3 + $0x18c] sm:$0xf] %v496_v63  ;;  %v464_v31 = vld [vmem:[#allocation2 + $0x7c] sm:$0x1]  ;;  %v462_v20 = vsel %vm4515_vm9, %v324_v3, %v461_v57 }
  0x7e   :  { %v707_v6 = vshrl.u32 %v539_v0, 16  ;;  %v710_v8 = vshll.u32 %v539_v0, 16  ;;  %v4274_v9 = vld [vmem:[%s5244_s1 + $0x108] sm:$0xff]   ;;  %966 = vst [vmem:[#allocation3 + $0x194] sm:$0xf] %v922_v4  ;;  %v716_v10 = vshll.u32 %v540_v1, 16  ;;  %v705_v17 = vsel %vm4524_vm10, %v700_v5, %v704_v49 }
  0x7f   :  { %v330_v15 = vshll.u32 %v3764_v55, 16  ;;  %v832_v16 = vld [vmem:[#allocation2 + $0x70] sm:$0xe]  ;;  %v467_v21 = vld [vmem:[#allocation2 + $0x80] sm:$0xf]  ;;  %3994 = vmatpush3.bf16.msra.mxu0 %v4274_v9  ;;  %v4783_v35 = vrot.slane %v327_v13, 7  ;;  %v465_v25 = vsel %vm4530_vm11, %v325_v12, %v464_v31 }
  0x80   :  { %v709_v18 = vrot.slane %v707_v6, 4  ;;  %v712_v19 = vrot.slane %v710_v8, 5  ;;  %v497_v22 = vld [vmem:[#allocation2 + $0x70] sm:$0xf]  ;;  %v718_v24 = vrot.slane %v716_v10, 5  ;;  %v3569_v26 = vrot.slane %v832_v16, 9 }
  0x81   :  { %v541_v23 = vld [vmem:[#allocation2 + $0x70] sm:$0xf]  ;;  %802 = vst [vmem:[#allocation3 + $0x16c] sm:$0xf] %v705_v17  ;;  %463 = vst [vmem:[#allocation2 + $0x78] sm:$0xf] %v462_v20  ;;  %v332_v33 = vor.u32 %v330_v15, %v4783_v35 }
  0x82   :  { %513 = vst [vmem:[#allocation3 + $0x1b0] sm:$0xf] %v497_v22  ;;  %v4275_v27 = vld [vmem:[%s5244_s1 + $0x188] sm:$0xff]   ;;  %v713_v28 = vor.u32 %v712_v19, %v709_v18  ;;  %466 = vst [vmem:[#allocation2 + $0x7c] sm:$0x1] %v465_v25  ;;  %v721_v32 = vshrl.u32 %v541_v23, 16 }
  0x83   :  { %v833_v29 = vld [vmem:[#allocation2 + $0x74] sm:$0x1]  ;;  %v333_v34 = vrot.slane %v4783_v35, 4  ;;  %v724_v37 = vshll.u32 %v541_v23, 16  ;;  %4058 = vmatpush3.bf16.msra.mxu1 %v4275_v27  ;;  %v3845_v38 = vld [vmem:[%s5245_s0 + $0x38] sm:$0xff]   ;;  %v468_v45 = vsel %vm4515_vm9, %v332_v33, %v467_v21  ;;  %v4282_v17 = vld [vmem:[%s5244_s1 + $0x140] sm:$0xff]  }
  0x84   :  { %v542_v30 = vld [vmem:[#allocation2 + $0x74] sm:$0x1]  ;;  %v925_v36 = vrot.slane %v833_v29, 5  ;;  %v4249_v39 = vld [vmem:[#allocation3 + $0x124] ss:$36 sps:$4 sm:$0xff]   ;;  %v714_v42 = vrot.slane %v713_v28, 4  ;;  %v3797_v43 = vunpack.c.l.bf16 %v3845_v38  ;;  %v3798_v44 = vunpack.c.h.bf16 %v3845_v38  ;;  %3995 = vmatprep.subr.bf16.mxu0 %v4282_v17 }
  0x85   :  { %v4253_v41 = vld [vmem:[#allocation3 + $0x120] ss:$36 sps:$4 sm:$0xff]   ;;  %v723_v48 = vrot.slane %v721_v32, 4  ;;  %v726_v49 = vrot.slane %v724_v37, 5  ;;  %3020 = vmatprep.mubr.bf16.mxu0 %v4249_v39  ;;  %v4256_v50 = vld [vmem:[#allocation3 + $0x174] ss:$36 sps:$4 sm:$0xff]  }
  0x86   :  { %v926_v46 = vsel %vm4493_vm5, %v3569_v26, %v925_v36  ;;  %v4258_v51 = vld [vmem:[#allocation3 + $0x170] ss:$36 sps:$4 sm:$0xff]   ;;  %v719_v52 = vsel %vm4524_vm10, %v714_v42, %v718_v24  ;;  %469 = vst [vmem:[#allocation2 + $0x80] sm:$0xf] %v468_v45  ;;  %v730_v53 = vshll.u32 %v542_v30, 16  ;;  %v118_v54 = vmul.f32 %v4747_v58, %v3797_v43  ;;  %3021 = vmatmul.mubr.bf16.gmra.mxu0 %v4253_v41  ;;  %v4283_v22 = vld [vmem:[%s5244_s1 + $0x180] sm:$0xff]  }
  0x87   :  { %967 = vst [vmem:[#allocation3 + $0x1b8] sm:$0xf] %v926_v46  ;;  %v119_v55 = vmul.f32 %v4747_v58, %v3798_v44  ;;  %803 = vst [vmem:[#allocation3 + $0x190] sm:$0xf] %v719_v52  ;;  %v727_v56 = vor.u32 %v726_v49, %v723_v48  ;;  %3125 = vmatprep.mubr.bf16.mxu1 %v4256_v50  ;;  %v470_v16 = vld [vmem:[#allocation2 + $0x84] sm:$0x1] }
  0x88   :  { %v834_v57 = vld [vmem:[#allocation2 + $0x78] sm:$0xe]  ;;  %v732_v60 = vrot.slane %v730_v53, 5  ;;  %v140_v61 = vadd.f32 %v4757_v7, %v118_v54  ;;  %3126 = vmatmul.mubr.bf16.gmra.mxu1 %v4258_v51  ;;  %v471_v21 = vsel %vm4530_vm11, %v333_v34, %v470_v16  ;;  %v4263_v24 = vld [vmem:[#allocation3 + $0x168] ss:$36 sps:$4 sm:$0xff]   ;;  %v4285_v32 = vld [vmem:[%s5244_s1 + $0x100] sm:$0xff]  }
  0x89   :  { %v983_v59 = vld [vmem:[#allocation2 + $0x78] sm:$0xf]  ;;  %v141_v62 = vadd.f32 %v4757_v7, %v119_v55  ;;  %v835_v63 = vld [vmem:[#allocation2 + $0x7c] sm:$0x1]  ;;  %v3570_v0 = vrot.slane %v834_v57, 9  ;;  %v728_v3 = vrot.slane %v727_v56, 4  ;;  %3996 = vmatpush3.bf16.msra.mxu0 %v4285_v32 }
  0x8a   :  { %999 = vst [vmem:[#allocation3 + $0x1bc] sm:$0xf] %v983_v59  ;;  %v498_v1 = vld [vmem:[#allocation2 + $0x78] sm:$0xf]  ;;  %v929_v4 = vrot.slane %v835_v63, 5  ;;  %v156_v6 = vmax.f32 %v140_v61, 0.0 }
  0x8b   :  { %514 = vst [vmem:[#allocation3 + $0x1d4] sm:$0xf] %v498_v1  ;;  %v543_v58 = vld [vmem:[#allocation2 + $0x78] sm:$0xf]  ;;  %v544_v5 = vld [vmem:[#allocation2 + $0x7c] sm:$0x1]  ;;  %v733_v8 = vsel %vm4524_vm10, %v728_v3, %v732_v60 }
  0x8c   :  { %v735_v31 = vshrl.u32 %v543_v58, 16  ;;  %v738_v9 = vshll.u32 %v543_v58, 16  ;;  %v744_v10 = vshll.u32 %v544_v5, 16  ;;  %v4279_v7 = vld [vmem:[%s5244_s1 + $0x1c0] sm:$0xff]   ;;  %v930_v12 = vsel %vm4493_vm5, %v3570_v0, %v929_v4  ;;  %804 = vst [vmem:[#allocation3 + $0x1b4] sm:$0xf] %v733_v8 }
  0x8d   :  { %v157_v13 = vmax.f32 %v141_v62, 0.0  ;;  %v3765_v15 = vpack.c.bf16 %v156_v6, %v156_v6  ;;  %968 = vst [vmem:[#allocation3 + $0x1dc] sm:$0xf] %v930_v12  ;;  %v984_v18 = vld [vmem:[#allocation2 + $0x80] sm:$0xf]  ;;  %4059 = vmatprep.subr.bf16.mxu1 %v4279_v7  ;;  %v4830_v50 = vld [vmem:[%s5244_s1 + $0x238] sm:$0xff]  }
  0x8e   :  { %v737_v19 = vrot.slane %v735_v31, 4  ;;  %v740_v20 = vrot.slane %v738_v9, 5  ;;  %v4259_v23 = vld [vmem:[#allocation3 + $0x16c] ss:$36 sps:$4 sm:$0xff]   ;;  %1000 = vst [vmem:[#allocation3 + $0x1e0] sm:$0xf] %v984_v18  ;;  %4060 = vmatpush3.bf16.msra.mxu1 %v4283_v22  ;;  %4125 = vmatprep.subr.bf16.mxu0 %v4830_v50 }
  0x8f   :  { %v3766_v35 = vpack.c.bf16 %v157_v13, %v157_v13  ;;  %v335_v25 = vshrl.u32 %v3765_v15, 16  ;;  %472 = vst [vmem:[#allocation2 + $0x84] sm:$0x1] %v471_v21  ;;  %v746_v27 = vrot.slane %v744_v10, 5  ;;  %v338_v28 = vshll.u32 %v3765_v15, 16  ;;  %3028 = vmatprep.mubr.bf16.mxu0 %v4259_v23  ;;  %4157 = vmatprep.subr.bf16.mxu1 %v4830_v50 }
  0x90   :  { %v741_v26 = vor.u32 %v740_v20, %v737_v19  ;;  %v473_v29 = vld [vmem:[#allocation2 + $0x88] sm:$0xf]  ;;  %v476_v30 = vld [vmem:[#allocation2 + $0x8c] sm:$0x1]  ;;  %v836_v37 = vld [vmem:[#allocation2 + $0x80] sm:$0xe]  ;;  %3029 = vmatmul.mubr.bf16.gmra.mxu0 %v4263_v24 }
  0x91   :  { %v337_v33 = vrot.slane %v335_v25, 7  ;;  %v343_v34 = vshrl.u32 %v3766_v35, 16  ;;  %v346_v36 = vshll.u32 %v3766_v35, 16  ;;  %v479_v39 = vld [vmem:[#allocation2 + $0x90] sm:$0xf]  ;;  %v3571_v54 = vrot.slane %v836_v37, 9 }
  0x92   :  { %v742_v38 = vrot.slane %v741_v26, 4  ;;  %v499_v44 = vld [vmem:[#allocation2 + $0x80] sm:$0xf]  ;;  %v1452_v3 = vld [vmem:[#allocation2 + $0x10] sm:$0xf] }
  0x93   :  { %v340_v41 = vor.u32 %v338_v28, %v337_v33  ;;  %v341_v42 = vrot.slane %v337_v33, 4  ;;  %v4823_v43 = vrot.slane %v343_v34, 7  ;;  %v545_v45 = vld [vmem:[#allocation2 + $0x80] sm:$0xf]  ;;  %515 = vst [vmem:[#allocation3 + $0x1f8] sm:$0xf] %v499_v44 }
  0x94   :  { %v747_v46 = vsel %vm4524_vm10, %v742_v38, %v746_v27  ;;  %v749_v48 = vshrl.u32 %v545_v45, 16  ;;  %v752_v49 = vshll.u32 %v545_v45, 16  ;;  %v4268_v56 = vld [vmem:[#allocation3 + $0x1b8] ss:$36 sps:$4 sm:$0xff]   ;;  %1468 = vst [vmem:[#allocation3 + $0x18] sm:$0xf] %v1452_v3 }
  0x95   :  { %805 = vst [vmem:[#allocation3 + $0x1d8] sm:$0xf] %v747_v46  ;;  %v348_v51 = vor.u32 %v346_v36, %v4823_v43  ;;  %v474_v52 = vsel %vm4515_vm9, %v340_v41, %v473_v29  ;;  %v477_v53 = vsel %vm4530_vm11, %v341_v42, %v476_v30  ;;  %v4266_v55 = vld [vmem:[#allocation3 + $0x1bc] ss:$36 sps:$4 sm:$0xff]   ;;  %v1453_v4 = vld [vmem:[#allocation2 + $0x18] sm:$0xf] }
  0x96   :  { %475 = vst [vmem:[#allocation2 + $0x88] sm:$0xf] %v474_v52  ;;  %478 = vst [vmem:[#allocation2 + $0x8c] sm:$0x1] %v477_v53  ;;  %v751_v57 = vrot.slane %v749_v48, 4  ;;  %v754_v62 = vrot.slane %v752_v49, 5  ;;  %3133 = vmatprep.mubr.bf16.mxu1 %v4266_v55 }
  0x97   :  { %v480_v59 = vsel %vm4515_vm9, %v348_v51, %v479_v39  ;;  %v837_v60 = vld [vmem:[#allocation2 + $0x84] sm:$0x1]  ;;  %3134 = vmatmul.mubr.bf16.gmra.mxu1 %v4268_v56  ;;  %1469 = vst [vmem:[#allocation3 + $0x3c] sm:$0xf] %v1453_v4  ;;  %v1484_v6 = vld [vmem:[#allocation2 + $0x10] sm:$0xf] }
  0x98   :  { %v546_v61 = vld [vmem:[#allocation2 + $0x84] sm:$0x1]  ;;  %481 = vst [vmem:[#allocation2 + $0x90] sm:$0xf] %v480_v59  ;;  %v933_v63 = vrot.slane %v837_v60, 5  ;;  %v755_v1 = vor.u32 %v754_v62, %v751_v57  ;;  %v1517_v8 = vshrl.u32 %v1484_v6, 16 }
  0x99   :  { %v758_v0 = vshll.u32 %v546_v61, 16  ;;  %v4273_v9 = vld [vmem:[#allocation3 + $0x1b0] ss:$36 sps:$4 sm:$0xff]   ;;  %v1486_v7 = vld [vmem:[#allocation2 + $0x18] sm:$0xf]  ;;  %v1520_v12 = vshll.u32 %v1484_v6, 16 }
  0x9a   :  { %v934_v58 = vsel %vm4493_vm5, %v3571_v54, %v933_v63  ;;  %v756_v2 = vrot.slane %v755_v1, 4  ;;  %v1485_v10 = vld [vmem:[#allocation2 + $0x14] sm:$0x1]  ;;  %v1487_v18 = vld [vmem:[#allocation2 + $0x1c] sm:$0x1]  ;;  %v1519_v28 = vrot.slane %v1517_v8, 4 }
  0x9b   :  { %v760_v5 = vrot.slane %v758_v0, 5  ;;  %969 = vst [vmem:[#allocation3 + $0x200] sm:$0xf] %v934_v58  ;;  %v1522_v29 = vrot.slane %v1520_v12, 5  ;;  %v1003_v30 = vld [vmem:[#allocation2 + $0x8] sm:$0xf] }
  0x9c   :  { %v4269_v31 = vld [vmem:[#allocation3 + $0x1b4] ss:$36 sps:$4 sm:$0xff]   ;;  %v1526_v34 = vshll.u32 %v1485_v10, 16  ;;  %v1531_v36 = vshrl.u32 %v1486_v7, 16  ;;  %v1004_v37 = vld [vmem:[#allocation2 + $0xc] sm:$0x1] }
  0x9d   :  { %v838_v13 = vld [vmem:[#allocation2 + $0x88] sm:$0xe]  ;;  %v839_v15 = vld [vmem:[#allocation2 + $0x8c] sm:$0x1]  ;;  %v761_v17 = vsel %vm4524_vm10, %v756_v2, %v760_v5  ;;  %3036 = vmatprep.mubr.bf16.mxu0 %v4269_v31  ;;  %v1523_v39 = vor.u32 %v1522_v29, %v1519_v28  ;;  %v1534_v41 = vshll.u32 %v1486_v7, 16  ;;  %v1540_v42 = vshll.u32 %v1487_v18, 16 }
  0x9e   :  { %v985_v16 = vld [vmem:[#allocation2 + $0x88] sm:$0xf]  ;;  %v3572_v19 = vrot.slane %v838_v13, 9  ;;  %v937_v20 = vrot.slane %v839_v15, 5  ;;  %806 = vst [vmem:[#allocation3 + $0x1fc] sm:$0xf] %v761_v17  ;;  %3037 = vmatmul.mubr.bf16.gmra.mxu0 %v4273_v9 }
  0x9f   :  { %1001 = vst [vmem:[#allocation3 + $0x204] sm:$0xf] %v985_v16  ;;  %v500_v21 = vld [vmem:[#allocation2 + $0x88] sm:$0xf]  ;;  %v986_v23 = vld [vmem:[#allocation2 + $0x90] sm:$0xf] }
  0xa0   :  { %v547_v22 = vld [vmem:[#allocation2 + $0x88] sm:$0xf]  ;;  %516 = vst [vmem:[#allocation3 + $0x21c] sm:$0xf] %v500_v21  ;;  %v548_v24 = vld [vmem:[#allocation2 + $0x8c] sm:$0x1]  ;;  %v938_v26 = vsel %vm4493_vm5, %v3572_v19, %v937_v20 }
  0xa1   :  { %v763_v35 = vshrl.u32 %v547_v22, 16  ;;  %v766_v25 = vshll.u32 %v547_v22, 16  ;;  %1002 = vst [vmem:[#allocation3 + $0x228] sm:$0xf] %v986_v23  ;;  %v772_v27 = vshll.u32 %v548_v24, 16  ;;  %v1528_v46 = vrot.slane %v1526_v34, 5 }
  0xa2   :  { %970 = vst [vmem:[#allocation3 + $0x224] sm:$0xf] %v938_v26  ;;  %v1005_v44 = vld [vmem:[#allocation2 + $0x10] sm:$0xf]  ;;  %v1533_v48 = vrot.slane %v1531_v36, 4  ;;  %v1036_v51 = vshrl.u32 %v1003_v30, 16 }
  0xa3   :  { %v765_v32 = vrot.slane %v763_v35, 4  ;;  %v768_v33 = vrot.slane %v766_v25, 5  ;;  %v774_v38 = vrot.slane %v772_v27, 5  ;;  %v1006_v49 = vld [vmem:[#allocation2 + $0x14] sm:$0x1]  ;;  %v1524_v52 = vrot.slane %v1523_v39, 4 }
  0xa4   :  { %v1536_v53 = vrot.slane %v1534_v41, 5  ;;  %v1542_v54 = vrot.slane %v1540_v42, 5  ;;  %v1039_v55 = vshll.u32 %v1003_v30, 16  ;;  %v1291_v56 = vld [vmem:[#allocation2 + $0x8] sm:$0xe]  ;;  %v1038_v59 = vrot.slane %v1036_v51, 4 }
  0xa5   :  { %v769_v45 = vor.u32 %v768_v33, %v765_v32  ;;  %v1045_v60 = vshll.u32 %v1004_v37, 16  ;;  %v1050_v61 = vshrl.u32 %v1005_v44, 16  ;;  %v1529_v62 = vsel %vm4524_vm10, %v1524_v52, %v1528_v46  ;;  %v1292_v3 = vld [vmem:[#allocation2 + $0xc] sm:$0x1]  ;;  %v1293_v4 = vld [vmem:[#allocation2 + $0x10] sm:$0xe] }
  0xa6   :  { %v1537_v63 = vor.u32 %v1536_v53, %v1533_v48  ;;  %v1041_v0 = vrot.slane %v1039_v55, 5  ;;  %v1053_v1 = vshll.u32 %v1005_v44, 16  ;;  %1756 = vst [vmem:[#allocation3 + $0x1c] sm:$0xf] %v1529_v62  ;;  %v1059_v2 = vshll.u32 %v1006_v49, 16 }
  0xa7   :  { %v770_v57 = vrot.slane %v769_v45, 4  ;;  %v1047_v5 = vrot.slane %v1045_v60, 5  ;;  %v1052_v6 = vrot.slane %v1050_v61, 4  ;;  %v1294_v8 = vld [vmem:[#allocation2 + $0x14] sm:$0x1]  ;;  %v3573_v15 = vrot.slane %v1291_v56, 9 }
  0xa8   :  { %v4276_v31 = vld [vmem:[#allocation3 + $0x204] ss:$36 sps:$4 sm:$0xff]   ;;  %v1538_v10 = vrot.slane %v1537_v63, 4  ;;  %v1042_v7 = vor.u32 %v1041_v0, %v1038_v59  ;;  %v1055_v12 = vrot.slane %v1053_v1, 5  ;;  %v1061_v13 = vrot.slane %v1059_v2, 5  ;;  %v4864_v60 = vld [vmem:[%s5244_s1 + $0x230] sm:$0xff]  }
  0xa9   :  { %v775_v58 = vsel %vm4524_vm10, %v770_v57, %v774_v38  ;;  %v4278_v9 = vld [vmem:[#allocation3 + $0x200] ss:$36 sps:$4 sm:$0xff]   ;;  %v1357_v16 = vrot.slane %v1292_v3, 5  ;;  %3141 = vmatprep.mubr.bf16.mxu1 %v4276_v31  ;;  %v3574_v19 = vrot.slane %v1293_v4, 9  ;;  %v1361_v20 = vrot.slane %v1294_v8, 5 }
  0xaa   :  { %807 = vst [vmem:[#allocation3 + $0x220] sm:$0xf] %v775_v58  ;;  %v1543_v17 = vsel %vm4524_vm10, %v1538_v10, %v1542_v54  ;;  %v1043_v18 = vrot.slane %v1042_v7, 4  ;;  %3142 = vmatmul.mubr.bf16.gmra.mxu1 %v4278_v9  ;;  %v1056_v21 = vor.u32 %v1055_v12, %v1052_v6  ;;  %v1454_v23 = vld [vmem:[#allocation2 + $0x20] sm:$0xf] }
  0xab   :  { %1757 = vst [vmem:[#allocation3 + $0x40] sm:$0xf] %v1543_v17  ;;  %v1358_v22 = vsel %vm4493_vm5, %v3573_v15, %v1357_v16  ;;  %v1455_v24 = vld [vmem:[#allocation2 + $0x28] sm:$0xf]  ;;  %v1488_v35 = vld [vmem:[#allocation2 + $0x20] sm:$0xf]  ;;  %v1362_v26 = vsel %vm4493_vm5, %v3574_v19, %v1361_v20 }
  0xac   :  { %v1048_v25 = vsel %vm4524_vm10, %v1043_v18, %v1047_v5  ;;  %1435 = vst [vmem:[#allocation3 + $0x14] sm:$0xf] %v1358_v22  ;;  %1470 = vst [vmem:[#allocation3 + $0x60] sm:$0xf] %v1454_v23  ;;  %v1489_v27 = vld [vmem:[#allocation2 + $0x24] sm:$0x1] }
  0xad   :  { %1471 = vst [vmem:[#allocation3 + $0x84] sm:$0xf] %v1455_v24  ;;  %v1490_v28 = vld [vmem:[#allocation2 + $0x28] sm:$0xf]  ;;  %v1491_v29 = vld [vmem:[#allocation2 + $0x2c] sm:$0x1] }
  0xae   :  { %v1057_v30 = vrot.slane %v1056_v21, 4  ;;  %1275 = vst [vmem:[#allocation3 + $0x10] sm:$0xf] %v1048_v25  ;;  %1436 = vst [vmem:[#allocation3 + $0x38] sm:$0xf] %v1362_v26  ;;  %v1545_v32 = vshrl.u32 %v1488_v35, 16 }
  0xaf   :  { %v1548_v33 = vshll.u32 %v1488_v35, 16  ;;  %v1554_v34 = vshll.u32 %v1489_v27, 16  ;;  %v1007_v36 = vld [vmem:[#allocation2 + $0x18] sm:$0xf]  ;;  %v1559_v37 = vshrl.u32 %v1490_v28, 16  ;;  %v1562_v38 = vshll.u32 %v1490_v28, 16 }
  0xb0   :  { %v1568_v39 = vshll.u32 %v1491_v29, 16  ;;  %v1008_v41 = vld [vmem:[#allocation2 + $0x1c] sm:$0x1]  ;;  %v1062_v45 = vsel %vm4524_vm10, %v1057_v30, %v1061_v13  ;;  %v1547_v46 = vrot.slane %v1545_v32, 4  ;;  %v1009_v53 = vld [vmem:[#allocation2 + $0x20] sm:$0xf] }
  0xb1   :  { %v4280_v42 = vld [vmem:[#allocation3 + $0x1fc] ss:$36 sps:$4 sm:$0xff]   ;;  %1276 = vst [vmem:[#allocation3 + $0x34] sm:$0xf] %v1062_v45  ;;  %v1550_v48 = vrot.slane %v1548_v33, 5  ;;  %v1556_v49 = vrot.slane %v1554_v34, 5 }
  0xb2   :  { %v4284_v44 = vld [vmem:[#allocation3 + $0x1f8] ss:$36 sps:$4 sm:$0xff]   ;;  %v1561_v51 = vrot.slane %v1559_v37, 4  ;;  %v1564_v52 = vrot.slane %v1562_v38, 5  ;;  %3044 = vmatprep.mubr.bf16.mxu0 %v4280_v42  ;;  %v1570_v54 = vrot.slane %v1568_v39, 5  ;;  %v1064_v56 = vshrl.u32 %v1007_v36, 16 }
  0xb3   :  { %v1010_v55 = vld [vmem:[#allocation2 + $0x24] sm:$0x1]  ;;  %v1067_v57 = vshll.u32 %v1007_v36, 16  ;;  %v1073_v59 = vshll.u32 %v1008_v41, 16  ;;  %3045 = vmatmul.mubr.bf16.gmra.mxu0 %v4284_v44  ;;  %v4286_v61 = vld [vmem:[#allocation3 + $0x18] ss:$36 sps:$4 sm:$0xff]   ;;  %v1551_v63 = vor.u32 %v1550_v48, %v1547_v46 }
  0xb4   :  { %v4288_v62 = vld [vmem:[#allocation3 + $0x1c] ss:$36 sps:$4 sm:$0xff]   ;;  %v1565_v0 = vor.u32 %v1564_v52, %v1561_v51  ;;  %v1078_v1 = vshrl.u32 %v1009_v53, 16  ;;  %v1066_v3 = vrot.slane %v1064_v56, 4  ;;  %v1081_v5 = vshll.u32 %v1009_v53, 16  ;;  %v4869_v16 = vld [vmem:[%s5244_s1 + $0x228] sm:$0xff]  }
  0xb5   :  { %v1069_v4 = vrot.slane %v1067_v57, 5  ;;  %v1075_v58 = vrot.slane %v1073_v59, 5  ;;  %v1295_v6 = vld [vmem:[#allocation2 + $0x18] sm:$0xe]  ;;  %3279 = vmatprep.mubr.bf16.mxu1 %v4288_v62  ;;  %v1552_v2 = vrot.slane %v1551_v63, 4  ;;  %v1087_v9 = vshll.u32 %v1010_v55, 16 }
  0xb6   :  { %v1566_v8 = vrot.slane %v1565_v0, 4  ;;  %v1080_v31 = vrot.slane %v1078_v1, 4  ;;  %3280 = vmatmul.mubr.bf16.vlgmr.msra.gmra.mxu1 %v4286_v61  ;;  %v1083_v7 = vrot.slane %v1081_v5, 5  ;;  %v1296_v12 = vld [vmem:[#allocation2 + $0x1c] sm:$0x1]  ;;  %v3575_v15 = vrot.slane %v1295_v6, 9 }
  0xb7   :  { %v1070_v10 = vor.u32 %v1069_v4, %v1066_v3  ;;  %v1297_v13 = vld [vmem:[#allocation2 + $0x20] sm:$0xe]  ;;  %4165 = vmatpush3.bf16.msra.mxu1 %v4830_v50  ;;  %v1557_v17 = vsel %vm4524_vm10, %v1552_v2, %v1556_v49  ;;  %v1089_v19 = vrot.slane %v1087_v9, 5  ;;  %v1298_v20 = vld [vmem:[#allocation2 + $0x24] sm:$0x1]  ;;  %v1365_v21 = vrot.slane %v1296_v12, 5 }
  0xb8   :  { %v1571_v18 = vsel %vm4524_vm10, %v1566_v8, %v1570_v54  ;;  %v4289_v22 = vld [vmem:[#allocation3 + $0x10] ss:$36 sps:$4 sm:$0xff]   ;;  %1758 = vst [vmem:[#allocation3 + $0x64] sm:$0xf] %v1557_v17  ;;  %v1084_v35 = vor.u32 %v1083_v7, %v1080_v31  ;;  %4158 = vmatprep.subr.bf16.mxu1 %v4864_v60  ;;  %v3576_v26 = vrot.slane %v1297_v13, 9  ;;  %v1369_v27 = vrot.slane %v1298_v20, 5 }
  0xb9   :  { %v4291_v23 = vld [vmem:[#allocation3 + $0x14] ss:$36 sps:$4 sm:$0xff]   ;;  %1759 = vst [vmem:[#allocation3 + $0x88] sm:$0xf] %v1571_v18  ;;  %v1071_v24 = vrot.slane %v1070_v10, 4  ;;  %v1366_v25 = vsel %vm4493_vm5, %v3575_v15, %v1365_v21  ;;  %v285_v29 = vrot.slane %v4666_v47, 4 }
  0xba   :  { %v1456_v28 = vld [vmem:[#allocation2 + $0x30] sm:$0xf]  ;;  %3182 = vmatprep.mubr.bf16.mxu0 %v4291_v23  ;;  %v1085_v32 = vrot.slane %v1084_v35, 4  ;;  %1437 = vst [vmem:[#allocation3 + $0x5c] sm:$0xf] %v1366_v25  ;;  %v1370_v36 = vsel %vm4493_vm5, %v3576_v26, %v1369_v27  ;;  %v4892_v48 = vld [vmem:[%s5244_s1 + $0x220] sm:$0xff]  }
  0xbb   :  { %v1076_v30 = vsel %vm4524_vm10, %v1071_v24, %v1075_v58  ;;  %v1457_v33 = vld [vmem:[#allocation2 + $0x38] sm:$0xf]  ;;  %1472 = vst [vmem:[#allocation3 + $0xa8] sm:$0xf] %v1456_v28  ;;  %v1492_v34 = vld [vmem:[#allocation2 + $0x30] sm:$0xf]  ;;  %3183 = vmatmul.mubr.bf16.vlgmr.msra.gmra.mxu0 %v4289_v22  ;;  %4166 = vmatpush3.bf16.msra.mxu1 %v4864_v60 }
  0xbc   :  { %1277 = vst [vmem:[#allocation3 + $0x58] sm:$0xf] %v1076_v30  ;;  %1473 = vst [vmem:[#allocation3 + $0xcc] sm:$0xf] %v1457_v33  ;;  %v1493_v37 = vld [vmem:[#allocation2 + $0x34] sm:$0x1]  ;;  %4126 = vmatpush3.bf16.msra.mxu0 %v4830_v50  ;;  %v1090_v41 = vsel %vm4524_vm10, %v1085_v32, %v1089_v19  ;;  %4159 = vmatprep.subr.bf16.mxu1 %v4869_v16 }
  0xbd   :  { %v1494_v38 = vld [vmem:[#allocation2 + $0x38] sm:$0xf]  ;;  %v1495_v39 = vld [vmem:[#allocation2 + $0x3c] sm:$0x1]  ;;  %1438 = vst [vmem:[#allocation3 + $0x80] sm:$0xf] %v1370_v36  ;;  %4127 = vmatprep.subr.bf16.mxu0 %v4864_v60 }
  0xbe   :  { %v1573_v42 = vshrl.u32 %v1492_v34, 16  ;;  %v1576_v44 = vshll.u32 %v1492_v34, 16  ;;  %v1582_v45 = vshll.u32 %v1493_v37, 16  ;;  %v1011_v46 = vld [vmem:[#allocation2 + $0x28] sm:$0xf]  ;;  %v1587_v49 = vshrl.u32 %v1494_v38, 16 }
  0xbf   :  { %1278 = vst [vmem:[#allocation3 + $0x7c] sm:$0xf] %v1090_v41  ;;  %v1590_v50 = vshll.u32 %v1494_v38, 16  ;;  %v1596_v51 = vshll.u32 %v1495_v39, 16  ;;  %v1012_v52 = vld [vmem:[#allocation2 + $0x2c] sm:$0x1]  ;;  %4167 = vmatpush3.bf16.msra.mxu1 %v4869_v16 }
  0xc0   :  { %v1092_v53 = vshrl.u32 %v1011_v46, 16  ;;  %v1575_v54 = vrot.slane %v1573_v42, 4  ;;  %v1578_v55 = vrot.slane %v1576_v44, 5  ;;  %v1584_v56 = vrot.slane %v1582_v45, 5  ;;  %v1013_v57 = vld [vmem:[#allocation2 + $0x30] sm:$0xf]  ;;  %4128 = vmatpush3.bf16.msra.mxu0 %v4864_v60  ;;  %4160 = vmatprep.subr.bf16.mxu1 %v4892_v48 }
  0xc1   :  { %v1095_v59 = vshll.u32 %v1011_v46, 16  ;;  %v4898_v61 = vld [vmem:[%s5244_s1 + $0x218] sm:$0xff]   ;;  %v4293_v62 = vld [vmem:[#allocation3 + $0x64] ss:$36 sps:$4 sm:$0xff]   ;;  %v1589_v63 = vrot.slane %v1587_v49, 4  ;;  %v1592_v0 = vrot.slane %v1590_v50, 5  ;;  %4129 = vmatprep.subr.bf16.mxu0 %v4869_v16 }
  0xc2   :  { %v4295_v1 = vld [vmem:[#allocation3 + $0x60] ss:$36 sps:$4 sm:$0xff]   ;;  %v1579_v3 = vor.u32 %v1578_v55, %v1575_v54  ;;  %v1598_v4 = vrot.slane %v1596_v51, 5  ;;  %v1014_v58 = vld [vmem:[#allocation2 + $0x34] sm:$0x1]  ;;  %v1094_v5 = vrot.slane %v1092_v53, 4  ;;  %3287 = vmatprep.mubr.bf16.mxu1 %v4293_v62 }
  0xc3   :  { %v1593_v6 = vor.u32 %v1592_v0, %v1589_v63  ;;  %v1097_v2 = vrot.slane %v1095_v59, 5  ;;  %v1101_v8 = vshll.u32 %v1012_v52, 16  ;;  %v1106_v31 = vshrl.u32 %v1013_v57, 16  ;;  %v1299_v9 = vld [vmem:[#allocation2 + $0x28] sm:$0xe]  ;;  %3288 = vmatmul.mubr.bf16.gmra.mxu1 %v4295_v1  ;;  %v4908_v20 = vld [vmem:[%s5244_s1 + $0x210] sm:$0xff]  }
  0xc4   :  { %v1580_v10 = vrot.slane %v1579_v3, 4  ;;  %v1109_v7 = vshll.u32 %v1013_v57, 16  ;;  %v1115_v12 = vshll.u32 %v1014_v58, 16  ;;  %v1300_v13 = vld [vmem:[#allocation2 + $0x2c] sm:$0x1]  ;;  %4168 = vmatpush3.bf16.msra.mxu1 %v4892_v48  ;;  %4130 = vmatpush3.bf16.msra.mxu0 %v4869_v16  ;;  %v3577_v28 = vrot.slane %v1299_v9, 9 }
  0xc5   :  { %v1594_v60 = vrot.slane %v1593_v6, 4  ;;  %v1098_v15 = vor.u32 %v1097_v2, %v1094_v5  ;;  %v1103_v17 = vrot.slane %v1101_v8, 5  ;;  %v1108_v18 = vrot.slane %v1106_v31, 4  ;;  %v1301_v19 = vld [vmem:[#allocation2 + $0x30] sm:$0xe]  ;;  %4161 = vmatprep.subr.bf16.mxu1 %v4898_v61  ;;  %4131 = vmatprep.subr.bf16.mxu0 %v4892_v48  ;;  %v4933_v46 = vld [vmem:[%s5244_s1 + $0x208] sm:$0xff]  }
  0xc6   :  { %v4296_v21 = vld [vmem:[#allocation3 + $0x5c] ss:$36 sps:$4 sm:$0xff]   ;;  %v1585_v23 = vsel %vm4524_vm10, %v1580_v10, %v1584_v56  ;;  %v1111_v24 = vrot.slane %v1109_v7, 5  ;;  %v1117_v26 = vrot.slane %v1115_v12, 5  ;;  %v1302_v27 = vld [vmem:[#allocation2 + $0x34] sm:$0x1] }
  0xc7   :  { %v4299_v22 = vld [vmem:[#allocation3 + $0x58] ss:$36 sps:$4 sm:$0xff]   ;;  %v1599_v35 = vsel %vm4524_vm10, %v1594_v60, %v1598_v4  ;;  %1760 = vst [vmem:[#allocation3 + $0xac] sm:$0xf] %v1585_v23  ;;  %v1099_v25 = vrot.slane %v1098_v15, 4  ;;  %3190 = vmatprep.mubr.bf16.mxu0 %v4296_v21  ;;  %v1373_v32 = vrot.slane %v1300_v13, 5 }
  0xc8   :  { %1761 = vst [vmem:[#allocation3 + $0xd0] sm:$0xf] %v1599_v35  ;;  %v1112_v30 = vor.u32 %v1111_v24, %v1108_v18  ;;  %v3578_v33 = vrot.slane %v1301_v19, 9  ;;  %v1377_v34 = vrot.slane %v1302_v27, 5  ;;  %3191 = vmatmul.mubr.bf16.gmra.mxu0 %v4299_v22  ;;  %v434_v36 = vld [vmem:[#allocation2 + $0x44] sm:$0x1]  ;;  %4169 = vmatpush3.bf16.msra.mxu1 %v4898_v61 }
  0xc9   :  { %v1104_v16 = vsel %vm4524_vm10, %v1099_v25, %v1103_v17  ;;  %v1458_v37 = vld [vmem:[#allocation2 + $0x40] sm:$0xf]  ;;  %v1374_v39 = vsel %vm4493_vm5, %v3577_v28, %v1373_v32  ;;  %v435_v42 = vsel %vm4530_vm11, %v285_v29, %v434_v36  ;;  %v1459_v44 = vld [vmem:[#allocation2 + $0x48] sm:$0xf]  ;;  %4132 = vmatpush3.bf16.msra.mxu0 %v4892_v48  ;;  %4162 = vmatprep.subr.bf16.mxu1 %v4908_v20  ;;  %v1499_v49 = vld [vmem:[#allocation2 + $0x4c] sm:$0x1] }
  0xca   :  { %v1113_v38 = vrot.slane %v1112_v30, 4  ;;  %1279 = vst [vmem:[#allocation3 + $0xa0] sm:$0xf] %v1104_v16  ;;  %v1378_v41 = vsel %vm4493_vm5, %v3578_v33, %v1377_v34  ;;  %1474 = vst [vmem:[#allocation3 + $0xf0] sm:$0xf] %v1458_v37  ;;  %4133 = vmatprep.subr.bf16.mxu0 %v4898_v61  ;;  %v1624_v53 = vshll.u32 %v1499_v49, 16 }
  0xcb   :  { %v1496_v45 = vld [vmem:[#allocation2 + $0x40] sm:$0xf]  ;;  %1439 = vst [vmem:[#allocation3 + $0xa4] sm:$0xf] %v1374_v39  ;;  %1440 = vst [vmem:[#allocation3 + $0xc8] sm:$0xf] %v1378_v41 }
  0xcc   :  { %436 = vst [vmem:[#allocation2 + $0x44] sm:$0x1] %v435_v42  ;;  %1475 = vst [vmem:[#allocation3 + $0x114] sm:$0xf] %v1459_v44  ;;  %v1498_v47 = vld [vmem:[#allocation2 + $0x48] sm:$0xf]  ;;  %v1118_v48 = vsel %vm4524_vm10, %v1113_v38, %v1117_v26  ;;  %4170 = vmatpush3.bf16.msra.mxu1 %v4908_v20 }
  0xcd   :  { %v1601_v50 = vshrl.u32 %v1496_v45, 16  ;;  %v1604_v29 = vshll.u32 %v1496_v45, 16  ;;  %v1615_v51 = vshrl.u32 %v1498_v47, 16  ;;  %v1618_v52 = vshll.u32 %v1498_v47, 16  ;;  %v1015_v54 = vld [vmem:[#allocation2 + $0x38] sm:$0xf]  ;;  %4134 = vmatpush3.bf16.msra.mxu0 %v4898_v61  ;;  %4163 = vmatprep.subr.bf16.mxu1 %v4933_v46 }
  0xce   :  { %1280 = vst [vmem:[#allocation3 + $0xc4] sm:$0xf] %v1118_v48  ;;  %v1016_v57 = vld [vmem:[#allocation2 + $0x3c] sm:$0x1]  ;;  %v1017_v59 = vld [vmem:[#allocation2 + $0x40] sm:$0xf]  ;;  %4135 = vmatprep.subr.bf16.mxu0 %v4908_v20 }
  0xcf   :  { %v1603_v55 = vrot.slane %v1601_v50, 4  ;;  %v1606_v56 = vrot.slane %v1604_v29, 5  ;;  %v1617_v62 = vrot.slane %v1615_v51, 4  ;;  %v1620_v63 = vrot.slane %v1618_v52, 5  ;;  %v4944_v3 = vld [vmem:[%s5244_s1 + $0x200] sm:$0xff]  }
  0xd0   :  { %v1626_v0 = vrot.slane %v1624_v53, 5  ;;  %v1120_v1 = vshrl.u32 %v1015_v54, 16  ;;  %v4300_v4 = vld [vmem:[#allocation3 + $0xac] ss:$36 sps:$4 sm:$0xff]   ;;  %v1123_v6 = vshll.u32 %v1015_v54, 16  ;;  %v1129_v31 = vshll.u32 %v1016_v57, 16  ;;  %4171 = vmatpush3.bf16.msra.mxu1 %v4933_v46 }
  0xd1   :  { %v4302_v58 = vld [vmem:[#allocation3 + $0xa8] ss:$36 sps:$4 sm:$0xff]   ;;  %v1607_v5 = vor.u32 %v1606_v56, %v1603_v55  ;;  %v1621_v2 = vor.u32 %v1620_v63, %v1617_v62  ;;  %v1134_v9 = vshrl.u32 %v1017_v59, 16  ;;  %v1303_v10 = vld [vmem:[#allocation2 + $0x38] sm:$0xe]  ;;  %3295 = vmatprep.mubr.bf16.mxu1 %v4300_v4  ;;  %v1137_v12 = vshll.u32 %v1017_v59, 16  ;;  %4136 = vmatpush3.bf16.msra.mxu0 %v4908_v20 }
  0xd2   :  { %v1122_v8 = vrot.slane %v1120_v1, 4  ;;  %v1125_v7 = vrot.slane %v1123_v6, 5  ;;  %v1304_v13 = vld [vmem:[#allocation2 + $0x3c] sm:$0x1]  ;;  %v3579_v60 = vrot.slane %v1303_v10, 9  ;;  %3296 = vmatmul.mubr.bf16.gmra.mxu1 %v4302_v58  ;;  %v1131_v22 = vrot.slane %v1129_v31, 5  ;;  %4137 = vmatprep.subr.bf16.mxu0 %v4933_v46 }
  0xd3   :  { %v1608_v61 = vrot.slane %v1607_v5, 4  ;;  %v1497_v15 = vld [vmem:[#allocation2 + $0x44] sm:$0x1]  ;;  %v1622_v17 = vrot.slane %v1621_v2, 4  ;;  %v1136_v23 = vrot.slane %v1134_v9, 4  ;;  %4164 = vmatprep.subr.bf16.mxu1 %v4944_v3  ;;  %v1139_v27 = vrot.slane %v1137_v12, 5 }
  0xd4   :  { %v1018_v18 = vld [vmem:[#allocation2 + $0x44] sm:$0x1]  ;;  %v1610_v19 = vshll.u32 %v1497_v15, 16  ;;  %v1126_v21 = vor.u32 %v1125_v7, %v1122_v8  ;;  %v1305_v24 = vld [vmem:[#allocation2 + $0x40] sm:$0xe]  ;;  %v1381_v33 = vrot.slane %v1304_v13, 5  ;;  %4172 = vmatpush3.bf16.msra.mxu1 %v4944_v3 }
  0xd5   :  { %v4303_v35 = vld [vmem:[#allocation3 + $0xa4] ss:$36 sps:$4 sm:$0xff]   ;;  %v1627_v26 = vsel %vm4524_vm10, %v1622_v17, %v1626_v0  ;;  %v1143_v32 = vshll.u32 %v1018_v18, 16  ;;  %v1140_v34 = vor.u32 %v1139_v27, %v1136_v23  ;;  %v3580_v16 = vrot.slane %v1305_v24, 9  ;;  %4138 = vmatpush3.bf16.msra.mxu0 %v4933_v46  ;;  %v1460_v42 = vld [vmem:[#allocation2 + $0x60] sm:$0xf] }
  0xd6   :  { %v4306_v25 = vld [vmem:[#allocation3 + $0xa0] ss:$36 sps:$4 sm:$0xff]   ;;  %v1612_v28 = vrot.slane %v1610_v19, 5  ;;  %1763 = vst [vmem:[#allocation3 + $0x118] sm:$0xf] %v1627_v26  ;;  %v1127_v30 = vrot.slane %v1126_v21, 4  ;;  %3198 = vmatprep.mubr.bf16.mxu0 %v4303_v35  ;;  %v1382_v41 = vsel %vm4493_vm5, %v3579_v60, %v1381_v33  ;;  %4139 = vmatprep.subr.bf16.mxu0 %v4944_v3 }
  0xd7   :  { %v1306_v20 = vld [vmem:[#allocation2 + $0x44] sm:$0x1]  ;;  %3199 = vmatmul.mubr.bf16.gmra.mxu0 %v4306_v25  ;;  %v1145_v39 = vrot.slane %v1143_v32, 5  ;;  %v1461_v44 = vld [vmem:[#allocation2 + $0x68] sm:$0xf]  ;;  %v1141_v45 = vrot.slane %v1140_v34, 4 }
  0xd8   :  { %v1385_v36 = vrot.slane %v1306_v20, 5  ;;  %v1613_v37 = vsel %vm4524_vm10, %v1608_v61, %v1612_v28  ;;  %v1132_v38 = vsel %vm4524_vm10, %v1127_v30, %v1131_v22  ;;  %1441 = vst [vmem:[#allocation3 + $0xec] sm:$0xf] %v1382_v41  ;;  %1476 = vst [vmem:[#allocation3 + $0x138] sm:$0xf] %v1460_v42 }
  0xd9   :  { %1762 = vst [vmem:[#allocation3 + $0xf4] sm:$0xf] %v1613_v37  ;;  %1281 = vst [vmem:[#allocation3 + $0xe8] sm:$0xf] %v1132_v38  ;;  %v1500_v47 = vld [vmem:[#allocation2 + $0x60] sm:$0xf]  ;;  %v1146_v52 = vsel %vm4524_vm10, %v1141_v45, %v1145_v39  ;;  %4140 = vmatpush3.bf16.msra.mxu0 %v4944_v3 }
  0xda   :  { %v1386_v46 = vsel %vm4493_vm5, %v3580_v16, %v1385_v36  ;;  %1477 = vst [vmem:[#allocation3 + $0x15c] sm:$0xf] %v1461_v44  ;;  %v1501_v49 = vld [vmem:[#allocation2 + $0x64] sm:$0x1]  ;;  %v1502_v50 = vld [vmem:[#allocation2 + $0x68] sm:$0xf] }
  0xdb   :  { %1442 = vst [vmem:[#allocation3 + $0x110] sm:$0xf] %v1386_v46  ;;  %v1503_v29 = vld [vmem:[#allocation2 + $0x6c] sm:$0x1]  ;;  %v1629_v48 = vshrl.u32 %v1500_v47, 16  ;;  %v1632_v51 = vshll.u32 %v1500_v47, 16 }
  0xdc   :  { %v1638_v53 = vshll.u32 %v1501_v49, 16  ;;  %v1643_v54 = vshrl.u32 %v1502_v50, 16  ;;  %v1646_v55 = vshll.u32 %v1502_v50, 16  ;;  %v1019_v56 = vld [vmem:[#allocation2 + $0x58] sm:$0xf]  ;;  %v1652_v62 = vshll.u32 %v1503_v29, 16 }
  0xdd   :  { %1282 = vst [vmem:[#allocation3 + $0x10c] sm:$0xf] %v1146_v52  ;;  %v1631_v57 = vrot.slane %v1629_v48, 4  ;;  %v1634_v59 = vrot.slane %v1632_v51, 5  ;;  %v1020_v63 = vld [vmem:[#allocation2 + $0x5c] sm:$0x1] }
  0xde   :  { %v1148_v0 = vshrl.u32 %v1019_v56, 16  ;;  %v1640_v1 = vrot.slane %v1638_v53, 5  ;;  %v1645_v4 = vrot.slane %v1643_v54, 4  ;;  %v1648_v58 = vrot.slane %v1646_v55, 5  ;;  %v1021_v5 = vld [vmem:[#allocation2 + $0x60] sm:$0xf] }
  0xdf   :  { %v1635_v6 = vor.u32 %v1634_v59, %v1631_v57  ;;  %v1654_v2 = vrot.slane %v1652_v62, 5  ;;  %v1022_v8 = vld [vmem:[#allocation2 + $0x64] sm:$0x1]  ;;  %v1151_v9 = vshll.u32 %v1019_v56, 16  ;;  %v1157_v61 = vshll.u32 %v1020_v63, 16 }
  0xe0   :  { %v1150_v31 = vrot.slane %v1148_v0, 4  ;;  %v1649_v10 = vor.u32 %v1648_v58, %v1645_v4  ;;  %v1162_v7 = vshrl.u32 %v1021_v5, 16  ;;  %v1165_v12 = vshll.u32 %v1021_v5, 16  ;;  %v1307_v3 = vld [vmem:[#allocation2 + $0x58] sm:$0xe] }
  0xe1   :  { %v4307_v13 = vld [vmem:[#allocation3 + $0xf4] ss:$36 sps:$4 sm:$0xff]   ;;  %v1636_v15 = vrot.slane %v1635_v6, 4  ;;  %v1153_v18 = vrot.slane %v1151_v9, 5  ;;  %v1159_v19 = vrot.slane %v1157_v61, 5  ;;  %v1171_v24 = vshll.u32 %v1022_v8, 16 }
  0xe2   :  { %v4309_v60 = vld [vmem:[#allocation3 + $0xf0] ss:$36 sps:$4 sm:$0xff]   ;;  %v1650_v17 = vrot.slane %v1649_v10, 4  ;;  %v1164_v21 = vrot.slane %v1162_v7, 4  ;;  %3303 = vmatprep.mubr.bf16.mxu1 %v4307_v13  ;;  %v1167_v23 = vrot.slane %v1165_v12, 5  ;;  %v3581_v32 = vrot.slane %v1307_v3, 9 }
  0xe3   :  { %v1641_v22 = vsel %vm4524_vm10, %v1636_v15, %v1640_v1  ;;  %v1308_v35 = vld [vmem:[#allocation2 + $0x5c] sm:$0x1]  ;;  %v1309_v25 = vld [vmem:[#allocation2 + $0x60] sm:$0xe]  ;;  %3304 = vmatmul.mubr.bf16.gmra.mxu1 %v4309_v60  ;;  %v4310_v26 = vld [vmem:[#allocation3 + $0xec] ss:$36 sps:$4 sm:$0xff]   ;;  %v1154_v30 = vor.u32 %v1153_v18, %v1150_v31 }
  0xe4   :  { %v4313_v27 = vld [vmem:[#allocation3 + $0xe8] ss:$36 sps:$4 sm:$0xff]   ;;  %v1655_v28 = vsel %vm4524_vm10, %v1650_v17, %v1654_v2  ;;  %1764 = vst [vmem:[#allocation3 + $0x13c] sm:$0xf] %v1641_v22  ;;  %v1168_v20 = vor.u32 %v1167_v23, %v1164_v21  ;;  %v1173_v33 = vrot.slane %v1171_v24, 5  ;;  %v1389_v16 = vrot.slane %v1308_v35, 5  ;;  %3206 = vmatprep.mubr.bf16.mxu0 %v4310_v26 }
  0xe5   :  { %1765 = vst [vmem:[#allocation3 + $0x160] sm:$0xf] %v1655_v28  ;;  %v1310_v34 = vld [vmem:[#allocation2 + $0x64] sm:$0x1]  ;;  %v3582_v36 = vrot.slane %v1309_v25, 9  ;;  %v1155_v37 = vrot.slane %v1154_v30, 4  ;;  %3207 = vmatmul.mubr.bf16.gmra.mxu0 %v4313_v27 }
  0xe6   :  { %v1393_v38 = vrot.slane %v1310_v34, 5  ;;  %v1169_v39 = vrot.slane %v1168_v20, 4  ;;  %v1390_v41 = vsel %vm4493_vm5, %v3581_v32, %v1389_v16  ;;  %v1462_v42 = vld [vmem:[#allocation2 + $0x70] sm:$0xf]  ;;  %v1463_v44 = vld [vmem:[#allocation2 + $0x78] sm:$0xf] }
  0xe7   :  { %v1160_v45 = vsel %vm4524_vm10, %v1155_v37, %v1159_v19  ;;  %1443 = vst [vmem:[#allocation3 + $0x134] sm:$0xf] %v1390_v41  ;;  %1478 = vst [vmem:[#allocation3 + $0x180] sm:$0xf] %v1462_v42  ;;  %v1504_v47 = vld [vmem:[#allocation2 + $0x70] sm:$0xf] }
  0xe8   :  { %v1394_v46 = vsel %vm4493_vm5, %v3582_v36, %v1393_v38  ;;  %1479 = vst [vmem:[#allocation3 + $0x1a4] sm:$0xf] %v1463_v44  ;;  %v1505_v49 = vld [vmem:[#allocation2 + $0x74] sm:$0x1]  ;;  %v1506_v50 = vld [vmem:[#allocation2 + $0x78] sm:$0xf]  ;;  %v1174_v29 = vsel %vm4524_vm10, %v1169_v39, %v1173_v33 }
  0xe9   :  { %1283 = vst [vmem:[#allocation3 + $0x130] sm:$0xf] %v1160_v45  ;;  %1444 = vst [vmem:[#allocation3 + $0x158] sm:$0xf] %v1394_v46  ;;  %v1507_v48 = vld [vmem:[#allocation2 + $0x7c] sm:$0x1] }
  0xea   :  { %v1657_v51 = vshrl.u32 %v1504_v47, 16  ;;  %v1660_v52 = vshll.u32 %v1504_v47, 16  ;;  %v1666_v53 = vshll.u32 %v1505_v49, 16  ;;  %v349_v54 = vrot.slane %v4823_v43, 4  ;;  %1284 = vst [vmem:[#allocation3 + $0x154] sm:$0xf] %v1174_v29 }
  0xeb   :  { %v1671_v55 = vshrl.u32 %v1506_v50, 16  ;;  %v1674_v56 = vshll.u32 %v1506_v50, 16  ;;  %v1680_v57 = vshll.u32 %v1507_v48, 16  ;;  %v1023_v59 = vld [vmem:[#allocation2 + $0x68] sm:$0xf] }
  0xec   :  { %v1659_v62 = vrot.slane %v1657_v51, 4  ;;  %v1662_v63 = vrot.slane %v1660_v52, 5  ;;  %v1668_v0 = vrot.slane %v1666_v53, 5  ;;  %v1024_v1 = vld [vmem:[#allocation2 + $0x6c] sm:$0x1]  ;;  %v1176_v10 = vshrl.u32 %v1023_v59, 16 }
  0xed   :  { %v4314_v4 = vld [vmem:[#allocation3 + $0x13c] ss:$36 sps:$4 sm:$0xff]   ;;  %v1673_v5 = vrot.slane %v1671_v55, 4  ;;  %v1676_v2 = vrot.slane %v1674_v56, 5  ;;  %v1682_v8 = vrot.slane %v1680_v57, 5  ;;  %v1179_v61 = vshll.u32 %v1023_v59, 16 }
  0xee   :  { %v4316_v58 = vld [vmem:[#allocation3 + $0x138] ss:$36 sps:$4 sm:$0xff]   ;;  %v1663_v6 = vor.u32 %v1662_v63, %v1659_v62  ;;  %v1025_v31 = vld [vmem:[#allocation2 + $0x70] sm:$0xf]  ;;  %v1026_v9 = vld [vmem:[#allocation2 + $0x74] sm:$0x1]  ;;  %3311 = vmatprep.mubr.bf16.mxu1 %v4314_v4 }
  0xef   :  { %v1185_v7 = vshll.u32 %v1024_v1, 16  ;;  %v1190_v12 = vshrl.u32 %v1025_v31, 16  ;;  %v1311_v3 = vld [vmem:[#allocation2 + $0x68] sm:$0xe]  ;;  %3312 = vmatmul.mubr.bf16.gmra.mxu1 %v4316_v58  ;;  %v1677_v60 = vor.u32 %v1676_v2, %v1673_v5  ;;  %v1193_v15 = vshll.u32 %v1025_v31, 16 }
  0xf0   :  { %v1664_v13 = vrot.slane %v1663_v6, 4  ;;  %v1199_v17 = vshll.u32 %v1026_v9, 16  ;;  %v1312_v18 = vld [vmem:[#allocation2 + $0x6c] sm:$0x1]  ;;  %v1178_v19 = vrot.slane %v1176_v10, 4  ;;  %v1181_v21 = vrot.slane %v1179_v61, 5 }
  0xf1   :  { %v1187_v22 = vrot.slane %v1185_v7, 5  ;;  %v1192_v23 = vrot.slane %v1190_v12, 4  ;;  %v4317_v24 = vld [vmem:[#allocation3 + $0x134] ss:$36 sps:$4 sm:$0xff]   ;;  %v1678_v26 = vrot.slane %v1677_v60, 4  ;;  %v1195_v28 = vrot.slane %v1193_v15, 5 }
  0xf2   :  { %v4320_v35 = vld [vmem:[#allocation3 + $0x130] ss:$36 sps:$4 sm:$0xff]   ;;  %v1669_v25 = vsel %vm4524_vm10, %v1664_v13, %v1668_v0  ;;  %v1182_v27 = vor.u32 %v1181_v21, %v1178_v19  ;;  %v1201_v30 = vrot.slane %v1199_v17, 5  ;;  %3214 = vmatprep.mubr.bf16.mxu0 %v4317_v24  ;;  %v3583_v34 = vrot.slane %v1311_v3, 9  ;;  %v1464_v41 = vld [vmem:[#allocation2 + $0x80] sm:$0xf] }
  0xf3   :  { %1766 = vst [vmem:[#allocation3 + $0x184] sm:$0xf] %v1669_v25  ;;  %v1313_v32 = vld [vmem:[#allocation2 + $0x70] sm:$0xe]  ;;  %v1314_v20 = vld [vmem:[#allocation2 + $0x74] sm:$0x1]  ;;  %v1683_v33 = vsel %vm4524_vm10, %v1678_v26, %v1682_v8  ;;  %3215 = vmatmul.mubr.bf16.gmra.mxu0 %v4320_v35  ;;  %v1196_v38 = vor.u32 %v1195_v28, %v1192_v23 }
  0xf4   :  { %v1397_v16 = vrot.slane %v1312_v18, 5  ;;  %v3584_v36 = vrot.slane %v1313_v32, 9  ;;  %1767 = vst [vmem:[#allocation3 + $0x1a8] sm:$0xf] %v1683_v33  ;;  %v1183_v37 = vrot.slane %v1182_v27, 4  ;;  %v1401_v39 = vrot.slane %v1314_v20, 5 }
  0xf5   :  { %v1465_v44 = vld [vmem:[#allocation2 + $0x88] sm:$0xf]  ;;  %1480 = vst [vmem:[#allocation3 + $0x1c8] sm:$0xf] %v1464_v41  ;;  %v1508_v45 = vld [vmem:[#allocation2 + $0x80] sm:$0xf] }
  0xf6   :  { %v1398_v42 = vsel %vm4493_vm5, %v3583_v34, %v1397_v16  ;;  %v1509_v46 = vld [vmem:[#allocation2 + $0x84] sm:$0x1]  ;;  %v1188_v47 = vsel %vm4524_vm10, %v1183_v37, %v1187_v22  ;;  %v1197_v49 = vrot.slane %v1196_v38, 4  ;;  %v1402_v50 = vsel %vm4493_vm5, %v3584_v36, %v1401_v39  ;;  %1481 = vst [vmem:[#allocation3 + $0x1ec] sm:$0xf] %v1465_v44 }
  0xf7   :  { %1445 = vst [vmem:[#allocation3 + $0x17c] sm:$0xf] %v1398_v42  ;;  %v1510_v29 = vld [vmem:[#allocation2 + $0x88] sm:$0xf]  ;;  %v1511_v48 = vld [vmem:[#allocation2 + $0x8c] sm:$0x1] }
  0xf8   :  { %v1685_v51 = vshrl.u32 %v1508_v45, 16  ;;  %1285 = vst [vmem:[#allocation3 + $0x178] sm:$0xf] %v1188_v47  ;;  %1446 = vst [vmem:[#allocation3 + $0x1a0] sm:$0xf] %v1402_v50  ;;  %v1688_v52 = vshll.u32 %v1508_v45, 16  ;;  %v1202_v59 = vsel %vm4524_vm10, %v1197_v49, %v1201_v30 }
  0xf9   :  { %v1694_v53 = vshll.u32 %v1509_v46, 16  ;;  %v1699_v55 = vshrl.u32 %v1510_v29, 16  ;;  %v1702_v56 = vshll.u32 %v1510_v29, 16  ;;  %v1027_v57 = vld [vmem:[#allocation2 + $0x78] sm:$0xf]  ;;  %v1708_v63 = vshll.u32 %v1511_v48, 16 }
  0xfa   :  { %v1687_v62 = vrot.slane %v1685_v51, 4  ;;  %v1028_v0 = vld [vmem:[#allocation2 + $0x7c] sm:$0x1]  ;;  %v1029_v1 = vld [vmem:[#allocation2 + $0x80] sm:$0xf]  ;;  %v1690_v4 = vrot.slane %v1688_v52, 5 }
  0xfb   :  { %1286 = vst [vmem:[#allocation3 + $0x19c] sm:$0xf] %v1202_v59  ;;  %v1696_v58 = vrot.slane %v1694_v53, 5  ;;  %v1701_v5 = vrot.slane %v1699_v55, 4  ;;  %v1704_v6 = vrot.slane %v1702_v56, 5  ;;  %v1710_v2 = vrot.slane %v1708_v63, 5 }
  0xfc   :  { %v1030_v8 = vld [vmem:[#allocation2 + $0x84] sm:$0x1]  ;;  %v1204_v31 = vshrl.u32 %v1027_v57, 16  ;;  %v1207_v9 = vshll.u32 %v1027_v57, 16  ;;  %v1213_v10 = vshll.u32 %v1028_v0, 16  ;;  %v1691_v12 = vor.u32 %v1690_v4, %v1687_v62 }
  0xfd   :  { %v4321_v61 = vld [vmem:[#allocation3 + $0x184] ss:$36 sps:$4 sm:$0xff]   ;;  %v1705_v3 = vor.u32 %v1704_v6, %v1701_v5  ;;  %v1218_v13 = vshrl.u32 %v1029_v1, 16  ;;  %v1221_v18 = vshll.u32 %v1029_v1, 16  ;;  %v1315_v19 = vld [vmem:[#allocation2 + $0x78] sm:$0xe] }
  0xfe   :  { %v4323_v7 = vld [vmem:[#allocation3 + $0x180] ss:$36 sps:$4 sm:$0xff]   ;;  %v1206_v60 = vrot.slane %v1204_v31, 4  ;;  %v1209_v15 = vrot.slane %v1207_v9, 5  ;;  %v1215_v17 = vrot.slane %v1213_v10, 5  ;;  %3319 = vmatprep.mubr.bf16.mxu1 %v4321_v61  ;;  %v1692_v21 = vrot.slane %v1691_v12, 4 }
  0xff   :  { %v1706_v22 = vrot.slane %v1705_v3, 4  ;;  %v1220_v23 = vrot.slane %v1218_v13, 4  ;;  %v1227_v24 = vshll.u32 %v1030_v8, 16  ;;  %v1316_v35 = vld [vmem:[#allocation2 + $0x7c] sm:$0x1]  ;;  %3320 = vmatmul.mubr.bf16.gmra.mxu1 %v4323_v7  ;;  %v1223_v26 = vrot.slane %v1221_v18, 5 }
 0x100   :  { %v1210_v25 = vor.u32 %v1209_v15, %v1206_v60  ;;  %v1317_v27 = vld [vmem:[#allocation2 + $0x80] sm:$0xe]  ;;  %v1318_v28 = vld [vmem:[#allocation2 + $0x84] sm:$0x1]  ;;  %v1697_v30 = vsel %vm4524_vm10, %v1692_v21, %v1696_v58  ;;  %v3585_v33 = vrot.slane %v1315_v19, 9  ;;  %v1405_v38 = vrot.slane %v1316_v35, 5 }
 0x101   :  { %v1711_v32 = vsel %vm4524_vm10, %v1706_v22, %v1710_v2  ;;  %v1229_v20 = vrot.slane %v1227_v24, 5  ;;  %v4324_v34 = vld [vmem:[#allocation3 + $0x17c] ss:$36 sps:$4 sm:$0xff]   ;;  %1768 = vst [vmem:[#allocation3 + $0x1cc] sm:$0xf] %v1697_v30  ;;  %v1224_v37 = vor.u32 %v1223_v26, %v1220_v23  ;;  %v3586_v39 = vrot.slane %v1317_v27, 9  ;;  %v3933_v23 = vpop.f32.mrf.mxu1 }
 0x102   :  { %v4327_v16 = vld [vmem:[#allocation3 + $0x178] ss:$36 sps:$4 sm:$0xff]   ;;  %1769 = vst [vmem:[#allocation3 + $0x1f0] sm:$0xf] %v1711_v32  ;;  %v1211_v36 = vrot.slane %v1210_v25, 4  ;;  %v1409_v41 = vrot.slane %v1318_v28, 5  ;;  %3222 = vmatprep.mubr.bf16.mxu0 %v4324_v34  ;;  %v1406_v50 = vsel %vm4493_vm5, %v3585_v33, %v1405_v38 }
 0x103   :  { %v482_v42 = vld [vmem:[#allocation2 + $0x94] sm:$0x1]  ;;  %v1225_v45 = vrot.slane %v1224_v37, 4  ;;  %v1466_v47 = vld [vmem:[#allocation2 + $0x90] sm:$0xf]  ;;  %3223 = vmatmul.mubr.bf16.gmra.mxu0 %v4327_v16  ;;  %v3934_v33 = vpop.f32.mrf.mxu1 }
 0x104   :  { %v1216_v44 = vsel %vm4524_vm10, %v1211_v36, %v1215_v17  ;;  %v483_v46 = vsel %vm4530_vm11, %v349_v54, %v482_v42  ;;  %v1467_v49 = vld [vmem:[#allocation2 + $0x98] sm:$0xf]  ;;  %v1410_v29 = vsel %vm4493_vm5, %v3586_v39, %v1409_v41  ;;  %1482 = vst [vmem:[#allocation3 + $0x210] sm:$0xf] %v1466_v47  ;;  %v1512_v48 = vld [vmem:[#allocation2 + $0x90] sm:$0xf] }
 0x105   :  { %1287 = vst [vmem:[#allocation3 + $0x1c0] sm:$0xf] %v1216_v44  ;;  %484 = vst [vmem:[#allocation2 + $0x94] sm:$0x1] %v483_v46  ;;  %v1514_v51 = vld [vmem:[#allocation2 + $0x98] sm:$0xf]  ;;  %v1230_v14 = vsel %vm4524_vm10, %v1225_v45, %v1229_v20  ;;  %v3936_v46 = vpop.f32.mrf.mxu1 }
 0x106   :  { %1483 = vst [vmem:[#allocation3 + $0x234] sm:$0xf] %v1467_v49  ;;  %v1515_v52 = vld [vmem:[#allocation2 + $0x9c] sm:$0x1]  ;;  %1447 = vst [vmem:[#allocation3 + $0x1c4] sm:$0xf] %v1406_v50 }
 0x107   :  { %1448 = vst [vmem:[#allocation3 + $0x1e8] sm:$0xf] %v1410_v29  ;;  %v1713_v43 = vshrl.u32 %v1512_v48, 16  ;;  %v1716_v54 = vshll.u32 %v1512_v48, 16  ;;  %v1727_v53 = vshrl.u32 %v1514_v51, 16  ;;  %v1730_v55 = vshll.u32 %v1514_v51, 16 }
 0x108   :  { %1288 = vst [vmem:[#allocation3 + $0x1e4] sm:$0xf] %v1230_v14  ;;  %v1736_v56 = vshll.u32 %v1515_v52, 16  ;;  %v1031_v57 = vld [vmem:[#allocation2 + $0x88] sm:$0xf] }
 0x109   :  { %v1715_v59 = vrot.slane %v1713_v43, 4  ;;  %v1718_v62 = vrot.slane %v1716_v54, 5  ;;  %v1729_v63 = vrot.slane %v1727_v53, 4  ;;  %v1032_v0 = vld [vmem:[#allocation2 + $0x8c] sm:$0x1]  ;;  %v1232_v1 = vshrl.u32 %v1031_v57, 16 }
 0x10a   :  { %v4328_v4 = vld [vmem:[#allocation3 + $0x1cc] ss:$36 sps:$4 sm:$0xff]   ;;  %v1732_v58 = vrot.slane %v1730_v55, 5  ;;  %v1738_v5 = vrot.slane %v1736_v56, 5  ;;  %v1235_v9 = vshll.u32 %v1031_v57, 16  ;;  %v1241_v61 = vshll.u32 %v1032_v0, 16  ;;  %v3937_v56 = vpop.f32.mrf.mxu1 }
 0x10b   :  { %v4330_v6 = vld [vmem:[#allocation3 + $0x1c8] ss:$36 sps:$4 sm:$0xff]   ;;  %v1719_v2 = vor.u32 %v1718_v62, %v1715_v59  ;;  %v1033_v8 = vld [vmem:[#allocation2 + $0x90] sm:$0xf]  ;;  %v1234_v31 = vrot.slane %v1232_v1, 4  ;;  %3327 = vmatprep.mubr.bf16.mxu1 %v4328_v4  ;;  %v3935_v55 = vadd.f32 %v3934_v33, %v3933_v23  ;;  %v5020_v1 = vadd.f32 %v3937_v56, %v3936_v46 }
 0x10c   :  { %v1733_v10 = vor.u32 %v1732_v58, %v1729_v63  ;;  %v1246_v7 = vshrl.u32 %v1033_v8, 16  ;;  %v1249_v12 = vshll.u32 %v1033_v8, 16  ;;  %v1319_v3 = vld [vmem:[#allocation2 + $0x88] sm:$0xe]  ;;  %3328 = vmatmul.mubr.bf16.gmra.mxu1 %v4330_v6  ;;  %v1513_v13 = vld [vmem:[#allocation2 + $0x94] sm:$0x1]  ;;  %v3869_v8 = vpop.f32.mrf.mxu0 }
 0x10d   :  { %v1720_v60 = vrot.slane %v1719_v2, 4  ;;  %v1034_v15 = vld [vmem:[#allocation2 + $0x94] sm:$0x1]  ;;  %v1237_v17 = vrot.slane %v1235_v9, 5  ;;  %v1722_v18 = vshll.u32 %v1513_v13, 16  ;;  %v1243_v21 = vrot.slane %v1241_v61, 5 }
 0x10e   :  { %v1734_v19 = vrot.slane %v1733_v10, 4  ;;  %v1248_v22 = vrot.slane %v1246_v7, 4  ;;  %v4331_v24 = vld [vmem:[#allocation3 + $0x1c4] ss:$36 sps:$4 sm:$0xff]   ;;  %v1251_v26 = vrot.slane %v1249_v12, 5  ;;  %v1255_v30 = vshll.u32 %v1034_v15, 16 }
 0x10f   :  { %v4334_v35 = vld [vmem:[#allocation3 + $0x1c0] ss:$36 sps:$4 sm:$0xff]   ;;  %v1238_v25 = vor.u32 %v1237_v17, %v1234_v31  ;;  %v1724_v27 = vrot.slane %v1722_v18, 5  ;;  %v1320_v32 = vld [vmem:[#allocation2 + $0x8c] sm:$0x1]  ;;  %3230 = vmatprep.mubr.bf16.mxu0 %v4331_v24  ;;  %v3587_v37 = vrot.slane %v1319_v3, 9 }
 0x110   :  { %v1739_v28 = vsel %vm4524_vm10, %v1734_v19, %v1738_v5  ;;  %v1321_v20 = vld [vmem:[#allocation2 + $0x90] sm:$0xe]  ;;  %v1252_v16 = vor.u32 %v1251_v26, %v1248_v22  ;;  %v1322_v36 = vld [vmem:[#allocation2 + $0x94] sm:$0x1]  ;;  %v1413_v38 = vrot.slane %v1320_v32, 5  ;;  %3231 = vmatmul.mubr.bf16.gmra.mxu0 %v4334_v35  ;;  %v1257_v41 = vrot.slane %v1255_v30, 5 }
 0x111   :  { %1771 = vst [vmem:[#allocation3 + $0x238] sm:$0xf] %v1739_v28  ;;  %v1239_v34 = vrot.slane %v1238_v25, 4  ;;  %v1725_v39 = vsel %vm4524_vm10, %v1720_v60, %v1724_v27  ;;  %v3588_v42 = vrot.slane %v1321_v20, 9  ;;  %v1417_v44 = vrot.slane %v1322_v36, 5  ;;  %v3870_v60 = vpop.f32.mrf.mxu0  ;;  %v3939_v36 = vpop.f32.mrf.mxu1 }
 0x112   :  { %v1788_v45 = vld [vmem:[#allocation2 + $0x60] sm:$0xe]  ;;  %1770 = vst [vmem:[#allocation3 + $0x214] sm:$0xf] %v1725_v39  ;;  %v1253_v49 = vrot.slane %v1252_v16, 4  ;;  %v1414_v50 = vsel %vm4493_vm5, %v3587_v37, %v1413_v38 }
 0x113   :  { %v1244_v47 = vsel %vm4524_vm10, %v1239_v34, %v1243_v21  ;;  %v1789_v29 = vld [vmem:[#allocation2 + $0x64] sm:$0x1]  ;;  %v1790_v48 = vld [vmem:[#allocation2 + $0x68] sm:$0xe]  ;;  %v3597_v51 = vrot.slane %v1788_v45, 9  ;;  %v1418_v52 = vsel %vm4493_vm5, %v3588_v42, %v1417_v44  ;;  %v3871_v21 = vadd.f32 %v3870_v60, %v3869_v8  ;;  %v3872_v25 = vpop.f32.mrf.mxu0 }
 0x114   :  { %1289 = vst [vmem:[#allocation3 + $0x208] sm:$0xf] %v1244_v47  ;;  %1449 = vst [vmem:[#allocation3 + $0x20c] sm:$0xf] %v1414_v50  ;;  %v1791_v14 = vld [vmem:[#allocation2 + $0x6c] sm:$0x1]  ;;  %v1258_v57 = vsel %vm4524_vm10, %v1253_v49, %v1257_v41  ;;  %v3940_v49 = vpop.f32.mrf.mxu1 }
 0x115   :  { %v1870_v43 = vrot.slane %v1789_v29, 5  ;;  %v3598_v54 = vrot.slane %v1790_v48, 9  ;;  %v1792_v53 = vld [vmem:[#allocation2 + $0x70] sm:$0xe]  ;;  %1450 = vst [vmem:[#allocation3 + $0x230] sm:$0xf] %v1418_v52  ;;  %v5034_v32 = vadd.f32 %v3935_v55, %v3871_v21  ;;  %v3873_v37 = vpop.f32.mrf.mxu0 }
 0x116   :  { %v1874_v59 = vrot.slane %v1791_v14, 5  ;;  %v1793_v62 = vld [vmem:[#allocation2 + $0x74] sm:$0x1]  ;;  %v1794_v63 = vld [vmem:[#allocation2 + $0x78] sm:$0xe]  ;;  %v3599_v0 = vrot.slane %v1792_v53, 9  ;;  %v3874_v44 = vadd.f32 %v3873_v37, %v3872_v25 }
 0x117   :  { %1290 = vst [vmem:[#allocation3 + $0x22c] sm:$0xf] %v1258_v57  ;;  %v1871_v4 = vsel %vm4493_vm5, %v3597_v51, %v1870_v43  ;;  %v1795_v58 = vld [vmem:[#allocation2 + $0x7c] sm:$0x1]  ;;  %v1878_v5 = vrot.slane %v1793_v62, 5  ;;  %v3600_v6 = vrot.slane %v1794_v63, 9  ;;  %v3941_v51 = vadd.f32 %v3940_v49, %v3939_v36 }
 0x118   :  { %v1772_v2 = vld [vmem:[#allocation2 + $0x10] sm:$0xe]  ;;  %v1875_v11 = vsel %vm4493_vm5, %v3598_v54, %v1874_v59  ;;  %1924 = vst [vmem:[#allocation3 + $0x140] sm:$0xf] %v1871_v4  ;;  %v1882_v31 = vrot.slane %v1795_v58, 5  ;;  %v5041_v52 = vadd.f32 %v5020_v1, %v3874_v44  ;;  %v3942_v54 = vpop.f32.mrf.mxu1 }
 0x119   :  { %v1773_v9 = vld [vmem:[#allocation2 + $0x14] sm:$0x1]  ;;  %v1774_v10 = vld [vmem:[#allocation2 + $0x18] sm:$0xe]  ;;  %v3589_v61 = vrot.slane %v1772_v2, 9  ;;  %v1879_v7 = vsel %vm4493_vm5, %v3599_v0, %v1878_v5 }
 0x11a   :  { %1925 = vst [vmem:[#allocation3 + $0x164] sm:$0xf] %v1875_v11  ;;  %v1775_v12 = vld [vmem:[#allocation2 + $0x1c] sm:$0x1]  ;;  %v1838_v3 = vrot.slane %v1773_v9, 5  ;;  %v3590_v13 = vrot.slane %v1774_v10, 9  ;;  %v1883_v15 = vsel %vm4493_vm5, %v3600_v6, %v1882_v31  ;;  %v3943_v63 = vpop.f32.mrf.mxu1  ;;  %v3875_v10 = vpop.f32.mrf.mxu0 }
 0x11b   :  { %1926 = vst [vmem:[#allocation3 + $0x188] sm:$0xf] %v1879_v7  ;;  %v1842_v17 = vrot.slane %v1775_v12, 5  ;;  %v1776_v18 = vld [vmem:[#allocation2 + $0x20] sm:$0xe]  ;;  %v3944_v58 = vadd.f32 %v3943_v63, %v3942_v54 }
 0x11c   :  { %v1777_v19 = vld [vmem:[#allocation2 + $0x24] sm:$0x1]  ;;  %v4335_v22 = vld [vmem:[#allocation3 + $0x214] ss:$36 sps:$4 sm:$0xff]   ;;  %1927 = vst [vmem:[#allocation3 + $0x1ac] sm:$0xf] %v1883_v15  ;;  %v1839_v24 = vsel %vm4493_vm5, %v3589_v61, %v1838_v3 }
 0x11d   :  { %v4337_v23 = vld [vmem:[#allocation3 + $0x210] ss:$36 sps:$4 sm:$0xff]   ;;  %v3591_v35 = vrot.slane %v1776_v18, 9  ;;  %v1843_v26 = vsel %vm4493_vm5, %v3590_v13, %v1842_v17  ;;  %1916 = vst [vmem:[#allocation3 + $0x20] sm:$0xf] %v1839_v24  ;;  %v1846_v30 = vrot.slane %v1777_v19, 5  ;;  %3335 = vmatprep.mubr.bf16.mxu1 %v4335_v22  ;;  %v3876_v18 = vpop.f32.mrf.mxu0 }
 0x11e   :  { %v1778_v27 = vld [vmem:[#allocation2 + $0x28] sm:$0xe]  ;;  %v1779_v28 = vld [vmem:[#allocation2 + $0x2c] sm:$0x1]  ;;  %1917 = vst [vmem:[#allocation3 + $0x44] sm:$0xf] %v1843_v26  ;;  %3336 = vmatmul.mubr.bf16.gmra.mxu1 %v4337_v23 }
 0x11f   :  { %v3592_v20 = vrot.slane %v1778_v27, 9  ;;  %v1850_v33 = vrot.slane %v1779_v28, 5  ;;  %v1796_v34 = vld [vmem:[#allocation2 + $0x80] sm:$0xe]  ;;  %v1797_v16 = vld [vmem:[#allocation2 + $0x84] sm:$0x1]  ;;  %v1847_v41 = vsel %vm4493_vm5, %v3591_v35, %v1846_v30  ;;  %v3877_v35 = vadd.f32 %v3876_v18, %v3875_v10  ;;  %v3878_v28 = vpop.f32.mrf.mxu0 }
 0x120   :  { %v4339_v38 = vld [vmem:[#allocation3 + $0x20c] ss:$36 sps:$4 sm:$0xff]   ;;  %v3601_v42 = vrot.slane %v1796_v34, 9  ;;  %1918 = vst [vmem:[#allocation3 + $0x68] sm:$0xf] %v1847_v41  ;;  %v1886_v29 = vrot.slane %v1797_v16, 5  ;;  %v3945_v34 = vpop.f32.mrf.mxu1 }
 0x121   :  { %v4341_v39 = vld [vmem:[#allocation3 + $0x208] ss:$36 sps:$4 sm:$0xff]   ;;  %v1851_v45 = vsel %vm4493_vm5, %v3592_v20, %v1850_v33  ;;  %3238 = vmatprep.mubr.bf16.mxu0 %v4339_v38  ;;  %v4342_v50 = vld [vmem:[#allocation3 + $0x140] ss:$36 sps:$4 sm:$0xff]   ;;  %v1800_v43 = vld [vmem:[#allocation2 + $0x90] sm:$0xe]  ;;  %v5057_v33 = vadd.f32 %v3941_v51, %v3877_v35  ;;  %v3879_v36 = vpop.f32.mrf.mxu0 }
 0x122   :  { %v1798_v46 = vld [vmem:[#allocation2 + $0x88] sm:$0xe]  ;;  %v1799_v47 = vld [vmem:[#allocation2 + $0x8c] sm:$0x1]  ;;  %1919 = vst [vmem:[#allocation3 + $0x8c] sm:$0xf] %v1851_v45  ;;  %3239 = vmatmul.mubr.bf16.gmra.mxu0 %v4341_v39  ;;  %4149 = vmatprep.mubr.bf16.mxu1 %v4342_v50  ;;  %v1887_v55 = vsel %vm4493_vm5, %v3601_v42, %v1886_v29  ;;  %v3946_v37 = vpop.f32.mrf.mxu1  ;;  %v3880_v38 = vadd.f32 %v3879_v36, %v3878_v28 }
 0x123   :  { %v3602_v48 = vrot.slane %v1798_v46, 9  ;;  %v1890_v14 = vrot.slane %v1799_v47, 5  ;;  %v4343_v53 = vld [vmem:[#allocation3 + $0x188] ss:$36 sps:$4 sm:$0xff]   ;;  %v1801_v56 = vld [vmem:[#allocation2 + $0x94] sm:$0x1]  ;;  %v3947_v39 = vadd.f32 %v3946_v37, %v3945_v34 }
 0x124   :  { %1928 = vst [vmem:[#allocation3 + $0x1d0] sm:$0xf] %v1887_v55  ;;  %v1802_v59 = vld [vmem:[#allocation2 + $0x98] sm:$0xe]  ;;  %v1803_v62 = vld [vmem:[#allocation2 + $0x9c] sm:$0x1]  ;;  %v5061_v42 = vadd.f32 %v3944_v58, %v3880_v38  ;;  %v3948_v44 = vpop.f32.mrf.mxu1  ;;  %v3881_v49 = vpop.f32.mrf.mxu0 }
 0x125   :  { %v1891_v57 = vsel %vm4493_vm5, %v3602_v48, %v1890_v14  ;;  %v4344_v0 = vld [vmem:[#allocation3 + $0x20] ss:$36 sps:$4 sm:$0xff]   ;;  %v3603_v1 = vrot.slane %v1800_v43, 9  ;;  %v1894_v4 = vrot.slane %v1801_v56, 5  ;;  %v3604_v5 = vrot.slane %v1802_v59, 9 }
 0x126   :  { %1929 = vst [vmem:[#allocation3 + $0x1f4] sm:$0xf] %v1891_v57  ;;  %v1898_v6 = vrot.slane %v1803_v62, 5  ;;  %v1780_v2 = vld [vmem:[#allocation2 + $0x30] sm:$0xe]  ;;  %4150 = vmatmul.mubr.bf16.vlgmr.msra.gmra.mxu1 %v4343_v53  ;;  %4141 = vmatprep.mubr.bf16.mxu0 %v4344_v0  ;;  %v3949_v45 = vpop.f32.mrf.mxu1  ;;  %v3882_v40 = vpop.f32.mrf.mxu0 }
 0x127   :  { %v1781_v8 = vld [vmem:[#allocation2 + $0x34] sm:$0x1]  ;;  %v1895_v11 = vsel %vm4493_vm5, %v3603_v1, %v1894_v4  ;;  %v1782_v31 = vld [vmem:[#allocation2 + $0x38] sm:$0xe]  ;;  %v1783_v9 = vld [vmem:[#allocation2 + $0x3c] sm:$0x1]  ;;  %v3950_v47 = vadd.f32 %v3949_v45, %v3948_v44  ;;  %v3883_v29 = vadd.f32 %v3882_v40, %v3881_v49 }
 0x128   :  { %v1899_v7 = vsel %vm4493_vm5, %v3604_v5, %v1898_v6  ;;  %1930 = vst [vmem:[#allocation3 + $0x218] sm:$0xf] %v1895_v11  ;;  %v3593_v12 = vrot.slane %v1780_v2, 9  ;;  %v1854_v3 = vrot.slane %v1781_v8, 5  ;;  %v3594_v13 = vrot.slane %v1782_v31, 9  ;;  %v3884_v48 = vpop.f32.mrf.mxu0 }
 0x129   :  { %v4345_v61 = vld [vmem:[#allocation3 + $0x68] ss:$36 sps:$4 sm:$0xff]   ;;  %1931 = vst [vmem:[#allocation3 + $0x23c] sm:$0xf] %v1899_v7  ;;  %v1858_v60 = vrot.slane %v1783_v9, 5  ;;  %v5063_v51 = vadd.f32 %v3947_v39, %v3883_v29  ;;  %v3951_v14 = vpop.f32.mrf.mxu1 }
 0x12a   :  { %v1784_v15 = vld [vmem:[#allocation2 + $0x40] sm:$0xe]  ;;  %v1785_v17 = vld [vmem:[#allocation2 + $0x44] sm:$0x1]  ;;  %4142 = vmatmul.mubr.bf16.vlgmr.msra.gmra.mxu0 %v4345_v61  ;;  %v1855_v19 = vsel %vm4493_vm5, %v3593_v12, %v1854_v3  ;;  %v1786_v21 = vld [vmem:[#allocation2 + $0x48] sm:$0xe]  ;;  %v3885_v43 = vpop.f32.mrf.mxu0 }
 0x12b   :  { %v1787_v22 = vld [vmem:[#allocation2 + $0x4c] sm:$0x1]  ;;  %v3595_v23 = vrot.slane %v1784_v15, 9  ;;  %v1862_v24 = vrot.slane %v1785_v17, 5  ;;  %v1859_v25 = vsel %vm4493_vm5, %v3594_v13, %v1858_v60  ;;  %1920 = vst [vmem:[#allocation3 + $0xb0] sm:$0xf] %v1855_v19  ;;  %v3886_v54 = vadd.f32 %v3885_v43, %v3884_v48  ;;  %v3952_v53 = vpop.f32.mrf.mxu1 }
 0x12c   :  { %v3596_v26 = vrot.slane %v1786_v21, 9  ;;  %v1866_v27 = vrot.slane %v1787_v22, 5  ;;  %1921 = vst [vmem:[#allocation3 + $0xd4] sm:$0xf] %v1859_v25  ;;  %v3953_v55 = vadd.f32 %v3952_v53, %v3951_v14 }
 0x12d   :  { %v4346_v30 = vld [vmem:[#allocation3 + $0x1d0] ss:$36 sps:$4 sm:$0xff]   ;;  %v1863_v20 = vsel %vm4493_vm5, %v3595_v23, %v1862_v24  ;;  %v5065_v56 = vadd.f32 %v3950_v47, %v3886_v54  ;;  %v3954_v57 = vpop.f32.mrf.mxu1 }
 0x12e   :  { %v1867_v16 = vsel %vm4493_vm5, %v3596_v26, %v1866_v27  ;;  %1922 = vst [vmem:[#allocation3 + $0xf8] sm:$0xf] %v1863_v20  ;;  %4153 = vmatprep.mubr.bf16.mxu1 %v4346_v30 }
 0x12f   :  { %1923 = vst [vmem:[#allocation3 + $0x11c] sm:$0xf] %v1867_v16  ;;  %5259 = vst [vmem:[#allocation4_spill] sm:$0xff] %v5065_v56  ;;  %v3955_v59 = vpop.f32.mrf.mxu1 }
 0x130   :  { %v4347_v41 = vld [vmem:[#allocation3 + $0x218] ss:$36 sps:$4 sm:$0xff]   ;;  %v3956_v63 = vadd.f32 %v3955_v59, %v3954_v57 }
 0x131   :  { %4154 = vmatmul.mubr.bf16.gmra.mxu1 %v4347_v41 }
 0x132   :  { %v3887_v62 = vpop.f32.mrf.mxu0 }
 0x133   :  { %v4348_v46 = vld [vmem:[#allocation3 + $0xb0] ss:$36 sps:$4 sm:$0xff]  }
 0x134   :  { %4145 = vmatprep.mubr.bf16.mxu0 %v4348_v46  ;;  %v3888_v0 = vpop.f32.mrf.mxu0 }
 0x135   :  { %v3889_v1 = vadd.f32 %v3888_v0, %v3887_v62 }
 0x136   :  { %v4349_v50 = vld [vmem:[#allocation3 + $0xf8] ss:$36 sps:$4 sm:$0xff]   ;;  %v3890_v4 = vpop.f32.mrf.mxu0 }
 0x137   :  { %4146 = vmatmul.mubr.bf16.gmra.mxu0 %v4349_v50  ;;  %v5067_v58 = vadd.f32 %v3953_v55, %v3889_v1 }
 0x138   :  { %v3891_v5 = vpop.f32.mrf.mxu0 }
 0x139   :  { %v3892_v6 = vadd.f32 %v3891_v5, %v3890_v4 }
 0x13b   :  { %v5069_v8 = vadd.f32 %v3956_v63, %v3892_v6 }
 0x13c   :  { %v3957_v2 = vpop.f32.mrf.mxu1 }
 0x13e   :  { %v3958_v11 = vpop.f32.mrf.mxu1 }
 0x13f   :  { %v3959_v31 = vadd.f32 %v3958_v11, %v3957_v2 }
 0x140   :  { %v3960_v9 = vpop.f32.mrf.mxu1 }
 0x142   :  { %v3961_v10 = vpop.f32.mrf.mxu1 }
 0x143   :  { %v3962_v61 = vadd.f32 %v3961_v10, %v3960_v9 }
 0x146   :  { %v3893_v7 = vpop.f32.mrf.mxu0 }
 0x148   :  { %v3894_v12 = vpop.f32.mrf.mxu0  ;;  %v3963_v3 = vpop.f32.mrf.mxu1 }
 0x149   :  { %v3895_v13 = vadd.f32 %v3894_v12, %v3893_v7 }
 0x14a   :  { %v3896_v60 = vpop.f32.mrf.mxu0  ;;  %v3964_v15 = vpop.f32.mrf.mxu1 }
 0x14b   :  { %v5071_v17 = vadd.f32 %v3959_v31, %v3895_v13  ;;  %v3965_v18 = vadd.f32 %v3964_v15, %v3963_v3 }
 0x14c   :  { %v3897_v19 = vpop.f32.mrf.mxu0  ;;  %v3966_v21 = vpop.f32.mrf.mxu1 }
 0x14d   :  { %v3898_v22 = vadd.f32 %v3897_v19, %v3896_v60 }
 0x14e   :  { %v3967_v23 = vpop.f32.mrf.mxu1 }
 0x14f   :  { %v5073_v24 = vadd.f32 %v3962_v61, %v3898_v22  ;;  %v3968_v35 = vadd.f32 %v3967_v23, %v3966_v21 }
 0x150   :  { %v3899_v25 = vpop.f32.mrf.mxu0 }
 0x152   :  { %v3900_v26 = vpop.f32.mrf.mxu0 }
 0x153   :  { %v3901_v27 = vadd.f32 %v3900_v26, %v3899_v25 }
 0x154   :  { %v3902_v28 = vpop.f32.mrf.mxu0 }
 0x155   :  { %v5075_v30 = vadd.f32 %v3965_v18, %v3901_v27 }
 0x156   :  { %v3903_v20 = vpop.f32.mrf.mxu0 }
 0x157   :  { %v3969_v34 = vpop.f32.mrf.mxu1  ;;  %v3904_v16 = vadd.f32 %v3903_v20, %v3902_v28 }
 0x159   :  { %v3970_v36 = vpop.f32.mrf.mxu1  ;;  %v5077_v37 = vadd.f32 %v3968_v35, %v3904_v16 }
 0x15a   :  { %v3971_v38 = vadd.f32 %v3970_v36, %v3969_v34 }
 0x15b   :  { %v3972_v39 = vpop.f32.mrf.mxu1 }
 0x15d   :  { %v3973_v44 = vpop.f32.mrf.mxu1 }
 0x15e   :  { %v3905_v41 = vpop.f32.mrf.mxu0  ;;  %v3974_v45 = vadd.f32 %v3973_v44, %v3972_v39 }
 0x160   :  { %v3906_v46 = vpop.f32.mrf.mxu0 }
 0x161   :  { %v3907_v47 = vadd.f32 %v3906_v46, %v3905_v41 }
 0x162   :  { %v3908_v49 = vpop.f32.mrf.mxu0 }
 0x163   :  { %v5079_v50 = vadd.f32 %v3971_v38, %v3907_v47 }
 0x164   :  { %v3909_v40 = vpop.f32.mrf.mxu0 }
 0x165   :  { %v3910_v29 = vadd.f32 %v3909_v40, %v3908_v49 }
 0x167   :  { %v5081_v48 = vadd.f32 %v3974_v45, %v3910_v29 }
 0x169   :  { %5260 = vst [vmem:[#allocation5_spill] sm:$0xff] %v5081_v48 }
 0x16a   :  { %v3975_v14 = vpop.f32.mrf.mxu1 }
 0x16c   :  { %v3976_v43 = vpop.f32.mrf.mxu1 }
 0x16d   :  { %v3977_v54 = vadd.f32 %v3976_v43, %v3975_v14 }
 0x16e   :  { %v3978_v53 = vpop.f32.mrf.mxu1 }
 0x170   :  { %v3979_v55 = vpop.f32.mrf.mxu1 }
 0x171   :  { %v3980_v59 = vadd.f32 %v3979_v55, %v3978_v53 }
 0x173   :  { %v3911_v57 = vpop.f32.mrf.mxu0 }
 0x175   :  { %v3912_v62 = vpop.f32.mrf.mxu0 }
 0x176   :  { %v3913_v63 = vadd.f32 %v3912_v62, %v3911_v57  ;;  %v4061_v0 = vpop.f32.mrf.mxu1 }
 0x177   :  { %v3914_v1 = vpop.f32.mrf.mxu0 }
 0x178   :  { %v5083_v4 = vadd.f32 %v3977_v54, %v3913_v63  ;;  %v4062_v5 = vpop.f32.mrf.mxu1 }
 0x179   :  { %v4063_v6 = vadd.f32 %v4062_v5, %v4061_v0  ;;  %v3915_v2 = vpop.f32.mrf.mxu0 }
 0x17a   :  { %v3916_v11 = vadd.f32 %v3915_v2, %v3914_v1  ;;  %v4064_v31 = vpop.f32.mrf.mxu1 }
 0x17b   :  { %v3997_v9 = vpop.f32.mrf.mxu0 }
 0x17c   :  { %v5085_v10 = vadd.f32 %v3980_v59, %v3916_v11  ;;  %v4065_v7 = vpop.f32.mrf.mxu1 }
 0x17d   :  { %v3998_v61 = vpop.f32.mrf.mxu0  ;;  %v4066_v21 = vadd.f32 %v4065_v7, %v4064_v31 }
 0x17e   :  { %5261 = vst [vmem:[#allocation6_spill] sm:$0xff] %v5085_v10  ;;  %v3999_v12 = vadd.f32 %v3998_v61, %v3997_v9 }
 0x17f   :  { %v4000_v3 = vpop.f32.mrf.mxu0 }
 0x180   :  { %v3185_v13 = vadd.f32 %v3999_v12, %v5034_v32 }
 0x181   :  { %v4001_v60 = vpop.f32.mrf.mxu0 }
 0x182   :  { %v4002_v18 = vadd.f32 %v4001_v60, %v4000_v3  ;;  %v5090_v19 = vadd.f32 %v4063_v6, %v3185_v13 }
 0x183   :  { %v5088_v15 = vpop.f32.mrf.mxu1 }
 0x184   :  { %5262 = vst [vmem:[#allocation7_spill] sm:$0xff] %v5090_v19  ;;  %v3188_v23 = vadd.f32 %v4002_v18, %v5041_v52 }
 0x185   :  { %v5092_v22 = vpop.f32.mrf.mxu1 }
 0x186   :  { %v5095_v35 = vadd.f32 %v4066_v21, %v3188_v23  ;;  %v4069_v19 = vadd.f32 %v5092_v22, %v5088_v15 }
 0x187   :  { %v5097_v26 = vpop.f32.mrf.mxu1 }
 0x188   :  { %5263 = vst [vmem:[#allocation8_spill] sm:$0xff] %v5095_v35  ;;  %v4003_v25 = vpop.f32.mrf.mxu0 }
 0x189   :  { %v5099_v28 = vpop.f32.mrf.mxu1 }
 0x18a   :  { %v4004_v27 = vpop.f32.mrf.mxu0 }
 0x18c   :  { %v4006_v32 = vpop.f32.mrf.mxu0 }
 0x18e   :  { %v4007_v34 = vpop.f32.mrf.mxu0 }
 0x192   :  { %v4073_v20 = vpop.f32.mrf.mxu1 }
 0x194   :  { %v4074_v16 = vpop.f32.mrf.mxu1 }
 0x195   :  { %v4075_v36 = vadd.f32 %v4074_v16, %v4073_v20 }
 0x196   :  { %v5101_v41 = vpop.f32.mrf.mxu1 }
 0x197   :  { %v4009_v38 = vpop.f32.mrf.mxu0  ;;  %5264 = vst [vmem:[#allocation9_spill] sm:$0xff] %v5101_v41 }
 0x198   :  { %v5106_v46 = vpop.f32.mrf.mxu1 }
 0x199   :  { %v4010_v39 = vpop.f32.mrf.mxu0  ;;  %5265 = vst [vmem:[#allocation10_spill] sm:$0xff] %v5106_v46 }
 0x19a   :  { %v4011_v44 = vadd.f32 %v4010_v39, %v4009_v38 }
 0x19b   :  { %v5104_v45 = vpop.f32.mrf.mxu0 }
 0x19c   :  { %v3201_v52 = vadd.f32 %v4011_v44, %v5063_v51  ;;  %v4008_v44 = vadd.f32 %v4007_v34, %v4006_v32 }
 0x19d   :  { %v5110_v49 = vpop.f32.mrf.mxu0 }
 0x19e   :  { %v5108_v47 = vadd.f32 %v4075_v36, %v3201_v52  ;;  %v4005_v36 = vadd.f32 %v4004_v27, %v4003_v25  ;;  %v3196_v25 = vadd.f32 %v4008_v44, %v5061_v42 }
 0x1a0   :  { %5266 = vst [vmem:[#allocation11_spill] sm:$0xff] %v5108_v47  ;;  %v3193_v41 = vadd.f32 %v4005_v36, %v5057_v33  ;;  %v4072_v33 = vadd.f32 %v5099_v28, %v5097_v26 }
 0x1a2   :  { %v3293_v26 = vadd.f32 %v4072_v33, %v3196_v25 }
 0x1a3   :  { %v5112_v40 = vpop.f32.mrf.mxu1 }
 0x1a5   :  { %v5114_v29 = vpop.f32.mrf.mxu1  ;;  %v4015_v14 = vpop.f32.mrf.mxu0 }
 0x1a7   :  { %v5116_v43 = vpop.f32.mrf.mxu1  ;;  %v4016_v54 = vpop.f32.mrf.mxu0 }
 0x1a8   :  { %v4017_v56 = vadd.f32 %v4016_v54, %v4015_v14 }
 0x1a9   :  { %v5118_v53 = vpop.f32.mrf.mxu1  ;;  %v4018_v55 = vpop.f32.mrf.mxu0 }
 0x1aa   :  { %v3209_v54 = vadd.f32 %v4017_v56, %v5067_v58 }
 0x1ab   :  { %v4019_v57 = vpop.f32.mrf.mxu0 }
 0x1af   :  { %v4085_v51 = vpop.f32.mrf.mxu1 }
 0x1b1   :  { %v4086_v59 = vpop.f32.mrf.mxu1 }
 0x1b3   :  { %v4021_v62 = vpop.f32.mrf.mxu0  ;;  %v4088_v63 = vpop.f32.mrf.mxu1 }
 0x1b5   :  { %v4022_v0 = vpop.f32.mrf.mxu0  ;;  %v4089_v1 = vpop.f32.mrf.mxu1 }
 0x1b6   :  { %v4023_v46 = vadd.f32 %v4022_v0, %v4021_v62  ;;  %v4087_v0 = vadd.f32 %v4086_v59, %v4085_v51 }
 0x1b7   :  { %v4024_v5 = vpop.f32.mrf.mxu0 }
 0x1b8   :  { %v3217_v32 = vadd.f32 %v4023_v46, %v5071_v17  ;;  %v5146_v46 = vld [vmem:[%s5248_s4] ss:$0 sm:$0xff] }
 0x1b9   :  { %v4025_v2 = vpop.f32.mrf.mxu0 }
 0x1ba   :  { %v4026_v27 = vadd.f32 %v4025_v2, %v4024_v5  ;;  %v4020_v5 = vadd.f32 %v4019_v57, %v4018_v55  ;;  %v3314_v28 = vadd.f32 %v4087_v0, %v3217_v32  ;;  %v5269_v0 = vld [vmem:[#allocation8_spill] sm:$0xff] }
 0x1bc   :  { %v3220_v2 = vadd.f32 %v4026_v27, %v5073_v24  ;;  %v5156_v24 = vadd.f32 %v5118_v53, %v5116_v43 }
 0x1bf   :  { %v4091_v6 = vpop.f32.mrf.mxu1 }
 0x1c1   :  { %v4092_v11 = vpop.f32.mrf.mxu1 }
 0x1c2   :  { %v4093_v34 = vadd.f32 %v4092_v11, %v4091_v6  ;;  %v5162_v6 = vadd.f32 %v4020_v5, %v5069_v8 }
 0x1c3   :  { %v4094_v31 = vpop.f32.mrf.mxu1  ;;  %v4027_v9 = vpop.f32.mrf.mxu0 }
 0x1c5   :  { %v4028_v61 = vpop.f32.mrf.mxu0  ;;  %v4095_v7 = vpop.f32.mrf.mxu1 }
 0x1c6   :  { %v4029_v38 = vadd.f32 %v4028_v61, %v4027_v9  ;;  %v4096_v56 = vadd.f32 %v4095_v7, %v4094_v31 }
 0x1c7   :  { %v4030_v12 = vpop.f32.mrf.mxu0 }
 0x1c8   :  { %v3225_v10 = vadd.f32 %v4029_v38, %v5075_v30  ;;  %v3290_v30 = vadd.f32 %v4069_v19, %v3193_v41  ;;  %v4081_v19 = vadd.f32 %v5114_v29, %v5112_v40 }
 0x1c9   :  { %v4031_v13 = vpop.f32.mrf.mxu0 }
 0x1ca   :  { %v4032_v35 = vadd.f32 %v4031_v13, %v4030_v12  ;;  %v3322_v22 = vadd.f32 %v4093_v34, %v3225_v10  ;;  %v5152_v10 = vadd.f32 %v5110_v49, %v5104_v45  ;;  %v5159_v29 = vadd.f32 %v4081_v19, %v3209_v54  ;;  %v5168_v49 = vld [vmem:[%s5249_s5] ss:$0 sm:$0xff] }
 0x1cc   :  { %v5120_v3 = vpop.f32.mrf.mxu1  ;;  %v3228_v15 = vadd.f32 %v4032_v35, %v5077_v37  ;;  %v4090_v35 = vadd.f32 %v4089_v1, %v4088_v63 }
 0x1ce   :  { %v4098_v60 = vpop.f32.mrf.mxu1  ;;  %v3325_v59 = vadd.f32 %v4096_v56, %v3228_v15  ;;  %v3317_v53 = vadd.f32 %v4090_v35, %v3220_v2  ;;  %v5270_v15 = vld [vmem:[#allocation6_spill] sm:$0xff] }
 0x1cf   :  { %v4099_v63 = vadd.f32 %v4098_v60, %v5120_v3 }
 0x1d0   :  { %v4033_v18 = vpop.f32.mrf.mxu0  ;;  %v5122_v23 = vpop.f32.mrf.mxu1 }
 0x1d2   :  { %v4034_v21 = vpop.f32.mrf.mxu0  ;;  %v4101_v16 = vpop.f32.mrf.mxu1 }
 0x1d3   :  { %v4035_v61 = vadd.f32 %v4034_v21, %v4033_v18  ;;  %v4102_v8 = vadd.f32 %v4101_v16, %v5122_v23  ;;  %v5267_v18 = vld [vmem:[#allocation7_spill] sm:$0xff] }
 0x1d4   :  { %v4036_v20 = vpop.f32.mrf.mxu0 }
 0x1d5   :  { %v3233_v45 = vadd.f32 %v4035_v61, %v5079_v50 }
 0x1d6   :  { %v4037_v39 = vpop.f32.mrf.mxu0 }
 0x1d7   :  { %v4038_v1 = vadd.f32 %v4037_v39, %v4036_v20  ;;  %v3330_v16 = vadd.f32 %v4099_v63, %v3233_v45 }
 0x1de   :  { %v5124_v52 = vpop.f32.mrf.mxu1 }
 0x1e0   :  { %v5127_v47 = vpop.f32.mrf.mxu1 }
 0x1e1   :  { %v4105_v20 = vadd.f32 %v5127_v47, %v5124_v52 }
 0x1e2   :  { %v4039_v48 = vpop.f32.mrf.mxu0  ;;  %v5133_v9 = vpop.f32.mrf.mxu1 }
 0x1e4   :  { %v4040_v62 = vpop.f32.mrf.mxu0  ;;  %v5138_v14 = vpop.f32.mrf.mxu1 }
 0x1e5   :  { %v4041_v41 = vadd.f32 %v4040_v62, %v4039_v48  ;;  %v4108_v56 = vadd.f32 %v5138_v14, %v5133_v9 }
 0x1e6   :  { %v4042_v42 = vpop.f32.mrf.mxu0  ;;  %v4151_v17 = vpop.f32.mrf.mxu1 }
 0x1e7   :  { %v3419_v58 = vadd.f32 %v4151_v17, %v3322_v22  ;;  %v3241_v12 = vadd.f32 %v4041_v41, %v5083_v4  ;;  %v5268_v4 = vld [vmem:[#allocation5_spill] sm:$0xff] }
 0x1e8   :  { %v4043_v37 = vpop.f32.mrf.mxu0  ;;  %v3410_v55 = vpop.f32.mrf.mxu1  ;;  %v3236_v25 = vadd.f32 %v4038_v1, %v5268_v4 }
 0x1e9   :  { %v3458_v51 = vmul.f32 %v5146_v46, %v3419_v58  ;;  %v3411_v57 = vadd.f32 %v3410_v55, %v3314_v28  ;;  %v4044_v38 = vadd.f32 %v4043_v37, %v4042_v42 }
 0x1ea   :  { %v4143_v40 = vpop.f32.mrf.mxu0  ;;  %v4152_v43 = vpop.f32.mrf.mxu1 }
 0x1eb   :  { %v3387_v48 = vadd.f32 %v4143_v40, %v3290_v30  ;;  %v3456_v11 = vmul.f32 %v5146_v46, %v3411_v57  ;;  %v3422_v31 = vadd.f32 %v4152_v43, %v3325_v59  ;;  %v3481_v36 = vadd.f32 %v5168_v49, %v3458_v51 }
 0x1ec   :  { %v3378_v7 = vpop.f32.mrf.mxu0  ;;  %v3413_v13 = vpop.f32.mrf.mxu1  ;;  %v3338_v30 = vadd.f32 %v4105_v20, %v3241_v12  ;;  %v3244_v22 = vadd.f32 %v4044_v38, %v5270_v15  ;;  %v5271_v12 = vld [vmem:[#allocation4_spill] sm:$0xff] }
 0x1ed   :  { %v3450_v50 = vmul.f32 %v5146_v46, %v3387_v48  ;;  %v3379_v21 = vadd.f32 %v3378_v7, %v5267_v18  ;;  %v3459_v44 = vmul.f32 %v5146_v46, %v3422_v31  ;;  %v3414_v3 = vadd.f32 %v3413_v13, %v3317_v53 }
 0x1ee   :  { %v4144_v60 = vpop.f32.mrf.mxu0  ;;  %v3479_v27 = vadd.f32 %v5168_v49, %v3456_v11  ;;  %v3497_v52 = vmax.f32 %v3481_v36, 0.0  ;;  %v3341_v45 = vadd.f32 %v4108_v56, %v3244_v22  ;;  %v3333_v48 = vadd.f32 %v4102_v8, %v3236_v25 }
 0x1ef   :  { %v3448_v39 = vmul.f32 %v5146_v46, %v3379_v21  ;;  %v3390_v23 = vadd.f32 %v4144_v60, %v3293_v26  ;;  %v3482_v32 = vadd.f32 %v5168_v49, %v3459_v44  ;;  %v3457_v34 = vmul.f32 %v5146_v46, %v3414_v3  ;;  %v5272_v44 = vld [vmem:[#allocation11_spill] sm:$0xff]  ;;  %v5273_v60 = vld [vmem:[#allocation9_spill] sm:$0xff] }
 0x1f0   :  { %v3381_v62 = vpop.f32.mrf.mxu0  ;;  %v3473_v33 = vadd.f32 %v5168_v49, %v3450_v50  ;;  %v3495_v58 = vmax.f32 %v3479_v27, 0.0  ;;  %v3204_v50 = vadd.f32 %v5152_v10, %v5271_v12  ;;  %v3309_v21 = vadd.f32 %v5156_v24, %v5162_v6  ;;  %v5274_v10 = vld [vmem:[#allocation10_spill] sm:$0xff] }
 0x1f1   :  { %v3451_v54 = vmul.f32 %v5146_v46, %v3390_v23  ;;  %v3382_v47 = vadd.f32 %v3381_v62, %v5269_v0  ;;  %v3498_v42 = vmax.f32 %v3482_v32, 0.0  ;;  %v3480_v5 = vadd.f32 %v5168_v49, %v3457_v34  ;;  %v4155_v2 = vpop.f32.mrf.mxu1 }
 0x1f2   :  { %v3471_v61 = vadd.f32 %v5168_v49, %v3448_v39  ;;  %v3435_v17 = vadd.f32 %v4155_v2, %v3338_v30  ;;  %v3489_v41 = vmax.f32 %v3473_v33, 0.0  ;;  %v4078_v20 = vadd.f32 %v5274_v10, %v5273_v60 }
 0x1f3   :  { %v3474_v26 = vadd.f32 %v5168_v49, %v3451_v54  ;;  %v3449_v19 = vmul.f32 %v5146_v46, %v3382_v47  ;;  %v3827_v28 = vpack.c.bf16 %v3498_v42, %v3497_v52  ;;  %v3496_v37 = vmax.f32 %v3480_v5, 0.0  ;;  %v3426_v35 = vpop.f32.mrf.mxu1 }
 0x1f4   :  { %v3427_v51 = vadd.f32 %v3426_v35, %v3330_v16  ;;  %v3462_v40 = vmul.f32 %v5146_v46, %v3435_v17  ;;  %v3487_v9 = vmax.f32 %v3471_v61, 0.0  ;;  %v3301_v27 = vadd.f32 %v4078_v20, %v3204_v50 }
 0x1f5   :  { %v3490_v55 = vmax.f32 %v3474_v26, 0.0  ;;  %v3472_v57 = vadd.f32 %v5168_v49, %v3449_v19  ;;  %3850 = vst [vmem:[%s5250_s6 + $0x28] sm:$0xff] %v3827_v28   ;;  %v3822_v59 = vpack.c.bf16 %v3496_v37, %v3495_v58  ;;  %v4156_v43 = vpop.f32.mrf.mxu1 }
 0x1f6   :  { %v3460_v53 = vmul.f32 %v5146_v46, %v3427_v51  ;;  %v3438_v11 = vadd.f32 %v4156_v43, %v3341_v45  ;;  %v3485_v36 = vadd.f32 %v5168_v49, %v3462_v40 }
 0x1f7   :  { %v3807_v14 = vpack.c.bf16 %v3490_v55, %v3489_v41  ;;  %v3488_v63 = vmax.f32 %v3472_v57, 0.0  ;;  %v4147_v1 = vpop.f32.mrf.mxu0  ;;  %3849 = vst [vmem:[%s5250_s6 + $0x20] sm:$0xff] %v3822_v59   ;;  %v3429_v7 = vpop.f32.mrf.mxu1 }
 0x1f8   :  { %v3403_v31 = vadd.f32 %v4147_v1, %v5159_v29  ;;  %v3430_v13 = vadd.f32 %v3429_v7, %v3333_v48  ;;  %v3463_v38 = vmul.f32 %v5146_v46, %v3438_v11  ;;  %v3483_v39 = vadd.f32 %v5168_v49, %v3460_v53 }
 0x1f9   :  { %3846 = vst [vmem:[%s5250_s6 + $0x8] sm:$0xff] %v3807_v14   ;;  %v3802_v8 = vpack.c.bf16 %v3488_v63, %v3487_v9  ;;  %v3394_v18 = vpop.f32.mrf.mxu0  ;;  %v3501_v34 = vmax.f32 %v3485_v36, 0.0 }
 0x1fa   :  { %v3454_v29 = vmul.f32 %v5146_v46, %v3403_v31  ;;  %v3395_v3 = vadd.f32 %v3394_v18, %v5272_v44  ;;  %v3461_v23 = vmul.f32 %v5146_v46, %v3430_v13  ;;  %v3486_v6 = vadd.f32 %v5168_v49, %v3463_v38 }
 0x1fb   :  { %3803 = vst [vmem:[%s5250_s6] sm:$0xff] %v3802_v8   ;;  %v4148_v24 = vpop.f32.mrf.mxu0  ;;  %v3499_v54 = vmax.f32 %v3483_v39, 0.0 }
 0x1fc   :  { %v3406_v16 = vadd.f32 %v4148_v24, %v3309_v21  ;;  %v3484_v4 = vadd.f32 %v5168_v49, %v3461_v23  ;;  %v3452_v25 = vmul.f32 %v5146_v46, %v3395_v3  ;;  %v3502_v62 = vmax.f32 %v3486_v6, 0.0 }
 0x1fd   :  { %v3397_v32 = vpop.f32.mrf.mxu0  ;;  %v3477_v33 = vadd.f32 %v5168_v49, %v3454_v29 }
 0x1fe   :  { %v3455_v30 = vmul.f32 %v5146_v46, %v3406_v16  ;;  %v3500_v0 = vmax.f32 %v3484_v4, 0.0  ;;  %v3398_v47 = vadd.f32 %v3397_v32, %v3301_v27  ;;  %v3837_v52 = vpack.c.bf16 %v3502_v62, %v3501_v34 }
 0x1ff   :  { %v3475_v42 = vadd.f32 %v5168_v49, %v3452_v25  ;;  %v3493_v2 = vmax.f32 %v3477_v33, 0.0 }
 0x200   :  { %v3478_v15 = vadd.f32 %v5168_v49, %v3455_v30  ;;  %v3832_v22 = vpack.c.bf16 %v3500_v0, %v3499_v54  ;;  %v3453_v5 = vmul.f32 %v5146_v46, %v3398_v47  ;;  %3852 = vst [vmem:[%s5250_s6 + $0x38] sm:$0xff] %v3837_v52  }
 0x201   :  { %v3491_v19 = vmax.f32 %v3475_v42, 0.0 }
 0x202   :  { %v3494_v61 = vmax.f32 %v3478_v15, 0.0  ;;  %3851 = vst [vmem:[%s5250_s6 + $0x30] sm:$0xff] %v3832_v22   ;;  %v3476_v17 = vadd.f32 %v5168_v49, %v3453_v5 }
 0x204   :  { %v3817_v26 = vpack.c.bf16 %v3494_v61, %v3493_v2  ;;  %v3492_v56 = vmax.f32 %v3476_v17, 0.0 }
 0x206   :  { %3848 = vst [vmem:[%s5250_s6 + $0x18] sm:$0xff] %v3817_v26   ;;  %v3812_v46 = vpack.c.bf16 %v3492_v56, %v3491_v19 }
 0x208   :  { %3847 = vst [vmem:[%s5250_s6 + $0x10] sm:$0xff] %v3812_v46  }

// kernel: network_block_fwd.5
= control target key start
LH: loop header
LB: loop body
LE: loop exit
PB: predicated region body
PF: predicated region fallthrough
CT: control target
= control target key end

     0   :  { %v4149_v1 = vmov 0   ;;  %vm233_vm0 = vsmask.f32 7938  ;;  %vm232_vm1 = vcmask 1043456   ;;  %vm238_vm2 = vcmask 1040384   ;;  %s4994_s2 = inlined_call_operand.vmem [shape: bf16[1152,128], index: 2, kind: input, shape index: {}]   ;;  %s4995_s0 = inlined_call_operand.vmem [shape: bf16[2,8,8,128], index: 0, kind: input, shape index: {}]   ;;  %s4996_s1 = inlined_call_operand.vmem [shape: bf16[2,8,8,128], index: 1, kind: input, shape index: {}]   ;;  %s4997_s3 = inlined_call_operand.vmem [shape: bf16[2,8,8,128], index: 3, kind: output, shape index: {}]  }
   0x1   :  { %v3973_v0 = vld [vmem:[%s4994_s2 + $0xf8] sm:$0xff]   ;;  %15 = vst [vmem:[#allocation2] sm:$0xf] %v4149_v1  ;;  %16 = vst [vmem:[#allocation2 + $0x4] sm:$0x1] %v4149_v1  ;;  %v3977_v5 = vld [vmem:[%s4994_s2 + $0xf0] sm:$0xff]  }
   0x2   :  { %17 = vst [vmem:[#allocation2 + $0x8] sm:$0xf] %v4149_v1  ;;  %18 = vst [vmem:[#allocation2 + $0xc] sm:$0x1] %v4149_v1  ;;  %v3974_v2 = vld [vmem:[%s4994_s2 + $0x78] sm:$0xff]   ;;  %3716 = vmatprep.subr.bf16.mxu1 %v3973_v0  ;;  %v3978_v6 = vld [vmem:[%s4994_s2 + $0x70] sm:$0xff]  }
   0x3   :  { %19 = vst [vmem:[#allocation2 + $0x10] sm:$0xf] %v4149_v1  ;;  %20 = vst [vmem:[#allocation2 + $0x14] sm:$0x1] %v4149_v1  ;;  %v3975_v3 = vld [vmem:[%s4994_s2 + $0xb8] sm:$0xff]   ;;  %3652 = vmatprep.subr.bf16.mxu0 %v3974_v2  ;;  %v3979_v7 = vld [vmem:[%s4994_s2 + $0xb0] sm:$0xff]  }
   0x4   :  { %21 = vst [vmem:[#allocation2 + $0x18] sm:$0xf] %v4149_v1  ;;  %22 = vst [vmem:[#allocation2 + $0x1c] sm:$0x1] %v4149_v1  ;;  %v3976_v4 = vld [vmem:[%s4994_s2 + $0x38] sm:$0xff]   ;;  %3717 = vmatpush3.bf16.msra.mxu1 %v3975_v3  ;;  %v3980_v8 = vld [vmem:[%s4994_s2 + $0x30] sm:$0xff]  }
   0x5   :  { %23 = vst [vmem:[#allocation2 + $0x20] sm:$0xf] %v4149_v1  ;;  %24 = vst [vmem:[#allocation2 + $0x24] sm:$0x1] %v4149_v1  ;;  %3653 = vmatpush3.bf16.msra.mxu0 %v3976_v4  ;;  %3718 = vmatprep.subr.bf16.mxu1 %v3977_v5  ;;  %v3981_v9 = vld [vmem:[%s4994_s2 + $0xe8] sm:$0xff]   ;;  %v3985_v13 = vld [vmem:[%s4994_s2 + $0xe0] sm:$0xff]  }
   0x6   :  { %25 = vst [vmem:[#allocation2 + $0x28] sm:$0xf] %v4149_v1  ;;  %26 = vst [vmem:[#allocation2 + $0x2c] sm:$0x1] %v4149_v1  ;;  %3654 = vmatprep.subr.bf16.mxu0 %v3978_v6  ;;  %v3982_v10 = vld [vmem:[%s4994_s2 + $0x68] sm:$0xff]   ;;  %v3986_v14 = vld [vmem:[%s4994_s2 + $0x60] sm:$0xff]  }
   0x7   :  { %27 = vst [vmem:[#allocation2 + $0x30] sm:$0xf] %v4149_v1  ;;  %28 = vst [vmem:[#allocation2 + $0x34] sm:$0x1] %v4149_v1  ;;  %v3983_v11 = vld [vmem:[%s4994_s2 + $0xa8] sm:$0xff]   ;;  %v3987_v15 = vld [vmem:[%s4994_s2 + $0xa0] sm:$0xff]  }
   0x8   :  { %29 = vst [vmem:[#allocation2 + $0x38] sm:$0xf] %v4149_v1  ;;  %30 = vst [vmem:[#allocation2 + $0x3c] sm:$0x1] %v4149_v1  ;;  %3719 = vmatpush3.bf16.msra.mxu1 %v3979_v7  ;;  %v3984_v12 = vld [vmem:[%s4994_s2 + $0x28] sm:$0xff]   ;;  %v3988_v16 = vld [vmem:[%s4994_s2 + $0x20] sm:$0xff]  }
   0x9   :  { %31 = vst [vmem:[#allocation2 + $0x40] sm:$0xf] %v4149_v1  ;;  %32 = vst [vmem:[#allocation2 + $0x44] sm:$0x1] %v4149_v1  ;;  %3655 = vmatpush3.bf16.msra.mxu0 %v3980_v8  ;;  %3720 = vmatprep.subr.bf16.mxu1 %v3981_v9  ;;  %v3989_v17 = vld [vmem:[%s4994_s2 + $0xd8] sm:$0xff]   ;;  %v3993_v21 = vld [vmem:[%s4994_s2 + $0xd0] sm:$0xff]  }
   0xa   :  { %33 = vst [vmem:[#allocation2 + $0x48] sm:$0xf] %v4149_v1  ;;  %34 = vst [vmem:[#allocation2 + $0x4c] sm:$0x1] %v4149_v1  ;;  %3656 = vmatprep.subr.bf16.mxu0 %v3982_v10  ;;  %v3990_v18 = vld [vmem:[%s4994_s2 + $0x58] sm:$0xff]   ;;  %v3994_v22 = vld [vmem:[%s4994_s2 + $0x50] sm:$0xff]  }
   0xb   :  { %35 = vst [vmem:[#allocation2 + $0x50] sm:$0xf] %v4149_v1  ;;  %36 = vst [vmem:[#allocation2 + $0x54] sm:$0x1] %v4149_v1  ;;  %v3991_v19 = vld [vmem:[%s4994_s2 + $0x98] sm:$0xff]   ;;  %v3995_v23 = vld [vmem:[%s4994_s2 + $0x90] sm:$0xff]  }
   0xc   :  { %37 = vst [vmem:[#allocation2 + $0x58] sm:$0xf] %v4149_v1  ;;  %38 = vst [vmem:[#allocation2 + $0x5c] sm:$0x1] %v4149_v1  ;;  %3721 = vmatpush3.bf16.msra.mxu1 %v3983_v11  ;;  %v3992_v20 = vld [vmem:[%s4994_s2 + $0x18] sm:$0xff]   ;;  %v3996_v24 = vld [vmem:[%s4994_s2 + $0x10] sm:$0xff]  }
   0xd   :  { %39 = vst [vmem:[#allocation2 + $0x60] sm:$0xf] %v4149_v1  ;;  %40 = vst [vmem:[#allocation2 + $0x64] sm:$0x1] %v4149_v1  ;;  %3657 = vmatpush3.bf16.msra.mxu0 %v3984_v12  ;;  %3722 = vmatprep.subr.bf16.mxu1 %v3985_v13  ;;  %v3997_v25 = vld [vmem:[%s4994_s2 + $0xc8] sm:$0xff]   ;;  %v4001_v29 = vld [vmem:[%s4994_s2 + $0xc0] sm:$0xff]  }
   0xe   :  { %41 = vst [vmem:[#allocation2 + $0x68] sm:$0xf] %v4149_v1  ;;  %42 = vst [vmem:[#allocation2 + $0x6c] sm:$0x1] %v4149_v1  ;;  %3658 = vmatprep.subr.bf16.mxu0 %v3986_v14  ;;  %v3998_v26 = vld [vmem:[%s4994_s2 + $0x48] sm:$0xff]   ;;  %v4002_v30 = vld [vmem:[%s4994_s2 + $0x40] sm:$0xff]  }
   0xf   :  { %43 = vst [vmem:[#allocation2 + $0x70] sm:$0xf] %v4149_v1  ;;  %44 = vst [vmem:[#allocation2 + $0x74] sm:$0x1] %v4149_v1  ;;  %v3999_v27 = vld [vmem:[%s4994_s2 + $0x88] sm:$0xff]   ;;  %v4003_v31 = vld [vmem:[%s4994_s2 + $0x80] sm:$0xff]  }
  0x10   :  { %45 = vst [vmem:[#allocation2 + $0x78] sm:$0xf] %v4149_v1  ;;  %46 = vst [vmem:[#allocation2 + $0x7c] sm:$0x1] %v4149_v1  ;;  %3723 = vmatpush3.bf16.msra.mxu1 %v3987_v15  ;;  %v4000_v28 = vld [vmem:[%s4994_s2 + $0x8] sm:$0xff]   ;;  %vm721_vm3 = vcmask 1042432  }
  0x11   :  { %47 = vst [vmem:[#allocation2 + $0x80] sm:$0xf] %v4149_v1  ;;  %48 = vst [vmem:[#allocation2 + $0x84] sm:$0x1] %v4149_v1  ;;  %3659 = vmatpush3.bf16.msra.mxu0 %v3988_v16  ;;  %3724 = vmatprep.subr.bf16.mxu1 %v3989_v17  ;;  %v4004_v32 = vld [vmem:[%s4994_s2] sm:$0xff]   ;;  %vm722_vm4 = vcmask 1046532  }
  0x12   :  { %49 = vst [vmem:[#allocation2 + $0x88] sm:$0xf] %v4149_v1  ;;  %50 = vst [vmem:[#allocation2 + $0x8c] sm:$0x1] %v4149_v1  ;;  %3660 = vmatprep.subr.bf16.mxu0 %v3990_v18  ;;  %v55_v33 = vld [vmem:[%s4995_s0] sm:$0xf] }
  0x13   :  { %51 = vst [vmem:[#allocation2 + $0x90] sm:$0xf] %v4149_v1  ;;  %52 = vst [vmem:[#allocation2 + $0x94] sm:$0x1] %v4149_v1  ;;  %v56_v34 = vld [vmem:[%s4995_s0 + $0x4] sm:$0xf] }
  0x14   :  { %53 = vst [vmem:[#allocation2 + $0x98] sm:$0xf] %v4149_v1  ;;  %54 = vst [vmem:[#allocation2 + $0x9c] sm:$0x1] %v4149_v1  ;;  %3725 = vmatpush3.bf16.msra.mxu1 %v3991_v19  ;;  %vm239_vm6 = vsmask.f32 256 }
  0x15   :  { %3661 = vmatpush3.bf16.msra.mxu0 %v3992_v20  ;;  %3726 = vmatprep.subr.bf16.mxu1 %v3993_v21  ;;  %vm4273_vm5 = vmand %vm232_vm1, %vm233_vm0  ;;  %v72_v36 = vshrl.u32 %v55_v33, 16  ;;  %v75_v37 = vshll.u32 %v55_v33, 16  ;;  %v80_v38 = vshrl.u32 %v56_v34, 16  ;;  %v83_v39 = vshll.u32 %v56_v34, 16  ;;  %v235_v41 = vld [vmem:[#allocation2 + $0x8] sm:$0xf] }
  0x16   :  { %3662 = vmatprep.subr.bf16.mxu0 %v3994_v22  ;;  %vm4278_vm7 = vmand %vm238_vm2, %vm239_vm6  ;;  %v241_v42 = vld [vmem:[#allocation2 + $0xc] sm:$0x1]  ;;  %v244_v43 = vld [vmem:[#allocation2 + $0x10] sm:$0xf]  ;;  %vm398_vm9 = vsmask.f32 3328 }
  0x17   :  { %v657_v44 = vld [vmem:[#allocation2] sm:$0xe]  ;;  %v74_v45 = vrot.slane %v72_v36, 7  ;;  %v82_v46 = vrot.slane %v80_v38, 7  ;;  %v658_v47 = vld [vmem:[#allocation2 + $0x4] sm:$0x1]  ;;  %vm4284_vm8 = vmor %vm721_vm3, %vm722_vm4 }
  0x18   :  { %3727 = vmatpush3.bf16.msra.mxu1 %v3995_v23  ;;  %v3374_v49 = vrot.slane %v657_v44, 9  ;;  %v4011_v50 = vld [vmem:[%s4994_s2 + $0x178] sm:$0xff]   ;;  %v726_v51 = vrot.slane %v658_v47, 5  ;;  %v334_v52 = vld [vmem:[#allocation2] sm:$0xf] }
  0x19   :  { %3663 = vmatpush3.bf16.msra.mxu0 %v3996_v24  ;;  %3728 = vmatprep.subr.bf16.mxu1 %v3997_v25  ;;  %v366_v53 = vld [vmem:[#allocation2] sm:$0xf]  ;;  %v4012_v54 = vld [vmem:[%s4994_s2 + $0x1f8] sm:$0xff]   ;;  %v77_v55 = vor.u32 %v75_v37, %v74_v45  ;;  %v78_v56 = vrot.slane %v74_v45, 4  ;;  %v85_v57 = vor.u32 %v83_v39, %v82_v46  ;;  %v86_v58 = vrot.slane %v82_v46, 4 }
  0x1a   :  { %3664 = vmatprep.subr.bf16.mxu0 %v3998_v26  ;;  %350 = vst [vmem:[#allocation3] sm:$0xf] %v334_v52  ;;  %v367_v59 = vld [vmem:[#allocation2 + $0x4] sm:$0x1]  ;;  %v727_v60 = vsel %vm4284_vm8, %v3374_v49, %v726_v51  ;;  %vm399_vm10 = vsmask.f32 7440 }
  0x1b   :  { %v402_v61 = vshrl.u32 %v366_v53, 16  ;;  %v236_v62 = vsel %vm4273_vm5, %v77_v55, %v235_v41  ;;  %v242_v63 = vsel %vm4278_vm7, %v78_v56, %v241_v42  ;;  %v245_v0 = vsel %vm4273_vm5, %v85_v57, %v244_v43  ;;  %804 = vst [vmem:[#allocation3 + $0x8] sm:$0xf] %v727_v60  ;;  %v57_v6 = vld [vmem:[%s4995_s0 + $0x8] sm:$0xf]  ;;  %vm4310_vm11 = vmor %vm398_vm9, %vm399_vm10 }
  0x1c   :  { %3729 = vmatpush3.bf16.msra.mxu1 %v3999_v27  ;;  %v405_v1 = vshll.u32 %v366_v53, 16  ;;  %237 = vst [vmem:[#allocation2 + $0x8] sm:$0xf] %v236_v62  ;;  %243 = vst [vmem:[#allocation2 + $0xc] sm:$0x1] %v242_v63  ;;  %v411_v3 = vshll.u32 %v367_v59, 16 }
  0x1d   :  { %3665 = vmatpush3.bf16.msra.mxu0 %v4000_v28  ;;  %3730 = vmatprep.subr.bf16.mxu1 %v4001_v29  ;;  %246 = vst [vmem:[#allocation2 + $0x10] sm:$0xf] %v245_v0  ;;  %v404_v2 = vrot.slane %v402_v61, 4  ;;  %v58_v8 = vld [vmem:[%s4995_s0 + $0xc] sm:$0xf]  ;;  %v88_v9 = vshrl.u32 %v57_v6, 16 }
  0x1e   :  { %3666 = vmatprep.subr.bf16.mxu0 %v4002_v30  ;;  %v407_v4 = vrot.slane %v405_v1, 5  ;;  %v413_v5 = vrot.slane %v411_v3, 5  ;;  %v91_v10 = vshll.u32 %v57_v6, 16  ;;  %v247_v11 = vld [vmem:[#allocation2 + $0x14] sm:$0x1]  ;;  %v96_v13 = vshrl.u32 %v58_v8, 16 }
  0x1f   :  { %v99_v14 = vshll.u32 %v58_v8, 16  ;;  %v248_v15 = vsel %vm4278_vm7, %v86_v58, %v247_v11  ;;  %v90_v17 = vrot.slane %v88_v9, 7  ;;  %v250_v18 = vld [vmem:[#allocation2 + $0x18] sm:$0xf]  ;;  %v253_v20 = vld [vmem:[#allocation2 + $0x1c] sm:$0x1] }
  0x20   :  { %3731 = vmatpush3.bf16.msra.mxu1 %v4003_v31  ;;  %v408_v7 = vor.u32 %v407_v4, %v404_v2  ;;  %249 = vst [vmem:[#allocation2 + $0x14] sm:$0x1] %v248_v15  ;;  %v4316_v19 = vrot.slane %v96_v13, 7  ;;  %v256_v21 = vld [vmem:[#allocation2 + $0x20] sm:$0xf]  ;;  %v4014_v0 = vld [vmem:[%s4994_s2 + $0x1b8] sm:$0xff]  }
  0x21   :  { %3667 = vmatpush3.bf16.msra.mxu0 %v4004_v32  ;;  %3844 = vmatprep.subr.bf16.mxu1 %v4012_v54  ;;  %v93_v26 = vor.u32 %v91_v10, %v90_v17  ;;  %v94_v34 = vrot.slane %v90_v17, 4  ;;  %v59_v2 = vld [vmem:[%s4995_s0 + $0x10] sm:$0xf] }
  0x22   :  { %3780 = vmatprep.subr.bf16.mxu0 %v4011_v50  ;;  %v409_v16 = vrot.slane %v408_v7, 4  ;;  %v101_v31 = vor.u32 %v99_v14, %v4316_v19  ;;  %v102_v60 = vrot.slane %v4316_v19, 4  ;;  %v4021_v7 = vld [vmem:[%s4994_s2 + $0x1f0] sm:$0xff]  }
  0x23   :  { %v659_v22 = vld [vmem:[#allocation2 + $0x8] sm:$0xe]  ;;  %v660_v23 = vld [vmem:[#allocation2 + $0xc] sm:$0x1]  ;;  %v251_v36 = vsel %vm4273_vm5, %v93_v26, %v250_v18  ;;  %v254_v43 = vsel %vm4278_vm7, %v94_v34, %v253_v20 }
  0x24   :  { %v820_v24 = vld [vmem:[#allocation2 + $0x8] sm:$0xf]  ;;  %v414_v25 = vsel %vm4310_vm11, %v409_v16, %v413_v5  ;;  %v3375_v27 = vrot.slane %v659_v22, 9  ;;  %v730_v28 = vrot.slane %v660_v23, 5  ;;  %v821_v29 = vld [vmem:[#allocation2 + $0x10] sm:$0xf]  ;;  %v257_v44 = vsel %vm4273_vm5, %v101_v31, %v256_v21 }
  0x25   :  { %836 = vst [vmem:[#allocation3 + $0xc] sm:$0xf] %v820_v24  ;;  %v335_v30 = vld [vmem:[#allocation2 + $0x8] sm:$0xf]  ;;  %641 = vst [vmem:[#allocation3 + $0x4] sm:$0xf] %v414_v25 }
  0x26   :  { %837 = vst [vmem:[#allocation3 + $0x30] sm:$0xf] %v821_v29  ;;  %351 = vst [vmem:[#allocation3 + $0x24] sm:$0xf] %v335_v30  ;;  %v368_v32 = vld [vmem:[#allocation2 + $0x8] sm:$0xf]  ;;  %v731_v37 = vsel %vm4284_vm8, %v3375_v27, %v730_v28 }
  0x27   :  { %v369_v33 = vld [vmem:[#allocation2 + $0xc] sm:$0x1]  ;;  %v416_v38 = vshrl.u32 %v368_v32, 16  ;;  %v419_v39 = vshll.u32 %v368_v32, 16  ;;  %252 = vst [vmem:[#allocation2 + $0x18] sm:$0xf] %v251_v36 }
  0x28   :  { %v425_v41 = vshll.u32 %v369_v33, 16  ;;  %v661_v42 = vld [vmem:[#allocation2 + $0x10] sm:$0xe]  ;;  %805 = vst [vmem:[#allocation3 + $0x2c] sm:$0xf] %v731_v37  ;;  %v104_v24 = vshrl.u32 %v59_v2, 16 }
  0x29   :  { %v3376_v45 = vrot.slane %v661_v42, 9  ;;  %v336_v46 = vld [vmem:[#allocation2 + $0x10] sm:$0xf]  ;;  %v418_v49 = vrot.slane %v416_v38, 4  ;;  %v421_v50 = vrot.slane %v419_v39, 5  ;;  %v107_v25 = vshll.u32 %v59_v2, 16 }
  0x2a   :  { %v370_v47 = vld [vmem:[#allocation2 + $0x10] sm:$0xf]  ;;  %v427_v51 = vrot.slane %v425_v41, 5  ;;  %255 = vst [vmem:[#allocation2 + $0x1c] sm:$0x1] %v254_v43  ;;  %v106_v33 = vrot.slane %v104_v24, 7 }
  0x2b   :  { %258 = vst [vmem:[#allocation2 + $0x20] sm:$0xf] %v257_v44  ;;  %v662_v52 = vld [vmem:[#allocation2 + $0x14] sm:$0x1]  ;;  %352 = vst [vmem:[#allocation3 + $0x48] sm:$0xf] %v336_v46  ;;  %v422_v57 = vor.u32 %v421_v50, %v418_v49 }
  0x2c   :  { %v430_v53 = vshrl.u32 %v370_v47, 16  ;;  %v734_v54 = vrot.slane %v662_v52, 5  ;;  %v371_v55 = vld [vmem:[#allocation2 + $0x14] sm:$0x1]  ;;  %v433_v56 = vshll.u32 %v370_v47, 16  ;;  %v4013_v38 = vld [vmem:[%s4994_s2 + $0x138] sm:$0xff]   ;;  %v109_v46 = vor.u32 %v107_v25, %v106_v33 }
  0x2d   :  { %v439_v59 = vshll.u32 %v371_v55, 16  ;;  %v423_v63 = vrot.slane %v422_v57, 4  ;;  %v4007_v9 = vld [vmem:[#allocation3 + $0xc] ss:$36 sps:$4 sm:$0xff]   ;;  %v60_v23 = vld [vmem:[%s4995_s0 + $0x14] sm:$0xf] }
  0x2e   :  { %v432_v58 = vrot.slane %v430_v53, 4  ;;  %v735_v61 = vsel %vm4284_vm8, %v3376_v45, %v734_v54  ;;  %v435_v62 = vrot.slane %v433_v56, 5  ;;  %v663_v3 = vld [vmem:[#allocation2 + $0x18] sm:$0xe]  ;;  %2934 = vmatprep.mubr.bf16.mxu1 %v4007_v9  ;;  %v4024_v22 = vld [vmem:[%s4994_s2 + $0x1b0] sm:$0xff]   ;;  %v112_v34 = vshrl.u32 %v60_v23, 16 }
  0x2f   :  { %806 = vst [vmem:[#allocation3 + $0x50] sm:$0xf] %v735_v61  ;;  %v441_v1 = vrot.slane %v439_v59, 5  ;;  %v822_v4 = vld [vmem:[#allocation2 + $0x18] sm:$0xf]  ;;  %v428_v10 = vsel %vm4310_vm11, %v423_v63, %v427_v51  ;;  %v3377_v11 = vrot.slane %v663_v3, 9 }
  0x30   :  { %v337_v5 = vld [vmem:[#allocation2 + $0x18] sm:$0xf]  ;;  %v436_v6 = vor.u32 %v435_v62, %v432_v58  ;;  %v4005_v8 = vld [vmem:[#allocation3 + $0x8] ss:$36 sps:$4 sm:$0xff]   ;;  %838 = vst [vmem:[#allocation3 + $0x54] sm:$0xf] %v822_v4 }
  0x31   :  { %353 = vst [vmem:[#allocation3 + $0x6c] sm:$0xf] %v337_v5  ;;  %642 = vst [vmem:[#allocation3 + $0x28] sm:$0xf] %v428_v10  ;;  %v664_v13 = vld [vmem:[#allocation2 + $0x1c] sm:$0x1]  ;;  %2935 = vmatmul.mubr.bf16.vlgmr.msra.gmra.mxu1 %v4005_v8 }
  0x32   :  { %v823_v14 = vld [vmem:[#allocation2 + $0x20] sm:$0xf]  ;;  %v372_v15 = vld [vmem:[#allocation2 + $0x18] sm:$0xf]  ;;  %v738_v16 = vrot.slane %v664_v13, 5  ;;  %v437_v18 = vrot.slane %v436_v6, 4  ;;  %3845 = vmatpush3.bf16.msra.mxu1 %v4014_v0 }
  0x33   :  { %839 = vst [vmem:[#allocation3 + $0x78] sm:$0xf] %v823_v14  ;;  %v373_v17 = vld [vmem:[#allocation2 + $0x1c] sm:$0x1]  ;;  %v444_v19 = vshrl.u32 %v372_v15, 16  ;;  %v447_v20 = vshll.u32 %v372_v15, 16  ;;  %3846 = vmatprep.subr.bf16.mxu1 %v4021_v7 }
  0x34   :  { %v453_v21 = vshll.u32 %v373_v17, 16  ;;  %v739_v26 = vsel %vm4284_vm8, %v3377_v11, %v738_v16  ;;  %v442_v27 = vsel %vm4310_vm11, %v437_v18, %v441_v1  ;;  %v259_v30 = vld [vmem:[#allocation2 + $0x24] sm:$0x1]  ;;  %v262_v31 = vld [vmem:[#allocation2 + $0x28] sm:$0xf]  ;;  %v115_v36 = vshll.u32 %v60_v23, 16 }
  0x35   :  { %v446_v28 = vrot.slane %v444_v19, 4  ;;  %v449_v29 = vrot.slane %v447_v20, 5  ;;  %807 = vst [vmem:[#allocation3 + $0x74] sm:$0xf] %v739_v26  ;;  %643 = vst [vmem:[#allocation3 + $0x4c] sm:$0xf] %v442_v27  ;;  %v260_v41 = vsel %vm4278_vm7, %v102_v60, %v259_v30  ;;  %v263_v55 = vsel %vm4273_vm5, %v109_v46, %v262_v31 }
  0x36   :  { %v455_v32 = vrot.slane %v453_v21, 5  ;;  %v265_v37 = vld [vmem:[#allocation2 + $0x2c] sm:$0x1]  ;;  %v268_v42 = vld [vmem:[#allocation2 + $0x30] sm:$0xf]  ;;  %v110_v47 = vrot.slane %v106_v33, 4  ;;  %3847 = vmatpush3.bf16.msra.mxu1 %v4024_v22 }
  0x37   :  { %v450_v39 = vor.u32 %v449_v29, %v446_v28  ;;  %v665_v43 = vld [vmem:[#allocation2 + $0x20] sm:$0xe]  ;;  %v4020_v45 = vld [vmem:[%s4994_s2 + $0x170] sm:$0xff]   ;;  %v114_v49 = vrot.slane %v112_v34, 7  ;;  %261 = vst [vmem:[#allocation2 + $0x24] sm:$0x1] %v260_v41 }
  0x38   :  { %v338_v44 = vld [vmem:[#allocation2 + $0x20] sm:$0xf]  ;;  %v4010_v52 = vld [vmem:[#allocation3 + $0x4] ss:$36 sps:$4 sm:$0xff]   ;;  %v266_v56 = vsel %vm4278_vm7, %v110_v47, %v265_v37  ;;  %v4023_v59 = vld [vmem:[%s4994_s2 + $0x130] sm:$0xff]   ;;  %v3378_v0 = vrot.slane %v665_v43, 9 }
  0x39   :  { %354 = vst [vmem:[#allocation3 + $0x90] sm:$0xf] %v338_v44  ;;  %v374_v50 = vld [vmem:[#allocation2 + $0x20] sm:$0xf]  ;;  %v451_v53 = vrot.slane %v450_v39, 4  ;;  %v117_v54 = vor.u32 %v115_v36, %v114_v49  ;;  %v4031_v57 = vld [vmem:[%s4994_s2 + $0x1e8] sm:$0xff]   ;;  %2837 = vmatprep.mubr.bf16.mxu0 %v4010_v52 }
  0x3a   :  { %v4008_v51 = vld [vmem:[#allocation3] ss:$36 sps:$4 sm:$0xff]   ;;  %264 = vst [vmem:[#allocation2 + $0x28] sm:$0xf] %v263_v55  ;;  %267 = vst [vmem:[#allocation2 + $0x2c] sm:$0x1] %v266_v56  ;;  %3848 = vmatprep.subr.bf16.mxu1 %v4031_v57 }
  0x3b   :  { %v456_v58 = vsel %vm4310_vm11, %v451_v53, %v455_v32  ;;  %v458_v60 = vshrl.u32 %v374_v50, 16  ;;  %v461_v61 = vshll.u32 %v374_v50, 16  ;;  %2838 = vmatmul.mubr.bf16.vlgmr.msra.gmra.mxu0 %v4008_v51  ;;  %v118_v62 = vrot.slane %v114_v49, 4  ;;  %v4030_v1 = vld [vmem:[%s4994_s2 + $0x168] sm:$0xff]   ;;  %v4015_v2 = vld [vmem:[#allocation3 + $0x54] ss:$36 sps:$4 sm:$0xff]  }
  0x3c   :  { %644 = vst [vmem:[#allocation3 + $0x70] sm:$0xf] %v456_v58  ;;  %v269_v63 = vsel %vm4273_vm5, %v117_v54, %v268_v42  ;;  %3781 = vmatpush3.bf16.msra.mxu0 %v4013_v38  ;;  %v4017_v3 = vld [vmem:[#allocation3 + $0x50] ss:$36 sps:$4 sm:$0xff]   ;;  %2942 = vmatprep.mubr.bf16.mxu1 %v4015_v2  ;;  %v4033_v8 = vld [vmem:[%s4994_s2 + $0x128] sm:$0xff]   ;;  %v4040_v44 = vld [vmem:[%s4994_s2 + $0x160] sm:$0xff]  }
  0x3d   :  { %270 = vst [vmem:[#allocation2 + $0x30] sm:$0xf] %v269_v63  ;;  %v460_v4 = vrot.slane %v458_v60, 4  ;;  %3782 = vmatprep.subr.bf16.mxu0 %v4020_v45  ;;  %v463_v5 = vrot.slane %v461_v61, 5  ;;  %v4034_v9 = vld [vmem:[%s4994_s2 + $0x1a8] sm:$0xff]   ;;  %2943 = vmatmul.mubr.bf16.gmra.mxu1 %v4017_v3  ;;  %v4041_v55 = vld [vmem:[%s4994_s2 + $0x1e0] sm:$0xff]  }
  0x3e   :  { %v666_v6 = vld [vmem:[#allocation2 + $0x24] sm:$0x1]  ;;  %v61_v14 = vld [vmem:[%s4995_s0 + $0x18] sm:$0xf]  ;;  %v62_v15 = vld [vmem:[%s4995_s0 + $0x1c] sm:$0xf]  ;;  %3849 = vmatpush3.bf16.msra.mxu1 %v4034_v9 }
  0x3f   :  { %v375_v7 = vld [vmem:[#allocation2 + $0x24] sm:$0x1]  ;;  %v742_v10 = vrot.slane %v666_v6, 5  ;;  %v464_v11 = vor.u32 %v463_v5, %v460_v4  ;;  %v120_v16 = vshrl.u32 %v61_v14, 16  ;;  %v123_v17 = vshll.u32 %v61_v14, 16  ;;  %3850 = vmatprep.subr.bf16.mxu1 %v4041_v55 }
  0x40   :  { %v467_v13 = vshll.u32 %v375_v7, 16  ;;  %3783 = vmatpush3.bf16.msra.mxu0 %v4023_v59  ;;  %v128_v18 = vshrl.u32 %v62_v15, 16  ;;  %v131_v19 = vshll.u32 %v62_v15, 16  ;;  %v271_v20 = vld [vmem:[#allocation2 + $0x34] sm:$0x1]  ;;  %v4044_v7 = vld [vmem:[%s4994_s2 + $0x1a0] sm:$0xff]  }
  0x41   :  { %v667_v21 = vld [vmem:[#allocation2 + $0x28] sm:$0xe]  ;;  %v668_v22 = vld [vmem:[#allocation2 + $0x2c] sm:$0x1]  ;;  %v743_v23 = vsel %vm4284_vm8, %v3378_v0, %v742_v10  ;;  %3784 = vmatprep.subr.bf16.mxu0 %v4030_v1  ;;  %v272_v25 = vsel %vm4278_vm7, %v118_v62, %v271_v20  ;;  %v465_v32 = vrot.slane %v464_v11, 4  ;;  %v122_v37 = vrot.slane %v120_v16, 7 }
  0x42   :  { %v824_v24 = vld [vmem:[#allocation2 + $0x28] sm:$0xf]  ;;  %v3379_v28 = vrot.slane %v667_v21, 9  ;;  %808 = vst [vmem:[#allocation3 + $0x98] sm:$0xf] %v743_v23  ;;  %v746_v29 = vrot.slane %v668_v22, 5  ;;  %3851 = vmatpush3.bf16.msra.mxu1 %v4044_v7 }
  0x43   :  { %v4018_v26 = vld [vmem:[#allocation3 + $0x4c] ss:$36 sps:$4 sm:$0xff]   ;;  %840 = vst [vmem:[#allocation3 + $0x9c] sm:$0xf] %v824_v24  ;;  %273 = vst [vmem:[#allocation2 + $0x34] sm:$0x1] %v272_v25  ;;  %v125_v46 = vor.u32 %v123_v17, %v122_v37 }
  0x44   :  { %v4022_v27 = vld [vmem:[#allocation3 + $0x48] ss:$36 sps:$4 sm:$0xff]   ;;  %v825_v30 = vld [vmem:[#allocation2 + $0x30] sm:$0xf]  ;;  %2845 = vmatprep.mubr.bf16.mxu0 %v4018_v26  ;;  %v469_v36 = vrot.slane %v467_v13, 5  ;;  %3785 = vmatpush3.bf16.msra.mxu0 %v4033_v8  ;;  %v747_v38 = vsel %vm4284_vm8, %v3379_v28, %v746_v29  ;;  %v126_v47 = vrot.slane %v122_v37, 4 }
  0x45   :  { %v339_v31 = vld [vmem:[#allocation2 + $0x28] sm:$0xf]  ;;  %841 = vst [vmem:[#allocation3 + $0xc0] sm:$0xf] %v825_v30  ;;  %v377_v34 = vld [vmem:[#allocation2 + $0x2c] sm:$0x1]  ;;  %2846 = vmatmul.mubr.bf16.gmra.mxu0 %v4022_v27  ;;  %3786 = vmatprep.subr.bf16.mxu0 %v4040_v44 }
  0x46   :  { %355 = vst [vmem:[#allocation3 + $0xb4] sm:$0xf] %v339_v31  ;;  %v376_v33 = vld [vmem:[#allocation2 + $0x28] sm:$0xf]  ;;  %v481_v42 = vshll.u32 %v377_v34, 16  ;;  %v470_v45 = vsel %vm4310_vm11, %v465_v32, %v469_v36  ;;  %v4401_v49 = vrot.slane %v128_v18, 7 }
  0x47   :  { %v472_v39 = vshrl.u32 %v376_v33, 16  ;;  %v475_v41 = vshll.u32 %v376_v33, 16  ;;  %v274_v43 = vld [vmem:[#allocation2 + $0x38] sm:$0xf]  ;;  %809 = vst [vmem:[#allocation3 + $0xbc] sm:$0xf] %v747_v38 }
  0x48   :  { %v277_v50 = vld [vmem:[#allocation2 + $0x3c] sm:$0x1]  ;;  %v280_v51 = vld [vmem:[#allocation2 + $0x40] sm:$0xf]  ;;  %645 = vst [vmem:[#allocation3 + $0x94] sm:$0xf] %v470_v45  ;;  %v133_v57 = vor.u32 %v131_v19, %v4401_v49  ;;  %v275_v58 = vsel %vm4273_vm5, %v125_v46, %v274_v43 }
  0x49   :  { %v474_v52 = vrot.slane %v472_v39, 4  ;;  %v477_v53 = vrot.slane %v475_v41, 5  ;;  %v669_v54 = vld [vmem:[#allocation2 + $0x30] sm:$0xe]  ;;  %v483_v56 = vrot.slane %v481_v42, 5  ;;  %v278_v59 = vsel %vm4278_vm7, %v126_v47, %v277_v50  ;;  %v4043_v62 = vld [vmem:[%s4994_s2 + $0x120] sm:$0xff]  }
  0x4a   :  { %v340_v60 = vld [vmem:[#allocation2 + $0x30] sm:$0xf]  ;;  %276 = vst [vmem:[#allocation2 + $0x38] sm:$0xf] %v275_v58  ;;  %279 = vst [vmem:[#allocation2 + $0x3c] sm:$0x1] %v278_v59  ;;  %v281_v3 = vsel %vm4273_vm5, %v133_v57, %v280_v51  ;;  %3787 = vmatpush3.bf16.msra.mxu0 %v4043_v62 }
  0x4b   :  { %v378_v61 = vld [vmem:[#allocation2 + $0x30] sm:$0xf]  ;;  %v478_v63 = vor.u32 %v477_v53, %v474_v52  ;;  %v670_v0 = vld [vmem:[#allocation2 + $0x34] sm:$0x1]  ;;  %v3380_v1 = vrot.slane %v669_v54, 9  ;;  %v4050_v37 = vld [vmem:[%s4994_s2 + $0x158] sm:$0xff]  }
  0x4c   :  { %356 = vst [vmem:[#allocation3 + $0xd8] sm:$0xf] %v340_v60  ;;  %v379_v2 = vld [vmem:[#allocation2 + $0x34] sm:$0x1]  ;;  %v750_v4 = vrot.slane %v670_v0, 5  ;;  %v486_v5 = vshrl.u32 %v378_v61, 16  ;;  %3788 = vmatprep.subr.bf16.mxu0 %v4050_v37 }
  0x4d   :  { %v489_v6 = vshll.u32 %v378_v61, 16  ;;  %v479_v8 = vrot.slane %v478_v63, 4  ;;  %282 = vst [vmem:[#allocation2 + $0x40] sm:$0xf] %v281_v3  ;;  %v495_v9 = vshll.u32 %v379_v2, 16  ;;  %v4051_v43 = vld [vmem:[%s4994_s2 + $0x1d8] sm:$0xff]  }
  0x4e   :  { %v751_v10 = vsel %vm4284_vm8, %v3380_v1, %v750_v4  ;;  %v488_v11 = vrot.slane %v486_v5, 4  ;;  %v4025_v14 = vld [vmem:[#allocation3 + $0x9c] ss:$36 sps:$4 sm:$0xff]   ;;  %v64_v20 = vld [vmem:[%s4995_s0 + $0x24] sm:$0xf]  ;;  %3852 = vmatprep.subr.bf16.mxu1 %v4051_v43 }
  0x4f   :  { %v491_v13 = vrot.slane %v489_v6, 5  ;;  %v4027_v15 = vld [vmem:[#allocation3 + $0x98] ss:$36 sps:$4 sm:$0xff]   ;;  %v484_v16 = vsel %vm4310_vm11, %v479_v8, %v483_v56  ;;  %810 = vst [vmem:[#allocation3 + $0xe0] sm:$0xf] %v751_v10  ;;  %v497_v18 = vrot.slane %v495_v9, 5  ;;  %2950 = vmatprep.mubr.bf16.mxu1 %v4025_v14 }
  0x50   :  { %646 = vst [vmem:[#allocation3 + $0xb8] sm:$0xf] %v484_v16  ;;  %v63_v19 = vld [vmem:[%s4995_s0 + $0x20] sm:$0xf]  ;;  %2951 = vmatmul.mubr.bf16.gmra.mxu1 %v4027_v15  ;;  %v144_v42 = vshrl.u32 %v64_v20, 16  ;;  %v147_v54 = vshll.u32 %v64_v20, 16 }
  0x51   :  { %v492_v17 = vor.u32 %v491_v13, %v488_v11  ;;  %v671_v21 = vld [vmem:[#allocation2 + $0x38] sm:$0xe]  ;;  %v672_v22 = vld [vmem:[#allocation2 + $0x3c] sm:$0x1]  ;;  %v136_v36 = vshrl.u32 %v63_v19, 16  ;;  %v139_v41 = vshll.u32 %v63_v19, 16 }
  0x52   :  { %v826_v23 = vld [vmem:[#allocation2 + $0x38] sm:$0xf]  ;;  %v3381_v24 = vrot.slane %v671_v21, 9  ;;  %v754_v25 = vrot.slane %v672_v22, 5  ;;  %v381_v29 = vld [vmem:[#allocation2 + $0x3c] sm:$0x1] }
  0x53   :  { %842 = vst [vmem:[#allocation3 + $0xe4] sm:$0xf] %v826_v23  ;;  %v341_v26 = vld [vmem:[#allocation2 + $0x38] sm:$0xf]  ;;  %v493_v30 = vrot.slane %v492_v17, 4  ;;  %v509_v34 = vshll.u32 %v381_v29, 16 }
  0x54   :  { %v380_v27 = vld [vmem:[#allocation2 + $0x38] sm:$0xf]  ;;  %v827_v28 = vld [vmem:[#allocation2 + $0x40] sm:$0xf]  ;;  %357 = vst [vmem:[#allocation3 + $0xfc] sm:$0xf] %v341_v26  ;;  %v755_v32 = vsel %vm4284_vm8, %v3381_v24, %v754_v25 }
  0x55   :  { %v500_v31 = vshrl.u32 %v380_v27, 16  ;;  %843 = vst [vmem:[#allocation3 + $0x108] sm:$0xf] %v827_v28  ;;  %v503_v33 = vshll.u32 %v380_v27, 16  ;;  %811 = vst [vmem:[#allocation3 + $0x104] sm:$0xf] %v755_v32  ;;  %v498_v38 = vsel %vm4310_vm11, %v493_v30, %v497_v18 }
  0x56   :  { %v4032_v45 = vld [vmem:[#allocation3 + $0x90] ss:$36 sps:$4 sm:$0xff]   ;;  %647 = vst [vmem:[#allocation3 + $0xdc] sm:$0xf] %v498_v38  ;;  %v286_v47 = vld [vmem:[#allocation2 + $0x58] sm:$0xf] }
  0x57   :  { %v502_v39 = vrot.slane %v500_v31, 4  ;;  %v4028_v44 = vld [vmem:[#allocation3 + $0x94] ss:$36 sps:$4 sm:$0xff]   ;;  %v505_v46 = vrot.slane %v503_v33, 5  ;;  %v289_v50 = vld [vmem:[#allocation2 + $0x5c] sm:$0x1] }
  0x58   :  { %v511_v51 = vrot.slane %v509_v34, 5  ;;  %v138_v52 = vrot.slane %v136_v36, 7  ;;  %v146_v53 = vrot.slane %v144_v42, 7  ;;  %v292_v55 = vld [vmem:[#allocation2 + $0x60] sm:$0xf]  ;;  %2853 = vmatprep.mubr.bf16.mxu0 %v4028_v44  ;;  %v4053_v1 = vld [vmem:[%s4994_s2 + $0x118] sm:$0xff]  }
  0x59   :  { %v506_v56 = vor.u32 %v505_v46, %v502_v39  ;;  %v673_v57 = vld [vmem:[#allocation2 + $0x50] sm:$0xe]  ;;  %v674_v58 = vld [vmem:[#allocation2 + $0x54] sm:$0x1]  ;;  %2854 = vmatmul.mubr.bf16.gmra.mxu0 %v4032_v45  ;;  %v4054_v11 = vld [vmem:[%s4994_s2 + $0x198] sm:$0xff]  }
  0x5a   :  { %v342_v59 = vld [vmem:[#allocation2 + $0x50] sm:$0xf]  ;;  %v141_v60 = vor.u32 %v139_v41, %v138_v52  ;;  %v142_v61 = vrot.slane %v138_v52, 4  ;;  %v149_v62 = vor.u32 %v147_v54, %v146_v53  ;;  %v150_v63 = vrot.slane %v146_v53, 4  ;;  %v383_v5 = vld [vmem:[#allocation2 + $0x54] sm:$0x1]  ;;  %3789 = vmatpush3.bf16.msra.mxu0 %v4053_v1  ;;  %3853 = vmatpush3.bf16.msra.mxu1 %v4054_v11 }
  0x5b   :  { %358 = vst [vmem:[#allocation3 + $0x120] sm:$0xf] %v342_v59  ;;  %v382_v0 = vld [vmem:[#allocation2 + $0x50] sm:$0xf]  ;;  %v507_v2 = vrot.slane %v506_v56, 4  ;;  %v3382_v3 = vrot.slane %v673_v57, 9 }
  0x5c   :  { %v758_v4 = vrot.slane %v674_v58, 5  ;;  %v514_v6 = vshrl.u32 %v382_v0, 16  ;;  %v287_v7 = vsel %vm4273_vm5, %v141_v60, %v286_v47  ;;  %v290_v8 = vsel %vm4278_vm7, %v142_v61, %v289_v50  ;;  %v4035_v13 = vld [vmem:[#allocation3 + $0xe4] ss:$36 sps:$4 sm:$0xff]   ;;  %v4060_v20 = vld [vmem:[%s4994_s2 + $0x150] sm:$0xff]  }
  0x5d   :  { %v293_v9 = vsel %vm4273_vm5, %v149_v62, %v292_v55  ;;  %v517_v10 = vshll.u32 %v382_v0, 16  ;;  %v4037_v14 = vld [vmem:[#allocation3 + $0xe0] ss:$36 sps:$4 sm:$0xff]   ;;  %v512_v15 = vsel %vm4310_vm11, %v507_v2, %v511_v51  ;;  %288 = vst [vmem:[#allocation2 + $0x58] sm:$0xf] %v287_v7  ;;  %v523_v19 = vshll.u32 %v383_v5, 16  ;;  %2958 = vmatprep.mubr.bf16.mxu1 %v4035_v13  ;;  %3790 = vmatprep.subr.bf16.mxu0 %v4060_v20 }
  0x5e   :  { %291 = vst [vmem:[#allocation2 + $0x5c] sm:$0x1] %v290_v8  ;;  %294 = vst [vmem:[#allocation2 + $0x60] sm:$0xf] %v293_v9  ;;  %v759_v16 = vsel %vm4284_vm8, %v3382_v3, %v758_v4  ;;  %v516_v17 = vrot.slane %v514_v6, 4  ;;  %2959 = vmatmul.mubr.bf16.gmra.mxu1 %v4037_v14  ;;  %v4061_v23 = vld [vmem:[%s4994_s2 + $0x1d0] sm:$0xff]  }
  0x5f   :  { %648 = vst [vmem:[#allocation3 + $0x100] sm:$0xf] %v512_v15  ;;  %812 = vst [vmem:[#allocation3 + $0x128] sm:$0xf] %v759_v16  ;;  %v519_v18 = vrot.slane %v517_v10, 5  ;;  %v525_v22 = vrot.slane %v523_v19, 5  ;;  %3854 = vmatprep.subr.bf16.mxu1 %v4061_v23 }
  0x60   :  { %v65_v24 = vld [vmem:[%s4995_s0 + $0x28] sm:$0xf]  ;;  %v66_v25 = vld [vmem:[%s4995_s0 + $0x2c] sm:$0xf]  ;;  %v295_v26 = vld [vmem:[#allocation2 + $0x64] sm:$0x1] }
  0x61   :  { %v520_v21 = vor.u32 %v519_v18, %v516_v17  ;;  %v152_v28 = vshrl.u32 %v65_v24, 16  ;;  %v155_v29 = vshll.u32 %v65_v24, 16  ;;  %v160_v30 = vshrl.u32 %v66_v25, 16  ;;  %v4063_v33 = vld [vmem:[%s4994_s2 + $0x110] sm:$0xff]   ;;  %v4042_v41 = vld [vmem:[#allocation3 + $0xd8] ss:$36 sps:$4 sm:$0xff]  }
  0x62   :  { %v163_v31 = vshll.u32 %v66_v25, 16  ;;  %v296_v32 = vsel %vm4278_vm7, %v150_v63, %v295_v26  ;;  %3791 = vmatpush3.bf16.msra.mxu0 %v4063_v33  ;;  %v298_v47 = vld [vmem:[#allocation2 + $0x68] sm:$0xf]  ;;  %v301_v50 = vld [vmem:[#allocation2 + $0x6c] sm:$0x1]  ;;  %v4064_v55 = vld [vmem:[%s4994_s2 + $0x190] sm:$0xff]  }
  0x63   :  { %v521_v27 = vrot.slane %v520_v21, 4  ;;  %297 = vst [vmem:[#allocation2 + $0x64] sm:$0x1] %v296_v32  ;;  %v154_v46 = vrot.slane %v152_v28, 7  ;;  %v304_v51 = vld [vmem:[#allocation2 + $0x70] sm:$0xf]  ;;  %3855 = vmatpush3.bf16.msra.mxu1 %v4064_v55 }
  0x64   :  { %v675_v34 = vld [vmem:[#allocation2 + $0x58] sm:$0xe]  ;;  %v4474_v54 = vrot.slane %v160_v30, 7  ;;  %v4070_v61 = vld [vmem:[%s4994_s2 + $0x148] sm:$0xff]   ;;  %v4080_v26 = vld [vmem:[%s4994_s2 + $0x140] sm:$0xff]  }
  0x65   :  { %v676_v36 = vld [vmem:[#allocation2 + $0x5c] sm:$0x1]  ;;  %v828_v37 = vld [vmem:[#allocation2 + $0x58] sm:$0xf]  ;;  %v526_v38 = vsel %vm4310_vm11, %v521_v27, %v525_v22  ;;  %v3383_v42 = vrot.slane %v675_v34, 9  ;;  %v157_v62 = vor.u32 %v155_v29, %v154_v46  ;;  %v158_v63 = vrot.slane %v154_v46, 4  ;;  %3792 = vmatprep.subr.bf16.mxu0 %v4070_v61 }
  0x66   :  { %v4038_v39 = vld [vmem:[#allocation3 + $0xdc] ss:$36 sps:$4 sm:$0xff]   ;;  %844 = vst [vmem:[#allocation3 + $0x12c] sm:$0xf] %v828_v37  ;;  %649 = vst [vmem:[#allocation3 + $0x124] sm:$0xf] %v526_v38  ;;  %v165_v0 = vor.u32 %v163_v31, %v4474_v54 }
  0x67   :  { %v762_v43 = vrot.slane %v676_v36, 5  ;;  %v829_v44 = vld [vmem:[#allocation2 + $0x60] sm:$0xf]  ;;  %v343_v45 = vld [vmem:[#allocation2 + $0x58] sm:$0xf]  ;;  %2861 = vmatprep.mubr.bf16.mxu0 %v4038_v39  ;;  %v299_v7 = vsel %vm4273_vm5, %v157_v62, %v298_v47  ;;  %v302_v8 = vsel %vm4278_vm7, %v158_v63, %v301_v50  ;;  %v4071_v14 = vld [vmem:[%s4994_s2 + $0x1c8] sm:$0xff]  }
  0x68   :  { %845 = vst [vmem:[#allocation3 + $0x150] sm:$0xf] %v829_v44  ;;  %359 = vst [vmem:[#allocation3 + $0x144] sm:$0xf] %v343_v45  ;;  %v384_v52 = vld [vmem:[#allocation2 + $0x58] sm:$0xf]  ;;  %2862 = vmatmul.mubr.bf16.gmra.mxu0 %v4042_v41  ;;  %v305_v9 = vsel %vm4273_vm5, %v165_v0, %v304_v51  ;;  %3856 = vmatprep.subr.bf16.mxu1 %v4071_v14 }
  0x69   :  { %v385_v53 = vld [vmem:[#allocation2 + $0x5c] sm:$0x1]  ;;  %v763_v56 = vsel %vm4284_vm8, %v3383_v42, %v762_v43  ;;  %v528_v57 = vshrl.u32 %v384_v52, 16  ;;  %v531_v58 = vshll.u32 %v384_v52, 16  ;;  %v677_v60 = vld [vmem:[#allocation2 + $0x60] sm:$0xe] }
  0x6a   :  { %v537_v59 = vshll.u32 %v385_v53, 16  ;;  %813 = vst [vmem:[#allocation3 + $0x14c] sm:$0xf] %v763_v56  ;;  %v344_v1 = vld [vmem:[#allocation2 + $0x60] sm:$0xf]  ;;  %v3384_v6 = vrot.slane %v677_v60, 9 }
  0x6b   :  { %v386_v2 = vld [vmem:[#allocation2 + $0x60] sm:$0xf]  ;;  %v530_v3 = vrot.slane %v528_v57, 4  ;;  %v533_v4 = vrot.slane %v531_v58, 5  ;;  %360 = vst [vmem:[#allocation3 + $0x168] sm:$0xf] %v344_v1 }
  0x6c   :  { %v539_v5 = vrot.slane %v537_v59, 5  ;;  %v678_v10 = vld [vmem:[#allocation2 + $0x64] sm:$0x1]  ;;  %v542_v13 = vshrl.u32 %v386_v2, 16  ;;  %300 = vst [vmem:[#allocation2 + $0x68] sm:$0xf] %v299_v7 }
  0x6d   :  { %v387_v11 = vld [vmem:[#allocation2 + $0x64] sm:$0x1]  ;;  %v534_v15 = vor.u32 %v533_v4, %v530_v3  ;;  %303 = vst [vmem:[#allocation2 + $0x6c] sm:$0x1] %v302_v8  ;;  %306 = vst [vmem:[#allocation2 + $0x70] sm:$0xf] %v305_v9 }
  0x6e   :  { %v766_v16 = vrot.slane %v678_v10, 5  ;;  %v545_v17 = vshll.u32 %v386_v2, 16  ;;  %v551_v18 = vshll.u32 %v387_v11, 16  ;;  %v4073_v19 = vld [vmem:[%s4994_s2 + $0x108] sm:$0xff]   ;;  %v544_v20 = vrot.slane %v542_v13, 4  ;;  %v4081_v61 = vld [vmem:[%s4994_s2 + $0x1c0] sm:$0xff]  }
  0x6f   :  { %v4074_v21 = vld [vmem:[%s4994_s2 + $0x188] sm:$0xff]   ;;  %v535_v22 = vrot.slane %v534_v15, 4  ;;  %v166_v23 = vrot.slane %v4474_v54, 4  ;;  %3793 = vmatpush3.bf16.msra.mxu0 %v4073_v19  ;;  %v67_v32 = vld [vmem:[%s4995_s0 + $0x30] sm:$0xf]  ;;  %v4083_v3 = vld [vmem:[%s4994_s2 + $0x100] sm:$0xff]  }
  0x70   :  { %v767_v24 = vsel %vm4284_vm8, %v3384_v6, %v766_v16  ;;  %v547_v25 = vrot.slane %v545_v17, 5  ;;  %3857 = vmatpush3.bf16.msra.mxu1 %v4074_v21  ;;  %v4045_v27 = vld [vmem:[#allocation3 + $0x12c] ss:$36 sps:$4 sm:$0xff]   ;;  %v553_v31 = vrot.slane %v551_v18, 5  ;;  %3794 = vmatprep.subr.bf16.mxu0 %v4080_v26  ;;  %v68_v33 = vld [vmem:[%s4995_s0 + $0x34] sm:$0xf] }
  0x71   :  { %814 = vst [vmem:[#allocation3 + $0x170] sm:$0xf] %v767_v24  ;;  %v4047_v28 = vld [vmem:[#allocation3 + $0x128] ss:$36 sps:$4 sm:$0xff]   ;;  %v540_v29 = vsel %vm4310_vm11, %v535_v22, %v539_v5  ;;  %2966 = vmatprep.mubr.bf16.mxu1 %v4045_v27  ;;  %v168_v36 = vshrl.u32 %v67_v32, 16  ;;  %v171_v37 = vshll.u32 %v67_v32, 16  ;;  %3858 = vmatprep.subr.bf16.mxu1 %v4081_v61 }
  0x72   :  { %v548_v30 = vor.u32 %v547_v25, %v544_v20  ;;  %650 = vst [vmem:[#allocation3 + $0x148] sm:$0xf] %v540_v29  ;;  %v176_v38 = vshrl.u32 %v68_v33, 16  ;;  %v307_v39 = vld [vmem:[#allocation2 + $0x74] sm:$0x1]  ;;  %2967 = vmatmul.mubr.bf16.gmra.mxu1 %v4047_v28  ;;  %v179_v0 = vshll.u32 %v68_v33, 16 }
  0x73   :  { %v679_v41 = vld [vmem:[#allocation2 + $0x68] sm:$0xe]  ;;  %v308_v44 = vsel %vm4278_vm7, %v166_v23, %v307_v39  ;;  %v170_v54 = vrot.slane %v168_v36, 7  ;;  %v310_v60 = vld [vmem:[#allocation2 + $0x78] sm:$0xf]  ;;  %3795 = vmatpush3.bf16.msra.mxu0 %v4083_v3  ;;  %v4084_v18 = vld [vmem:[%s4994_s2 + $0x180] sm:$0xff]  }
  0x74   :  { %v549_v34 = vrot.slane %v548_v30, 4  ;;  %v680_v42 = vld [vmem:[#allocation2 + $0x6c] sm:$0x1]  ;;  %v830_v43 = vld [vmem:[#allocation2 + $0x68] sm:$0xf]  ;;  %v3385_v45 = vrot.slane %v679_v41, 9  ;;  %3859 = vmatpush3.bf16.msra.mxu1 %v4084_v18 }
  0x75   :  { %v770_v46 = vrot.slane %v680_v42, 5  ;;  %v831_v47 = vld [vmem:[#allocation2 + $0x70] sm:$0xf]  ;;  %846 = vst [vmem:[#allocation3 + $0x174] sm:$0xf] %v830_v43  ;;  %v4518_v55 = vrot.slane %v176_v38, 7  ;;  %v173_v62 = vor.u32 %v171_v37, %v170_v54 }
  0x76   :  { %v345_v50 = vld [vmem:[#allocation2 + $0x68] sm:$0xf]  ;;  %v554_v51 = vsel %vm4310_vm11, %v549_v34, %v553_v31  ;;  %309 = vst [vmem:[#allocation2 + $0x74] sm:$0x1] %v308_v44  ;;  %847 = vst [vmem:[#allocation3 + $0x198] sm:$0xf] %v831_v47 }
  0x77   :  { %361 = vst [vmem:[#allocation3 + $0x18c] sm:$0xf] %v345_v50  ;;  %v388_v52 = vld [vmem:[#allocation2 + $0x68] sm:$0xf]  ;;  %v389_v53 = vld [vmem:[#allocation2 + $0x6c] sm:$0x1]  ;;  %v771_v56 = vsel %vm4284_vm8, %v3385_v45, %v770_v46  ;;  %v181_v9 = vor.u32 %v179_v0, %v4518_v55  ;;  %v311_v10 = vsel %vm4273_vm5, %v173_v62, %v310_v60 }
  0x78   :  { %651 = vst [vmem:[#allocation3 + $0x16c] sm:$0xf] %v554_v51  ;;  %v556_v57 = vshrl.u32 %v388_v52, 16  ;;  %v559_v58 = vshll.u32 %v388_v52, 16  ;;  %v565_v59 = vshll.u32 %v389_v53, 16  ;;  %v174_v63 = vrot.slane %v170_v54, 4 }
  0x79   :  { %815 = vst [vmem:[#allocation3 + $0x194] sm:$0xf] %v771_v56  ;;  %v182_v1 = vrot.slane %v4518_v55, 4  ;;  %v313_v2 = vld [vmem:[#allocation2 + $0x7c] sm:$0x1] }
  0x7a   :  { %v4048_v4 = vld [vmem:[#allocation3 + $0x124] ss:$36 sps:$4 sm:$0xff]   ;;  %v558_v6 = vrot.slane %v556_v57, 4  ;;  %v561_v7 = vrot.slane %v559_v58, 5  ;;  %v567_v8 = vrot.slane %v565_v59, 5  ;;  %v314_v14 = vsel %vm4278_vm7, %v174_v63, %v313_v2  ;;  %v4546_v36 = vld [vmem:[%s4994_s2 + $0x238] sm:$0xff]  }
  0x7b   :  { %v4052_v5 = vld [vmem:[#allocation3 + $0x120] ss:$36 sps:$4 sm:$0xff]   ;;  %v681_v13 = vld [vmem:[#allocation2 + $0x70] sm:$0xe]  ;;  %2869 = vmatprep.mubr.bf16.mxu0 %v4048_v4  ;;  %312 = vst [vmem:[#allocation2 + $0x78] sm:$0xf] %v311_v10  ;;  %3924 = vmatprep.subr.bf16.mxu0 %v4546_v36 }
  0x7c   :  { %v316_v11 = vld [vmem:[#allocation2 + $0x80] sm:$0xf]  ;;  %v3386_v15 = vrot.slane %v681_v13, 9  ;;  %v346_v16 = vld [vmem:[#allocation2 + $0x70] sm:$0xf]  ;;  %2870 = vmatmul.mubr.bf16.gmra.mxu0 %v4052_v5  ;;  %v562_v19 = vor.u32 %v561_v7, %v558_v6  ;;  %3956 = vmatprep.subr.bf16.mxu1 %v4546_v36 }
  0x7d   :  { %v390_v17 = vld [vmem:[#allocation2 + $0x70] sm:$0xf]  ;;  %315 = vst [vmem:[#allocation2 + $0x7c] sm:$0x1] %v314_v14  ;;  %v317_v20 = vsel %vm4273_vm5, %v181_v9, %v316_v11  ;;  %v682_v21 = vld [vmem:[#allocation2 + $0x74] sm:$0x1] }
  0x7e   :  { %362 = vst [vmem:[#allocation3 + $0x1b0] sm:$0xf] %v346_v16  ;;  %v391_v22 = vld [vmem:[#allocation2 + $0x74] sm:$0x1]  ;;  %v570_v23 = vshrl.u32 %v390_v17, 16  ;;  %v774_v24 = vrot.slane %v682_v21, 5 }
  0x7f   :  { %318 = vst [vmem:[#allocation2 + $0x80] sm:$0xf] %v317_v20  ;;  %v573_v25 = vshll.u32 %v390_v17, 16  ;;  %v579_v26 = vshll.u32 %v391_v22, 16  ;;  %v563_v27 = vrot.slane %v562_v19, 4 }
  0x80   :  { %v572_v28 = vrot.slane %v570_v23, 4  ;;  %v4055_v29 = vld [vmem:[#allocation3 + $0x174] ss:$36 sps:$4 sm:$0xff]   ;;  %v775_v31 = vsel %vm4284_vm8, %v3386_v15, %v774_v24  ;;  %v70_v57 = vld [vmem:[%s4995_s0 + $0x3c] sm:$0xf] }
  0x81   :  { %v4057_v30 = vld [vmem:[#allocation3 + $0x170] ss:$36 sps:$4 sm:$0xff]   ;;  %v575_v32 = vrot.slane %v573_v25, 5  ;;  %v568_v33 = vsel %vm4310_vm11, %v563_v27, %v567_v8  ;;  %816 = vst [vmem:[#allocation3 + $0x1b8] sm:$0xf] %v775_v31  ;;  %v581_v34 = vrot.slane %v579_v26, 5  ;;  %2974 = vmatprep.mubr.bf16.mxu1 %v4055_v29 }
  0x82   :  { %652 = vst [vmem:[#allocation3 + $0x190] sm:$0xf] %v568_v33  ;;  %2975 = vmatmul.mubr.bf16.gmra.mxu1 %v4057_v30  ;;  %v683_v38 = vld [vmem:[#allocation2 + $0x78] sm:$0xe]  ;;  %v319_v62 = vld [vmem:[#allocation2 + $0x84] sm:$0x1] }
  0x83   :  { %v576_v37 = vor.u32 %v575_v32, %v572_v28  ;;  %v832_v39 = vld [vmem:[#allocation2 + $0x78] sm:$0xf]  ;;  %v3387_v43 = vrot.slane %v683_v38, 9  ;;  %v192_v0 = vshrl.u32 %v70_v57, 16  ;;  %v195_v2 = vshll.u32 %v70_v57, 16 }
  0x84   :  { %v347_v41 = vld [vmem:[#allocation2 + $0x78] sm:$0xf]  ;;  %v684_v42 = vld [vmem:[#allocation2 + $0x7c] sm:$0x1]  ;;  %848 = vst [vmem:[#allocation3 + $0x1bc] sm:$0xf] %v832_v39  ;;  %v320_v6 = vsel %vm4278_vm7, %v182_v1, %v319_v62 }
  0x85   :  { %363 = vst [vmem:[#allocation3 + $0x1d4] sm:$0xf] %v347_v41  ;;  %v392_v44 = vld [vmem:[#allocation2 + $0x78] sm:$0xf]  ;;  %v577_v45 = vrot.slane %v576_v37, 4  ;;  %v778_v46 = vrot.slane %v684_v42, 5 }
  0x86   :  { %v833_v47 = vld [vmem:[#allocation2 + $0x80] sm:$0xf]  ;;  %v393_v50 = vld [vmem:[#allocation2 + $0x7c] sm:$0x1]  ;;  %v584_v51 = vshrl.u32 %v392_v44, 16  ;;  %v587_v53 = vshll.u32 %v392_v44, 16 }
  0x87   :  { %849 = vst [vmem:[#allocation3 + $0x1e0] sm:$0xf] %v833_v47  ;;  %v582_v52 = vsel %vm4310_vm11, %v577_v45, %v581_v34  ;;  %v593_v54 = vshll.u32 %v393_v50, 16  ;;  %v69_v56 = vld [vmem:[%s4995_s0 + $0x38] sm:$0xf]  ;;  %v779_v58 = vsel %vm4284_vm8, %v3387_v43, %v778_v46  ;;  %v4564_v9 = vrot.slane %v192_v0, 7 }
  0x88   :  { %v586_v59 = vrot.slane %v584_v51, 4  ;;  %653 = vst [vmem:[#allocation3 + $0x1b4] sm:$0xf] %v582_v52  ;;  %v184_v60 = vshrl.u32 %v69_v56, 16  ;;  %v187_v61 = vshll.u32 %v69_v56, 16  ;;  %v589_v63 = vrot.slane %v587_v53, 5 }
  0x89   :  { %817 = vst [vmem:[#allocation3 + $0x1dc] sm:$0xf] %v779_v58  ;;  %v4058_v3 = vld [vmem:[#allocation3 + $0x16c] ss:$36 sps:$4 sm:$0xff]   ;;  %v595_v8 = vrot.slane %v593_v54, 5  ;;  %v197_v18 = vor.u32 %v195_v2, %v4564_v9 }
  0x8a   :  { %v4062_v4 = vld [vmem:[#allocation3 + $0x168] ss:$36 sps:$4 sm:$0xff]   ;;  %v186_v5 = vrot.slane %v184_v60, 7  ;;  %v590_v7 = vor.u32 %v589_v63, %v586_v59  ;;  %321 = vst [vmem:[#allocation2 + $0x84] sm:$0x1] %v320_v6  ;;  %2877 = vmatprep.mubr.bf16.mxu0 %v4058_v3 }
  0x8b   :  { %v322_v10 = vld [vmem:[#allocation2 + $0x88] sm:$0xf]  ;;  %v325_v11 = vld [vmem:[#allocation2 + $0x8c] sm:$0x1]  ;;  %v328_v15 = vld [vmem:[#allocation2 + $0x90] sm:$0xf]  ;;  %2878 = vmatmul.mubr.bf16.gmra.mxu0 %v4062_v4 }
  0x8c   :  { %v189_v13 = vor.u32 %v187_v61, %v186_v5  ;;  %v190_v14 = vrot.slane %v186_v5, 4  ;;  %v348_v16 = vld [vmem:[#allocation2 + $0x80] sm:$0xf]  ;;  %v591_v17 = vrot.slane %v590_v7, 4  ;;  %v329_v24 = vsel %vm4273_vm5, %v197_v18, %v328_v15  ;;  %v1301_v37 = vld [vmem:[#allocation2 + $0x10] sm:$0xf] }
  0x8d   :  { %v685_v55 = vld [vmem:[#allocation2 + $0x80] sm:$0xe]  ;;  %364 = vst [vmem:[#allocation3 + $0x1f8] sm:$0xf] %v348_v16  ;;  %330 = vst [vmem:[#allocation2 + $0x90] sm:$0xf] %v329_v24 }
  0x8e   :  { %v394_v19 = vld [vmem:[#allocation2 + $0x80] sm:$0xf]  ;;  %v323_v1 = vsel %vm4273_vm5, %v189_v13, %v322_v10  ;;  %v326_v20 = vsel %vm4278_vm7, %v190_v14, %v325_v11  ;;  %v596_v23 = vsel %vm4310_vm11, %v591_v17, %v595_v8  ;;  %v3388_v28 = vrot.slane %v685_v55, 9  ;;  %v1302_v38 = vld [vmem:[#allocation2 + $0x18] sm:$0xf] }
  0x8f   :  { %v598_v21 = vshrl.u32 %v394_v19, 16  ;;  %v601_v22 = vshll.u32 %v394_v19, 16  ;;  %324 = vst [vmem:[#allocation2 + $0x88] sm:$0xf] %v323_v1  ;;  %327 = vst [vmem:[#allocation2 + $0x8c] sm:$0x1] %v326_v20 }
  0x90   :  { %v4065_v25 = vld [vmem:[#allocation3 + $0x1bc] ss:$36 sps:$4 sm:$0xff]   ;;  %654 = vst [vmem:[#allocation3 + $0x1d8] sm:$0xf] %v596_v23  ;;  %1317 = vst [vmem:[#allocation3 + $0x18] sm:$0xf] %v1301_v37 }
  0x91   :  { %v4067_v26 = vld [vmem:[#allocation3 + $0x1b8] ss:$36 sps:$4 sm:$0xff]   ;;  %v600_v27 = vrot.slane %v598_v21, 4  ;;  %v603_v29 = vrot.slane %v601_v22, 5  ;;  %2982 = vmatprep.mubr.bf16.mxu1 %v4065_v25  ;;  %v686_v30 = vld [vmem:[#allocation2 + $0x84] sm:$0x1] }
  0x92   :  { %v395_v31 = vld [vmem:[#allocation2 + $0x84] sm:$0x1]  ;;  %2983 = vmatmul.mubr.bf16.gmra.mxu1 %v4067_v26  ;;  %v782_v32 = vrot.slane %v686_v30, 5  ;;  %1318 = vst [vmem:[#allocation3 + $0x3c] sm:$0xf] %v1302_v38 }
  0x93   :  { %v604_v33 = vor.u32 %v603_v29, %v600_v27  ;;  %v607_v34 = vshll.u32 %v395_v31, 16  ;;  %v1333_v42 = vld [vmem:[#allocation2 + $0x10] sm:$0xf]  ;;  %v1334_v43 = vld [vmem:[#allocation2 + $0x14] sm:$0x1] }
  0x94   :  { %v783_v35 = vsel %vm4284_vm8, %v3388_v28, %v782_v32  ;;  %v1335_v47 = vld [vmem:[#allocation2 + $0x18] sm:$0xf]  ;;  %v4072_v51 = vld [vmem:[#allocation3 + $0x1b0] ss:$36 sps:$4 sm:$0xff]   ;;  %v1336_v58 = vld [vmem:[#allocation2 + $0x1c] sm:$0x1] }
  0x95   :  { %v605_v39 = vrot.slane %v604_v33, 4  ;;  %v609_v41 = vrot.slane %v607_v34, 5  ;;  %818 = vst [vmem:[#allocation3 + $0x200] sm:$0xf] %v783_v35  ;;  %v835_v56 = vld [vmem:[#allocation2 + $0x90] sm:$0xf] }
  0x96   :  { %v687_v44 = vld [vmem:[#allocation2 + $0x88] sm:$0xe]  ;;  %v688_v45 = vld [vmem:[#allocation2 + $0x8c] sm:$0x1]  ;;  %v1366_v59 = vshrl.u32 %v1333_v42, 16  ;;  %v1369_v62 = vshll.u32 %v1333_v42, 16 }
  0x97   :  { %v834_v46 = vld [vmem:[#allocation2 + $0x88] sm:$0xf]  ;;  %v4068_v50 = vld [vmem:[#allocation3 + $0x1b4] ss:$36 sps:$4 sm:$0xff]   ;;  %v3389_v52 = vrot.slane %v687_v44, 9  ;;  %v610_v53 = vsel %vm4310_vm11, %v605_v39, %v609_v41  ;;  %v786_v54 = vrot.slane %v688_v45, 5 }
  0x98   :  { %850 = vst [vmem:[#allocation3 + $0x204] sm:$0xf] %v834_v46  ;;  %v349_v57 = vld [vmem:[#allocation2 + $0x88] sm:$0xf]  ;;  %655 = vst [vmem:[#allocation3 + $0x1fc] sm:$0xf] %v610_v53  ;;  %2885 = vmatprep.mubr.bf16.mxu0 %v4068_v50 }
  0x99   :  { %851 = vst [vmem:[#allocation3 + $0x228] sm:$0xf] %v835_v56  ;;  %365 = vst [vmem:[#allocation3 + $0x21c] sm:$0xf] %v349_v57  ;;  %v396_v60 = vld [vmem:[#allocation2 + $0x88] sm:$0xf]  ;;  %2886 = vmatmul.mubr.bf16.gmra.mxu0 %v4072_v51  ;;  %v787_v0 = vsel %vm4284_vm8, %v3389_v52, %v786_v54 }
  0x9a   :  { %v397_v61 = vld [vmem:[#allocation2 + $0x8c] sm:$0x1]  ;;  %v1375_v63 = vshll.u32 %v1334_v43, 16  ;;  %v612_v2 = vshrl.u32 %v396_v60, 16  ;;  %v615_v3 = vshll.u32 %v396_v60, 16  ;;  %v1368_v6 = vrot.slane %v1366_v59, 4 }
  0x9b   :  { %v621_v4 = vshll.u32 %v397_v61, 16  ;;  %v852_v5 = vld [vmem:[#allocation2 + $0x8] sm:$0xf]  ;;  %819 = vst [vmem:[#allocation3 + $0x224] sm:$0xf] %v787_v0  ;;  %v1371_v7 = vrot.slane %v1369_v62, 5 }
  0x9c   :  { %v1377_v8 = vrot.slane %v1375_v63, 5  ;;  %v1380_v10 = vshrl.u32 %v1335_v47, 16  ;;  %v853_v11 = vld [vmem:[#allocation2 + $0xc] sm:$0x1]  ;;  %v614_v13 = vrot.slane %v612_v2, 4  ;;  %v617_v14 = vrot.slane %v615_v3, 5 }
  0x9d   :  { %v623_v15 = vrot.slane %v621_v4, 5  ;;  %v1383_v16 = vshll.u32 %v1335_v47, 16  ;;  %v854_v17 = vld [vmem:[#allocation2 + $0x10] sm:$0xf]  ;;  %v1372_v18 = vor.u32 %v1371_v7, %v1368_v6  ;;  %v1389_v19 = vshll.u32 %v1336_v58, 16 }
  0x9e   :  { %v1382_v55 = vrot.slane %v1380_v10, 4  ;;  %v855_v1 = vld [vmem:[#allocation2 + $0x14] sm:$0x1]  ;;  %v885_v20 = vshrl.u32 %v852_v5, 16  ;;  %v618_v21 = vor.u32 %v617_v14, %v614_v13  ;;  %v888_v23 = vshll.u32 %v852_v5, 16 }
  0x9f   :  { %v1385_v22 = vrot.slane %v1383_v16, 5  ;;  %v894_v24 = vshll.u32 %v853_v11, 16  ;;  %v1140_v25 = vld [vmem:[#allocation2 + $0x8] sm:$0xe]  ;;  %v1373_v26 = vrot.slane %v1372_v18, 4  ;;  %v1391_v27 = vrot.slane %v1389_v19, 5 }
  0xa0   :  { %v887_v28 = vrot.slane %v885_v20, 4  ;;  %v899_v29 = vshrl.u32 %v854_v17, 16  ;;  %v619_v30 = vrot.slane %v618_v21, 4  ;;  %v890_v32 = vrot.slane %v888_v23, 5  ;;  %v1141_v34 = vld [vmem:[#allocation2 + $0xc] sm:$0x1] }
  0xa1   :  { %v1386_v31 = vor.u32 %v1385_v22, %v1382_v55  ;;  %v896_v33 = vrot.slane %v894_v24, 5  ;;  %v1378_v37 = vsel %vm4310_vm11, %v1373_v26, %v1377_v8  ;;  %v902_v35 = vshll.u32 %v854_v17, 16  ;;  %v1142_v41 = vld [vmem:[#allocation2 + $0x10] sm:$0xe]  ;;  %v4075_v42 = vld [vmem:[#allocation3 + $0x204] ss:$36 sps:$4 sm:$0xff]  }
  0xa2   :  { %v901_v38 = vrot.slane %v899_v29, 4  ;;  %v908_v39 = vshll.u32 %v855_v1, 16  ;;  %v4077_v43 = vld [vmem:[#allocation3 + $0x200] ss:$36 sps:$4 sm:$0xff]   ;;  %v624_v44 = vsel %vm4310_vm11, %v619_v30, %v623_v15  ;;  %1605 = vst [vmem:[#allocation3 + $0x1c] sm:$0xf] %v1378_v37  ;;  %v891_v46 = vor.u32 %v890_v32, %v887_v28  ;;  %2990 = vmatprep.mubr.bf16.mxu1 %v4075_v42 }
  0xa3   :  { %v1387_v45 = vrot.slane %v1386_v31, 4  ;;  %656 = vst [vmem:[#allocation3 + $0x220] sm:$0xf] %v624_v44  ;;  %v904_v47 = vrot.slane %v902_v35, 5  ;;  %v1143_v51 = vld [vmem:[#allocation2 + $0x14] sm:$0x1]  ;;  %2991 = vmatmul.mubr.bf16.gmra.mxu1 %v4077_v43 }
  0xa4   :  { %v910_v50 = vrot.slane %v908_v39, 5  ;;  %v3390_v52 = vrot.slane %v1140_v25, 9  ;;  %v1206_v53 = vrot.slane %v1141_v34, 5  ;;  %v892_v56 = vrot.slane %v891_v46, 4  ;;  %v1303_v61 = vld [vmem:[#allocation2 + $0x20] sm:$0xf] }
  0xa5   :  { %v1392_v54 = vsel %vm4310_vm11, %v1387_v45, %v1391_v27  ;;  %v3391_v57 = vrot.slane %v1142_v41, 9  ;;  %v1210_v58 = vrot.slane %v1143_v51, 5  ;;  %v905_v59 = vor.u32 %v904_v47, %v901_v38  ;;  %v1304_v62 = vld [vmem:[#allocation2 + $0x28] sm:$0xf]  ;;  %1319 = vst [vmem:[#allocation3 + $0x60] sm:$0xf] %v1303_v61 }
  0xa6   :  { %1606 = vst [vmem:[#allocation3 + $0x40] sm:$0xf] %v1392_v54  ;;  %v1207_v60 = vsel %vm4284_vm8, %v3390_v52, %v1206_v53  ;;  %v897_v63 = vsel %vm4310_vm11, %v892_v56, %v896_v33  ;;  %1320 = vst [vmem:[#allocation3 + $0x84] sm:$0xf] %v1304_v62  ;;  %v1337_v2 = vld [vmem:[#allocation2 + $0x20] sm:$0xf] }
  0xa7   :  { %v1211_v0 = vsel %vm4284_vm8, %v3391_v57, %v1210_v58  ;;  %1284 = vst [vmem:[#allocation3 + $0x14] sm:$0xf] %v1207_v60  ;;  %v1338_v3 = vld [vmem:[#allocation2 + $0x24] sm:$0x1]  ;;  %v1339_v4 = vld [vmem:[#allocation2 + $0x28] sm:$0xf] }
  0xa8   :  { %v906_v5 = vrot.slane %v905_v59, 4  ;;  %1124 = vst [vmem:[#allocation3 + $0x10] sm:$0xf] %v897_v63  ;;  %1285 = vst [vmem:[#allocation3 + $0x38] sm:$0xf] %v1211_v0  ;;  %v1394_v7 = vshrl.u32 %v1337_v2, 16 }
  0xa9   :  { %v1340_v6 = vld [vmem:[#allocation2 + $0x2c] sm:$0x1]  ;;  %v1397_v8 = vshll.u32 %v1337_v2, 16  ;;  %v1403_v10 = vshll.u32 %v1338_v3, 16  ;;  %v1408_v11 = vshrl.u32 %v1339_v4, 16  ;;  %v1411_v13 = vshll.u32 %v1339_v4, 16 }
  0xaa   :  { %v1417_v14 = vshll.u32 %v1340_v6, 16  ;;  %v856_v15 = vld [vmem:[#allocation2 + $0x18] sm:$0xf]  ;;  %v911_v16 = vsel %vm4310_vm11, %v906_v5, %v910_v50  ;;  %v1396_v17 = vrot.slane %v1394_v7, 4  ;;  %v857_v19 = vld [vmem:[#allocation2 + $0x1c] sm:$0x1] }
  0xab   :  { %v1399_v18 = vrot.slane %v1397_v8, 5  ;;  %v1405_v55 = vrot.slane %v1403_v10, 5  ;;  %v4078_v1 = vld [vmem:[#allocation3 + $0x1fc] ss:$36 sps:$4 sm:$0xff]   ;;  %1125 = vst [vmem:[#allocation3 + $0x34] sm:$0xf] %v911_v16 }
  0xac   :  { %v4082_v20 = vld [vmem:[#allocation3 + $0x1f8] ss:$36 sps:$4 sm:$0xff]   ;;  %v1410_v21 = vrot.slane %v1408_v11, 4  ;;  %v1413_v23 = vrot.slane %v1411_v13, 5  ;;  %v1419_v24 = vrot.slane %v1417_v14, 5  ;;  %2893 = vmatprep.mubr.bf16.mxu0 %v4078_v1  ;;  %v913_v29 = vshrl.u32 %v856_v15, 16 }
  0xad   :  { %v1400_v22 = vor.u32 %v1399_v18, %v1396_v17  ;;  %v858_v25 = vld [vmem:[#allocation2 + $0x20] sm:$0xf]  ;;  %v859_v26 = vld [vmem:[#allocation2 + $0x24] sm:$0x1]  ;;  %v4085_v27 = vld [vmem:[#allocation3 + $0x18] ss:$36 sps:$4 sm:$0xff]   ;;  %2894 = vmatmul.mubr.bf16.gmra.mxu0 %v4082_v20 }
  0xae   :  { %v4087_v28 = vld [vmem:[#allocation3 + $0x1c] ss:$36 sps:$4 sm:$0xff]   ;;  %v1414_v31 = vor.u32 %v1413_v23, %v1410_v21  ;;  %v916_v32 = vshll.u32 %v856_v15, 16  ;;  %v922_v33 = vshll.u32 %v857_v19, 16  ;;  %v1144_v34 = vld [vmem:[#allocation2 + $0x18] sm:$0xe] }
  0xaf   :  { %v1401_v30 = vrot.slane %v1400_v22, 4  ;;  %v4598_v37 = vld [vmem:[%s4994_s2 + $0x230] sm:$0xff]   ;;  %3128 = vmatprep.mubr.bf16.mxu1 %v4087_v28  ;;  %v915_v38 = vrot.slane %v913_v29, 4  ;;  %v927_v35 = vshrl.u32 %v858_v25, 16  ;;  %v930_v39 = vshll.u32 %v858_v25, 16  ;;  %v4606_v47 = vld [vmem:[%s4994_s2 + $0x228] sm:$0xff]  }
  0xb0   :  { %v936_v41 = vshll.u32 %v859_v26, 16  ;;  %v134_v42 = vrot.slane %v4401_v49, 4  ;;  %3129 = vmatmul.mubr.bf16.vlgmr.msra.gmra.mxu1 %v4085_v27  ;;  %v1415_v44 = vrot.slane %v1414_v31, 4  ;;  %v918_v45 = vrot.slane %v916_v32, 5  ;;  %v1145_v46 = vld [vmem:[#allocation2 + $0x1c] sm:$0x1] }
  0xb1   :  { %v1406_v43 = vsel %vm4310_vm11, %v1401_v30, %v1405_v55  ;;  %3964 = vmatpush3.bf16.msra.mxu1 %v4546_v36  ;;  %v924_v50 = vrot.slane %v922_v33, 5  ;;  %v929_v51 = vrot.slane %v927_v35, 4  ;;  %v932_v52 = vrot.slane %v930_v39, 5  ;;  %v1146_v53 = vld [vmem:[#allocation2 + $0x20] sm:$0xe]  ;;  %v4635_v35 = vld [vmem:[%s4994_s2 + $0x218] sm:$0xff]  }
  0xb2   :  { %1607 = vst [vmem:[#allocation3 + $0x64] sm:$0xf] %v1406_v43  ;;  %v3392_v54 = vrot.slane %v1144_v34, 9  ;;  %v4088_v56 = vld [vmem:[#allocation3 + $0x10] ss:$36 sps:$4 sm:$0xff]   ;;  %v1420_v58 = vsel %vm4310_vm11, %v1415_v44, %v1419_v24  ;;  %v919_v59 = vor.u32 %v918_v45, %v915_v38  ;;  %v1214_v60 = vrot.slane %v1145_v46, 5  ;;  %3957 = vmatprep.subr.bf16.mxu1 %v4598_v37 }
  0xb3   :  { %v4090_v57 = vld [vmem:[#allocation3 + $0x14] ss:$36 sps:$4 sm:$0xff]   ;;  %1608 = vst [vmem:[#allocation3 + $0x88] sm:$0xf] %v1420_v58  ;;  %v933_v61 = vor.u32 %v932_v52, %v929_v51  ;;  %v938_v62 = vrot.slane %v936_v41, 5  ;;  %v3393_v0 = vrot.slane %v1146_v53, 9 }
  0xb4   :  { %v1147_v63 = vld [vmem:[#allocation2 + $0x24] sm:$0x1]  ;;  %3031 = vmatprep.mubr.bf16.mxu0 %v4090_v57  ;;  %v920_v2 = vrot.slane %v919_v59, 4  ;;  %v1215_v3 = vsel %vm4284_vm8, %v3392_v54, %v1214_v60  ;;  %v1305_v5 = vld [vmem:[#allocation2 + $0x30] sm:$0xf] }
  0xb5   :  { %v1218_v4 = vrot.slane %v1147_v63, 5  ;;  %v934_v6 = vrot.slane %v933_v61, 4  ;;  %1286 = vst [vmem:[#allocation3 + $0x5c] sm:$0xf] %v1215_v3  ;;  %3965 = vmatpush3.bf16.msra.mxu1 %v4598_v37  ;;  %v1306_v7 = vld [vmem:[#allocation2 + $0x38] sm:$0xf]  ;;  %3032 = vmatmul.mubr.bf16.vlgmr.msra.gmra.mxu0 %v4088_v56 }
  0xb6   :  { %1321 = vst [vmem:[#allocation3 + $0xa8] sm:$0xf] %v1305_v5  ;;  %v1341_v8 = vld [vmem:[#allocation2 + $0x30] sm:$0xf]  ;;  %v4618_v10 = vld [vmem:[%s4994_s2 + $0x220] sm:$0xff]   ;;  %v925_v11 = vsel %vm4310_vm11, %v920_v2, %v924_v50  ;;  %3958 = vmatprep.subr.bf16.mxu1 %v4606_v47  ;;  %3925 = vmatpush3.bf16.msra.mxu0 %v4546_v36 }
  0xb7   :  { %v1219_v13 = vsel %vm4284_vm8, %v3393_v0, %v1218_v4  ;;  %1322 = vst [vmem:[#allocation3 + $0xcc] sm:$0xf] %v1306_v7  ;;  %v1342_v14 = vld [vmem:[#allocation2 + $0x34] sm:$0x1]  ;;  %v1343_v15 = vld [vmem:[#allocation2 + $0x38] sm:$0xf]  ;;  %v939_v17 = vsel %vm4310_vm11, %v934_v6, %v938_v62  ;;  %3926 = vmatprep.subr.bf16.mxu0 %v4598_v37 }
  0xb8   :  { %v1344_v16 = vld [vmem:[#allocation2 + $0x3c] sm:$0x1]  ;;  %1126 = vst [vmem:[#allocation3 + $0x58] sm:$0xf] %v925_v11  ;;  %1287 = vst [vmem:[#allocation3 + $0x80] sm:$0xf] %v1219_v13 }
  0xb9   :  { %v1422_v18 = vshrl.u32 %v1341_v8, 16  ;;  %v1425_v55 = vshll.u32 %v1341_v8, 16  ;;  %v1431_v19 = vshll.u32 %v1342_v14, 16  ;;  %v860_v1 = vld [vmem:[#allocation2 + $0x28] sm:$0xf]  ;;  %v1436_v20 = vshrl.u32 %v1343_v15, 16  ;;  %3966 = vmatpush3.bf16.msra.mxu1 %v4606_v47 }
  0xba   :  { %1127 = vst [vmem:[#allocation3 + $0x7c] sm:$0xf] %v939_v17  ;;  %v1439_v21 = vshll.u32 %v1343_v15, 16  ;;  %v1445_v22 = vshll.u32 %v1344_v16, 16  ;;  %v861_v23 = vld [vmem:[#allocation2 + $0x2c] sm:$0x1]  ;;  %3959 = vmatprep.subr.bf16.mxu1 %v4618_v10  ;;  %3927 = vmatpush3.bf16.msra.mxu0 %v4598_v37 }
  0xbb   :  { %v1424_v24 = vrot.slane %v1422_v18, 4  ;;  %v1427_v25 = vrot.slane %v1425_v55, 5  ;;  %v1433_v26 = vrot.slane %v1431_v19, 5  ;;  %v862_v36 = vld [vmem:[#allocation2 + $0x30] sm:$0xf]  ;;  %v941_v27 = vshrl.u32 %v860_v1, 16  ;;  %3928 = vmatprep.subr.bf16.mxu0 %v4606_v47 }
  0xbc   :  { %v4092_v28 = vld [vmem:[#allocation3 + $0x64] ss:$36 sps:$4 sm:$0xff]   ;;  %v1438_v30 = vrot.slane %v1436_v20, 4  ;;  %v1441_v32 = vrot.slane %v1439_v21, 5  ;;  %v1447_v33 = vrot.slane %v1445_v22, 5  ;;  %v944_v39 = vshll.u32 %v860_v1, 16 }
  0xbd   :  { %v4094_v29 = vld [vmem:[#allocation3 + $0x60] ss:$36 sps:$4 sm:$0xff]   ;;  %v1428_v31 = vor.u32 %v1427_v25, %v1424_v24  ;;  %v863_v34 = vld [vmem:[#allocation2 + $0x34] sm:$0x1]  ;;  %v943_v38 = vrot.slane %v941_v27, 4  ;;  %3136 = vmatprep.mubr.bf16.mxu1 %v4092_v28  ;;  %v950_v41 = vshll.u32 %v861_v23, 16  ;;  %3967 = vmatpush3.bf16.msra.mxu1 %v4618_v10 }
  0xbe   :  { %v955_v43 = vshrl.u32 %v862_v36, 16  ;;  %v958_v44 = vshll.u32 %v862_v36, 16  ;;  %v1148_v45 = vld [vmem:[#allocation2 + $0x28] sm:$0xe]  ;;  %3137 = vmatmul.mubr.bf16.gmra.mxu1 %v4094_v29  ;;  %v1442_v46 = vor.u32 %v1441_v32, %v1438_v30  ;;  %v964_v50 = vshll.u32 %v863_v34, 16  ;;  %v4642_v58 = vld [vmem:[%s4994_s2 + $0x210] sm:$0xff]   ;;  %3929 = vmatpush3.bf16.msra.mxu0 %v4606_v47 }
  0xbf   :  { %v1429_v37 = vrot.slane %v1428_v31, 4  ;;  %v1149_v51 = vld [vmem:[#allocation2 + $0x2c] sm:$0x1]  ;;  %v1150_v52 = vld [vmem:[#allocation2 + $0x30] sm:$0xe]  ;;  %v946_v53 = vrot.slane %v944_v39, 5  ;;  %3960 = vmatprep.subr.bf16.mxu1 %v4635_v35  ;;  %3930 = vmatprep.subr.bf16.mxu0 %v4618_v10 }
  0xc0   :  { %v952_v54 = vrot.slane %v950_v41, 5  ;;  %v957_v56 = vrot.slane %v955_v43, 4  ;;  %v960_v57 = vrot.slane %v958_v44, 5  ;;  %v4095_v59 = vld [vmem:[#allocation3 + $0x5c] ss:$36 sps:$4 sm:$0xff]   ;;  %v1443_v62 = vrot.slane %v1442_v46, 4 }
  0xc1   :  { %v4098_v60 = vld [vmem:[#allocation3 + $0x58] ss:$36 sps:$4 sm:$0xff]   ;;  %v1434_v61 = vsel %vm4310_vm11, %v1429_v37, %v1433_v26  ;;  %v947_v63 = vor.u32 %v946_v53, %v943_v38  ;;  %v966_v2 = vrot.slane %v964_v50, 5  ;;  %v1151_v3 = vld [vmem:[#allocation2 + $0x34] sm:$0x1]  ;;  %v3394_v4 = vrot.slane %v1148_v45, 9  ;;  %3039 = vmatprep.mubr.bf16.mxu0 %v4095_v59  ;;  %3968 = vmatpush3.bf16.msra.mxu1 %v4635_v35 }
  0xc2   :  { %1609 = vst [vmem:[#allocation3 + $0xac] sm:$0xf] %v1434_v61  ;;  %v961_v0 = vor.u32 %v960_v57, %v957_v56  ;;  %v1448_v5 = vsel %vm4310_vm11, %v1443_v62, %v1447_v33  ;;  %v1222_v6 = vrot.slane %v1149_v51, 5  ;;  %v3395_v7 = vrot.slane %v1150_v52, 9  ;;  %v4654_v47 = vld [vmem:[%s4994_s2 + $0x208] sm:$0xff]   ;;  %3040 = vmatmul.mubr.bf16.gmra.mxu0 %v4098_v60  ;;  %3961 = vmatprep.subr.bf16.mxu1 %v4642_v58  ;;  %v4679_v37 = vld [vmem:[%s4994_s2 + $0x200] sm:$0xff]  }
  0xc3   :  { %v1226_v8 = vrot.slane %v1151_v3, 5  ;;  %1610 = vst [vmem:[#allocation3 + $0xd0] sm:$0xf] %v1448_v5  ;;  %v948_v11 = vrot.slane %v947_v63, 4  ;;  %v283_v14 = vld [vmem:[#allocation2 + $0x44] sm:$0x1]  ;;  %3931 = vmatpush3.bf16.msra.mxu0 %v4618_v10 }
  0xc4   :  { %v962_v13 = vrot.slane %v961_v0, 4  ;;  %v1307_v15 = vld [vmem:[#allocation2 + $0x40] sm:$0xf]  ;;  %v1223_v16 = vsel %vm4284_vm8, %v3394_v4, %v1222_v6  ;;  %v284_v18 = vsel %vm4278_vm7, %v134_v42, %v283_v14  ;;  %v1308_v55 = vld [vmem:[#allocation2 + $0x48] sm:$0xf]  ;;  %3932 = vmatprep.subr.bf16.mxu0 %v4635_v35 }
  0xc5   :  { %v1227_v17 = vsel %vm4284_vm8, %v3395_v7, %v1226_v8  ;;  %1323 = vst [vmem:[#allocation3 + $0xf0] sm:$0xf] %v1307_v15  ;;  %v1345_v19 = vld [vmem:[#allocation2 + $0x40] sm:$0xf]  ;;  %v1347_v1 = vld [vmem:[#allocation2 + $0x48] sm:$0xf]  ;;  %v953_v20 = vsel %vm4310_vm11, %v948_v11, %v952_v54  ;;  %3969 = vmatpush3.bf16.msra.mxu1 %v4642_v58 }
  0xc6   :  { %v967_v21 = vsel %vm4310_vm11, %v962_v13, %v966_v2  ;;  %1288 = vst [vmem:[#allocation3 + $0xa4] sm:$0xf] %v1223_v16  ;;  %1289 = vst [vmem:[#allocation3 + $0xc8] sm:$0xf] %v1227_v17  ;;  %v1348_v49 = vld [vmem:[#allocation2 + $0x4c] sm:$0x1]  ;;  %3962 = vmatprep.subr.bf16.mxu1 %v4654_v47 }
  0xc7   :  { %285 = vst [vmem:[#allocation2 + $0x44] sm:$0x1] %v284_v18  ;;  %1324 = vst [vmem:[#allocation3 + $0x114] sm:$0xf] %v1308_v55  ;;  %v1450_v42 = vshrl.u32 %v1345_v19, 16  ;;  %v1453_v22 = vshll.u32 %v1345_v19, 16  ;;  %3933 = vmatpush3.bf16.msra.mxu0 %v4635_v35 }
  0xc8   :  { %v864_v23 = vld [vmem:[#allocation2 + $0x38] sm:$0xf]  ;;  %1128 = vst [vmem:[#allocation3 + $0xa0] sm:$0xf] %v953_v20  ;;  %1129 = vst [vmem:[#allocation3 + $0xc4] sm:$0xf] %v967_v21  ;;  %3934 = vmatprep.subr.bf16.mxu0 %v4642_v58 }
  0xc9   :  { %v1464_v10 = vshrl.u32 %v1347_v1, 16  ;;  %v1467_v24 = vshll.u32 %v1347_v1, 16  ;;  %v1473_v25 = vshll.u32 %v1348_v49, 16  ;;  %v865_v26 = vld [vmem:[#allocation2 + $0x3c] sm:$0x1]  ;;  %v969_v36 = vshrl.u32 %v864_v23, 16  ;;  %3970 = vmatpush3.bf16.msra.mxu1 %v4654_v47 }
  0xca   :  { %v1452_v27 = vrot.slane %v1450_v42, 4  ;;  %v1455_v28 = vrot.slane %v1453_v22, 5  ;;  %v866_v29 = vld [vmem:[#allocation2 + $0x40] sm:$0xf]  ;;  %v972_v30 = vshll.u32 %v864_v23, 16  ;;  %v978_v31 = vshll.u32 %v865_v26, 16  ;;  %3963 = vmatprep.subr.bf16.mxu1 %v4679_v37 }
  0xcb   :  { %v1466_v32 = vrot.slane %v1464_v10, 4  ;;  %v1469_v33 = vrot.slane %v1467_v24, 5  ;;  %v1475_v34 = vrot.slane %v1473_v25, 5  ;;  %v971_v38 = vrot.slane %v969_v36, 4  ;;  %v1152_v45 = vld [vmem:[#allocation2 + $0x38] sm:$0xe]  ;;  %3935 = vmatpush3.bf16.msra.mxu0 %v4642_v58 }
  0xcc   :  { %v1456_v39 = vor.u32 %v1455_v28, %v1452_v27  ;;  %v974_v41 = vrot.slane %v972_v30, 5  ;;  %v980_v43 = vrot.slane %v978_v31, 5  ;;  %v983_v44 = vshrl.u32 %v866_v29, 16  ;;  %v4099_v46 = vld [vmem:[#allocation3 + $0xac] ss:$36 sps:$4 sm:$0xff]   ;;  %3936 = vmatprep.subr.bf16.mxu0 %v4654_v47 }
  0xcd   :  { %v4101_v50 = vld [vmem:[#allocation3 + $0xa8] ss:$36 sps:$4 sm:$0xff]   ;;  %v1470_v51 = vor.u32 %v1469_v33, %v1466_v32  ;;  %v986_v52 = vshll.u32 %v866_v29, 16  ;;  %v1153_v56 = vld [vmem:[#allocation2 + $0x3c] sm:$0x1]  ;;  %3144 = vmatprep.mubr.bf16.mxu1 %v4099_v46  ;;  %v3396_v8 = vrot.slane %v1152_v45, 9  ;;  %3971 = vmatpush3.bf16.msra.mxu1 %v4679_v37 }
  0xce   :  { %v1457_v53 = vrot.slane %v1456_v39, 4  ;;  %v975_v35 = vor.u32 %v974_v41, %v971_v38  ;;  %v985_v54 = vrot.slane %v983_v44, 4  ;;  %v1154_v57 = vld [vmem:[#allocation2 + $0x40] sm:$0xe]  ;;  %v1346_v59 = vld [vmem:[#allocation2 + $0x44] sm:$0x1]  ;;  %3145 = vmatmul.mubr.bf16.gmra.mxu1 %v4101_v50 }
  0xcf   :  { %v1471_v60 = vrot.slane %v1470_v51, 4  ;;  %v867_v61 = vld [vmem:[#allocation2 + $0x44] sm:$0x1]  ;;  %v988_v62 = vrot.slane %v986_v52, 5  ;;  %v1459_v0 = vshll.u32 %v1346_v59, 16  ;;  %v1230_v13 = vrot.slane %v1153_v56, 5  ;;  %3937 = vmatpush3.bf16.msra.mxu0 %v4654_v47 }
  0xd0   :  { %v4102_v63 = vld [vmem:[#allocation3 + $0xa4] ss:$36 sps:$4 sm:$0xff]   ;;  %v976_v2 = vrot.slane %v975_v35, 4  ;;  %v992_v6 = vshll.u32 %v867_v61, 16  ;;  %v3397_v14 = vrot.slane %v1154_v57, 9  ;;  %3938 = vmatprep.subr.bf16.mxu0 %v4679_v37 }
  0xd1   :  { %v4105_v3 = vld [vmem:[#allocation3 + $0xa0] ss:$36 sps:$4 sm:$0xff]   ;;  %v1476_v4 = vsel %vm4310_vm11, %v1471_v60, %v1475_v34  ;;  %v989_v5 = vor.u32 %v988_v62, %v985_v54  ;;  %3047 = vmatprep.mubr.bf16.mxu0 %v4102_v63  ;;  %v1461_v11 = vrot.slane %v1459_v0, 5  ;;  %v1231_v55 = vsel %vm4284_vm8, %v3396_v8, %v1230_v13  ;;  %v1310_v1 = vld [vmem:[#allocation2 + $0x68] sm:$0xf] }
  0xd2   :  { %v1155_v7 = vld [vmem:[#allocation2 + $0x44] sm:$0x1]  ;;  %1612 = vst [vmem:[#allocation3 + $0x118] sm:$0xf] %v1476_v4  ;;  %v981_v58 = vsel %vm4310_vm11, %v976_v2, %v980_v43  ;;  %3048 = vmatmul.mubr.bf16.gmra.mxu0 %v4105_v3  ;;  %v994_v16 = vrot.slane %v992_v6, 5 }
  0xd3   :  { %v990_v15 = vrot.slane %v989_v5, 4  ;;  %1130 = vst [vmem:[#allocation3 + $0xe8] sm:$0xf] %v981_v58  ;;  %v1234_v17 = vrot.slane %v1155_v7, 5  ;;  %v1462_v18 = vsel %vm4310_vm11, %v1457_v53, %v1461_v11  ;;  %v1309_v19 = vld [vmem:[#allocation2 + $0x60] sm:$0xf]  ;;  %3939 = vmatpush3.bf16.msra.mxu0 %v4679_v37 }
  0xd4   :  { %v1349_v20 = vld [vmem:[#allocation2 + $0x60] sm:$0xf]  ;;  %1611 = vst [vmem:[#allocation3 + $0xf4] sm:$0xf] %v1462_v18  ;;  %1290 = vst [vmem:[#allocation3 + $0xec] sm:$0xf] %v1231_v55 }
  0xd5   :  { %v995_v21 = vsel %vm4310_vm11, %v990_v15, %v994_v16  ;;  %v1235_v49 = vsel %vm4284_vm8, %v3397_v14, %v1234_v17  ;;  %1325 = vst [vmem:[#allocation3 + $0x138] sm:$0xf] %v1309_v19  ;;  %1326 = vst [vmem:[#allocation3 + $0x15c] sm:$0xf] %v1310_v1  ;;  %v1350_v42 = vld [vmem:[#allocation2 + $0x64] sm:$0x1] }
  0xd6   :  { %v1351_v22 = vld [vmem:[#allocation2 + $0x68] sm:$0xf]  ;;  %v1352_v23 = vld [vmem:[#allocation2 + $0x6c] sm:$0x1]  ;;  %1131 = vst [vmem:[#allocation3 + $0x10c] sm:$0xf] %v995_v21 }
  0xd7   :  { %1291 = vst [vmem:[#allocation3 + $0x110] sm:$0xf] %v1235_v49  ;;  %v1478_v10 = vshrl.u32 %v1349_v20, 16  ;;  %v1481_v24 = vshll.u32 %v1349_v20, 16  ;;  %v1487_v47 = vshll.u32 %v1350_v42, 16  ;;  %v1492_v25 = vshrl.u32 %v1351_v22, 16 }
  0xd8   :  { %v868_v26 = vld [vmem:[#allocation2 + $0x58] sm:$0xf]  ;;  %v1495_v36 = vshll.u32 %v1351_v22, 16  ;;  %v1501_v27 = vshll.u32 %v1352_v23, 16  ;;  %v869_v28 = vld [vmem:[#allocation2 + $0x5c] sm:$0x1] }
  0xd9   :  { %v870_v29 = vld [vmem:[#allocation2 + $0x60] sm:$0xf]  ;;  %v1480_v30 = vrot.slane %v1478_v10, 4  ;;  %v1483_v31 = vrot.slane %v1481_v24, 5  ;;  %v1489_v32 = vrot.slane %v1487_v47, 5  ;;  %v1494_v33 = vrot.slane %v1492_v25, 4 }
  0xda   :  { %v871_v34 = vld [vmem:[#allocation2 + $0x64] sm:$0x1]  ;;  %v1497_v38 = vrot.slane %v1495_v36, 5  ;;  %v1503_v39 = vrot.slane %v1501_v27, 5  ;;  %v997_v41 = vshrl.u32 %v868_v26, 16  ;;  %v1000_v43 = vshll.u32 %v868_v26, 16 }
  0xdb   :  { %v1484_v44 = vor.u32 %v1483_v31, %v1480_v30  ;;  %v1006_v45 = vshll.u32 %v869_v28, 16  ;;  %v1011_v46 = vshrl.u32 %v870_v29, 16  ;;  %v1014_v50 = vshll.u32 %v870_v29, 16  ;;  %v1156_v51 = vld [vmem:[#allocation2 + $0x58] sm:$0xe] }
  0xdc   :  { %v1498_v52 = vor.u32 %v1497_v38, %v1494_v33  ;;  %v999_v53 = vrot.slane %v997_v41, 4  ;;  %v1002_v35 = vrot.slane %v1000_v43, 5  ;;  %v1020_v54 = vshll.u32 %v871_v34, 16  ;;  %v1157_v56 = vld [vmem:[#allocation2 + $0x5c] sm:$0x1] }
  0xdd   :  { %v4106_v57 = vld [vmem:[#allocation3 + $0xf4] ss:$36 sps:$4 sm:$0xff]   ;;  %v1485_v60 = vrot.slane %v1484_v44, 4  ;;  %v1008_v63 = vrot.slane %v1006_v45, 5  ;;  %v4112_v0 = vld [vmem:[#allocation3 + $0xe8] ss:$36 sps:$4 sm:$0xff]  }
  0xde   :  { %v4108_v59 = vld [vmem:[#allocation3 + $0xf0] ss:$36 sps:$4 sm:$0xff]   ;;  %v1499_v62 = vrot.slane %v1498_v52, 4  ;;  %v1003_v37 = vor.u32 %v1002_v35, %v999_v53  ;;  %3152 = vmatprep.mubr.bf16.mxu1 %v4106_v57  ;;  %v1013_v3 = vrot.slane %v1011_v46, 4  ;;  %v1016_v4 = vrot.slane %v1014_v50, 5 }
  0xdf   :  { %v4109_v61 = vld [vmem:[#allocation3 + $0xec] ss:$36 sps:$4 sm:$0xff]   ;;  %v1490_v2 = vsel %vm4310_vm11, %v1485_v60, %v1489_v32  ;;  %v1022_v5 = vrot.slane %v1020_v54, 5  ;;  %3153 = vmatmul.mubr.bf16.gmra.mxu1 %v4108_v59  ;;  %v1158_v8 = vld [vmem:[#allocation2 + $0x60] sm:$0xe]  ;;  %v3398_v58 = vrot.slane %v1156_v51, 9 }
  0xe0   :  { %3055 = vmatprep.mubr.bf16.mxu0 %v4109_v61  ;;  %v1504_v6 = vsel %vm4310_vm11, %v1499_v62, %v1503_v39  ;;  %1613 = vst [vmem:[#allocation3 + $0x13c] sm:$0xf] %v1490_v2  ;;  %v1004_v7 = vrot.slane %v1003_v37, 4  ;;  %v1159_v11 = vld [vmem:[#allocation2 + $0x64] sm:$0x1]  ;;  %v1017_v13 = vor.u32 %v1016_v4, %v1013_v3  ;;  %v1238_v14 = vrot.slane %v1157_v56, 5 }
  0xe1   :  { %3056 = vmatmul.mubr.bf16.gmra.mxu0 %v4112_v0  ;;  %1614 = vst [vmem:[#allocation3 + $0x160] sm:$0xf] %v1504_v6  ;;  %v3399_v15 = vrot.slane %v1158_v8, 9  ;;  %v1242_v16 = vrot.slane %v1159_v11, 5  ;;  %v1311_v18 = vld [vmem:[#allocation2 + $0x70] sm:$0xf] }
  0xe2   :  { %v1009_v17 = vsel %vm4310_vm11, %v1004_v7, %v1008_v63  ;;  %v1312_v55 = vld [vmem:[#allocation2 + $0x78] sm:$0xf]  ;;  %v1018_v19 = vrot.slane %v1017_v13, 4  ;;  %v1239_v1 = vsel %vm4284_vm8, %v3398_v58, %v1238_v14  ;;  %1327 = vst [vmem:[#allocation3 + $0x180] sm:$0xf] %v1311_v18  ;;  %v198_v18 = vrot.slane %v4564_v9, 4 }
  0xe3   :  { %1132 = vst [vmem:[#allocation3 + $0x130] sm:$0xf] %v1009_v17  ;;  %v1243_v20 = vsel %vm4284_vm8, %v3399_v15, %v1242_v16  ;;  %1328 = vst [vmem:[#allocation3 + $0x1a4] sm:$0xf] %v1312_v55  ;;  %v1353_v21 = vld [vmem:[#allocation2 + $0x70] sm:$0xf] }
  0xe4   :  { %v1354_v49 = vld [vmem:[#allocation2 + $0x74] sm:$0x1]  ;;  %1292 = vst [vmem:[#allocation3 + $0x134] sm:$0xf] %v1239_v1  ;;  %1293 = vst [vmem:[#allocation3 + $0x158] sm:$0xf] %v1243_v20  ;;  %v1023_v24 = vsel %vm4310_vm11, %v1018_v19, %v1022_v5 }
  0xe5   :  { %v1355_v42 = vld [vmem:[#allocation2 + $0x78] sm:$0xf]  ;;  %v1356_v22 = vld [vmem:[#allocation2 + $0x7c] sm:$0x1]  ;;  %v1506_v23 = vshrl.u32 %v1353_v21, 16  ;;  %v1509_v10 = vshll.u32 %v1353_v21, 16 }
  0xe6   :  { %v1515_v47 = vshll.u32 %v1354_v49, 16  ;;  %v1520_v25 = vshrl.u32 %v1355_v42, 16  ;;  %v1523_v26 = vshll.u32 %v1355_v42, 16  ;;  %v872_v36 = vld [vmem:[#allocation2 + $0x68] sm:$0xf]  ;;  %v1529_v29 = vshll.u32 %v1356_v22, 16 }
  0xe7   :  { %1133 = vst [vmem:[#allocation3 + $0x154] sm:$0xf] %v1023_v24  ;;  %v1508_v27 = vrot.slane %v1506_v23, 4  ;;  %v1511_v28 = vrot.slane %v1509_v10, 5  ;;  %v873_v30 = vld [vmem:[#allocation2 + $0x6c] sm:$0x1] }
  0xe8   :  { %v1025_v31 = vshrl.u32 %v872_v36, 16  ;;  %v1517_v32 = vrot.slane %v1515_v47, 5  ;;  %v1522_v33 = vrot.slane %v1520_v25, 4  ;;  %v1525_v34 = vrot.slane %v1523_v26, 5  ;;  %v874_v38 = vld [vmem:[#allocation2 + $0x70] sm:$0xf] }
  0xe9   :  { %v4113_v39 = vld [vmem:[#allocation3 + $0x13c] ss:$36 sps:$4 sm:$0xff]   ;;  %v1512_v43 = vor.u32 %v1511_v28, %v1508_v27  ;;  %v1531_v44 = vrot.slane %v1529_v29, 5  ;;  %v875_v46 = vld [vmem:[#allocation2 + $0x74] sm:$0x1]  ;;  %v1028_v51 = vshll.u32 %v872_v36, 16 }
  0xea   :  { %v4115_v41 = vld [vmem:[#allocation3 + $0x138] ss:$36 sps:$4 sm:$0xff]   ;;  %v1526_v45 = vor.u32 %v1525_v34, %v1522_v33  ;;  %v1027_v50 = vrot.slane %v1025_v31, 4  ;;  %v1034_v52 = vshll.u32 %v873_v30, 16  ;;  %3160 = vmatprep.mubr.bf16.mxu1 %v4113_v39  ;;  %v1039_v35 = vshrl.u32 %v874_v38, 16 }
  0xeb   :  { %v1513_v53 = vrot.slane %v1512_v43, 4  ;;  %v1042_v54 = vshll.u32 %v874_v38, 16  ;;  %v1048_v56 = vshll.u32 %v875_v46, 16  ;;  %v1160_v57 = vld [vmem:[#allocation2 + $0x68] sm:$0xe]  ;;  %3161 = vmatmul.mubr.bf16.gmra.mxu1 %v4115_v41  ;;  %v1030_v60 = vrot.slane %v1028_v51, 5 }
  0xec   :  { %v1527_v59 = vrot.slane %v1526_v45, 4  ;;  %v1036_v61 = vrot.slane %v1034_v52, 5  ;;  %v1161_v62 = vld [vmem:[#allocation2 + $0x6c] sm:$0x1]  ;;  %v1041_v63 = vrot.slane %v1039_v35, 4  ;;  %v3400_v8 = vrot.slane %v1160_v57, 9 }
  0xed   :  { %v1518_v37 = vsel %vm4310_vm11, %v1513_v53, %v1517_v32  ;;  %v1044_v0 = vrot.slane %v1042_v54, 5  ;;  %v1050_v2 = vrot.slane %v1048_v56, 5  ;;  %v1162_v3 = vld [vmem:[#allocation2 + $0x70] sm:$0xe]  ;;  %v4116_v4 = vld [vmem:[#allocation3 + $0x134] ss:$36 sps:$4 sm:$0xff]   ;;  %v1031_v7 = vor.u32 %v1030_v60, %v1027_v50 }
  0xee   :  { %v4119_v5 = vld [vmem:[#allocation3 + $0x130] ss:$36 sps:$4 sm:$0xff]   ;;  %v1532_v6 = vsel %vm4310_vm11, %v1527_v59, %v1531_v44  ;;  %1615 = vst [vmem:[#allocation3 + $0x184] sm:$0xf] %v1518_v37  ;;  %v1246_v13 = vrot.slane %v1161_v62, 5  ;;  %v3401_v14 = vrot.slane %v1162_v3, 9  ;;  %3063 = vmatprep.mubr.bf16.mxu0 %v4116_v4 }
  0xef   :  { %1616 = vst [vmem:[#allocation3 + $0x1a8] sm:$0xf] %v1532_v6  ;;  %v1045_v11 = vor.u32 %v1044_v0, %v1041_v63  ;;  %v1163_v58 = vld [vmem:[#allocation2 + $0x74] sm:$0x1]  ;;  %v1032_v15 = vrot.slane %v1031_v7, 4  ;;  %3064 = vmatmul.mubr.bf16.gmra.mxu0 %v4119_v5 }
  0xf0   :  { %v1250_v16 = vrot.slane %v1163_v58, 5  ;;  %v1313_v17 = vld [vmem:[#allocation2 + $0x80] sm:$0xf]  ;;  %v1247_v19 = vsel %vm4284_vm8, %v3400_v8, %v1246_v13  ;;  %v1314_v1 = vld [vmem:[#allocation2 + $0x88] sm:$0xf] }
  0xf1   :  { %v1046_v55 = vrot.slane %v1045_v11, 4  ;;  %1329 = vst [vmem:[#allocation3 + $0x1c8] sm:$0xf] %v1313_v17  ;;  %v1357_v20 = vld [vmem:[#allocation2 + $0x80] sm:$0xf]  ;;  %v1037_v21 = vsel %vm4310_vm11, %v1032_v15, %v1036_v61 }
  0xf2   :  { %v1251_v49 = vsel %vm4284_vm8, %v3401_v14, %v1250_v16  ;;  %1294 = vst [vmem:[#allocation3 + $0x17c] sm:$0xf] %v1247_v19  ;;  %1330 = vst [vmem:[#allocation3 + $0x1ec] sm:$0xf] %v1314_v1  ;;  %v1358_v42 = vld [vmem:[#allocation2 + $0x84] sm:$0x1] }
  0xf3   :  { %v1359_v22 = vld [vmem:[#allocation2 + $0x88] sm:$0xf]  ;;  %v1360_v23 = vld [vmem:[#allocation2 + $0x8c] sm:$0x1]  ;;  %v1051_v10 = vsel %vm4310_vm11, %v1046_v55, %v1050_v2  ;;  %1134 = vst [vmem:[#allocation3 + $0x178] sm:$0xf] %v1037_v21 }
  0xf4   :  { %1295 = vst [vmem:[#allocation3 + $0x1a0] sm:$0xf] %v1251_v49  ;;  %v1534_v24 = vshrl.u32 %v1357_v20, 16  ;;  %v1537_v47 = vshll.u32 %v1357_v20, 16  ;;  %v1543_v25 = vshll.u32 %v1358_v42, 16  ;;  %v1548_v36 = vshrl.u32 %v1359_v22, 16 }
  0xf5   :  { %v876_v26 = vld [vmem:[#allocation2 + $0x78] sm:$0xf]  ;;  %1135 = vst [vmem:[#allocation3 + $0x19c] sm:$0xf] %v1051_v10  ;;  %v1551_v27 = vshll.u32 %v1359_v22, 16  ;;  %v1557_v28 = vshll.u32 %v1360_v23, 16  ;;  %v3732_v10 = vpop.f32.mrf.mxu1 }
  0xf6   :  { %v877_v29 = vld [vmem:[#allocation2 + $0x7c] sm:$0x1]  ;;  %v1053_v30 = vshrl.u32 %v876_v26, 16  ;;  %v1536_v31 = vrot.slane %v1534_v24, 4  ;;  %v1539_v32 = vrot.slane %v1537_v47, 5  ;;  %v1545_v33 = vrot.slane %v1543_v25, 5 }
  0xf7   :  { %v878_v34 = vld [vmem:[#allocation2 + $0x80] sm:$0xf]  ;;  %v4120_v38 = vld [vmem:[#allocation3 + $0x184] ss:$36 sps:$4 sm:$0xff]   ;;  %v1550_v41 = vrot.slane %v1548_v36, 4  ;;  %v1553_v44 = vrot.slane %v1551_v27, 5 }
  0xf8   :  { %v4122_v39 = vld [vmem:[#allocation3 + $0x180] ss:$36 sps:$4 sm:$0xff]   ;;  %v1540_v43 = vor.u32 %v1539_v32, %v1536_v31  ;;  %v1559_v45 = vrot.slane %v1557_v28, 5  ;;  %v1055_v50 = vrot.slane %v1053_v30, 4  ;;  %3168 = vmatprep.mubr.bf16.mxu1 %v4120_v38  ;;  %v1056_v51 = vshll.u32 %v876_v26, 16  ;;  %v3733_v30 = vpop.f32.mrf.mxu1 }
  0xf9   :  { %v879_v46 = vld [vmem:[#allocation2 + $0x84] sm:$0x1]  ;;  %v1062_v52 = vshll.u32 %v877_v29, 16  ;;  %v1067_v53 = vshrl.u32 %v878_v34, 16  ;;  %v1070_v35 = vshll.u32 %v878_v34, 16  ;;  %3169 = vmatmul.mubr.bf16.gmra.mxu1 %v4122_v39  ;;  %v1554_v57 = vor.u32 %v1553_v44, %v1550_v41 }
  0xfa   :  { %v1164_v54 = vld [vmem:[#allocation2 + $0x78] sm:$0xe]  ;;  %v1541_v56 = vrot.slane %v1540_v43, 4  ;;  %v1076_v59 = vshll.u32 %v879_v46, 16  ;;  %v1165_v60 = vld [vmem:[#allocation2 + $0x7c] sm:$0x1] }
  0xfb   :  { %v1166_v61 = vld [vmem:[#allocation2 + $0x80] sm:$0xe]  ;;  %v1058_v62 = vrot.slane %v1056_v51, 5  ;;  %v1064_v37 = vrot.slane %v1062_v52, 5  ;;  %v1069_v63 = vrot.slane %v1067_v53, 4  ;;  %v1072_v0 = vrot.slane %v1070_v35, 5 }
  0xfc   :  { %v4123_v2 = vld [vmem:[#allocation3 + $0x17c] ss:$36 sps:$4 sm:$0xff]   ;;  %v1546_v4 = vsel %vm4310_vm11, %v1541_v56, %v1545_v33  ;;  %v1555_v5 = vrot.slane %v1554_v57, 4  ;;  %v1078_v8 = vrot.slane %v1076_v59, 5  ;;  %v1167_v11 = vld [vmem:[#allocation2 + $0x84] sm:$0x1]  ;;  %v3734_v59 = vadd.f32 %v3733_v30, %v3732_v10 }
  0xfd   :  { %v4126_v3 = vld [vmem:[#allocation3 + $0x178] ss:$36 sps:$4 sm:$0xff]   ;;  %1617 = vst [vmem:[#allocation3 + $0x1cc] sm:$0xf] %v1546_v4  ;;  %v1059_v6 = vor.u32 %v1058_v62, %v1055_v50  ;;  %v1073_v7 = vor.u32 %v1072_v0, %v1069_v63  ;;  %v3402_v58 = vrot.slane %v1164_v54, 9  ;;  %3071 = vmatprep.mubr.bf16.mxu0 %v4123_v2  ;;  %v1254_v14 = vrot.slane %v1165_v60, 5 }
  0xfe   :  { %v1560_v13 = vsel %vm4310_vm11, %v1555_v5, %v1559_v45  ;;  %v3403_v15 = vrot.slane %v1166_v61, 9  ;;  %v1258_v16 = vrot.slane %v1167_v11, 5  ;;  %3072 = vmatmul.mubr.bf16.gmra.mxu0 %v4126_v3  ;;  %v331_v19 = vld [vmem:[#allocation2 + $0x94] sm:$0x1]  ;;  %v1315_v1 = vld [vmem:[#allocation2 + $0x90] sm:$0xf]  ;;  %v3735_v45 = vpop.f32.mrf.mxu1 }
  0xff   :  { %1618 = vst [vmem:[#allocation3 + $0x1f0] sm:$0xf] %v1560_v13  ;;  %v1060_v17 = vrot.slane %v1059_v6, 4  ;;  %v1074_v55 = vrot.slane %v1073_v7, 4  ;;  %v1255_v20 = vsel %vm4284_vm8, %v3402_v58, %v1254_v14  ;;  %v332_v49 = vsel %vm4278_vm7, %v198_v18, %v331_v19  ;;  %v1316_v42 = vld [vmem:[#allocation2 + $0x98] sm:$0xf]  ;;  %v3668_v7 = vpop.f32.mrf.mxu0 }
 0x100   :  { %v1259_v21 = vsel %vm4284_vm8, %v3403_v15, %v1258_v16  ;;  %1331 = vst [vmem:[#allocation3 + $0x210] sm:$0xf] %v1315_v1  ;;  %v1361_v22 = vld [vmem:[#allocation2 + $0x90] sm:$0xf]  ;;  %v1363_v23 = vld [vmem:[#allocation2 + $0x98] sm:$0xf]  ;;  %v3736_v60 = vpop.f32.mrf.mxu1 }
 0x101   :  { %v1065_v24 = vsel %vm4310_vm11, %v1060_v17, %v1064_v37  ;;  %v1079_v47 = vsel %vm4310_vm11, %v1074_v55, %v1078_v8  ;;  %1296 = vst [vmem:[#allocation3 + $0x1c4] sm:$0xf] %v1255_v20  ;;  %1297 = vst [vmem:[#allocation3 + $0x1e8] sm:$0xf] %v1259_v21  ;;  %v1364_v25 = vld [vmem:[#allocation2 + $0x9c] sm:$0x1]  ;;  %v4742_v2 = vadd.f32 %v3736_v60, %v3735_v45  ;;  %v3669_v19 = vpop.f32.mrf.mxu0 }
 0x102   :  { %333 = vst [vmem:[#allocation2 + $0x94] sm:$0x1] %v332_v49  ;;  %1332 = vst [vmem:[#allocation3 + $0x234] sm:$0xf] %v1316_v42  ;;  %v1562_v9 = vshrl.u32 %v1361_v22, 16  ;;  %v1565_v26 = vshll.u32 %v1361_v22, 16  ;;  %v3670_v10 = vadd.f32 %v3669_v19, %v3668_v7 }
 0x103   :  { %v880_v40 = vld [vmem:[#allocation2 + $0x88] sm:$0xf]  ;;  %1136 = vst [vmem:[#allocation3 + $0x1c0] sm:$0xf] %v1065_v24  ;;  %1137 = vst [vmem:[#allocation3 + $0x1e4] sm:$0xf] %v1079_v47  ;;  %v3671_v24 = vpop.f32.mrf.mxu0  ;;  %v3738_v47 = vpop.f32.mrf.mxu1 }
 0x104   :  { %v1576_v18 = vshrl.u32 %v1363_v23, 16  ;;  %v1579_v36 = vshll.u32 %v1363_v23, 16  ;;  %v1585_v27 = vshll.u32 %v1364_v25, 16  ;;  %v881_v28 = vld [vmem:[#allocation2 + $0x8c] sm:$0x1]  ;;  %v1081_v29 = vshrl.u32 %v880_v40, 16 }
 0x105   :  { %v1564_v31 = vrot.slane %v1562_v9, 4  ;;  %v1567_v32 = vrot.slane %v1565_v26, 5  ;;  %v882_v33 = vld [vmem:[#allocation2 + $0x90] sm:$0xf]  ;;  %v1084_v34 = vshll.u32 %v880_v40, 16  ;;  %v1090_v38 = vshll.u32 %v881_v28, 16 }
 0x106   :  { %v1578_v39 = vrot.slane %v1576_v18, 4  ;;  %v1581_v41 = vrot.slane %v1579_v36, 5  ;;  %v1587_v43 = vrot.slane %v1585_v27, 5  ;;  %v1083_v44 = vrot.slane %v1081_v29, 4  ;;  %v1168_v53 = vld [vmem:[#allocation2 + $0x88] sm:$0xe] }
 0x107   :  { %v1568_v46 = vor.u32 %v1567_v32, %v1564_v31  ;;  %v1086_v50 = vrot.slane %v1084_v34, 5  ;;  %v1092_v51 = vrot.slane %v1090_v38, 5  ;;  %v1095_v52 = vshrl.u32 %v882_v33, 16  ;;  %v4127_v35 = vld [vmem:[#allocation3 + $0x1cc] ss:$36 sps:$4 sm:$0xff]   ;;  %v3672_v32 = vpop.f32.mrf.mxu0 }
 0x108   :  { %v4129_v54 = vld [vmem:[#allocation3 + $0x1c8] ss:$36 sps:$4 sm:$0xff]   ;;  %v1582_v56 = vor.u32 %v1581_v41, %v1578_v39  ;;  %v1098_v57 = vshll.u32 %v882_v33, 16  ;;  %v1170_v0 = vld [vmem:[#allocation2 + $0x90] sm:$0xe]  ;;  %3176 = vmatprep.mubr.bf16.mxu1 %v4127_v35  ;;  %v3404_v55 = vrot.slane %v1168_v53, 9  ;;  %v3739_v33 = vpop.f32.mrf.mxu1  ;;  %v3673_v12 = vadd.f32 %v3672_v32, %v3671_v24 }
 0x109   :  { %v1569_v61 = vrot.slane %v1568_v46, 4  ;;  %v1087_v62 = vor.u32 %v1086_v50, %v1083_v44  ;;  %v1097_v37 = vrot.slane %v1095_v52, 4  ;;  %v1169_v63 = vld [vmem:[#allocation2 + $0x8c] sm:$0x1]  ;;  %v1362_v3 = vld [vmem:[#allocation2 + $0x94] sm:$0x1]  ;;  %3177 = vmatmul.mubr.bf16.gmra.mxu1 %v4129_v54 }
 0x10a   :  { %v1583_v4 = vrot.slane %v1582_v56, 4  ;;  %v883_v5 = vld [vmem:[#allocation2 + $0x94] sm:$0x1]  ;;  %v1100_v6 = vrot.slane %v1098_v57, 5  ;;  %v4130_v8 = vld [vmem:[#allocation3 + $0x1c4] ss:$36 sps:$4 sm:$0xff]   ;;  %v3741_v52 = vpop.f32.mrf.mxu1  ;;  %v4763_v57 = vadd.f32 %v4742_v2, %v3673_v12 }
 0x10b   :  { %v1571_v11 = vshll.u32 %v1362_v3, 16  ;;  %v1088_v58 = vrot.slane %v1087_v62, 4  ;;  %v4133_v13 = vld [vmem:[#allocation3 + $0x1c0] ss:$36 sps:$4 sm:$0xff]   ;;  %v1104_v16 = vshll.u32 %v883_v5, 16  ;;  %3079 = vmatprep.mubr.bf16.mxu0 %v4130_v8  ;;  %v1262_v21 = vrot.slane %v1169_v63, 5  ;;  %v3674_v63 = vpop.f32.mrf.mxu0 }
 0x10c   :  { %v1588_v14 = vsel %vm4310_vm11, %v1583_v4, %v1587_v43  ;;  %v1101_v15 = vor.u32 %v1100_v6, %v1097_v37  ;;  %v1171_v17 = vld [vmem:[#allocation2 + $0x94] sm:$0x1]  ;;  %v3405_v49 = vrot.slane %v1170_v0, 9  ;;  %3080 = vmatmul.mubr.bf16.gmra.mxu0 %v4133_v13  ;;  %v1637_v26 = vld [vmem:[#allocation2 + $0x60] sm:$0xe]  ;;  %v4756_v43 = vadd.f32 %v3734_v59, %v3670_v10  ;;  %v3742_v0 = vpop.f32.mrf.mxu1 }
 0x10d   :  { %v1573_v1 = vrot.slane %v1571_v11, 5  ;;  %1620 = vst [vmem:[#allocation3 + $0x238] sm:$0xf] %v1588_v14  ;;  %v1093_v20 = vsel %vm4310_vm11, %v1088_v58, %v1092_v51  ;;  %v1106_v22 = vrot.slane %v1104_v16, 5  ;;  %v1266_v23 = vrot.slane %v1171_v17, 5  ;;  %v3675_v58 = vpop.f32.mrf.mxu0 }
 0x10e   :  { %v1102_v42 = vrot.slane %v1101_v15, 4  ;;  %1138 = vst [vmem:[#allocation3 + $0x208] sm:$0xf] %v1093_v20  ;;  %v1263_v9 = vsel %vm4284_vm8, %v3404_v55, %v1262_v21  ;;  %v1638_v40 = vld [vmem:[#allocation2 + $0x64] sm:$0x1]  ;;  %v3414_v29 = vrot.slane %v1637_v26, 9  ;;  %v3740_v59 = vadd.f32 %v3739_v33, %v3738_v47 }
 0x10f   :  { %v1574_v25 = vsel %vm4310_vm11, %v1569_v61, %v1573_v1  ;;  %v1639_v18 = vld [vmem:[#allocation2 + $0x68] sm:$0xe]  ;;  %v1267_v27 = vsel %vm4284_vm8, %v3405_v49, %v1266_v23  ;;  %1298 = vst [vmem:[#allocation3 + $0x20c] sm:$0xf] %v1263_v9  ;;  %v1640_v28 = vld [vmem:[#allocation2 + $0x6c] sm:$0x1]  ;;  %v3743_v13 = vadd.f32 %v3742_v0, %v3741_v52  ;;  %v3676_v19 = vadd.f32 %v3675_v58, %v3674_v63  ;;  %v3677_v49 = vpop.f32.mrf.mxu0 }
 0x110   :  { %1619 = vst [vmem:[#allocation3 + $0x214] sm:$0xf] %v1574_v25  ;;  %v1107_v36 = vsel %vm4310_vm11, %v1102_v42, %v1106_v22  ;;  %v1719_v30 = vrot.slane %v1638_v40, 5  ;;  %v1641_v31 = vld [vmem:[#allocation2 + $0x70] sm:$0xe]  ;;  %v3415_v34 = vrot.slane %v1639_v18, 9 }
 0x111   :  { %1139 = vst [vmem:[#allocation3 + $0x22c] sm:$0xf] %v1107_v36  ;;  %1299 = vst [vmem:[#allocation3 + $0x230] sm:$0xf] %v1267_v27  ;;  %v1723_v38 = vrot.slane %v1640_v28, 5  ;;  %v3416_v46 = vrot.slane %v1641_v31, 9  ;;  %v4773_v10 = vadd.f32 %v3740_v59, %v3676_v19  ;;  %v3678_v9 = vpop.f32.mrf.mxu0 }
 0x112   :  { %v1642_v39 = vld [vmem:[#allocation2 + $0x74] sm:$0x1]  ;;  %v1643_v41 = vld [vmem:[#allocation2 + $0x78] sm:$0xe]  ;;  %v1720_v44 = vsel %vm4284_vm8, %v3414_v29, %v1719_v30  ;;  %v1644_v45 = vld [vmem:[#allocation2 + $0x7c] sm:$0x1]  ;;  %v3679_v36 = vadd.f32 %v3678_v9, %v3677_v49 }
 0x113   :  { %v1727_v50 = vrot.slane %v1642_v39, 5  ;;  %v3417_v51 = vrot.slane %v1643_v41, 9  ;;  %v1724_v53 = vsel %vm4284_vm8, %v3415_v34, %v1723_v38  ;;  %1773 = vst [vmem:[#allocation3 + $0x140] sm:$0xf] %v1720_v44  ;;  %v1731_v35 = vrot.slane %v1644_v45, 5  ;;  %v3744_v45 = vpop.f32.mrf.mxu1 }
 0x114   :  { %v1621_v54 = vld [vmem:[#allocation2 + $0x10] sm:$0xe]  ;;  %v1622_v56 = vld [vmem:[#allocation2 + $0x14] sm:$0x1]  ;;  %1774 = vst [vmem:[#allocation3 + $0x164] sm:$0xf] %v1724_v53  ;;  %v4779_v33 = vadd.f32 %v3743_v13, %v3679_v36 }
 0x115   :  { %v1728_v60 = vsel %vm4284_vm8, %v3416_v46, %v1727_v50  ;;  %v1623_v61 = vld [vmem:[#allocation2 + $0x18] sm:$0xe]  ;;  %v1624_v62 = vld [vmem:[#allocation2 + $0x1c] sm:$0x1]  ;;  %v3406_v37 = vrot.slane %v1621_v54, 9  ;;  %v1732_v3 = vsel %vm4284_vm8, %v3417_v51, %v1731_v35  ;;  %v1687_v4 = vrot.slane %v1622_v56, 5  ;;  %v3745_v59 = vpop.f32.mrf.mxu1 }
 0x116   :  { %1775 = vst [vmem:[#allocation3 + $0x188] sm:$0xf] %v1728_v60  ;;  %v3407_v5 = vrot.slane %v1623_v61, 9  ;;  %v1691_v6 = vrot.slane %v1624_v62, 5  ;;  %v1625_v7 = vld [vmem:[#allocation2 + $0x20] sm:$0xe] }
 0x117   :  { %1776 = vst [vmem:[#allocation3 + $0x1ac] sm:$0xf] %v1732_v3  ;;  %v1626_v2 = vld [vmem:[#allocation2 + $0x24] sm:$0x1]  ;;  %v1627_v8 = vld [vmem:[#allocation2 + $0x28] sm:$0xe]  ;;  %v1688_v16 = vsel %vm4284_vm8, %v3406_v37, %v1687_v4 }
 0x118   :  { %v1628_v11 = vld [vmem:[#allocation2 + $0x2c] sm:$0x1]  ;;  %v4134_v14 = vld [vmem:[#allocation3 + $0x214] ss:$36 sps:$4 sm:$0xff]   ;;  %v1692_v17 = vsel %vm4284_vm8, %v3407_v5, %v1691_v6  ;;  %v3408_v55 = vrot.slane %v1625_v7, 9  ;;  %v1695_v20 = vrot.slane %v1626_v2, 5  ;;  %v3746_v5 = vadd.f32 %v3745_v59, %v3744_v45  ;;  %v3747_v6 = vpop.f32.mrf.mxu1 }
 0x119   :  { %v4136_v15 = vld [vmem:[#allocation3 + $0x210] ss:$36 sps:$4 sm:$0xff]   ;;  %1765 = vst [vmem:[#allocation3 + $0x20] sm:$0xf] %v1688_v16  ;;  %1766 = vst [vmem:[#allocation3 + $0x44] sm:$0xf] %v1692_v17  ;;  %3184 = vmatprep.mubr.bf16.mxu1 %v4134_v14 }
 0x11a   :  { %v4137_v1 = vld [vmem:[#allocation3 + $0x20c] ss:$36 sps:$4 sm:$0xff]   ;;  %v3409_v21 = vrot.slane %v1627_v8, 9  ;;  %v1699_v22 = vrot.slane %v1628_v11, 5  ;;  %v1645_v23 = vld [vmem:[#allocation2 + $0x80] sm:$0xe]  ;;  %3185 = vmatmul.mubr.bf16.gmra.mxu1 %v4136_v15  ;;  %v1696_v24 = vsel %vm4284_vm8, %v3408_v55, %v1695_v20  ;;  %v3748_v16 = vpop.f32.mrf.mxu1  ;;  %v3680_v20 = vpop.f32.mrf.mxu0 }
 0x11b   :  { %v4140_v42 = vld [vmem:[#allocation3 + $0x208] ss:$36 sps:$4 sm:$0xff]   ;;  %3087 = vmatprep.mubr.bf16.mxu0 %v4137_v1  ;;  %v1646_v47 = vld [vmem:[#allocation2 + $0x84] sm:$0x1]  ;;  %1767 = vst [vmem:[#allocation3 + $0x68] sm:$0xf] %v1696_v24  ;;  %v3749_v55 = vadd.f32 %v3748_v16, %v3747_v6 }
 0x11c   :  { %v1647_v25 = vld [vmem:[#allocation2 + $0x88] sm:$0xe]  ;;  %3088 = vmatmul.mubr.bf16.gmra.mxu0 %v4140_v42  ;;  %v4141_v26 = vld [vmem:[#allocation3 + $0x140] ss:$36 sps:$4 sm:$0xff]   ;;  %v1700_v40 = vsel %vm4284_vm8, %v3409_v21, %v1699_v22  ;;  %v1648_v18 = vld [vmem:[#allocation2 + $0x8c] sm:$0x1]  ;;  %v3681_v49 = vpop.f32.mrf.mxu0 }
 0x11d   :  { %1768 = vst [vmem:[#allocation3 + $0x8c] sm:$0xf] %v1700_v40  ;;  %v3418_v27 = vrot.slane %v1645_v23, 9  ;;  %v1735_v28 = vrot.slane %v1646_v47, 5  ;;  %v3419_v29 = vrot.slane %v1647_v25, 9  ;;  %v1739_v30 = vrot.slane %v1648_v18, 5  ;;  %3948 = vmatprep.mubr.bf16.mxu1 %v4141_v26 }
 0x11e   :  { %v4142_v31 = vld [vmem:[#allocation3 + $0x188] ss:$36 sps:$4 sm:$0xff]   ;;  %v1649_v32 = vld [vmem:[#allocation2 + $0x90] sm:$0xe]  ;;  %v1650_v39 = vld [vmem:[#allocation2 + $0x94] sm:$0x1]  ;;  %v3682_v22 = vadd.f32 %v3681_v49, %v3680_v20  ;;  %v3683_v23 = vpop.f32.mrf.mxu0  ;;  %v3750_v9 = vpop.f32.mrf.mxu1 }
 0x11f   :  { %v1736_v34 = vsel %vm4284_vm8, %v3418_v27, %v1735_v28  ;;  %v1740_v38 = vsel %vm4284_vm8, %v3419_v29, %v1739_v30  ;;  %v1651_v41 = vld [vmem:[#allocation2 + $0x98] sm:$0xe]  ;;  %v1652_v12 = vld [vmem:[#allocation2 + $0x9c] sm:$0x1]  ;;  %v3420_v46 = vrot.slane %v1649_v32, 9  ;;  %v1743_v50 = vrot.slane %v1650_v39, 5 }
 0x120   :  { %v4143_v44 = vld [vmem:[#allocation3 + $0x20] ss:$36 sps:$4 sm:$0xff]   ;;  %1777 = vst [vmem:[#allocation3 + $0x1d0] sm:$0xf] %v1736_v34  ;;  %1778 = vst [vmem:[#allocation3 + $0x1f4] sm:$0xf] %v1740_v38  ;;  %v4797_v24 = vadd.f32 %v3746_v5, %v3682_v22  ;;  %v3684_v25 = vpop.f32.mrf.mxu0  ;;  %v3751_v40 = vpop.f32.mrf.mxu1 }
 0x121   :  { %v3421_v51 = vrot.slane %v1651_v41, 9  ;;  %v1747_v52 = vrot.slane %v1652_v12, 5  ;;  %v1629_v53 = vld [vmem:[#allocation2 + $0x30] sm:$0xe]  ;;  %3940 = vmatprep.mubr.bf16.mxu0 %v4143_v44  ;;  %v1630_v35 = vld [vmem:[#allocation2 + $0x34] sm:$0x1]  ;;  %v1744_v60 = vsel %vm4284_vm8, %v3420_v46, %v1743_v50  ;;  %v3685_v26 = vadd.f32 %v3684_v25, %v3683_v23 }
 0x122   :  { %v1631_v54 = vld [vmem:[#allocation2 + $0x38] sm:$0xe]  ;;  %v1632_v56 = vld [vmem:[#allocation2 + $0x3c] sm:$0x1]  ;;  %3949 = vmatmul.mubr.bf16.vlgmr.msra.gmra.mxu1 %v4142_v31  ;;  %v3410_v62 = vrot.slane %v1629_v53, 9  ;;  %v1703_v37 = vrot.slane %v1630_v35, 5  ;;  %v3752_v36 = vadd.f32 %v3751_v40, %v3750_v9  ;;  %v3753_v48 = vpop.f32.mrf.mxu1 }
 0x123   :  { %v1748_v61 = vsel %vm4284_vm8, %v3421_v51, %v1747_v52  ;;  %v1633_v63 = vld [vmem:[#allocation2 + $0x40] sm:$0xe]  ;;  %1779 = vst [vmem:[#allocation3 + $0x218] sm:$0xf] %v1744_v60  ;;  %v3411_v3 = vrot.slane %v1631_v54, 9  ;;  %v1707_v4 = vrot.slane %v1632_v56, 5  ;;  %v4799_v18 = vadd.f32 %v3749_v55, %v3685_v26 }
 0x124   :  { %v4144_v0 = vld [vmem:[#allocation3 + $0x68] ss:$36 sps:$4 sm:$0xff]   ;;  %1780 = vst [vmem:[#allocation3 + $0x23c] sm:$0xf] %v1748_v61  ;;  %v1704_v7 = vsel %vm4284_vm8, %v3410_v62, %v1703_v37  ;;  %v1634_v2 = vld [vmem:[#allocation2 + $0x44] sm:$0x1]  ;;  %v3754_v28 = vpop.f32.mrf.mxu1 }
 0x125   :  { %v1635_v8 = vld [vmem:[#allocation2 + $0x48] sm:$0xe]  ;;  %v1636_v11 = vld [vmem:[#allocation2 + $0x4c] sm:$0x1]  ;;  %3941 = vmatmul.mubr.bf16.vlgmr.msra.gmra.mxu0 %v4144_v0  ;;  %v1708_v58 = vsel %vm4284_vm8, %v3411_v3, %v1707_v4  ;;  %1769 = vst [vmem:[#allocation3 + $0xb0] sm:$0xf] %v1704_v7  ;;  %v3755_v29 = vadd.f32 %v3754_v28, %v3753_v48 }
 0x126   :  { %v3412_v13 = vrot.slane %v1633_v63, 9  ;;  %v1711_v14 = vrot.slane %v1634_v2, 5  ;;  %v3413_v15 = vrot.slane %v1635_v8, 9  ;;  %1770 = vst [vmem:[#allocation3 + $0xd4] sm:$0xf] %v1708_v58  ;;  %v1715_v1 = vrot.slane %v1636_v11, 5 }
 0x127   :  { %v4145_v17 = vld [vmem:[#allocation3 + $0x1d0] ss:$36 sps:$4 sm:$0xff]   ;;  %5006 = vst [vmem:[#allocation4_spill] sm:$0xff] %v4799_v18  ;;  %v4889_v18 = vld [vmem:[%s4996_s1 + $0x20] sm:$0xff]  }
 0x128   :  { %v1712_v19 = vsel %vm4284_vm8, %v3412_v13, %v1711_v14  ;;  %3952 = vmatprep.mubr.bf16.mxu1 %v4145_v17  ;;  %v1716_v21 = vsel %vm4284_vm8, %v3413_v15, %v1715_v1  ;;  %v3686_v30 = vpop.f32.mrf.mxu0 }
 0x129   :  { %1771 = vst [vmem:[#allocation3 + $0xf8] sm:$0xf] %v1712_v19  ;;  %1772 = vst [vmem:[#allocation3 + $0x11c] sm:$0xf] %v1716_v21 }
 0x12a   :  { %v3687_v31 = vpop.f32.mrf.mxu0 }
 0x12b   :  { %v4146_v42 = vld [vmem:[#allocation3 + $0x218] ss:$36 sps:$4 sm:$0xff]   ;;  %v3688_v32 = vadd.f32 %v3687_v31, %v3686_v30 }
 0x12c   :  { %3953 = vmatmul.mubr.bf16.gmra.mxu1 %v4146_v42  ;;  %v3689_v34 = vpop.f32.mrf.mxu0 }
 0x12d   :  { %v4147_v47 = vld [vmem:[#allocation3 + $0xb0] ss:$36 sps:$4 sm:$0xff]   ;;  %v4801_v38 = vadd.f32 %v3752_v36, %v3688_v32 }
 0x12e   :  { %3944 = vmatprep.mubr.bf16.mxu0 %v4147_v47  ;;  %v3690_v39 = vpop.f32.mrf.mxu0 }
 0x12f   :  { %5007 = vst [vmem:[#allocation5_spill] sm:$0xff] %v4801_v38  ;;  %v3691_v41 = vadd.f32 %v3690_v39, %v3689_v34 }
 0x130   :  { %v4148_v27 = vld [vmem:[#allocation3 + $0xf8] ss:$36 sps:$4 sm:$0xff]  }
 0x131   :  { %3945 = vmatmul.mubr.bf16.gmra.mxu0 %v4148_v27  ;;  %v4803_v12 = vadd.f32 %v3755_v29, %v3691_v41 }
 0x132   :  { %v3756_v44 = vpop.f32.mrf.mxu1 }
 0x133   :  { %5008 = vst [vmem:[#allocation6_spill] sm:$0xff] %v4803_v12 }
 0x134   :  { %v3757_v45 = vpop.f32.mrf.mxu1 }
 0x135   :  { %v3758_v46 = vadd.f32 %v3757_v45, %v3756_v44 }
 0x136   :  { %v3759_v50 = vpop.f32.mrf.mxu1 }
 0x138   :  { %v3760_v51 = vpop.f32.mrf.mxu1 }
 0x139   :  { %v3761_v52 = vadd.f32 %v3760_v51, %v3759_v50 }
 0x13c   :  { %v3692_v53 = vpop.f32.mrf.mxu0 }
 0x13e   :  { %v3693_v35 = vpop.f32.mrf.mxu0 }
 0x13f   :  { %v3694_v54 = vadd.f32 %v3693_v35, %v3692_v53 }
 0x140   :  { %v3695_v56 = vpop.f32.mrf.mxu0 }
 0x141   :  { %v4805_v59 = vadd.f32 %v3758_v46, %v3694_v54 }
 0x142   :  { %v3696_v60 = vpop.f32.mrf.mxu0  ;;  %v3762_v61 = vpop.f32.mrf.mxu1 }
 0x143   :  { %v3697_v62 = vadd.f32 %v3696_v60, %v3695_v56 }
 0x144   :  { %v3763_v37 = vpop.f32.mrf.mxu1 }
 0x145   :  { %v4807_v63 = vadd.f32 %v3761_v52, %v3697_v62  ;;  %v3764_v0 = vadd.f32 %v3763_v37, %v3762_v61 }
 0x146   :  { %v3765_v3 = vpop.f32.mrf.mxu1 }
 0x148   :  { %v3766_v4 = vpop.f32.mrf.mxu1 }
 0x149   :  { %v3767_v5 = vadd.f32 %v3766_v4, %v3765_v3 }
 0x14b   :  { %v3698_v6 = vpop.f32.mrf.mxu0 }
 0x14d   :  { %v3699_v7 = vpop.f32.mrf.mxu0 }
 0x14e   :  { %v3700_v2 = vadd.f32 %v3699_v7, %v3698_v6 }
 0x14f   :  { %v3701_v8 = vpop.f32.mrf.mxu0 }
 0x150   :  { %v4809_v11 = vadd.f32 %v3764_v0, %v3700_v2 }
 0x151   :  { %v3702_v58 = vpop.f32.mrf.mxu0 }
 0x152   :  { %v3768_v13 = vpop.f32.mrf.mxu1  ;;  %v3703_v14 = vadd.f32 %v3702_v58, %v3701_v8 }
 0x154   :  { %v3769_v15 = vpop.f32.mrf.mxu1  ;;  %v4811_v16 = vadd.f32 %v3767_v5, %v3703_v14 }
 0x155   :  { %v3770_v17 = vadd.f32 %v3769_v15, %v3768_v13 }
 0x156   :  { %v3771_v55 = vpop.f32.mrf.mxu1 }
 0x158   :  { %v3772_v19 = vpop.f32.mrf.mxu1 }
 0x159   :  { %v3704_v1 = vpop.f32.mrf.mxu0  ;;  %v3773_v20 = vadd.f32 %v3772_v19, %v3771_v55 }
 0x15b   :  { %v3705_v21 = vpop.f32.mrf.mxu0 }
 0x15c   :  { %v3706_v49 = vadd.f32 %v3705_v21, %v3704_v1 }
 0x15d   :  { %v3707_v42 = vpop.f32.mrf.mxu0 }
 0x15e   :  { %v4813_v22 = vadd.f32 %v3770_v17, %v3706_v49 }
 0x15f   :  { %v3708_v23 = vpop.f32.mrf.mxu0 }
 0x160   :  { %v3709_v47 = vadd.f32 %v3708_v23, %v3707_v42 }
 0x162   :  { %v4815_v25 = vadd.f32 %v3773_v20, %v3709_v47 }
 0x163   :  { %v3774_v9 = vpop.f32.mrf.mxu1 }
 0x165   :  { %v3775_v26 = vpop.f32.mrf.mxu1 }
 0x166   :  { %v3776_v40 = vadd.f32 %v3775_v26, %v3774_v9 }
 0x167   :  { %v3777_v36 = vpop.f32.mrf.mxu1 }
 0x169   :  { %v3778_v27 = vpop.f32.mrf.mxu1 }
 0x16a   :  { %v3779_v48 = vadd.f32 %v3778_v27, %v3777_v36 }
 0x16d   :  { %v3710_v28 = vpop.f32.mrf.mxu0 }
 0x16f   :  { %v3711_v29 = vpop.f32.mrf.mxu0 }
 0x170   :  { %v3860_v30 = vpop.f32.mrf.mxu1  ;;  %v3712_v31 = vadd.f32 %v3711_v29, %v3710_v28 }
 0x171   :  { %v3713_v32 = vpop.f32.mrf.mxu0 }
 0x172   :  { %v3861_v34 = vpop.f32.mrf.mxu1  ;;  %v4817_v39 = vadd.f32 %v3776_v40, %v3712_v31 }
 0x173   :  { %v3862_v41 = vadd.f32 %v3861_v34, %v3860_v30  ;;  %v3714_v44 = vpop.f32.mrf.mxu0 }
 0x174   :  { %v3715_v45 = vadd.f32 %v3714_v44, %v3713_v32  ;;  %v3863_v46 = vpop.f32.mrf.mxu1 }
 0x175   :  { %v3796_v50 = vpop.f32.mrf.mxu0 }
 0x176   :  { %v4819_v51 = vadd.f32 %v3779_v48, %v3715_v45  ;;  %v3864_v35 = vpop.f32.mrf.mxu1 }
 0x177   :  { %v3797_v52 = vpop.f32.mrf.mxu0  ;;  %v3865_v0 = vadd.f32 %v3864_v35, %v3863_v46 }
 0x178   :  { %v3798_v53 = vadd.f32 %v3797_v52, %v3796_v50 }
 0x179   :  { %v3799_v54 = vpop.f32.mrf.mxu0 }
 0x17a   :  { %v3034_v56 = vadd.f32 %v3798_v53, %v4756_v43 }
 0x17b   :  { %v3800_v60 = vpop.f32.mrf.mxu0 }
 0x17c   :  { %v3801_v61 = vadd.f32 %v3800_v60, %v3799_v54  ;;  %v4824_v37 = vadd.f32 %v3862_v41, %v3034_v56 }
 0x17e   :  { %v4822_v62 = vpop.f32.mrf.mxu1  ;;  %v3037_v3 = vadd.f32 %v3801_v61, %v4763_v57 }
 0x180   :  { %v4827_v4 = vpop.f32.mrf.mxu1  ;;  %v4829_v5 = vadd.f32 %v3865_v0, %v3037_v3 }
 0x182   :  { %v3802_v6 = vpop.f32.mrf.mxu0  ;;  %v4831_v2 = vpop.f32.mrf.mxu1 }
 0x184   :  { %v3803_v7 = vpop.f32.mrf.mxu0  ;;  %v4835_v43 = vpop.f32.mrf.mxu1 }
 0x186   :  { %v4833_v8 = vpop.f32.mrf.mxu0 }
 0x188   :  { %v4837_v58 = vpop.f32.mrf.mxu0 }
 0x18e   :  { %v3872_v13 = vpop.f32.mrf.mxu1 }
 0x190   :  { %v3873_v14 = vpop.f32.mrf.mxu1 }
 0x191   :  { %v3874_v17 = vadd.f32 %v3873_v14, %v3872_v13 }
 0x192   :  { %v3808_v15 = vpop.f32.mrf.mxu0  ;;  %v4839_v19 = vpop.f32.mrf.mxu1 }
 0x193   :  { %5009 = vst [vmem:[#allocation7_spill] sm:$0xff] %v4839_v19 }
 0x194   :  { %v3809_v55 = vpop.f32.mrf.mxu0  ;;  %v4846_v49 = vpop.f32.mrf.mxu1 }
 0x195   :  { %v3810_v57 = vadd.f32 %v3809_v55, %v3808_v15  ;;  %5012 = vst [vmem:[#allocation10_spill] sm:$0xff] %v4846_v49 }
 0x196   :  { %v4842_v20 = vpop.f32.mrf.mxu0 }
 0x197   :  { %v3050_v1 = vadd.f32 %v3810_v57, %v4797_v24  ;;  %5010 = vst [vmem:[#allocation8_spill] sm:$0xff] %v4842_v20 }
 0x198   :  { %v4848_v42 = vpop.f32.mrf.mxu0 }
 0x199   :  { %v4844_v21 = vadd.f32 %v3874_v17, %v3050_v1  ;;  %5013 = vst [vmem:[#allocation11_spill] sm:$0xff] %v4848_v42  ;;  %v3584_v42 = vunpack.c.l.bf16 %v4889_v18 }
 0x19b   :  { %5011 = vst [vmem:[#allocation9_spill] sm:$0xff] %v4844_v21  ;;  %v3642_v21 = vld [vmem:[%s4996_s1 + $0x28] sm:$0xff]  }
 0x19f   :  { %v4850_v23 = vpop.f32.mrf.mxu1 }
 0x1a0   :  { %5014 = vst [vmem:[#allocation12_spill] sm:$0xff] %v4850_v23 }
 0x1a1   :  { %v4852_v47 = vpop.f32.mrf.mxu0  ;;  %v4854_v9 = vpop.f32.mrf.mxu1 }
 0x1a2   :  { %5015 = vst [vmem:[#allocation13_spill] sm:$0xff] %v4854_v9  ;;  %v3807_v9 = vadd.f32 %v4837_v58, %v4833_v8 }
 0x1a3   :  { %v4856_v26 = vpop.f32.mrf.mxu0  ;;  %v4858_v40 = vpop.f32.mrf.mxu1 }
 0x1a4   :  { %5016 = vst [vmem:[#allocation14_spill] sm:$0xff] %v4858_v40  ;;  %v4884_v40 = vld [vmem:[%s4996_s1 + $0x8] sm:$0xff]  }
 0x1a5   :  { %v4860_v36 = vpop.f32.mrf.mxu1  ;;  %v4862_v24 = vpop.f32.mrf.mxu0  ;;  %v3572_v38 = vunpack.c.l.bf16 %v4884_v40 }
 0x1a6   :  { %5017 = vst [vmem:[#allocation15_spill] sm:$0xff] %v4860_v36  ;;  %5018 = vst [vmem:[#allocation16_spill] sm:$0xff] %v4862_v24 }
 0x1a7   :  { %v4864_v48 = vpop.f32.mrf.mxu0 }
 0x1a8   :  { %5019 = vst [vmem:[#allocation17_spill] sm:$0xff] %v4864_v48 }
 0x1ab   :  { %v3884_v27 = vpop.f32.mrf.mxu1 }
 0x1ad   :  { %v3885_v28 = vpop.f32.mrf.mxu1 }
 0x1af   :  { %v3820_v29 = vpop.f32.mrf.mxu0  ;;  %v3887_v30 = vpop.f32.mrf.mxu1 }
 0x1b1   :  { %v3821_v31 = vpop.f32.mrf.mxu0  ;;  %v3888_v32 = vpop.f32.mrf.mxu1 }
 0x1b2   :  { %v3822_v49 = vadd.f32 %v3821_v31, %v3820_v29 }
 0x1b3   :  { %v3823_v34 = vpop.f32.mrf.mxu0 }
 0x1b5   :  { %v3824_v44 = vpop.f32.mrf.mxu0 }
 0x1b6   :  { %v3825_v29 = vadd.f32 %v3824_v44, %v3823_v34 }
 0x1b9   :  { %v3890_v41 = vpop.f32.mrf.mxu1 }
 0x1bb   :  { %v3891_v45 = vpop.f32.mrf.mxu1 }
 0x1bd   :  { %v3893_v52 = vpop.f32.mrf.mxu1 }
 0x1be   :  { %v3826_v46 = vpop.f32.mrf.mxu0 }
 0x1bf   :  { %v3894_v35 = vpop.f32.mrf.mxu1 }
 0x1c0   :  { %v3827_v50 = vpop.f32.mrf.mxu0 }
 0x1c1   :  { %v3828_v55 = vadd.f32 %v3827_v50, %v3826_v46  ;;  %v4894_v46 = vld [vmem:[%s4996_s1] sm:$0xff]   ;;  %v3804_v50 = vadd.f32 %v3803_v7, %v3802_v6  ;;  %v3066_v6 = vadd.f32 %v3822_v49, %v4805_v59  ;;  %v3892_v7 = vadd.f32 %v3891_v45, %v3890_v41 }
 0x1c2   :  { %v3829_v53 = vpop.f32.mrf.mxu0  ;;  %v3569_v20 = vunpack.c.h.bf16 %v4894_v46  ;;  %v3886_v59 = vadd.f32 %v3885_v28, %v3884_v27  ;;  %v3069_v49 = vadd.f32 %v3825_v29, %v4807_v63  ;;  %v3045_v41 = vadd.f32 %v3807_v9, %v4779_v33 }
 0x1c3   :  { %v3074_v31 = vadd.f32 %v3828_v55, %v4809_v11  ;;  %v3589_v11 = vunpack.c.h.bf16 %v3642_v21  ;;  %v4911_v55 = vld [vmem:[%s4996_s1 + $0x38] sm:$0xff]   ;;  %v3042_v8 = vadd.f32 %v3804_v50, %v4773_v10  ;;  %v3889_v45 = vadd.f32 %v3888_v32, %v3887_v30 }
 0x1c4   :  { %v3830_v54 = vpop.f32.mrf.mxu0  ;;  %v3596_v10 = vunpack.c.l.bf16 %v4911_v55  ;;  %v3871_v27 = vadd.f32 %v4835_v43, %v4831_v2 }
 0x1c5   :  { %v3831_v19 = vadd.f32 %v3830_v54, %v3829_v53  ;;  %v3588_v54 = vunpack.c.l.bf16 %v3642_v21  ;;  %v3868_v21 = vadd.f32 %v4827_v4, %v4822_v62  ;;  %v3166_v30 = vadd.f32 %v3889_v45, %v3069_v49 }
 0x1c6   :  { %v3142_v29 = vadd.f32 %v3871_v27, %v3045_v41  ;;  %v5030_v41 = vld [vmem:[#allocation11_spill] sm:$0xff] }
 0x1c7   :  { %v3077_v34 = vadd.f32 %v3831_v19, %v4811_v16  ;;  %v3895_v16 = vadd.f32 %v3894_v35, %v3893_v52  ;;  %v3171_v19 = vadd.f32 %v3892_v7, %v3074_v31  ;;  %v3139_v28 = vadd.f32 %v3868_v21, %v3042_v8  ;;  %v5029_v21 = vld [vmem:[#allocation8_spill] sm:$0xff] }
 0x1c8   :  { %v3597_v35 = vunpack.c.h.bf16 %v4911_v55  ;;  %v3813_v45 = vadd.f32 %v5030_v41, %v5029_v21 }
 0x1c9   :  { %v4866_v56 = vpop.f32.mrf.mxu1 }
 0x1cb   :  { %v4868_v61 = vpop.f32.mrf.mxu1 }
 0x1cc   :  { %v3832_v60 = vpop.f32.mrf.mxu0 }
 0x1cd   :  { %v4870_v3 = vpop.f32.mrf.mxu1 }
 0x1ce   :  { %v3833_v0 = vpop.f32.mrf.mxu0  ;;  %5020 = vst [vmem:[#allocation18_spill] sm:$0xff] %v4870_v3  ;;  %v3585_v3 = vunpack.c.h.bf16 %v4889_v18  ;;  %v3163_v18 = vadd.f32 %v3886_v59, %v3066_v6 }
 0x1cf   :  { %v4872_v14 = vpop.f32.mrf.mxu1  ;;  %v3834_v63 = vadd.f32 %v3833_v0, %v3832_v60 }
 0x1d0   :  { %v3835_v13 = vpop.f32.mrf.mxu0  ;;  %5021 = vst [vmem:[#allocation19_spill] sm:$0xff] %v4872_v14  ;;  %v3573_v14 = vunpack.c.h.bf16 %v4884_v40 }
 0x1d1   :  { %v3082_v7 = vadd.f32 %v3834_v63, %v4813_v22 }
 0x1d2   :  { %v3836_v15 = vpop.f32.mrf.mxu0 }
 0x1d3   :  { %v3837_v32 = vadd.f32 %v3836_v15, %v3835_v13 }
 0x1da   :  { %v4874_v17 = vpop.f32.mrf.mxu1 }
 0x1dc   :  { %v3838_v57 = vpop.f32.mrf.mxu0  ;;  %v4876_v1 = vpop.f32.mrf.mxu1 }
 0x1de   :  { %v3839_v36 = vpop.f32.mrf.mxu0  ;;  %v4896_v12 = vpop.f32.mrf.mxu1 }
 0x1df   :  { %v3840_v50 = vadd.f32 %v3839_v36, %v3838_v57  ;;  %v3816_v36 = vadd.f32 %v4856_v26, %v4852_v47 }
 0x1e0   :  { %v3841_v53 = vpop.f32.mrf.mxu0  ;;  %v4901_v23 = vpop.f32.mrf.mxu1 }
 0x1e1   :  { %5022 = vst [vmem:[#allocation20_spill] sm:$0xff] %v4901_v23  ;;  %v3174_v23 = vadd.f32 %v3895_v16, %v3077_v34  ;;  %v3090_v6 = vadd.f32 %v3840_v50, %v4817_v39  ;;  %v3898_v39 = vadd.f32 %v4868_v61, %v4866_v56  ;;  %v3643_v56 = vld [vmem:[%s4996_s1 + $0x30] sm:$0xff]   ;;  %v5025_v61 = vld [vmem:[#allocation17_spill] sm:$0xff] }
 0x1e2   :  { %v3842_v44 = vpop.f32.mrf.mxu0  ;;  %v3950_v58 = vpop.f32.mrf.mxu1  ;;  %v5031_v50 = vld [vmem:[#allocation5_spill] sm:$0xff] }
 0x1e3   :  { %v3268_v40 = vadd.f32 %v3950_v58, %v3171_v19  ;;  %v3843_v62 = vadd.f32 %v3842_v44, %v3841_v53  ;;  %v5028_v58 = vld [vmem:[#allocation19_spill] sm:$0xff]  ;;  %v3179_v16 = vadd.f32 %v3898_v39, %v3082_v7 }
 0x1e4   :  { %v3259_v48 = vpop.f32.mrf.mxu1 }
 0x1e5   :  { %v3942_v24 = vpop.f32.mrf.mxu0  ;;  %v3260_v4 = vadd.f32 %v3259_v48, %v3163_v18  ;;  %v3332_v2 = vadd.f32 %v3588_v54, %v3268_v40  ;;  %v3904_v48 = vadd.f32 %v4876_v1, %v4874_v17  ;;  %v3093_v47 = vadd.f32 %v3843_v62, %v4819_v51  ;;  %v5032_v62 = vld [vmem:[#allocation12_spill] sm:$0xff] }
 0x1e6   :  { %v3951_v52 = vpop.f32.mrf.mxu1  ;;  %v3236_v57 = vadd.f32 %v3942_v24, %v3139_v28  ;;  %v3058_v40 = vadd.f32 %v3816_v36, %v5031_v50  ;;  %v3640_v36 = vld [vmem:[%s4996_s1 + $0x18] sm:$0xff]  }
 0x1e7   :  { %v3227_v33 = vpop.f32.mrf.mxu0  ;;  %v3271_v9 = vadd.f32 %v3951_v52, %v3174_v23  ;;  %v3330_v26 = vadd.f32 %v3584_v42, %v3260_v4  ;;  %v3187_v42 = vadd.f32 %v3904_v48, %v3090_v6  ;;  %v3593_v52 = vunpack.c.h.bf16 %v3643_v56  ;;  %v5033_v4 = vld [vmem:[#allocation13_spill] sm:$0xff] }
 0x1e8   :  { %v3262_v31 = vpop.f32.mrf.mxu1  ;;  %v3228_v23 = vadd.f32 %v3227_v33, %v4824_v37  ;;  %v3324_v54 = vadd.f32 %v3572_v38, %v3236_v57  ;;  %v5023_v17 = vld [vmem:[#allocation20_spill] sm:$0xff]  ;;  %v3880_v33 = vadd.f32 %v5033_v4, %v5032_v62 }
 0x1e9   :  { %v3333_v43 = vadd.f32 %v3589_v11, %v3271_v9  ;;  %v3943_v60 = vpop.f32.mrf.mxu0  ;;  %v3263_v0 = vadd.f32 %v3262_v31, %v3166_v30  ;;  %v3085_v11 = vadd.f32 %v3837_v32, %v4815_v25  ;;  %v3907_v37 = vadd.f32 %v5023_v17, %v4896_v12  ;;  %v5024_v38 = vld [vmem:[#allocation16_spill] sm:$0xff]  ;;  %v5027_v12 = vld [vmem:[#allocation18_spill] sm:$0xff] }
 0x1ea   :  { %v3239_v53 = vadd.f32 %v3943_v60, %v3142_v29  ;;  %v3901_v59 = vadd.f32 %v5028_v58, %v5027_v12  ;;  %v5034_v9 = vld [vmem:[#allocation6_spill] sm:$0xff]  ;;  %v3155_v48 = vadd.f32 %v3880_v33, %v3058_v40 }
 0x1eb   :  { %v3626_v24 = vpack.c.bf16 %v3333_v43, %v3332_v2  ;;  %v3331_v13 = vadd.f32 %v3585_v3, %v3263_v0  ;;  %v3230_v15 = vpop.f32.mrf.mxu0  ;;  %v3819_v3 = vadd.f32 %v5025_v61, %v5024_v38  ;;  %v3190_v19 = vadd.f32 %v3907_v37, %v3093_v47  ;;  %v5035_v2 = vld [vmem:[#allocation4_spill] sm:$0xff]  ;;  %v5036_v60 = vld [vmem:[#allocation14_spill] sm:$0xff]  ;;  %v5037_v0 = vld [vmem:[#allocation15_spill] sm:$0xff] }
 0x1ec   :  { %v3325_v34 = vadd.f32 %v3573_v14, %v3239_v53  ;;  %v3231_v44 = vadd.f32 %v3230_v15, %v4829_v5  ;;  %v3954_v22 = vpop.f32.mrf.mxu1  ;;  %v5026_v5 = vunpack.c.l.bf16 %v4894_v46  ;;  %v3592_v46 = vunpack.c.l.bf16 %v3643_v56  ;;  %v5039_v15 = vld [vmem:[#allocation10_spill] sm:$0xff] }
 0x1ed   :  { %3649 = vst [vmem:[%s4997_s3 + $0x28] sm:$0xff] %v3626_v24   ;;  %v3621_v51 = vpack.c.bf16 %v3331_v13, %v3330_v26  ;;  %v3284_v49 = vadd.f32 %v3954_v22, %v3187_v42  ;;  %v3182_v28 = vadd.f32 %v3901_v59, %v3085_v11  ;;  %v3061_v30 = vadd.f32 %v3819_v3, %v5034_v9  ;;  %v5038_v13 = vld [vmem:[#allocation7_spill] sm:$0xff]  ;;  %v5040_v11 = vld [vmem:[#allocation9_spill] sm:$0xff] }
 0x1ee   :  { %v3322_v14 = vadd.f32 %v5026_v5, %v3228_v23  ;;  %v3606_v25 = vpack.c.bf16 %v3325_v34, %v3324_v54  ;;  %v3323_v1 = vadd.f32 %v3569_v20, %v3231_v44  ;;  %v3275_v8 = vpop.f32.mrf.mxu1  ;;  %v3053_v43 = vadd.f32 %v3813_v45, %v5035_v2  ;;  %v3639_v23 = vld [vmem:[%s4996_s1 + $0x10] sm:$0xff]  }
 0x1ef   :  { %3648 = vst [vmem:[%s4997_s3 + $0x20] sm:$0xff] %v3621_v51   ;;  %v3276_v27 = vadd.f32 %v3275_v8, %v3179_v16  ;;  %v3336_v57 = vadd.f32 %v3596_v10, %v3284_v49  ;;  %v3883_v7 = vadd.f32 %v5037_v0, %v5036_v60  ;;  %v3580_v53 = vunpack.c.l.bf16 %v3640_v36 }
 0x1f0   :  { %3645 = vst [vmem:[%s4997_s3 + $0x8] sm:$0xff] %v3606_v25   ;;  %v3601_v20 = vpack.c.bf16 %v3323_v1, %v3322_v14  ;;  %v3955_v18 = vpop.f32.mrf.mxu1  ;;  %v3877_v55 = vadd.f32 %v5039_v15, %v5038_v13  ;;  %v3581_v54 = vunpack.c.h.bf16 %v3640_v36  ;;  %v3576_v34 = vunpack.c.l.bf16 %v3639_v23 }
 0x1f1   :  { %v3287_v63 = vadd.f32 %v3955_v18, %v3190_v19  ;;  %v3946_v29 = vpop.f32.mrf.mxu0  ;;  %v3334_v47 = vadd.f32 %v3592_v46, %v3276_v27  ;;  %v3158_v39 = vadd.f32 %v3883_v7, %v3061_v30  ;;  %v3577_v42 = vunpack.c.h.bf16 %v3639_v23 }
 0x1f2   :  { %3602 = vst [vmem:[%s4997_s3] sm:$0xff] %v3601_v20   ;;  %v3278_v32 = vpop.f32.mrf.mxu1  ;;  %v3150_v51 = vadd.f32 %v3877_v55, %v3053_v43 }
 0x1f3   :  { %v3337_v31 = vadd.f32 %v3597_v35, %v3287_v63  ;;  %v3279_v6 = vadd.f32 %v3278_v32, %v3182_v28  ;;  %v3243_v26 = vpop.f32.mrf.mxu0  ;;  %v3252_v35 = vadd.f32 %v3946_v29, %v3155_v48 }
 0x1f4   :  { %v3244_v17 = vadd.f32 %v3243_v26, %v5040_v11 }
 0x1f5   :  { %v3636_v24 = vpack.c.bf16 %v3337_v31, %v3336_v57  ;;  %v3335_v10 = vadd.f32 %v3593_v52, %v3279_v6  ;;  %v3947_v44 = vpop.f32.mrf.mxu0  ;;  %v3328_v38 = vadd.f32 %v3580_v53, %v3252_v35 }
 0x1f6   :  { %v3255_v37 = vadd.f32 %v3947_v44, %v3158_v39  ;;  %v3326_v5 = vadd.f32 %v3576_v34, %v3244_v17 }
 0x1f7   :  { %3651 = vst [vmem:[%s4997_s3 + $0x38] sm:$0xff] %v3636_v24   ;;  %v3631_v22 = vpack.c.bf16 %v3335_v10, %v3334_v47  ;;  %v3246_v56 = vpop.f32.mrf.mxu0 }
 0x1f8   :  { %v3329_v61 = vadd.f32 %v3581_v54, %v3255_v37  ;;  %v3247_v3 = vadd.f32 %v3246_v56, %v3150_v51 }
 0x1f9   :  { %3650 = vst [vmem:[%s4997_s3 + $0x30] sm:$0xff] %v3631_v22  }
 0x1fa   :  { %v3616_v14 = vpack.c.bf16 %v3329_v61, %v3328_v38  ;;  %v3327_v25 = vadd.f32 %v3577_v42, %v3247_v3 }
 0x1fc   :  { %3647 = vst [vmem:[%s4997_s3 + $0x18] sm:$0xff] %v3616_v14   ;;  %v3611_v1 = vpack.c.bf16 %v3327_v25, %v3326_v5 }
 0x1fe   :  { %3646 = vst [vmem:[%s4997_s3 + $0x10] sm:$0xff] %v3611_v1  }

</bundles_post_ra>
